<compile_context>
chip_gen: v6e
topology: v6e:2x2x1
jax: 0.10.0
libtpu: 0.0.40
codegen_flags: <defaults>
</compile_context>

<pallas_src>
import jax
import jax.numpy as jnp
from jax.experimental import pallas as pl
from jax.experimental.pallas import tpu as pltpu


# ----------------------------------------------------------------------------
# Fused kernel: 4x (conv3x3 as 9 accumulating matmuls + bias + ReLU)
#               -> flatten -> fc1 + ReLU -> fc_out
# ----------------------------------------------------------------------------
def _gocnn_fused_kernel(x_ref, cw_ref, cb_ref, w1_hbm_ref, b1_ref, w2_ref, b2_ref,
                        o_ref, pad_ref, flat_ref, w1_vmem_ref, w1_sem):
    # x_ref   : (N, H, W, C)     input, NHWC, channel-padded to C (extra channels = 0)
    # cw_ref  : (L, 9, C, C)     conv weights, tap-major (layer 1 zero-padded along Cin)
    # cb_ref  : (L, 1, C)        conv biases
    # w1_hbm  : (H*W*C, hidden)  fc1 weights (rows permuted to NHWC flatten order), in HBM
    # b1_ref  : (1, hidden);  w2_ref : (hidden, out_dim);  b2_ref : (1, out_dim)
    # o_ref   : (N, out_dim)
    # scratch : pad (N,H+2,W+2,C), flat (N, H*W*C), w1 VMEM copy, DMA sem
    N, Hp, Wp, C = pad_ref.shape
    H, W = Hp - 2, Wp - 2
    NHW = N * H * W
    n_layers = cw_ref.shape[0]

    # Stream fc1 weights (the only large operand) HBM -> VMEM now; overlap with convs.
    w1_copy = pltpu.make_async_copy(w1_hbm_ref, w1_vmem_ref, w1_sem)
    w1_copy.start()

    # Zero the padded activation buffer once; the 1-pixel halo stays zero for every
    # layer, which implements SAME padding for the whole conv stack.
    pad_ref[...] = jnp.zeros_like(pad_ref)
    pad_ref[:, 1:1 + H, 1:1 + W, :] = x_ref[...]

    act = None
    for layer in range(n_layers):
        w_l = cw_ref[layer]                       # (9, C, C) value, one load per layer
        acc = jnp.zeros((NHW, C), jnp.float32)
        # 3 sublane-shifted halo loads per layer (one per dx), reused across dy.
        for dx in range(3):
            sh = pad_ref[:, :, dx:dx + W, :]      # (N, Hp, W, C)
            for dy in range(3):
                # Leading-dim slice + leading-dim merge: cheap, no lane relayout.
                patch = sh[:, dy:dy + H].reshape(NHW, C)         # (N*H*W, C)
                acc = acc + jnp.dot(patch, w_l[dy * 3 + dx],
                                    preferred_element_type=jnp.float32)
        act = jnp.maximum(acc + cb_ref[layer], 0.0)              # (N*H*W, C)
        if layer + 1 < n_layers:
            # Write back into the interior of the haloed buffer for the next layer.
            pad_ref[:, 1:1 + H, 1:1 + W, :] = act.reshape(N, H, W, C)

    # Flatten in NHWC (h, w, c) order into (N, H*W*C). fc1 weights were pre-permuted to
    # this order at trace time, so no runtime transpose of activations is needed.
    a3 = act.reshape(N, H * W, C)
    for j in range(H * W):
        flat_ref[:, j * C:(j + 1) * C] = a3[:, j, :]

    # fc1 + ReLU + fc_out (fc1 weights were prefetched above).
    w1_copy.wait()
    h = jnp.dot(flat_ref[...], w1_vmem_ref[...], preferred_element_type=jnp.float32)
    h = jnp.maximum(h + b1_ref[...], 0.0)
    out = jnp.dot(h, w2_ref[...], preferred_element_type=jnp.float32) + b2_ref[...]
    o_ref[...] = out.astype(o_ref.dtype)


# ----------------------------------------------------------------------------
# Wrapper: layout prep (trace-time, tiny) + single pallas_call
# ----------------------------------------------------------------------------
@jax.jit
def gocnn_forward(x_nchw, params):
    N, Cin, H, W = x_nchw.shape
    C = params["conv2_w"].shape[2]          # num_channels
    hidden = params["fc1_w"].shape[1]
    out_dim = params["fc2_w"].shape[1]

    # NCHW -> NHWC, channel-pad the input to C so all layers share one code path.
    x = jnp.transpose(x_nchw, (0, 2, 3, 1))
    x = jnp.pad(x, ((0, 0), (0, 0), (0, 0), (0, C - Cin)))

    # Conv weights HWIO -> tap-major (9, C, C); layer 1 zero-padded along Cin.
    w1c = jnp.pad(params["conv1_w"], ((0, 0), (0, 0), (0, C - Cin), (0, 0)))
    conv_ws = [w1c, params["conv2_w"], params["conv3_w"], params["conv4_w"]]
    cw = jnp.stack([w.reshape(9, C, C) for w in conv_ws])                      # (4,9,C,C)
    cb = jnp.stack([params[f"conv{i}_b"].reshape(1, C) for i in range(1, 5)])  # (4,1,C)

    # PyTorch flattens NCHW as (c, h, w); the kernel flattens NHWC as (h, w, c).
    # Permute fc1 rows once so the results are identical with zero runtime transpose.
    w1p = (params["fc1_w"].reshape(C, H, W, hidden)
           .transpose(1, 2, 0, 3).reshape(H * W * C, hidden))
    b1 = params["fc1_b"].reshape(1, hidden)
    w2 = params["fc2_w"]
    b2 = params["fc2_b"].reshape(1, out_dim)

    vmem = pl.BlockSpec(memory_space=pltpu.MemorySpace.VMEM)
    return pl.pallas_call(
        _gocnn_fused_kernel,
        out_shape=jax.ShapeDtypeStruct((N, out_dim), jnp.float32),
        in_specs=[vmem, vmem, vmem,
                  pl.BlockSpec(memory_space=pl.ANY),   # fc1 weights stay in HBM, manual DMA
                  vmem, vmem, vmem],
        out_specs=vmem,
        scratch_shapes=[
            pltpu.VMEM((N, H + 2, W + 2, C), jnp.float32),   # zero-haloed activations
            pltpu.VMEM((N, H * W * C), jnp.float32),         # flattened activations
            pltpu.VMEM((H * W * C, hidden), jnp.float32),    # prefetched fc1 weights
            pltpu.SemaphoreType.DMA,
        ],
    )(x, cw, cb, w1p, b1, w2, b2)


# ----------------------------------------------------------------------------
# Pure-JAX reference (mirrors the PyTorch module) + params
# ----------------------------------------------------------------------------
def gocnn_reference(x_nchw, params):
    x = x_nchw
    for i in range(1, 5):
        x = jax.lax.conv_general_dilated(
            x, params[f"conv{i}_w"], window_strides=(1, 1), padding="SAME",
            dimension_numbers=("NCHW", "HWIO", "NCHW"),
            precision=jax.lax.Precision.HIGHEST)
        x = jnp.maximum(x + params[f"conv{i}_b"][None, :, None, None], 0.0)
    n = x.shape[0]
    x = x.reshape(n, -1)                                   # == torch x.view(-1, C*H*W)
    h = jnp.maximum(jnp.dot(x, params["fc1_w"], precision=jax.lax.Precision.HIGHEST)
                    + params["fc1_b"], 0.0)
    return jnp.dot(h, params["fc2_w"], precision=jax.lax.Precision.HIGHEST) + params["fc2_b"]


def init_params(key, in_channels, num_channels, board_w, board_h, hidden):
    fc_in = num_channels * board_w * board_h
    out_dim = board_w * board_h + 1
    ks = jax.random.split(key, 12)
    scale = 0.05
    p = {}
    cins = [in_channels, num_channels, num_channels, num_channels]
    for i in range(4):
        p[f"conv{i+1}_w"] = scale * jax.random.normal(
            ks[2 * i], (3, 3, cins[i], num_channels), jnp.float32)
        p[f"conv{i+1}_b"] = scale * jax.random.normal(
            ks[2 * i + 1], (num_channels,), jnp.float32)
    p["fc1_w"] = scale * jax.random.normal(ks[8], (fc_in, hidden), jnp.float32)
    p["fc1_b"] = scale * jax.random.normal(ks[9], (hidden,), jnp.float32)
    p["fc2_w"] = scale * jax.random.normal(ks[10], (hidden, out_dim), jnp.float32)
    p["fc2_b"] = scale * jax.random.normal(ks[11], (out_dim,), jnp.float32)
    return p


if __name__ == "__main__":
    board_w = board_h = 8
    num_channels = 32
    hidden = 64
    num_past_steps = 2
    in_channels = 1 + 1 + 2 + num_past_steps * 2   # = 8
    batch = 2

    key = jax.random.PRNGKey(0)
    kx, kp = jax.random.split(key)
    x = jax.random.normal(kx, (batch, in_channels, board_h, board_w), jnp.float32)
    params = init_params(kp, in_channels, num_channels, board_w, board_h, hidden)

    q_values = jax.block_until_ready(gocnn_forward(x, params))
    assert q_values.shape == (batch, board_w * board_h + 1)
    assert bool(jnp.all(jnp.isfinite(q_values)))

    # Verify against the NCHW reference (checks conv math, flatten order, fc permutation).
    ref = gocnn_reference(x, params)
    max_err = float(jnp.max(jnp.abs(q_values - ref)))
    assert bool(jnp.allclose(q_values, ref, rtol=2e-2, atol=2e-2)), f"max_err={max_err}"
    print("KERNEL_OK")
</pallas_src>

<mosaic_0001>
module attributes {stable_mosaic.version = 11 : i64} {
  func.func @_gocnn_fused_kernel(%arg0: memref<2x8x8x32xf32, #tpu.memory_space<vmem>>, %arg1: memref<4x9x32x32xf32, #tpu.memory_space<vmem>>, %arg2: memref<4x1x32xf32, #tpu.memory_space<vmem>>, %arg3: memref<2048x64xf32, #tpu.memory_space<any>>, %arg4: memref<1x64xf32, #tpu.memory_space<vmem>>, %arg5: memref<64x65xf32, #tpu.memory_space<vmem>>, %arg6: memref<1x65xf32, #tpu.memory_space<vmem>>, %arg7: memref<2x65xf32, #tpu.memory_space<vmem>>, %arg8: memref<2x10x10x32xf32, #tpu.memory_space<vmem>>, %arg9: memref<2x2048xf32, #tpu.memory_space<vmem>>, %arg10: memref<2048x64xf32, #tpu.memory_space<vmem>>, %arg11: memref<!tpu.dma_semaphore, #tpu.memory_space<semaphore_mem>>) attributes {dimension_semantics = [], scalar_prefetch = 0 : i64, scratch_operands = 4 : i64, tpu.core_type = #tpu.core_type<tc>} {
    tpu.enqueue_dma source(%arg3 : memref<2048x64xf32, #tpu.memory_space<any>>) target(%arg10 : memref<2048x64xf32, #tpu.memory_space<vmem>>) target_semaphore(%arg11 : memref<!tpu.dma_semaphore, #tpu.memory_space<semaphore_mem>>)
    %cst = arith.constant 0.000000e+00 : f32
    %0 = vector.broadcast %cst : f32 to vector<2x10x10x32xf32>
    %c0 = arith.constant 0 : index
    %c0_0 = arith.constant 0 : index
    %c0_1 = arith.constant 0 : index
    %c0_2 = arith.constant 0 : index
    %1 = vector.load %arg8[%c0, %c0_0, %c0_1, %c0_2] : memref<2x10x10x32xf32, #tpu.memory_space<vmem>>, vector<2x10x10x32xf32>
    tpu.vector_store %arg8[%c0, %c0_0, %c0_1, %c0_2], %0 {strides = array<i32>} : memref<2x10x10x32xf32, #tpu.memory_space<vmem>>, vector<2x10x10x32xf32>,
    %c0_3 = arith.constant 0 : index
    %c0_4 = arith.constant 0 : index
    %c0_5 = arith.constant 0 : index
    %c0_6 = arith.constant 0 : index
    %2 = vector.load %arg0[%c0_3, %c0_4, %c0_5, %c0_6] : memref<2x8x8x32xf32, #tpu.memory_space<vmem>>, vector<2x8x8x32xf32>
    %c0_7 = arith.constant 0 : index
    %c1 = arith.constant 1 : index
    %c1_8 = arith.constant 1 : index
    %c0_9 = arith.constant 0 : index
    %3 = vector.load %arg8[%c0_7, %c1, %c1_8, %c0_9] : memref<2x10x10x32xf32, #tpu.memory_space<vmem>>, vector<2x8x8x32xf32>
    tpu.vector_store %arg8[%c0_7, %c1, %c1_8, %c0_9], %2 {strides = array<i32>} : memref<2x10x10x32xf32, #tpu.memory_space<vmem>>, vector<2x8x8x32xf32>,
    %c0_10 = arith.constant 0 : index
    %c0_11 = arith.constant 0 : index
    %c0_12 = arith.constant 0 : index
    %c0_13 = arith.constant 0 : index
    %4 = vector.load %arg1[%c0_10, %c0_11, %c0_12, %c0_13] : memref<4x9x32x32xf32, #tpu.memory_space<vmem>>, vector<1x9x32x32xf32>
    %5 = vector.shape_cast %4 : vector<1x9x32x32xf32> to vector<9x32x32xf32>
    %cst_14 = arith.constant 0.000000e+00 : f32
    %6 = vector.broadcast %cst_14 : f32 to vector<128x32xf32>
    %c0_15 = arith.constant 0 : index
    %c0_16 = arith.constant 0 : index
    %c0_17 = arith.constant 0 : index
    %c0_18 = arith.constant 0 : index
    %7 = vector.load %arg8[%c0_15, %c0_16, %c0_17, %c0_18] : memref<2x10x10x32xf32, #tpu.memory_space<vmem>>, vector<2x10x8x32xf32>
    %8 = vector.extract_strided_slice %7 {offsets = [0, 0, 0, 0], sizes = [2, 8, 8, 32], strides = [1, 1, 1, 1]} : vector<2x10x8x32xf32> to vector<2x8x8x32xf32>
    %9 = vector.shape_cast %8 : vector<2x8x8x32xf32> to vector<128x32xf32>
    %10 = vector.extract_strided_slice %5 {offsets = [0, 0, 0], sizes = [1, 32, 32], strides = [1, 1, 1]} : vector<9x32x32xf32> to vector<1x32x32xf32>
    %11 = vector.shape_cast %10 : vector<1x32x32xf32> to vector<32x32xf32>
    %cst_19 = arith.constant dense<0.000000e+00> : vector<128x32xf32>
    %12 = tpu.matmul %9, %11, %cst_19 {dimension_numbers = #tpu.dot_dimension_numbers<[1], [0], [0], [1], [0, 0, 1, 1], [], []>} : vector<128x32xf32>, vector<32x32xf32>, vector<128x32xf32> -> vector<128x32xf32>
    %13 = arith.addf %6, %12 : vector<128x32xf32>
    %14 = vector.extract_strided_slice %7 {offsets = [0, 1, 0, 0], sizes = [2, 8, 8, 32], strides = [1, 1, 1, 1]} : vector<2x10x8x32xf32> to vector<2x8x8x32xf32>
    %15 = vector.shape_cast %14 : vector<2x8x8x32xf32> to vector<128x32xf32>
    %16 = vector.extract_strided_slice %5 {offsets = [3, 0, 0], sizes = [1, 32, 32], strides = [1, 1, 1]} : vector<9x32x32xf32> to vector<1x32x32xf32>
    %17 = vector.shape_cast %16 : vector<1x32x32xf32> to vector<32x32xf32>
    %cst_20 = arith.constant dense<0.000000e+00> : vector<128x32xf32>
    %18 = tpu.matmul %15, %17, %cst_20 {dimension_numbers = #tpu.dot_dimension_numbers<[1], [0], [0], [1], [0, 0, 1, 1], [], []>} : vector<128x32xf32>, vector<32x32xf32>, vector<128x32xf32> -> vector<128x32xf32>
    %19 = arith.addf %13, %18 : vector<128x32xf32>
    %20 = vector.extract_strided_slice %7 {offsets = [0, 2, 0, 0], sizes = [2, 8, 8, 32], strides = [1, 1, 1, 1]} : vector<2x10x8x32xf32> to vector<2x8x8x32xf32>
    %21 = vector.shape_cast %20 : vector<2x8x8x32xf32> to vector<128x32xf32>
    %22 = vector.extract_strided_slice %5 {offsets = [6, 0, 0], sizes = [1, 32, 32], strides = [1, 1, 1]} : vector<9x32x32xf32> to vector<1x32x32xf32>
    %23 = vector.shape_cast %22 : vector<1x32x32xf32> to vector<32x32xf32>
    %cst_21 = arith.constant dense<0.000000e+00> : vector<128x32xf32>
    %24 = tpu.matmul %21, %23, %cst_21 {dimension_numbers = #tpu.dot_dimension_numbers<[1], [0], [0], [1], [0, 0, 1, 1], [], []>} : vector<128x32xf32>, vector<32x32xf32>, vector<128x32xf32> -> vector<128x32xf32>
    %25 = arith.addf %19, %24 : vector<128x32xf32>
    %c0_22 = arith.constant 0 : index
    %c0_23 = arith.constant 0 : index
    %c1_24 = arith.constant 1 : index
    %c0_25 = arith.constant 0 : index
    %26 = vector.load %arg8[%c0_22, %c0_23, %c1_24, %c0_25] : memref<2x10x10x32xf32, #tpu.memory_space<vmem>>, vector<2x10x8x32xf32>
    %27 = vector.extract_strided_slice %26 {offsets = [0, 0, 0, 0], sizes = [2, 8, 8, 32], strides = [1, 1, 1, 1]} : vector<2x10x8x32xf32> to vector<2x8x8x32xf32>
    %28 = vector.shape_cast %27 : vector<2x8x8x32xf32> to vector<128x32xf32>
    %29 = vector.extract_strided_slice %5 {offsets = [1, 0, 0], sizes = [1, 32, 32], strides = [1, 1, 1]} : vector<9x32x32xf32> to vector<1x32x32xf32>
    %30 = vector.shape_cast %29 : vector<1x32x32xf32> to vector<32x32xf32>
    %cst_26 = arith.constant dense<0.000000e+00> : vector<128x32xf32>
    %31 = tpu.matmul %28, %30, %cst_26 {dimension_numbers = #tpu.dot_dimension_numbers<[1], [0], [0], [1], [0, 0, 1, 1], [], []>} : vector<128x32xf32>, vector<32x32xf32>, vector<128x32xf32> -> vector<128x32xf32>
    %32 = arith.addf %25, %31 : vector<128x32xf32>
    %33 = vector.extract_strided_slice %26 {offsets = [0, 1, 0, 0], sizes = [2, 8, 8, 32], strides = [1, 1, 1, 1]} : vector<2x10x8x32xf32> to vector<2x8x8x32xf32>
    %34 = vector.shape_cast %33 : vector<2x8x8x32xf32> to vector<128x32xf32>
    %35 = vector.extract_strided_slice %5 {offsets = [4, 0, 0], sizes = [1, 32, 32], strides = [1, 1, 1]} : vector<9x32x32xf32> to vector<1x32x32xf32>
    %36 = vector.shape_cast %35 : vector<1x32x32xf32> to vector<32x32xf32>
    %cst_27 = arith.constant dense<0.000000e+00> : vector<128x32xf32>
    %37 = tpu.matmul %34, %36, %cst_27 {dimension_numbers = #tpu.dot_dimension_numbers<[1], [0], [0], [1], [0, 0, 1, 1], [], []>} : vector<128x32xf32>, vector<32x32xf32>, vector<128x32xf32> -> vector<128x32xf32>
    %38 = arith.addf %32, %37 : vector<128x32xf32>
    %39 = vector.extract_strided_slice %26 {offsets = [0, 2, 0, 0], sizes = [2, 8, 8, 32], strides = [1, 1, 1, 1]} : vector<2x10x8x32xf32> to vector<2x8x8x32xf32>
    %40 = vector.shape_cast %39 : vector<2x8x8x32xf32> to vector<128x32xf32>
    %41 = vector.extract_strided_slice %5 {offsets = [7, 0, 0], sizes = [1, 32, 32], strides = [1, 1, 1]} : vector<9x32x32xf32> to vector<1x32x32xf32>
    %42 = vector.shape_cast %41 : vector<1x32x32xf32> to vector<32x32xf32>
    %cst_28 = arith.constant dense<0.000000e+00> : vector<128x32xf32>
    %43 = tpu.matmul %40, %42, %cst_28 {dimension_numbers = #tpu.dot_dimension_numbers<[1], [0], [0], [1], [0, 0, 1, 1], [], []>} : vector<128x32xf32>, vector<32x32xf32>, vector<128x32xf32> -> vector<128x32xf32>
    %44 = arith.addf %38, %43 : vector<128x32xf32>
    %c0_29 = arith.constant 0 : index
    %c0_30 = arith.constant 0 : index
    %c2 = arith.constant 2 : index
    %c0_31 = arith.constant 0 : index
    %45 = vector.load %arg8[%c0_29, %c0_30, %c2, %c0_31] : memref<2x10x10x32xf32, #tpu.memory_space<vmem>>, vector<2x10x8x32xf32>
    %46 = vector.extract_strided_slice %45 {offsets = [0, 0, 0, 0], sizes = [2, 8, 8, 32], strides = [1, 1, 1, 1]} : vector<2x10x8x32xf32> to vector<2x8x8x32xf32>
    %47 = vector.shape_cast %46 : vector<2x8x8x32xf32> to vector<128x32xf32>
    %48 = vector.extract_strided_slice %5 {offsets = [2, 0, 0], sizes = [1, 32, 32], strides = [1, 1, 1]} : vector<9x32x32xf32> to vector<1x32x32xf32>
    %49 = vector.shape_cast %48 : vector<1x32x32xf32> to vector<32x32xf32>
    %cst_32 = arith.constant dense<0.000000e+00> : vector<128x32xf32>
    %50 = tpu.matmul %47, %49, %cst_32 {dimension_numbers = #tpu.dot_dimension_numbers<[1], [0], [0], [1], [0, 0, 1, 1], [], []>} : vector<128x32xf32>, vector<32x32xf32>, vector<128x32xf32> -> vector<128x32xf32>
    %51 = arith.addf %44, %50 : vector<128x32xf32>
    %52 = vector.extract_strided_slice %45 {offsets = [0, 1, 0, 0], sizes = [2, 8, 8, 32], strides = [1, 1, 1, 1]} : vector<2x10x8x32xf32> to vector<2x8x8x32xf32>
    %53 = vector.shape_cast %52 : vector<2x8x8x32xf32> to vector<128x32xf32>
    %54 = vector.extract_strided_slice %5 {offsets = [5, 0, 0], sizes = [1, 32, 32], strides = [1, 1, 1]} : vector<9x32x32xf32> to vector<1x32x32xf32>
    %55 = vector.shape_cast %54 : vector<1x32x32xf32> to vector<32x32xf32>
    %cst_33 = arith.constant dense<0.000000e+00> : vector<128x32xf32>
    %56 = tpu.matmul %53, %55, %cst_33 {dimension_numbers = #tpu.dot_dimension_numbers<[1], [0], [0], [1], [0, 0, 1, 1], [], []>} : vector<128x32xf32>, vector<32x32xf32>, vector<128x32xf32> -> vector<128x32xf32>
    %57 = arith.addf %51, %56 : vector<128x32xf32>
    %58 = vector.extract_strided_slice %45 {offsets = [0, 2, 0, 0], sizes = [2, 8, 8, 32], strides = [1, 1, 1, 1]} : vector<2x10x8x32xf32> to vector<2x8x8x32xf32>
    %59 = vector.shape_cast %58 : vector<2x8x8x32xf32> to vector<128x32xf32>
    %60 = vector.extract_strided_slice %5 {offsets = [8, 0, 0], sizes = [1, 32, 32], strides = [1, 1, 1]} : vector<9x32x32xf32> to vector<1x32x32xf32>
    %61 = vector.shape_cast %60 : vector<1x32x32xf32> to vector<32x32xf32>
    %cst_34 = arith.constant dense<0.000000e+00> : vector<128x32xf32>
    %62 = tpu.matmul %59, %61, %cst_34 {dimension_numbers = #tpu.dot_dimension_numbers<[1], [0], [0], [1], [0, 0, 1, 1], [], []>} : vector<128x32xf32>, vector<32x32xf32>, vector<128x32xf32> -> vector<128x32xf32>
    %63 = arith.addf %57, %62 : vector<128x32xf32>
    %c0_35 = arith.constant 0 : index
    %c0_36 = arith.constant 0 : index
    %c0_37 = arith.constant 0 : index
    %64 = vector.load %arg2[%c0_35, %c0_36, %c0_37] : memref<4x1x32xf32, #tpu.memory_space<vmem>>, vector<1x1x32xf32>
    %65 = vector.shape_cast %64 : vector<1x1x32xf32> to vector<1x32xf32>
    %66 = vector.broadcast %65 : vector<1x32xf32> to vector<128x32xf32>
    %67 = arith.addf %63, %66 : vector<128x32xf32>
    %cst_38 = arith.constant 0.000000e+00 : f32
    %68 = vector.broadcast %cst_38 : f32 to vector<128x32xf32>
    %69 = arith.maximumf %67, %68 : vector<128x32xf32>
    %70 = vector.shape_cast %69 : vector<128x32xf32> to vector<2x8x8x32xf32>
    %c0_39 = arith.constant 0 : index
    %c1_40 = arith.constant 1 : index
    %c1_41 = arith.constant 1 : index
    %c0_42 = arith.constant 0 : index
    %71 = vector.load %arg8[%c0_39, %c1_40, %c1_41, %c0_42] : memref<2x10x10x32xf32, #tpu.memory_space<vmem>>, vector<2x8x8x32xf32>
    tpu.vector_store %arg8[%c0_39, %c1_40, %c1_41, %c0_42], %70 {strides = array<i32>} : memref<2x10x10x32xf32, #tpu.memory_space<vmem>>, vector<2x8x8x32xf32>,
    %c1_43 = arith.constant 1 : index
    %c0_44 = arith.constant 0 : index
    %c0_45 = arith.constant 0 : index
    %c0_46 = arith.constant 0 : index
    %72 = vector.load %arg1[%c1_43, %c0_44, %c0_45, %c0_46] : memref<4x9x32x32xf32, #tpu.memory_space<vmem>>, vector<1x9x32x32xf32>
    %73 = vector.shape_cast %72 : vector<1x9x32x32xf32> to vector<9x32x32xf32>
    %cst_47 = arith.constant 0.000000e+00 : f32
    %74 = vector.broadcast %cst_47 : f32 to vector<128x32xf32>
    %c0_48 = arith.constant 0 : index
    %c0_49 = arith.constant 0 : index
    %c0_50 = arith.constant 0 : index
    %c0_51 = arith.constant 0 : index
    %75 = vector.load %arg8[%c0_48, %c0_49, %c0_50, %c0_51] : memref<2x10x10x32xf32, #tpu.memory_space<vmem>>, vector<2x10x8x32xf32>
    %76 = vector.extract_strided_slice %75 {offsets = [0, 0, 0, 0], sizes = [2, 8, 8, 32], strides = [1, 1, 1, 1]} : vector<2x10x8x32xf32> to vector<2x8x8x32xf32>
    %77 = vector.shape_cast %76 : vector<2x8x8x32xf32> to vector<128x32xf32>
    %78 = vector.extract_strided_slice %73 {offsets = [0, 0, 0], sizes = [1, 32, 32], strides = [1, 1, 1]} : vector<9x32x32xf32> to vector<1x32x32xf32>
    %79 = vector.shape_cast %78 : vector<1x32x32xf32> to vector<32x32xf32>
    %cst_52 = arith.constant dense<0.000000e+00> : vector<128x32xf32>
    %80 = tpu.matmul %77, %79, %cst_52 {dimension_numbers = #tpu.dot_dimension_numbers<[1], [0], [0], [1], [0, 0, 1, 1], [], []>} : vector<128x32xf32>, vector<32x32xf32>, vector<128x32xf32> -> vector<128x32xf32>
    %81 = arith.addf %74, %80 : vector<128x32xf32>
    %82 = vector.extract_strided_slice %75 {offsets = [0, 1, 0, 0], sizes = [2, 8, 8, 32], strides = [1, 1, 1, 1]} : vector<2x10x8x32xf32> to vector<2x8x8x32xf32>
    %83 = vector.shape_cast %82 : vector<2x8x8x32xf32> to vector<128x32xf32>
    %84 = vector.extract_strided_slice %73 {offsets = [3, 0, 0], sizes = [1, 32, 32], strides = [1, 1, 1]} : vector<9x32x32xf32> to vector<1x32x32xf32>
    %85 = vector.shape_cast %84 : vector<1x32x32xf32> to vector<32x32xf32>
    %cst_53 = arith.constant dense<0.000000e+00> : vector<128x32xf32>
    %86 = tpu.matmul %83, %85, %cst_53 {dimension_numbers = #tpu.dot_dimension_numbers<[1], [0], [0], [1], [0, 0, 1, 1], [], []>} : vector<128x32xf32>, vector<32x32xf32>, vector<128x32xf32> -> vector<128x32xf32>
    %87 = arith.addf %81, %86 : vector<128x32xf32>
    %88 = vector.extract_strided_slice %75 {offsets = [0, 2, 0, 0], sizes = [2, 8, 8, 32], strides = [1, 1, 1, 1]} : vector<2x10x8x32xf32> to vector<2x8x8x32xf32>
    %89 = vector.shape_cast %88 : vector<2x8x8x32xf32> to vector<128x32xf32>
    %90 = vector.extract_strided_slice %73 {offsets = [6, 0, 0], sizes = [1, 32, 32], strides = [1, 1, 1]} : vector<9x32x32xf32> to vector<1x32x32xf32>
    %91 = vector.shape_cast %90 : vector<1x32x32xf32> to vector<32x32xf32>
    %cst_54 = arith.constant dense<0.000000e+00> : vector<128x32xf32>
    %92 = tpu.matmul %89, %91, %cst_54 {dimension_numbers = #tpu.dot_dimension_numbers<[1], [0], [0], [1], [0, 0, 1, 1], [], []>} : vector<128x32xf32>, vector<32x32xf32>, vector<128x32xf32> -> vector<128x32xf32>
    %93 = arith.addf %87, %92 : vector<128x32xf32>
    %c0_55 = arith.constant 0 : index
    %c0_56 = arith.constant 0 : index
    %c1_57 = arith.constant 1 : index
    %c0_58 = arith.constant 0 : index
    %94 = vector.load %arg8[%c0_55, %c0_56, %c1_57, %c0_58] : memref<2x10x10x32xf32, #tpu.memory_space<vmem>>, vector<2x10x8x32xf32>
    %95 = vector.extract_strided_slice %94 {offsets = [0, 0, 0, 0], sizes = [2, 8, 8, 32], strides = [1, 1, 1, 1]} : vector<2x10x8x32xf32> to vector<2x8x8x32xf32>
    %96 = vector.shape_cast %95 : vector<2x8x8x32xf32> to vector<128x32xf32>
    %97 = vector.extract_strided_slice %73 {offsets = [1, 0, 0], sizes = [1, 32, 32], strides = [1, 1, 1]} : vector<9x32x32xf32> to vector<1x32x32xf32>
    %98 = vector.shape_cast %97 : vector<1x32x32xf32> to vector<32x32xf32>
    %cst_59 = arith.constant dense<0.000000e+00> : vector<128x32xf32>
    %99 = tpu.matmul %96, %98, %cst_59 {dimension_numbers = #tpu.dot_dimension_numbers<[1], [0], [0], [1], [0, 0, 1, 1], [], []>} : vector<128x32xf32>, vector<32x32xf32>, vector<128x32xf32> -> vector<128x32xf32>
    %100 = arith.addf %93, %99 : vector<128x32xf32>
    %101 = vector.extract_strided_slice %94 {offsets = [0, 1, 0, 0], sizes = [2, 8, 8, 32], strides = [1, 1, 1, 1]} : vector<2x10x8x32xf32> to vector<2x8x8x32xf32>
    %102 = vector.shape_cast %101 : vector<2x8x8x32xf32> to vector<128x32xf32>
    %103 = vector.extract_strided_slice %73 {offsets = [4, 0, 0], sizes = [1, 32, 32], strides = [1, 1, 1]} : vector<9x32x32xf32> to vector<1x32x32xf32>
    %104 = vector.shape_cast %103 : vector<1x32x32xf32> to vector<32x32xf32>
    %cst_60 = arith.constant dense<0.000000e+00> : vector<128x32xf32>
    %105 = tpu.matmul %102, %104, %cst_60 {dimension_numbers = #tpu.dot_dimension_numbers<[1], [0], [0], [1], [0, 0, 1, 1], [], []>} : vector<128x32xf32>, vector<32x32xf32>, vector<128x32xf32> -> vector<128x32xf32>
    %106 = arith.addf %100, %105 : vector<128x32xf32>
    %107 = vector.extract_strided_slice %94 {offsets = [0, 2, 0, 0], sizes = [2, 8, 8, 32], strides = [1, 1, 1, 1]} : vector<2x10x8x32xf32> to vector<2x8x8x32xf32>
    %108 = vector.shape_cast %107 : vector<2x8x8x32xf32> to vector<128x32xf32>
    %109 = vector.extract_strided_slice %73 {offsets = [7, 0, 0], sizes = [1, 32, 32], strides = [1, 1, 1]} : vector<9x32x32xf32> to vector<1x32x32xf32>
    %110 = vector.shape_cast %109 : vector<1x32x32xf32> to vector<32x32xf32>
    %cst_61 = arith.constant dense<0.000000e+00> : vector<128x32xf32>
    %111 = tpu.matmul %108, %110, %cst_61 {dimension_numbers = #tpu.dot_dimension_numbers<[1], [0], [0], [1], [0, 0, 1, 1], [], []>} : vector<128x32xf32>, vector<32x32xf32>, vector<128x32xf32> -> vector<128x32xf32>
    %112 = arith.addf %106, %111 : vector<128x32xf32>
    %c0_62 = arith.constant 0 : index
    %c0_63 = arith.constant 0 : index
    %c2_64 = arith.constant 2 : index
    %c0_65 = arith.constant 0 : index
    %113 = vector.load %arg8[%c0_62, %c0_63, %c2_64, %c0_65] : memref<2x10x10x32xf32, #tpu.memory_space<vmem>>, vector<2x10x8x32xf32>
    %114 = vector.extract_strided_slice %113 {offsets = [0, 0, 0, 0], sizes = [2, 8, 8, 32], strides = [1, 1, 1, 1]} : vector<2x10x8x32xf32> to vector<2x8x8x32xf32>
    %115 = vector.shape_cast %114 : vector<2x8x8x32xf32> to vector<128x32xf32>
    %116 = vector.extract_strided_slice %73 {offsets = [2, 0, 0], sizes = [1, 32, 32], strides = [1, 1, 1]} : vector<9x32x32xf32> to vector<1x32x32xf32>
    %117 = vector.shape_cast %116 : vector<1x32x32xf32> to vector<32x32xf32>
    %cst_66 = arith.constant dense<0.000000e+00> : vector<128x32xf32>
    %118 = tpu.matmul %115, %117, %cst_66 {dimension_numbers = #tpu.dot_dimension_numbers<[1], [0], [0], [1], [0, 0, 1, 1], [], []>} : vector<128x32xf32>, vector<32x32xf32>, vector<128x32xf32> -> vector<128x32xf32>
    %119 = arith.addf %112, %118 : vector<128x32xf32>
    %120 = vector.extract_strided_slice %113 {offsets = [0, 1, 0, 0], sizes = [2, 8, 8, 32], strides = [1, 1, 1, 1]} : vector<2x10x8x32xf32> to vector<2x8x8x32xf32>
    %121 = vector.shape_cast %120 : vector<2x8x8x32xf32> to vector<128x32xf32>
    %122 = vector.extract_strided_slice %73 {offsets = [5, 0, 0], sizes = [1, 32, 32], strides = [1, 1, 1]} : vector<9x32x32xf32> to vector<1x32x32xf32>
    %123 = vector.shape_cast %122 : vector<1x32x32xf32> to vector<32x32xf32>
    %cst_67 = arith.constant dense<0.000000e+00> : vector<128x32xf32>
    %124 = tpu.matmul %121, %123, %cst_67 {dimension_numbers = #tpu.dot_dimension_numbers<[1], [0], [0], [1], [0, 0, 1, 1], [], []>} : vector<128x32xf32>, vector<32x32xf32>, vector<128x32xf32> -> vector<128x32xf32>
    %125 = arith.addf %119, %124 : vector<128x32xf32>
    %126 = vector.extract_strided_slice %113 {offsets = [0, 2, 0, 0], sizes = [2, 8, 8, 32], strides = [1, 1, 1, 1]} : vector<2x10x8x32xf32> to vector<2x8x8x32xf32>
    %127 = vector.shape_cast %126 : vector<2x8x8x32xf32> to vector<128x32xf32>
    %128 = vector.extract_strided_slice %73 {offsets = [8, 0, 0], sizes = [1, 32, 32], strides = [1, 1, 1]} : vector<9x32x32xf32> to vector<1x32x32xf32>
    %129 = vector.shape_cast %128 : vector<1x32x32xf32> to vector<32x32xf32>
    %cst_68 = arith.constant dense<0.000000e+00> : vector<128x32xf32>
    %130 = tpu.matmul %127, %129, %cst_68 {dimension_numbers = #tpu.dot_dimension_numbers<[1], [0], [0], [1], [0, 0, 1, 1], [], []>} : vector<128x32xf32>, vector<32x32xf32>, vector<128x32xf32> -> vector<128x32xf32>
    %131 = arith.addf %125, %130 : vector<128x32xf32>
    %c1_69 = arith.constant 1 : index
    %c0_70 = arith.constant 0 : index
    %c0_71 = arith.constant 0 : index
    %132 = vector.load %arg2[%c1_69, %c0_70, %c0_71] : memref<4x1x32xf32, #tpu.memory_space<vmem>>, vector<1x1x32xf32>
    %133 = vector.shape_cast %132 : vector<1x1x32xf32> to vector<1x32xf32>
    %134 = vector.broadcast %133 : vector<1x32xf32> to vector<128x32xf32>
    %135 = arith.addf %131, %134 : vector<128x32xf32>
    %cst_72 = arith.constant 0.000000e+00 : f32
    %136 = vector.broadcast %cst_72 : f32 to vector<128x32xf32>
    %137 = arith.maximumf %135, %136 : vector<128x32xf32>
    %138 = vector.shape_cast %137 : vector<128x32xf32> to vector<2x8x8x32xf32>
    %c0_73 = arith.constant 0 : index
    %c1_74 = arith.constant 1 : index
    %c1_75 = arith.constant 1 : index
    %c0_76 = arith.constant 0 : index
    %139 = vector.load %arg8[%c0_73, %c1_74, %c1_75, %c0_76] : memref<2x10x10x32xf32, #tpu.memory_space<vmem>>, vector<2x8x8x32xf32>
    tpu.vector_store %arg8[%c0_73, %c1_74, %c1_75, %c0_76], %138 {strides = array<i32>} : memref<2x10x10x32xf32, #tpu.memory_space<vmem>>, vector<2x8x8x32xf32>,
    %c2_77 = arith.constant 2 : index
    %c0_78 = arith.constant 0 : index
    %c0_79 = arith.constant 0 : index
    %c0_80 = arith.constant 0 : index
    %140 = vector.load %arg1[%c2_77, %c0_78, %c0_79, %c0_80] : memref<4x9x32x32xf32, #tpu.memory_space<vmem>>, vector<1x9x32x32xf32>
    %141 = vector.shape_cast %140 : vector<1x9x32x32xf32> to vector<9x32x32xf32>
    %cst_81 = arith.constant 0.000000e+00 : f32
    %142 = vector.broadcast %cst_81 : f32 to vector<128x32xf32>
    %c0_82 = arith.constant 0 : index
    %c0_83 = arith.constant 0 : index
    %c0_84 = arith.constant 0 : index
    %c0_85 = arith.constant 0 : index
    %143 = vector.load %arg8[%c0_82, %c0_83, %c0_84, %c0_85] : memref<2x10x10x32xf32, #tpu.memory_space<vmem>>, vector<2x10x8x32xf32>
    %144 = vector.extract_strided_slice %143 {offsets = [0, 0, 0, 0], sizes = [2, 8, 8, 32], strides = [1, 1, 1, 1]} : vector<2x10x8x32xf32> to vector<2x8x8x32xf32>
    %145 = vector.shape_cast %144 : vector<2x8x8x32xf32> to vector<128x32xf32>
    %146 = vector.extract_strided_slice %141 {offsets = [0, 0, 0], sizes = [1, 32, 32], strides = [1, 1, 1]} : vector<9x32x32xf32> to vector<1x32x32xf32>
    %147 = vector.shape_cast %146 : vector<1x32x32xf32> to vector<32x32xf32>
    %cst_86 = arith.constant dense<0.000000e+00> : vector<128x32xf32>
    %148 = tpu.matmul %145, %147, %cst_86 {dimension_numbers = #tpu.dot_dimension_numbers<[1], [0], [0], [1], [0, 0, 1, 1], [], []>} : vector<128x32xf32>, vector<32x32xf32>, vector<128x32xf32> -> vector<128x32xf32>
    %149 = arith.addf %142, %148 : vector<128x32xf32>
    %150 = vector.extract_strided_slice %143 {offsets = [0, 1, 0, 0], sizes = [2, 8, 8, 32], strides = [1, 1, 1, 1]} : vector<2x10x8x32xf32> to vector<2x8x8x32xf32>
    %151 = vector.shape_cast %150 : vector<2x8x8x32xf32> to vector<128x32xf32>
    %152 = vector.extract_strided_slice %141 {offsets = [3, 0, 0], sizes = [1, 32, 32], strides = [1, 1, 1]} : vector<9x32x32xf32> to vector<1x32x32xf32>
    %153 = vector.shape_cast %152 : vector<1x32x32xf32> to vector<32x32xf32>
    %cst_87 = arith.constant dense<0.000000e+00> : vector<128x32xf32>
    %154 = tpu.matmul %151, %153, %cst_87 {dimension_numbers = #tpu.dot_dimension_numbers<[1], [0], [0], [1], [0, 0, 1, 1], [], []>} : vector<128x32xf32>, vector<32x32xf32>, vector<128x32xf32> -> vector<128x32xf32>
    %155 = arith.addf %149, %154 : vector<128x32xf32>
    %156 = vector.extract_strided_slice %143 {offsets = [0, 2, 0, 0], sizes = [2, 8, 8, 32], strides = [1, 1, 1, 1]} : vector<2x10x8x32xf32> to vector<2x8x8x32xf32>
    %157 = vector.shape_cast %156 : vector<2x8x8x32xf32> to vector<128x32xf32>
    %158 = vector.extract_strided_slice %141 {offsets = [6, 0, 0], sizes = [1, 32, 32], strides = [1, 1, 1]} : vector<9x32x32xf32> to vector<1x32x32xf32>
    %159 = vector.shape_cast %158 : vector<1x32x32xf32> to vector<32x32xf32>
    %cst_88 = arith.constant dense<0.000000e+00> : vector<128x32xf32>
    %160 = tpu.matmul %157, %159, %cst_88 {dimension_numbers = #tpu.dot_dimension_numbers<[1], [0], [0], [1], [0, 0, 1, 1], [], []>} : vector<128x32xf32>, vector<32x32xf32>, vector<128x32xf32> -> vector<128x32xf32>
    %161 = arith.addf %155, %160 : vector<128x32xf32>
    %c0_89 = arith.constant 0 : index
    %c0_90 = arith.constant 0 : index
    %c1_91 = arith.constant 1 : index
    %c0_92 = arith.constant 0 : index
    %162 = vector.load %arg8[%c0_89, %c0_90, %c1_91, %c0_92] : memref<2x10x10x32xf32, #tpu.memory_space<vmem>>, vector<2x10x8x32xf32>
    %163 = vector.extract_strided_slice %162 {offsets = [0, 0, 0, 0], sizes = [2, 8, 8, 32], strides = [1, 1, 1, 1]} : vector<2x10x8x32xf32> to vector<2x8x8x32xf32>
    %164 = vector.shape_cast %163 : vector<2x8x8x32xf32> to vector<128x32xf32>
    %165 = vector.extract_strided_slice %141 {offsets = [1, 0, 0], sizes = [1, 32, 32], strides = [1, 1, 1]} : vector<9x32x32xf32> to vector<1x32x32xf32>
    %166 = vector.shape_cast %165 : vector<1x32x32xf32> to vector<32x32xf32>
    %cst_93 = arith.constant dense<0.000000e+00> : vector<128x32xf32>
    %167 = tpu.matmul %164, %166, %cst_93 {dimension_numbers = #tpu.dot_dimension_numbers<[1], [0], [0], [1], [0, 0, 1, 1], [], []>} : vector<128x32xf32>, vector<32x32xf32>, vector<128x32xf32> -> vector<128x32xf32>
    %168 = arith.addf %161, %167 : vector<128x32xf32>
    %169 = vector.extract_strided_slice %162 {offsets = [0, 1, 0, 0], sizes = [2, 8, 8, 32], strides = [1, 1, 1, 1]} : vector<2x10x8x32xf32> to vector<2x8x8x32xf32>
    %170 = vector.shape_cast %169 : vector<2x8x8x32xf32> to vector<128x32xf32>
    %171 = vector.extract_strided_slice %141 {offsets = [4, 0, 0], sizes = [1, 32, 32], strides = [1, 1, 1]} : vector<9x32x32xf32> to vector<1x32x32xf32>
    %172 = vector.shape_cast %171 : vector<1x32x32xf32> to vector<32x32xf32>
    %cst_94 = arith.constant dense<0.000000e+00> : vector<128x32xf32>
    %173 = tpu.matmul %170, %172, %cst_94 {dimension_numbers = #tpu.dot_dimension_numbers<[1], [0], [0], [1], [0, 0, 1, 1], [], []>} : vector<128x32xf32>, vector<32x32xf32>, vector<128x32xf32> -> vector<128x32xf32>
    %174 = arith.addf %168, %173 : vector<128x32xf32>
    %175 = vector.extract_strided_slice %162 {offsets = [0, 2, 0, 0], sizes = [2, 8, 8, 32], strides = [1, 1, 1, 1]} : vector<2x10x8x32xf32> to vector<2x8x8x32xf32>
    %176 = vector.shape_cast %175 : vector<2x8x8x32xf32> to vector<128x32xf32>
    %177 = vector.extract_strided_slice %141 {offsets = [7, 0, 0], sizes = [1, 32, 32], strides = [1, 1, 1]} : vector<9x32x32xf32> to vector<1x32x32xf32>
    %178 = vector.shape_cast %177 : vector<1x32x32xf32> to vector<32x32xf32>
    %cst_95 = arith.constant dense<0.000000e+00> : vector<128x32xf32>
    %179 = tpu.matmul %176, %178, %cst_95 {dimension_numbers = #tpu.dot_dimension_numbers<[1], [0], [0], [1], [0, 0, 1, 1], [], []>} : vector<128x32xf32>, vector<32x32xf32>, vector<128x32xf32> -> vector<128x32xf32>
    %180 = arith.addf %174, %179 : vector<128x32xf32>
    %c0_96 = arith.constant 0 : index
    %c0_97 = arith.constant 0 : index
    %c2_98 = arith.constant 2 : index
    %c0_99 = arith.constant 0 : index
    %181 = vector.load %arg8[%c0_96, %c0_97, %c2_98, %c0_99] : memref<2x10x10x32xf32, #tpu.memory_space<vmem>>, vector<2x10x8x32xf32>
    %182 = vector.extract_strided_slice %181 {offsets = [0, 0, 0, 0], sizes = [2, 8, 8, 32], strides = [1, 1, 1, 1]} : vector<2x10x8x32xf32> to vector<2x8x8x32xf32>
    %183 = vector.shape_cast %182 : vector<2x8x8x32xf32> to vector<128x32xf32>
    %184 = vector.extract_strided_slice %141 {offsets = [2, 0, 0], sizes = [1, 32, 32], strides = [1, 1, 1]} : vector<9x32x32xf32> to vector<1x32x32xf32>
    %185 = vector.shape_cast %184 : vector<1x32x32xf32> to vector<32x32xf32>
    %cst_100 = arith.constant dense<0.000000e+00> : vector<128x32xf32>
    %186 = tpu.matmul %183, %185, %cst_100 {dimension_numbers = #tpu.dot_dimension_numbers<[1], [0], [0], [1], [0, 0, 1, 1], [], []>} : vector<128x32xf32>, vector<32x32xf32>, vector<128x32xf32> -> vector<128x32xf32>
    %187 = arith.addf %180, %186 : vector<128x32xf32>
    %188 = vector.extract_strided_slice %181 {offsets = [0, 1, 0, 0], sizes = [2, 8, 8, 32], strides = [1, 1, 1, 1]} : vector<2x10x8x32xf32> to vector<2x8x8x32xf32>
    %189 = vector.shape_cast %188 : vector<2x8x8x32xf32> to vector<128x32xf32>
    %190 = vector.extract_strided_slice %141 {offsets = [5, 0, 0], sizes = [1, 32, 32], strides = [1, 1, 1]} : vector<9x32x32xf32> to vector<1x32x32xf32>
    %191 = vector.shape_cast %190 : vector<1x32x32xf32> to vector<32x32xf32>
    %cst_101 = arith.constant dense<0.000000e+00> : vector<128x32xf32>
    %192 = tpu.matmul %189, %191, %cst_101 {dimension_numbers = #tpu.dot_dimension_numbers<[1], [0], [0], [1], [0, 0, 1, 1], [], []>} : vector<128x32xf32>, vector<32x32xf32>, vector<128x32xf32> -> vector<128x32xf32>
    %193 = arith.addf %187, %192 : vector<128x32xf32>
    %194 = vector.extract_strided_slice %181 {offsets = [0, 2, 0, 0], sizes = [2, 8, 8, 32], strides = [1, 1, 1, 1]} : vector<2x10x8x32xf32> to vector<2x8x8x32xf32>
    %195 = vector.shape_cast %194 : vector<2x8x8x32xf32> to vector<128x32xf32>
    %196 = vector.extract_strided_slice %141 {offsets = [8, 0, 0], sizes = [1, 32, 32], strides = [1, 1, 1]} : vector<9x32x32xf32> to vector<1x32x32xf32>
    %197 = vector.shape_cast %196 : vector<1x32x32xf32> to vector<32x32xf32>
    %cst_102 = arith.constant dense<0.000000e+00> : vector<128x32xf32>
    %198 = tpu.matmul %195, %197, %cst_102 {dimension_numbers = #tpu.dot_dimension_numbers<[1], [0], [0], [1], [0, 0, 1, 1], [], []>} : vector<128x32xf32>, vector<32x32xf32>, vector<128x32xf32> -> vector<128x32xf32>
    %199 = arith.addf %193, %198 : vector<128x32xf32>
    %c2_103 = arith.constant 2 : index
    %c0_104 = arith.constant 0 : index
    %c0_105 = arith.constant 0 : index
    %200 = vector.load %arg2[%c2_103, %c0_104, %c0_105] : memref<4x1x32xf32, #tpu.memory_space<vmem>>, vector<1x1x32xf32>
    %201 = vector.shape_cast %200 : vector<1x1x32xf32> to vector<1x32xf32>
    %202 = vector.broadcast %201 : vector<1x32xf32> to vector<128x32xf32>
    %203 = arith.addf %199, %202 : vector<128x32xf32>
    %cst_106 = arith.constant 0.000000e+00 : f32
    %204 = vector.broadcast %cst_106 : f32 to vector<128x32xf32>
    %205 = arith.maximumf %203, %204 : vector<128x32xf32>
    %206 = vector.shape_cast %205 : vector<128x32xf32> to vector<2x8x8x32xf32>
    %c0_107 = arith.constant 0 : index
    %c1_108 = arith.constant 1 : index
    %c1_109 = arith.constant 1 : index
    %c0_110 = arith.constant 0 : index
    %207 = vector.load %arg8[%c0_107, %c1_108, %c1_109, %c0_110] : memref<2x10x10x32xf32, #tpu.memory_space<vmem>>, vector<2x8x8x32xf32>
    tpu.vector_store %arg8[%c0_107, %c1_108, %c1_109, %c0_110], %206 {strides = array<i32>} : memref<2x10x10x32xf32, #tpu.memory_space<vmem>>, vector<2x8x8x32xf32>,
    %c3 = arith.constant 3 : index
    %c0_111 = arith.constant 0 : index
    %c0_112 = arith.constant 0 : index
    %c0_113 = arith.constant 0 : index
    %208 = vector.load %arg1[%c3, %c0_111, %c0_112, %c0_113] : memref<4x9x32x32xf32, #tpu.memory_space<vmem>>, vector<1x9x32x32xf32>
    %209 = vector.shape_cast %208 : vector<1x9x32x32xf32> to vector<9x32x32xf32>
    %cst_114 = arith.constant 0.000000e+00 : f32
    %210 = vector.broadcast %cst_114 : f32 to vector<128x32xf32>
    %c0_115 = arith.constant 0 : index
    %c0_116 = arith.constant 0 : index
    %c0_117 = arith.constant 0 : index
    %c0_118 = arith.constant 0 : index
    %211 = vector.load %arg8[%c0_115, %c0_116, %c0_117, %c0_118] : memref<2x10x10x32xf32, #tpu.memory_space<vmem>>, vector<2x10x8x32xf32>
    %212 = vector.extract_strided_slice %211 {offsets = [0, 0, 0, 0], sizes = [2, 8, 8, 32], strides = [1, 1, 1, 1]} : vector<2x10x8x32xf32> to vector<2x8x8x32xf32>
    %213 = vector.shape_cast %212 : vector<2x8x8x32xf32> to vector<128x32xf32>
    %214 = vector.extract_strided_slice %209 {offsets = [0, 0, 0], sizes = [1, 32, 32], strides = [1, 1, 1]} : vector<9x32x32xf32> to vector<1x32x32xf32>
    %215 = vector.shape_cast %214 : vector<1x32x32xf32> to vector<32x32xf32>
    %cst_119 = arith.constant dense<0.000000e+00> : vector<128x32xf32>
    %216 = tpu.matmul %213, %215, %cst_119 {dimension_numbers = #tpu.dot_dimension_numbers<[1], [0], [0], [1], [0, 0, 1, 1], [], []>} : vector<128x32xf32>, vector<32x32xf32>, vector<128x32xf32> -> vector<128x32xf32>
    %217 = arith.addf %210, %216 : vector<128x32xf32>
    %218 = vector.extract_strided_slice %211 {offsets = [0, 1, 0, 0], sizes = [2, 8, 8, 32], strides = [1, 1, 1, 1]} : vector<2x10x8x32xf32> to vector<2x8x8x32xf32>
    %219 = vector.shape_cast %218 : vector<2x8x8x32xf32> to vector<128x32xf32>
    %220 = vector.extract_strided_slice %209 {offsets = [3, 0, 0], sizes = [1, 32, 32], strides = [1, 1, 1]} : vector<9x32x32xf32> to vector<1x32x32xf32>
    %221 = vector.shape_cast %220 : vector<1x32x32xf32> to vector<32x32xf32>
    %cst_120 = arith.constant dense<0.000000e+00> : vector<128x32xf32>
    %222 = tpu.matmul %219, %221, %cst_120 {dimension_numbers = #tpu.dot_dimension_numbers<[1], [0], [0], [1], [0, 0, 1, 1], [], []>} : vector<128x32xf32>, vector<32x32xf32>, vector<128x32xf32> -> vector<128x32xf32>
    %223 = arith.addf %217, %222 : vector<128x32xf32>
    %224 = vector.extract_strided_slice %211 {offsets = [0, 2, 0, 0], sizes = [2, 8, 8, 32], strides = [1, 1, 1, 1]} : vector<2x10x8x32xf32> to vector<2x8x8x32xf32>
    %225 = vector.shape_cast %224 : vector<2x8x8x32xf32> to vector<128x32xf32>
    %226 = vector.extract_strided_slice %209 {offsets = [6, 0, 0], sizes = [1, 32, 32], strides = [1, 1, 1]} : vector<9x32x32xf32> to vector<1x32x32xf32>
    %227 = vector.shape_cast %226 : vector<1x32x32xf32> to vector<32x32xf32>
    %cst_121 = arith.constant dense<0.000000e+00> : vector<128x32xf32>
    %228 = tpu.matmul %225, %227, %cst_121 {dimension_numbers = #tpu.dot_dimension_numbers<[1], [0], [0], [1], [0, 0, 1, 1], [], []>} : vector<128x32xf32>, vector<32x32xf32>, vector<128x32xf32> -> vector<128x32xf32>
    %229 = arith.addf %223, %228 : vector<128x32xf32>
    %c0_122 = arith.constant 0 : index
    %c0_123 = arith.constant 0 : index
    %c1_124 = arith.constant 1 : index
    %c0_125 = arith.constant 0 : index
    %230 = vector.load %arg8[%c0_122, %c0_123, %c1_124, %c0_125] : memref<2x10x10x32xf32, #tpu.memory_space<vmem>>, vector<2x10x8x32xf32>
    %231 = vector.extract_strided_slice %230 {offsets = [0, 0, 0, 0], sizes = [2, 8, 8, 32], strides = [1, 1, 1, 1]} : vector<2x10x8x32xf32> to vector<2x8x8x32xf32>
    %232 = vector.shape_cast %231 : vector<2x8x8x32xf32> to vector<128x32xf32>
    %233 = vector.extract_strided_slice %209 {offsets = [1, 0, 0], sizes = [1, 32, 32], strides = [1, 1, 1]} : vector<9x32x32xf32> to vector<1x32x32xf32>
    %234 = vector.shape_cast %233 : vector<1x32x32xf32> to vector<32x32xf32>
    %cst_126 = arith.constant dense<0.000000e+00> : vector<128x32xf32>
    %235 = tpu.matmul %232, %234, %cst_126 {dimension_numbers = #tpu.dot_dimension_numbers<[1], [0], [0], [1], [0, 0, 1, 1], [], []>} : vector<128x32xf32>, vector<32x32xf32>, vector<128x32xf32> -> vector<128x32xf32>
    %236 = arith.addf %229, %235 : vector<128x32xf32>
    %237 = vector.extract_strided_slice %230 {offsets = [0, 1, 0, 0], sizes = [2, 8, 8, 32], strides = [1, 1, 1, 1]} : vector<2x10x8x32xf32> to vector<2x8x8x32xf32>
    %238 = vector.shape_cast %237 : vector<2x8x8x32xf32> to vector<128x32xf32>
    %239 = vector.extract_strided_slice %209 {offsets = [4, 0, 0], sizes = [1, 32, 32], strides = [1, 1, 1]} : vector<9x32x32xf32> to vector<1x32x32xf32>
    %240 = vector.shape_cast %239 : vector<1x32x32xf32> to vector<32x32xf32>
    %cst_127 = arith.constant dense<0.000000e+00> : vector<128x32xf32>
    %241 = tpu.matmul %238, %240, %cst_127 {dimension_numbers = #tpu.dot_dimension_numbers<[1], [0], [0], [1], [0, 0, 1, 1], [], []>} : vector<128x32xf32>, vector<32x32xf32>, vector<128x32xf32> -> vector<128x32xf32>
    %242 = arith.addf %236, %241 : vector<128x32xf32>
    %243 = vector.extract_strided_slice %230 {offsets = [0, 2, 0, 0], sizes = [2, 8, 8, 32], strides = [1, 1, 1, 1]} : vector<2x10x8x32xf32> to vector<2x8x8x32xf32>
    %244 = vector.shape_cast %243 : vector<2x8x8x32xf32> to vector<128x32xf32>
    %245 = vector.extract_strided_slice %209 {offsets = [7, 0, 0], sizes = [1, 32, 32], strides = [1, 1, 1]} : vector<9x32x32xf32> to vector<1x32x32xf32>
    %246 = vector.shape_cast %245 : vector<1x32x32xf32> to vector<32x32xf32>
    %cst_128 = arith.constant dense<0.000000e+00> : vector<128x32xf32>
    %247 = tpu.matmul %244, %246, %cst_128 {dimension_numbers = #tpu.dot_dimension_numbers<[1], [0], [0], [1], [0, 0, 1, 1], [], []>} : vector<128x32xf32>, vector<32x32xf32>, vector<128x32xf32> -> vector<128x32xf32>
    %248 = arith.addf %242, %247 : vector<128x32xf32>
    %c0_129 = arith.constant 0 : index
    %c0_130 = arith.constant 0 : index
    %c2_131 = arith.constant 2 : index
    %c0_132 = arith.constant 0 : index
    %249 = vector.load %arg8[%c0_129, %c0_130, %c2_131, %c0_132] : memref<2x10x10x32xf32, #tpu.memory_space<vmem>>, vector<2x10x8x32xf32>
    %250 = vector.extract_strided_slice %249 {offsets = [0, 0, 0, 0], sizes = [2, 8, 8, 32], strides = [1, 1, 1, 1]} : vector<2x10x8x32xf32> to vector<2x8x8x32xf32>
    %251 = vector.shape_cast %250 : vector<2x8x8x32xf32> to vector<128x32xf32>
    %252 = vector.extract_strided_slice %209 {offsets = [2, 0, 0], sizes = [1, 32, 32], strides = [1, 1, 1]} : vector<9x32x32xf32> to vector<1x32x32xf32>
    %253 = vector.shape_cast %252 : vector<1x32x32xf32> to vector<32x32xf32>
    %cst_133 = arith.constant dense<0.000000e+00> : vector<128x32xf32>
    %254 = tpu.matmul %251, %253, %cst_133 {dimension_numbers = #tpu.dot_dimension_numbers<[1], [0], [0], [1], [0, 0, 1, 1], [], []>} : vector<128x32xf32>, vector<32x32xf32>, vector<128x32xf32> -> vector<128x32xf32>
    %255 = arith.addf %248, %254 : vector<128x32xf32>
    %256 = vector.extract_strided_slice %249 {offsets = [0, 1, 0, 0], sizes = [2, 8, 8, 32], strides = [1, 1, 1, 1]} : vector<2x10x8x32xf32> to vector<2x8x8x32xf32>
    %257 = vector.shape_cast %256 : vector<2x8x8x32xf32> to vector<128x32xf32>
    %258 = vector.extract_strided_slice %209 {offsets = [5, 0, 0], sizes = [1, 32, 32], strides = [1, 1, 1]} : vector<9x32x32xf32> to vector<1x32x32xf32>
    %259 = vector.shape_cast %258 : vector<1x32x32xf32> to vector<32x32xf32>
    %cst_134 = arith.constant dense<0.000000e+00> : vector<128x32xf32>
    %260 = tpu.matmul %257, %259, %cst_134 {dimension_numbers = #tpu.dot_dimension_numbers<[1], [0], [0], [1], [0, 0, 1, 1], [], []>} : vector<128x32xf32>, vector<32x32xf32>, vector<128x32xf32> -> vector<128x32xf32>
    %261 = arith.addf %255, %260 : vector<128x32xf32>
    %262 = vector.extract_strided_slice %249 {offsets = [0, 2, 0, 0], sizes = [2, 8, 8, 32], strides = [1, 1, 1, 1]} : vector<2x10x8x32xf32> to vector<2x8x8x32xf32>
    %263 = vector.shape_cast %262 : vector<2x8x8x32xf32> to vector<128x32xf32>
    %264 = vector.extract_strided_slice %209 {offsets = [8, 0, 0], sizes = [1, 32, 32], strides = [1, 1, 1]} : vector<9x32x32xf32> to vector<1x32x32xf32>
    %265 = vector.shape_cast %264 : vector<1x32x32xf32> to vector<32x32xf32>
    %cst_135 = arith.constant dense<0.000000e+00> : vector<128x32xf32>
    %266 = tpu.matmul %263, %265, %cst_135 {dimension_numbers = #tpu.dot_dimension_numbers<[1], [0], [0], [1], [0, 0, 1, 1], [], []>} : vector<128x32xf32>, vector<32x32xf32>, vector<128x32xf32> -> vector<128x32xf32>
    %267 = arith.addf %261, %266 : vector<128x32xf32>
    %c3_136 = arith.constant 3 : index
    %c0_137 = arith.constant 0 : index
    %c0_138 = arith.constant 0 : index
    %268 = vector.load %arg2[%c3_136, %c0_137, %c0_138] : memref<4x1x32xf32, #tpu.memory_space<vmem>>, vector<1x1x32xf32>
    %269 = vector.shape_cast %268 : vector<1x1x32xf32> to vector<1x32xf32>
    %270 = vector.broadcast %269 : vector<1x32xf32> to vector<128x32xf32>
    %271 = arith.addf %267, %270 : vector<128x32xf32>
    %cst_139 = arith.constant 0.000000e+00 : f32
    %272 = vector.broadcast %cst_139 : f32 to vector<128x32xf32>
    %273 = arith.maximumf %271, %272 : vector<128x32xf32>
    %274 = vector.shape_cast %273 : vector<128x32xf32> to vector<2x64x32xf32>
    %275 = vector.extract_strided_slice %274 {offsets = [0, 0, 0], sizes = [2, 1, 32], strides = [1, 1, 1]} : vector<2x64x32xf32> to vector<2x1x32xf32>
    %276 = vector.shape_cast %275 : vector<2x1x32xf32> to vector<2x32xf32>
    %c0_140 = arith.constant 0 : index
    %c0_141 = arith.constant 0 : index
    %277 = vector.load %arg9[%c0_140, %c0_141] : memref<2x2048xf32, #tpu.memory_space<vmem>>, vector<2x32xf32>
    tpu.vector_store %arg9[%c0_140, %c0_141], %276 {strides = array<i32>} : memref<2x2048xf32, #tpu.memory_space<vmem>>, vector<2x32xf32>,
    %278 = vector.extract_strided_slice %274 {offsets = [0, 1, 0], sizes = [2, 1, 32], strides = [1, 1, 1]} : vector<2x64x32xf32> to vector<2x1x32xf32>
    %279 = vector.shape_cast %278 : vector<2x1x32xf32> to vector<2x32xf32>
    %c0_142 = arith.constant 0 : index
    %c32 = arith.constant 32 : index
    %280 = vector.load %arg9[%c0_142, %c32] : memref<2x2048xf32, #tpu.memory_space<vmem>>, vector<2x32xf32>
    tpu.vector_store %arg9[%c0_142, %c32], %279 {strides = array<i32>} : memref<2x2048xf32, #tpu.memory_space<vmem>>, vector<2x32xf32>,
    %281 = vector.extract_strided_slice %274 {offsets = [0, 2, 0], sizes = [2, 1, 32], strides = [1, 1, 1]} : vector<2x64x32xf32> to vector<2x1x32xf32>
    %282 = vector.shape_cast %281 : vector<2x1x32xf32> to vector<2x32xf32>
    %c0_143 = arith.constant 0 : index
    %c64 = arith.constant 64 : index
    %283 = vector.load %arg9[%c0_143, %c64] : memref<2x2048xf32, #tpu.memory_space<vmem>>, vector<2x32xf32>
    tpu.vector_store %arg9[%c0_143, %c64], %282 {strides = array<i32>} : memref<2x2048xf32, #tpu.memory_space<vmem>>, vector<2x32xf32>,
    %284 = vector.extract_strided_slice %274 {offsets = [0, 3, 0], sizes = [2, 1, 32], strides = [1, 1, 1]} : vector<2x64x32xf32> to vector<2x1x32xf32>
    %285 = vector.shape_cast %284 : vector<2x1x32xf32> to vector<2x32xf32>
    %c0_144 = arith.constant 0 : index
    %c96 = arith.constant 96 : index
    %286 = vector.load %arg9[%c0_144, %c96] : memref<2x2048xf32, #tpu.memory_space<vmem>>, vector<2x32xf32>
    tpu.vector_store %arg9[%c0_144, %c96], %285 {strides = array<i32>} : memref<2x2048xf32, #tpu.memory_space<vmem>>, vector<2x32xf32>,
    %287 = vector.extract_strided_slice %274 {offsets = [0, 4, 0], sizes = [2, 1, 32], strides = [1, 1, 1]} : vector<2x64x32xf32> to vector<2x1x32xf32>
    %288 = vector.shape_cast %287 : vector<2x1x32xf32> to vector<2x32xf32>
    %c0_145 = arith.constant 0 : index
    %c128 = arith.constant 128 : index
    %289 = vector.load %arg9[%c0_145, %c128] : memref<2x2048xf32, #tpu.memory_space<vmem>>, vector<2x32xf32>
    tpu.vector_store %arg9[%c0_145, %c128], %288 {strides = array<i32>} : memref<2x2048xf32, #tpu.memory_space<vmem>>, vector<2x32xf32>,
    %290 = vector.extract_strided_slice %274 {offsets = [0, 5, 0], sizes = [2, 1, 32], strides = [1, 1, 1]} : vector<2x64x32xf32> to vector<2x1x32xf32>
    %291 = vector.shape_cast %290 : vector<2x1x32xf32> to vector<2x32xf32>
    %c0_146 = arith.constant 0 : index
    %c160 = arith.constant 160 : index
    %292 = vector.load %arg9[%c0_146, %c160] : memref<2x2048xf32, #tpu.memory_space<vmem>>, vector<2x32xf32>
    tpu.vector_store %arg9[%c0_146, %c160], %291 {strides = array<i32>} : memref<2x2048xf32, #tpu.memory_space<vmem>>, vector<2x32xf32>,
    %293 = vector.extract_strided_slice %274 {offsets = [0, 6, 0], sizes = [2, 1, 32], strides = [1, 1, 1]} : vector<2x64x32xf32> to vector<2x1x32xf32>
    %294 = vector.shape_cast %293 : vector<2x1x32xf32> to vector<2x32xf32>
    %c0_147 = arith.constant 0 : index
    %c192 = arith.constant 192 : index
    %295 = vector.load %arg9[%c0_147, %c192] : memref<2x2048xf32, #tpu.memory_space<vmem>>, vector<2x32xf32>
    tpu.vector_store %arg9[%c0_147, %c192], %294 {strides = array<i32>} : memref<2x2048xf32, #tpu.memory_space<vmem>>, vector<2x32xf32>,
    %296 = vector.extract_strided_slice %274 {offsets = [0, 7, 0], sizes = [2, 1, 32], strides = [1, 1, 1]} : vector<2x64x32xf32> to vector<2x1x32xf32>
    %297 = vector.shape_cast %296 : vector<2x1x32xf32> to vector<2x32xf32>
    %c0_148 = arith.constant 0 : index
    %c224 = arith.constant 224 : index
    %298 = vector.load %arg9[%c0_148, %c224] : memref<2x2048xf32, #tpu.memory_space<vmem>>, vector<2x32xf32>
    tpu.vector_store %arg9[%c0_148, %c224], %297 {strides = array<i32>} : memref<2x2048xf32, #tpu.memory_space<vmem>>, vector<2x32xf32>,
    %299 = vector.extract_strided_slice %274 {offsets = [0, 8, 0], sizes = [2, 1, 32], strides = [1, 1, 1]} : vector<2x64x32xf32> to vector<2x1x32xf32>
    %300 = vector.shape_cast %299 : vector<2x1x32xf32> to vector<2x32xf32>
    %c0_149 = arith.constant 0 : index
    %c256 = arith.constant 256 : index
    %301 = vector.load %arg9[%c0_149, %c256] : memref<2x2048xf32, #tpu.memory_space<vmem>>, vector<2x32xf32>
    tpu.vector_store %arg9[%c0_149, %c256], %300 {strides = array<i32>} : memref<2x2048xf32, #tpu.memory_space<vmem>>, vector<2x32xf32>,
    %302 = vector.extract_strided_slice %274 {offsets = [0, 9, 0], sizes = [2, 1, 32], strides = [1, 1, 1]} : vector<2x64x32xf32> to vector<2x1x32xf32>
    %303 = vector.shape_cast %302 : vector<2x1x32xf32> to vector<2x32xf32>
    %c0_150 = arith.constant 0 : index
    %c288 = arith.constant 288 : index
    %304 = vector.load %arg9[%c0_150, %c288] : memref<2x2048xf32, #tpu.memory_space<vmem>>, vector<2x32xf32>
    tpu.vector_store %arg9[%c0_150, %c288], %303 {strides = array<i32>} : memref<2x2048xf32, #tpu.memory_space<vmem>>, vector<2x32xf32>,
    %305 = vector.extract_strided_slice %274 {offsets = [0, 10, 0], sizes = [2, 1, 32], strides = [1, 1, 1]} : vector<2x64x32xf32> to vector<2x1x32xf32>
    %306 = vector.shape_cast %305 : vector<2x1x32xf32> to vector<2x32xf32>
    %c0_151 = arith.constant 0 : index
    %c320 = arith.constant 320 : index
    %307 = vector.load %arg9[%c0_151, %c320] : memref<2x2048xf32, #tpu.memory_space<vmem>>, vector<2x32xf32>
    tpu.vector_store %arg9[%c0_151, %c320], %306 {strides = array<i32>} : memref<2x2048xf32, #tpu.memory_space<vmem>>, vector<2x32xf32>,
    %308 = vector.extract_strided_slice %274 {offsets = [0, 11, 0], sizes = [2, 1, 32], strides = [1, 1, 1]} : vector<2x64x32xf32> to vector<2x1x32xf32>
    %309 = vector.shape_cast %308 : vector<2x1x32xf32> to vector<2x32xf32>
    %c0_152 = arith.constant 0 : index
    %c352 = arith.constant 352 : index
    %310 = vector.load %arg9[%c0_152, %c352] : memref<2x2048xf32, #tpu.memory_space<vmem>>, vector<2x32xf32>
    tpu.vector_store %arg9[%c0_152, %c352], %309 {strides = array<i32>} : memref<2x2048xf32, #tpu.memory_space<vmem>>, vector<2x32xf32>,
    %311 = vector.extract_strided_slice %274 {offsets = [0, 12, 0], sizes = [2, 1, 32], strides = [1, 1, 1]} : vector<2x64x32xf32> to vector<2x1x32xf32>
    %312 = vector.shape_cast %311 : vector<2x1x32xf32> to vector<2x32xf32>
    %c0_153 = arith.constant 0 : index
    %c384 = arith.constant 384 : index
    %313 = vector.load %arg9[%c0_153, %c384] : memref<2x2048xf32, #tpu.memory_space<vmem>>, vector<2x32xf32>
    tpu.vector_store %arg9[%c0_153, %c384], %312 {strides = array<i32>} : memref<2x2048xf32, #tpu.memory_space<vmem>>, vector<2x32xf32>,
    %314 = vector.extract_strided_slice %274 {offsets = [0, 13, 0], sizes = [2, 1, 32], strides = [1, 1, 1]} : vector<2x64x32xf32> to vector<2x1x32xf32>
    %315 = vector.shape_cast %314 : vector<2x1x32xf32> to vector<2x32xf32>
    %c0_154 = arith.constant 0 : index
    %c416 = arith.constant 416 : index
    %316 = vector.load %arg9[%c0_154, %c416] : memref<2x2048xf32, #tpu.memory_space<vmem>>, vector<2x32xf32>
    tpu.vector_store %arg9[%c0_154, %c416], %315 {strides = array<i32>} : memref<2x2048xf32, #tpu.memory_space<vmem>>, vector<2x32xf32>,
    %317 = vector.extract_strided_slice %274 {offsets = [0, 14, 0], sizes = [2, 1, 32], strides = [1, 1, 1]} : vector<2x64x32xf32> to vector<2x1x32xf32>
    %318 = vector.shape_cast %317 : vector<2x1x32xf32> to vector<2x32xf32>
    %c0_155 = arith.constant 0 : index
    %c448 = arith.constant 448 : index
    %319 = vector.load %arg9[%c0_155, %c448] : memref<2x2048xf32, #tpu.memory_space<vmem>>, vector<2x32xf32>
    tpu.vector_store %arg9[%c0_155, %c448], %318 {strides = array<i32>} : memref<2x2048xf32, #tpu.memory_space<vmem>>, vector<2x32xf32>,
    %320 = vector.extract_strided_slice %274 {offsets = [0, 15, 0], sizes = [2, 1, 32], strides = [1, 1, 1]} : vector<2x64x32xf32> to vector<2x1x32xf32>
    %321 = vector.shape_cast %320 : vector<2x1x32xf32> to vector<2x32xf32>
    %c0_156 = arith.constant 0 : index
    %c480 = arith.constant 480 : index
    %322 = vector.load %arg9[%c0_156, %c480] : memref<2x2048xf32, #tpu.memory_space<vmem>>, vector<2x32xf32>
    tpu.vector_store %arg9[%c0_156, %c480], %321 {strides = array<i32>} : memref<2x2048xf32, #tpu.memory_space<vmem>>, vector<2x32xf32>,
    %323 = vector.extract_strided_slice %274 {offsets = [0, 16, 0], sizes = [2, 1, 32], strides = [1, 1, 1]} : vector<2x64x32xf32> to vector<2x1x32xf32>
    %324 = vector.shape_cast %323 : vector<2x1x32xf32> to vector<2x32xf32>
    %c0_157 = arith.constant 0 : index
    %c512 = arith.constant 512 : index
    %325 = vector.load %arg9[%c0_157, %c512] : memref<2x2048xf32, #tpu.memory_space<vmem>>, vector<2x32xf32>
    tpu.vector_store %arg9[%c0_157, %c512], %324 {strides = array<i32>} : memref<2x2048xf32, #tpu.memory_space<vmem>>, vector<2x32xf32>,
    %326 = vector.extract_strided_slice %274 {offsets = [0, 17, 0], sizes = [2, 1, 32], strides = [1, 1, 1]} : vector<2x64x32xf32> to vector<2x1x32xf32>
    %327 = vector.shape_cast %326 : vector<2x1x32xf32> to vector<2x32xf32>
    %c0_158 = arith.constant 0 : index
    %c544 = arith.constant 544 : index
    %328 = vector.load %arg9[%c0_158, %c544] : memref<2x2048xf32, #tpu.memory_space<vmem>>, vector<2x32xf32>
    tpu.vector_store %arg9[%c0_158, %c544], %327 {strides = array<i32>} : memref<2x2048xf32, #tpu.memory_space<vmem>>, vector<2x32xf32>,
    %329 = vector.extract_strided_slice %274 {offsets = [0, 18, 0], sizes = [2, 1, 32], strides = [1, 1, 1]} : vector<2x64x32xf32> to vector<2x1x32xf32>
    %330 = vector.shape_cast %329 : vector<2x1x32xf32> to vector<2x32xf32>
    %c0_159 = arith.constant 0 : index
    %c576 = arith.constant 576 : index
    %331 = vector.load %arg9[%c0_159, %c576] : memref<2x2048xf32, #tpu.memory_space<vmem>>, vector<2x32xf32>
    tpu.vector_store %arg9[%c0_159, %c576], %330 {strides = array<i32>} : memref<2x2048xf32, #tpu.memory_space<vmem>>, vector<2x32xf32>,
    %332 = vector.extract_strided_slice %274 {offsets = [0, 19, 0], sizes = [2, 1, 32], strides = [1, 1, 1]} : vector<2x64x32xf32> to vector<2x1x32xf32>
    %333 = vector.shape_cast %332 : vector<2x1x32xf32> to vector<2x32xf32>
    %c0_160 = arith.constant 0 : index
    %c608 = arith.constant 608 : index
    %334 = vector.load %arg9[%c0_160, %c608] : memref<2x2048xf32, #tpu.memory_space<vmem>>, vector<2x32xf32>
    tpu.vector_store %arg9[%c0_160, %c608], %333 {strides = array<i32>} : memref<2x2048xf32, #tpu.memory_space<vmem>>, vector<2x32xf32>,
    %335 = vector.extract_strided_slice %274 {offsets = [0, 20, 0], sizes = [2, 1, 32], strides = [1, 1, 1]} : vector<2x64x32xf32> to vector<2x1x32xf32>
    %336 = vector.shape_cast %335 : vector<2x1x32xf32> to vector<2x32xf32>
    %c0_161 = arith.constant 0 : index
    %c640 = arith.constant 640 : index
    %337 = vector.load %arg9[%c0_161, %c640] : memref<2x2048xf32, #tpu.memory_space<vmem>>, vector<2x32xf32>
    tpu.vector_store %arg9[%c0_161, %c640], %336 {strides = array<i32>} : memref<2x2048xf32, #tpu.memory_space<vmem>>, vector<2x32xf32>,
    %338 = vector.extract_strided_slice %274 {offsets = [0, 21, 0], sizes = [2, 1, 32], strides = [1, 1, 1]} : vector<2x64x32xf32> to vector<2x1x32xf32>
    %339 = vector.shape_cast %338 : vector<2x1x32xf32> to vector<2x32xf32>
    %c0_162 = arith.constant 0 : index
    %c672 = arith.constant 672 : index
    %340 = vector.load %arg9[%c0_162, %c672] : memref<2x2048xf32, #tpu.memory_space<vmem>>, vector<2x32xf32>
    tpu.vector_store %arg9[%c0_162, %c672], %339 {strides = array<i32>} : memref<2x2048xf32, #tpu.memory_space<vmem>>, vector<2x32xf32>,
    %341 = vector.extract_strided_slice %274 {offsets = [0, 22, 0], sizes = [2, 1, 32], strides = [1, 1, 1]} : vector<2x64x32xf32> to vector<2x1x32xf32>
    %342 = vector.shape_cast %341 : vector<2x1x32xf32> to vector<2x32xf32>
    %c0_163 = arith.constant 0 : index
    %c704 = arith.constant 704 : index
    %343 = vector.load %arg9[%c0_163, %c704] : memref<2x2048xf32, #tpu.memory_space<vmem>>, vector<2x32xf32>
    tpu.vector_store %arg9[%c0_163, %c704], %342 {strides = array<i32>} : memref<2x2048xf32, #tpu.memory_space<vmem>>, vector<2x32xf32>,
    %344 = vector.extract_strided_slice %274 {offsets = [0, 23, 0], sizes = [2, 1, 32], strides = [1, 1, 1]} : vector<2x64x32xf32> to vector<2x1x32xf32>
    %345 = vector.shape_cast %344 : vector<2x1x32xf32> to vector<2x32xf32>
    %c0_164 = arith.constant 0 : index
    %c736 = arith.constant 736 : index
    %346 = vector.load %arg9[%c0_164, %c736] : memref<2x2048xf32, #tpu.memory_space<vmem>>, vector<2x32xf32>
    tpu.vector_store %arg9[%c0_164, %c736], %345 {strides = array<i32>} : memref<2x2048xf32, #tpu.memory_space<vmem>>, vector<2x32xf32>,
    %347 = vector.extract_strided_slice %274 {offsets = [0, 24, 0], sizes = [2, 1, 32], strides = [1, 1, 1]} : vector<2x64x32xf32> to vector<2x1x32xf32>
    %348 = vector.shape_cast %347 : vector<2x1x32xf32> to vector<2x32xf32>
    %c0_165 = arith.constant 0 : index
    %c768 = arith.constant 768 : index
    %349 = vector.load %arg9[%c0_165, %c768] : memref<2x2048xf32, #tpu.memory_space<vmem>>, vector<2x32xf32>
    tpu.vector_store %arg9[%c0_165, %c768], %348 {strides = array<i32>} : memref<2x2048xf32, #tpu.memory_space<vmem>>, vector<2x32xf32>,
    %350 = vector.extract_strided_slice %274 {offsets = [0, 25, 0], sizes = [2, 1, 32], strides = [1, 1, 1]} : vector<2x64x32xf32> to vector<2x1x32xf32>
    %351 = vector.shape_cast %350 : vector<2x1x32xf32> to vector<2x32xf32>
    %c0_166 = arith.constant 0 : index
    %c800 = arith.constant 800 : index
    %352 = vector.load %arg9[%c0_166, %c800] : memref<2x2048xf32, #tpu.memory_space<vmem>>, vector<2x32xf32>
    tpu.vector_store %arg9[%c0_166, %c800], %351 {strides = array<i32>} : memref<2x2048xf32, #tpu.memory_space<vmem>>, vector<2x32xf32>,
    %353 = vector.extract_strided_slice %274 {offsets = [0, 26, 0], sizes = [2, 1, 32], strides = [1, 1, 1]} : vector<2x64x32xf32> to vector<2x1x32xf32>
    %354 = vector.shape_cast %353 : vector<2x1x32xf32> to vector<2x32xf32>
    %c0_167 = arith.constant 0 : index
    %c832 = arith.constant 832 : index
    %355 = vector.load %arg9[%c0_167, %c832] : memref<2x2048xf32, #tpu.memory_space<vmem>>, vector<2x32xf32>
    tpu.vector_store %arg9[%c0_167, %c832], %354 {strides = array<i32>} : memref<2x2048xf32, #tpu.memory_space<vmem>>, vector<2x32xf32>,
    %356 = vector.extract_strided_slice %274 {offsets = [0, 27, 0], sizes = [2, 1, 32], strides = [1, 1, 1]} : vector<2x64x32xf32> to vector<2x1x32xf32>
    %357 = vector.shape_cast %356 : vector<2x1x32xf32> to vector<2x32xf32>
    %c0_168 = arith.constant 0 : index
    %c864 = arith.constant 864 : index
    %358 = vector.load %arg9[%c0_168, %c864] : memref<2x2048xf32, #tpu.memory_space<vmem>>, vector<2x32xf32>
    tpu.vector_store %arg9[%c0_168, %c864], %357 {strides = array<i32>} : memref<2x2048xf32, #tpu.memory_space<vmem>>, vector<2x32xf32>,
    %359 = vector.extract_strided_slice %274 {offsets = [0, 28, 0], sizes = [2, 1, 32], strides = [1, 1, 1]} : vector<2x64x32xf32> to vector<2x1x32xf32>
    %360 = vector.shape_cast %359 : vector<2x1x32xf32> to vector<2x32xf32>
    %c0_169 = arith.constant 0 : index
    %c896 = arith.constant 896 : index
    %361 = vector.load %arg9[%c0_169, %c896] : memref<2x2048xf32, #tpu.memory_space<vmem>>, vector<2x32xf32>
    tpu.vector_store %arg9[%c0_169, %c896], %360 {strides = array<i32>} : memref<2x2048xf32, #tpu.memory_space<vmem>>, vector<2x32xf32>,
    %362 = vector.extract_strided_slice %274 {offsets = [0, 29, 0], sizes = [2, 1, 32], strides = [1, 1, 1]} : vector<2x64x32xf32> to vector<2x1x32xf32>
    %363 = vector.shape_cast %362 : vector<2x1x32xf32> to vector<2x32xf32>
    %c0_170 = arith.constant 0 : index
    %c928 = arith.constant 928 : index
    %364 = vector.load %arg9[%c0_170, %c928] : memref<2x2048xf32, #tpu.memory_space<vmem>>, vector<2x32xf32>
    tpu.vector_store %arg9[%c0_170, %c928], %363 {strides = array<i32>} : memref<2x2048xf32, #tpu.memory_space<vmem>>, vector<2x32xf32>,
    %365 = vector.extract_strided_slice %274 {offsets = [0, 30, 0], sizes = [2, 1, 32], strides = [1, 1, 1]} : vector<2x64x32xf32> to vector<2x1x32xf32>
    %366 = vector.shape_cast %365 : vector<2x1x32xf32> to vector<2x32xf32>
    %c0_171 = arith.constant 0 : index
    %c960 = arith.constant 960 : index
    %367 = vector.load %arg9[%c0_171, %c960] : memref<2x2048xf32, #tpu.memory_space<vmem>>, vector<2x32xf32>
    tpu.vector_store %arg9[%c0_171, %c960], %366 {strides = array<i32>} : memref<2x2048xf32, #tpu.memory_space<vmem>>, vector<2x32xf32>,
    %368 = vector.extract_strided_slice %274 {offsets = [0, 31, 0], sizes = [2, 1, 32], strides = [1, 1, 1]} : vector<2x64x32xf32> to vector<2x1x32xf32>
    %369 = vector.shape_cast %368 : vector<2x1x32xf32> to vector<2x32xf32>
    %c0_172 = arith.constant 0 : index
    %c992 = arith.constant 992 : index
    %370 = vector.load %arg9[%c0_172, %c992] : memref<2x2048xf32, #tpu.memory_space<vmem>>, vector<2x32xf32>
    tpu.vector_store %arg9[%c0_172, %c992], %369 {strides = array<i32>} : memref<2x2048xf32, #tpu.memory_space<vmem>>, vector<2x32xf32>,
    %371 = vector.extract_strided_slice %274 {offsets = [0, 32, 0], sizes = [2, 1, 32], strides = [1, 1, 1]} : vector<2x64x32xf32> to vector<2x1x32xf32>
    %372 = vector.shape_cast %371 : vector<2x1x32xf32> to vector<2x32xf32>
    %c0_173 = arith.constant 0 : index
    %c1024 = arith.constant 1024 : index
    %373 = vector.load %arg9[%c0_173, %c1024] : memref<2x2048xf32, #tpu.memory_space<vmem>>, vector<2x32xf32>
    tpu.vector_store %arg9[%c0_173, %c1024], %372 {strides = array<i32>} : memref<2x2048xf32, #tpu.memory_space<vmem>>, vector<2x32xf32>,
    %374 = vector.extract_strided_slice %274 {offsets = [0, 33, 0], sizes = [2, 1, 32], strides = [1, 1, 1]} : vector<2x64x32xf32> to vector<2x1x32xf32>
    %375 = vector.shape_cast %374 : vector<2x1x32xf32> to vector<2x32xf32>
    %c0_174 = arith.constant 0 : index
    %c1056 = arith.constant 1056 : index
    %376 = vector.load %arg9[%c0_174, %c1056] : memref<2x2048xf32, #tpu.memory_space<vmem>>, vector<2x32xf32>
    tpu.vector_store %arg9[%c0_174, %c1056], %375 {strides = array<i32>} : memref<2x2048xf32, #tpu.memory_space<vmem>>, vector<2x32xf32>,
    %377 = vector.extract_strided_slice %274 {offsets = [0, 34, 0], sizes = [2, 1, 32], strides = [1, 1, 1]} : vector<2x64x32xf32> to vector<2x1x32xf32>
    %378 = vector.shape_cast %377 : vector<2x1x32xf32> to vector<2x32xf32>
    %c0_175 = arith.constant 0 : index
    %c1088 = arith.constant 1088 : index
    %379 = vector.load %arg9[%c0_175, %c1088] : memref<2x2048xf32, #tpu.memory_space<vmem>>, vector<2x32xf32>
    tpu.vector_store %arg9[%c0_175, %c1088], %378 {strides = array<i32>} : memref<2x2048xf32, #tpu.memory_space<vmem>>, vector<2x32xf32>,
    %380 = vector.extract_strided_slice %274 {offsets = [0, 35, 0], sizes = [2, 1, 32], strides = [1, 1, 1]} : vector<2x64x32xf32> to vector<2x1x32xf32>
    %381 = vector.shape_cast %380 : vector<2x1x32xf32> to vector<2x32xf32>
    %c0_176 = arith.constant 0 : index
    %c1120 = arith.constant 1120 : index
    %382 = vector.load %arg9[%c0_176, %c1120] : memref<2x2048xf32, #tpu.memory_space<vmem>>, vector<2x32xf32>
    tpu.vector_store %arg9[%c0_176, %c1120], %381 {strides = array<i32>} : memref<2x2048xf32, #tpu.memory_space<vmem>>, vector<2x32xf32>,
    %383 = vector.extract_strided_slice %274 {offsets = [0, 36, 0], sizes = [2, 1, 32], strides = [1, 1, 1]} : vector<2x64x32xf32> to vector<2x1x32xf32>
    %384 = vector.shape_cast %383 : vector<2x1x32xf32> to vector<2x32xf32>
    %c0_177 = arith.constant 0 : index
    %c1152 = arith.constant 1152 : index
    %385 = vector.load %arg9[%c0_177, %c1152] : memref<2x2048xf32, #tpu.memory_space<vmem>>, vector<2x32xf32>
    tpu.vector_store %arg9[%c0_177, %c1152], %384 {strides = array<i32>} : memref<2x2048xf32, #tpu.memory_space<vmem>>, vector<2x32xf32>,
    %386 = vector.extract_strided_slice %274 {offsets = [0, 37, 0], sizes = [2, 1, 32], strides = [1, 1, 1]} : vector<2x64x32xf32> to vector<2x1x32xf32>
    %387 = vector.shape_cast %386 : vector<2x1x32xf32> to vector<2x32xf32>
    %c0_178 = arith.constant 0 : index
    %c1184 = arith.constant 1184 : index
    %388 = vector.load %arg9[%c0_178, %c1184] : memref<2x2048xf32, #tpu.memory_space<vmem>>, vector<2x32xf32>
    tpu.vector_store %arg9[%c0_178, %c1184], %387 {strides = array<i32>} : memref<2x2048xf32, #tpu.memory_space<vmem>>, vector<2x32xf32>,
    %389 = vector.extract_strided_slice %274 {offsets = [0, 38, 0], sizes = [2, 1, 32], strides = [1, 1, 1]} : vector<2x64x32xf32> to vector<2x1x32xf32>
    %390 = vector.shape_cast %389 : vector<2x1x32xf32> to vector<2x32xf32>
    %c0_179 = arith.constant 0 : index
    %c1216 = arith.constant 1216 : index
    %391 = vector.load %arg9[%c0_179, %c1216] : memref<2x2048xf32, #tpu.memory_space<vmem>>, vector<2x32xf32>
    tpu.vector_store %arg9[%c0_179, %c1216], %390 {strides = array<i32>} : memref<2x2048xf32, #tpu.memory_space<vmem>>, vector<2x32xf32>,
    %392 = vector.extract_strided_slice %274 {offsets = [0, 39, 0], sizes = [2, 1, 32], strides = [1, 1, 1]} : vector<2x64x32xf32> to vector<2x1x32xf32>
    %393 = vector.shape_cast %392 : vector<2x1x32xf32> to vector<2x32xf32>
    %c0_180 = arith.constant 0 : index
    %c1248 = arith.constant 1248 : index
    %394 = vector.load %arg9[%c0_180, %c1248] : memref<2x2048xf32, #tpu.memory_space<vmem>>, vector<2x32xf32>
    tpu.vector_store %arg9[%c0_180, %c1248], %393 {strides = array<i32>} : memref<2x2048xf32, #tpu.memory_space<vmem>>, vector<2x32xf32>,
    %395 = vector.extract_strided_slice %274 {offsets = [0, 40, 0], sizes = [2, 1, 32], strides = [1, 1, 1]} : vector<2x64x32xf32> to vector<2x1x32xf32>
    %396 = vector.shape_cast %395 : vector<2x1x32xf32> to vector<2x32xf32>
    %c0_181 = arith.constant 0 : index
    %c1280 = arith.constant 1280 : index
    %397 = vector.load %arg9[%c0_181, %c1280] : memref<2x2048xf32, #tpu.memory_space<vmem>>, vector<2x32xf32>
    tpu.vector_store %arg9[%c0_181, %c1280], %396 {strides = array<i32>} : memref<2x2048xf32, #tpu.memory_space<vmem>>, vector<2x32xf32>,
    %398 = vector.extract_strided_slice %274 {offsets = [0, 41, 0], sizes = [2, 1, 32], strides = [1, 1, 1]} : vector<2x64x32xf32> to vector<2x1x32xf32>
    %399 = vector.shape_cast %398 : vector<2x1x32xf32> to vector<2x32xf32>
    %c0_182 = arith.constant 0 : index
    %c1312 = arith.constant 1312 : index
    %400 = vector.load %arg9[%c0_182, %c1312] : memref<2x2048xf32, #tpu.memory_space<vmem>>, vector<2x32xf32>
    tpu.vector_store %arg9[%c0_182, %c1312], %399 {strides = array<i32>} : memref<2x2048xf32, #tpu.memory_space<vmem>>, vector<2x32xf32>,
    %401 = vector.extract_strided_slice %274 {offsets = [0, 42, 0], sizes = [2, 1, 32], strides = [1, 1, 1]} : vector<2x64x32xf32> to vector<2x1x32xf32>
    %402 = vector.shape_cast %401 : vector<2x1x32xf32> to vector<2x32xf32>
    %c0_183 = arith.constant 0 : index
    %c1344 = arith.constant 1344 : index
    %403 = vector.load %arg9[%c0_183, %c1344] : memref<2x2048xf32, #tpu.memory_space<vmem>>, vector<2x32xf32>
    tpu.vector_store %arg9[%c0_183, %c1344], %402 {strides = array<i32>} : memref<2x2048xf32, #tpu.memory_space<vmem>>, vector<2x32xf32>,
    %404 = vector.extract_strided_slice %274 {offsets = [0, 43, 0], sizes = [2, 1, 32], strides = [1, 1, 1]} : vector<2x64x32xf32> to vector<2x1x32xf32>
    %405 = vector.shape_cast %404 : vector<2x1x32xf32> to vector<2x32xf32>
    %c0_184 = arith.constant 0 : index
    %c1376 = arith.constant 1376 : index
    %406 = vector.load %arg9[%c0_184, %c1376] : memref<2x2048xf32, #tpu.memory_space<vmem>>, vector<2x32xf32>
    tpu.vector_store %arg9[%c0_184, %c1376], %405 {strides = array<i32>} : memref<2x2048xf32, #tpu.memory_space<vmem>>, vector<2x32xf32>,
    %407 = vector.extract_strided_slice %274 {offsets = [0, 44, 0], sizes = [2, 1, 32], strides = [1, 1, 1]} : vector<2x64x32xf32> to vector<2x1x32xf32>
    %408 = vector.shape_cast %407 : vector<2x1x32xf32> to vector<2x32xf32>
    %c0_185 = arith.constant 0 : index
    %c1408 = arith.constant 1408 : index
    %409 = vector.load %arg9[%c0_185, %c1408] : memref<2x2048xf32, #tpu.memory_space<vmem>>, vector<2x32xf32>
    tpu.vector_store %arg9[%c0_185, %c1408], %408 {strides = array<i32>} : memref<2x2048xf32, #tpu.memory_space<vmem>>, vector<2x32xf32>,
    %410 = vector.extract_strided_slice %274 {offsets = [0, 45, 0], sizes = [2, 1, 32], strides = [1, 1, 1]} : vector<2x64x32xf32> to vector<2x1x32xf32>
    %411 = vector.shape_cast %410 : vector<2x1x32xf32> to vector<2x32xf32>
    %c0_186 = arith.constant 0 : index
    %c1440 = arith.constant 1440 : index
    %412 = vector.load %arg9[%c0_186, %c1440] : memref<2x2048xf32, #tpu.memory_space<vmem>>, vector<2x32xf32>
    tpu.vector_store %arg9[%c0_186, %c1440], %411 {strides = array<i32>} : memref<2x2048xf32, #tpu.memory_space<vmem>>, vector<2x32xf32>,
    %413 = vector.extract_strided_slice %274 {offsets = [0, 46, 0], sizes = [2, 1, 32], strides = [1, 1, 1]} : vector<2x64x32xf32> to vector<2x1x32xf32>
    %414 = vector.shape_cast %413 : vector<2x1x32xf32> to vector<2x32xf32>
    %c0_187 = arith.constant 0 : index
    %c1472 = arith.constant 1472 : index
    %415 = vector.load %arg9[%c0_187, %c1472] : memref<2x2048xf32, #tpu.memory_space<vmem>>, vector<2x32xf32>
    tpu.vector_store %arg9[%c0_187, %c1472], %414 {strides = array<i32>} : memref<2x2048xf32, #tpu.memory_space<vmem>>, vector<2x32xf32>,
    %416 = vector.extract_strided_slice %274 {offsets = [0, 47, 0], sizes = [2, 1, 32], strides = [1, 1, 1]} : vector<2x64x32xf32> to vector<2x1x32xf32>
    %417 = vector.shape_cast %416 : vector<2x1x32xf32> to vector<2x32xf32>
    %c0_188 = arith.constant 0 : index
    %c1504 = arith.constant 1504 : index
    %418 = vector.load %arg9[%c0_188, %c1504] : memref<2x2048xf32, #tpu.memory_space<vmem>>, vector<2x32xf32>
    tpu.vector_store %arg9[%c0_188, %c1504], %417 {strides = array<i32>} : memref<2x2048xf32, #tpu.memory_space<vmem>>, vector<2x32xf32>,
    %419 = vector.extract_strided_slice %274 {offsets = [0, 48, 0], sizes = [2, 1, 32], strides = [1, 1, 1]} : vector<2x64x32xf32> to vector<2x1x32xf32>
    %420 = vector.shape_cast %419 : vector<2x1x32xf32> to vector<2x32xf32>
    %c0_189 = arith.constant 0 : index
    %c1536 = arith.constant 1536 : index
    %421 = vector.load %arg9[%c0_189, %c1536] : memref<2x2048xf32, #tpu.memory_space<vmem>>, vector<2x32xf32>
    tpu.vector_store %arg9[%c0_189, %c1536], %420 {strides = array<i32>} : memref<2x2048xf32, #tpu.memory_space<vmem>>, vector<2x32xf32>,
    %422 = vector.extract_strided_slice %274 {offsets = [0, 49, 0], sizes = [2, 1, 32], strides = [1, 1, 1]} : vector<2x64x32xf32> to vector<2x1x32xf32>
    %423 = vector.shape_cast %422 : vector<2x1x32xf32> to vector<2x32xf32>
    %c0_190 = arith.constant 0 : index
    %c1568 = arith.constant 1568 : index
    %424 = vector.load %arg9[%c0_190, %c1568] : memref<2x2048xf32, #tpu.memory_space<vmem>>, vector<2x32xf32>
    tpu.vector_store %arg9[%c0_190, %c1568], %423 {strides = array<i32>} : memref<2x2048xf32, #tpu.memory_space<vmem>>, vector<2x32xf32>,
    %425 = vector.extract_strided_slice %274 {offsets = [0, 50, 0], sizes = [2, 1, 32], strides = [1, 1, 1]} : vector<2x64x32xf32> to vector<2x1x32xf32>
    %426 = vector.shape_cast %425 : vector<2x1x32xf32> to vector<2x32xf32>
    %c0_191 = arith.constant 0 : index
    %c1600 = arith.constant 1600 : index
    %427 = vector.load %arg9[%c0_191, %c1600] : memref<2x2048xf32, #tpu.memory_space<vmem>>, vector<2x32xf32>
    tpu.vector_store %arg9[%c0_191, %c1600], %426 {strides = array<i32>} : memref<2x2048xf32, #tpu.memory_space<vmem>>, vector<2x32xf32>,
    %428 = vector.extract_strided_slice %274 {offsets = [0, 51, 0], sizes = [2, 1, 32], strides = [1, 1, 1]} : vector<2x64x32xf32> to vector<2x1x32xf32>
    %429 = vector.shape_cast %428 : vector<2x1x32xf32> to vector<2x32xf32>
    %c0_192 = arith.constant 0 : index
    %c1632 = arith.constant 1632 : index
    %430 = vector.load %arg9[%c0_192, %c1632] : memref<2x2048xf32, #tpu.memory_space<vmem>>, vector<2x32xf32>
    tpu.vector_store %arg9[%c0_192, %c1632], %429 {strides = array<i32>} : memref<2x2048xf32, #tpu.memory_space<vmem>>, vector<2x32xf32>,
    %431 = vector.extract_strided_slice %274 {offsets = [0, 52, 0], sizes = [2, 1, 32], strides = [1, 1, 1]} : vector<2x64x32xf32> to vector<2x1x32xf32>
    %432 = vector.shape_cast %431 : vector<2x1x32xf32> to vector<2x32xf32>
    %c0_193 = arith.constant 0 : index
    %c1664 = arith.constant 1664 : index
    %433 = vector.load %arg9[%c0_193, %c1664] : memref<2x2048xf32, #tpu.memory_space<vmem>>, vector<2x32xf32>
    tpu.vector_store %arg9[%c0_193, %c1664], %432 {strides = array<i32>} : memref<2x2048xf32, #tpu.memory_space<vmem>>, vector<2x32xf32>,
    %434 = vector.extract_strided_slice %274 {offsets = [0, 53, 0], sizes = [2, 1, 32], strides = [1, 1, 1]} : vector<2x64x32xf32> to vector<2x1x32xf32>
    %435 = vector.shape_cast %434 : vector<2x1x32xf32> to vector<2x32xf32>
    %c0_194 = arith.constant 0 : index
    %c1696 = arith.constant 1696 : index
    %436 = vector.load %arg9[%c0_194, %c1696] : memref<2x2048xf32, #tpu.memory_space<vmem>>, vector<2x32xf32>
    tpu.vector_store %arg9[%c0_194, %c1696], %435 {strides = array<i32>} : memref<2x2048xf32, #tpu.memory_space<vmem>>, vector<2x32xf32>,
    %437 = vector.extract_strided_slice %274 {offsets = [0, 54, 0], sizes = [2, 1, 32], strides = [1, 1, 1]} : vector<2x64x32xf32> to vector<2x1x32xf32>
    %438 = vector.shape_cast %437 : vector<2x1x32xf32> to vector<2x32xf32>
    %c0_195 = arith.constant 0 : index
    %c1728 = arith.constant 1728 : index
    %439 = vector.load %arg9[%c0_195, %c1728] : memref<2x2048xf32, #tpu.memory_space<vmem>>, vector<2x32xf32>
    tpu.vector_store %arg9[%c0_195, %c1728], %438 {strides = array<i32>} : memref<2x2048xf32, #tpu.memory_space<vmem>>, vector<2x32xf32>,
    %440 = vector.extract_strided_slice %274 {offsets = [0, 55, 0], sizes = [2, 1, 32], strides = [1, 1, 1]} : vector<2x64x32xf32> to vector<2x1x32xf32>
    %441 = vector.shape_cast %440 : vector<2x1x32xf32> to vector<2x32xf32>
    %c0_196 = arith.constant 0 : index
    %c1760 = arith.constant 1760 : index
    %442 = vector.load %arg9[%c0_196, %c1760] : memref<2x2048xf32, #tpu.memory_space<vmem>>, vector<2x32xf32>
    tpu.vector_store %arg9[%c0_196, %c1760], %441 {strides = array<i32>} : memref<2x2048xf32, #tpu.memory_space<vmem>>, vector<2x32xf32>,
    %443 = vector.extract_strided_slice %274 {offsets = [0, 56, 0], sizes = [2, 1, 32], strides = [1, 1, 1]} : vector<2x64x32xf32> to vector<2x1x32xf32>
    %444 = vector.shape_cast %443 : vector<2x1x32xf32> to vector<2x32xf32>
    %c0_197 = arith.constant 0 : index
    %c1792 = arith.constant 1792 : index
    %445 = vector.load %arg9[%c0_197, %c1792] : memref<2x2048xf32, #tpu.memory_space<vmem>>, vector<2x32xf32>
    tpu.vector_store %arg9[%c0_197, %c1792], %444 {strides = array<i32>} : memref<2x2048xf32, #tpu.memory_space<vmem>>, vector<2x32xf32>,
    %446 = vector.extract_strided_slice %274 {offsets = [0, 57, 0], sizes = [2, 1, 32], strides = [1, 1, 1]} : vector<2x64x32xf32> to vector<2x1x32xf32>
    %447 = vector.shape_cast %446 : vector<2x1x32xf32> to vector<2x32xf32>
    %c0_198 = arith.constant 0 : index
    %c1824 = arith.constant 1824 : index
    %448 = vector.load %arg9[%c0_198, %c1824] : memref<2x2048xf32, #tpu.memory_space<vmem>>, vector<2x32xf32>
    tpu.vector_store %arg9[%c0_198, %c1824], %447 {strides = array<i32>} : memref<2x2048xf32, #tpu.memory_space<vmem>>, vector<2x32xf32>,
    %449 = vector.extract_strided_slice %274 {offsets = [0, 58, 0], sizes = [2, 1, 32], strides = [1, 1, 1]} : vector<2x64x32xf32> to vector<2x1x32xf32>
    %450 = vector.shape_cast %449 : vector<2x1x32xf32> to vector<2x32xf32>
    %c0_199 = arith.constant 0 : index
    %c1856 = arith.constant 1856 : index
    %451 = vector.load %arg9[%c0_199, %c1856] : memref<2x2048xf32, #tpu.memory_space<vmem>>, vector<2x32xf32>
    tpu.vector_store %arg9[%c0_199, %c1856], %450 {strides = array<i32>} : memref<2x2048xf32, #tpu.memory_space<vmem>>, vector<2x32xf32>,
    %452 = vector.extract_strided_slice %274 {offsets = [0, 59, 0], sizes = [2, 1, 32], strides = [1, 1, 1]} : vector<2x64x32xf32> to vector<2x1x32xf32>
    %453 = vector.shape_cast %452 : vector<2x1x32xf32> to vector<2x32xf32>
    %c0_200 = arith.constant 0 : index
    %c1888 = arith.constant 1888 : index
    %454 = vector.load %arg9[%c0_200, %c1888] : memref<2x2048xf32, #tpu.memory_space<vmem>>, vector<2x32xf32>
    tpu.vector_store %arg9[%c0_200, %c1888], %453 {strides = array<i32>} : memref<2x2048xf32, #tpu.memory_space<vmem>>, vector<2x32xf32>,
    %455 = vector.extract_strided_slice %274 {offsets = [0, 60, 0], sizes = [2, 1, 32], strides = [1, 1, 1]} : vector<2x64x32xf32> to vector<2x1x32xf32>
    %456 = vector.shape_cast %455 : vector<2x1x32xf32> to vector<2x32xf32>
    %c0_201 = arith.constant 0 : index
    %c1920 = arith.constant 1920 : index
    %457 = vector.load %arg9[%c0_201, %c1920] : memref<2x2048xf32, #tpu.memory_space<vmem>>, vector<2x32xf32>
    tpu.vector_store %arg9[%c0_201, %c1920], %456 {strides = array<i32>} : memref<2x2048xf32, #tpu.memory_space<vmem>>, vector<2x32xf32>,
    %458 = vector.extract_strided_slice %274 {offsets = [0, 61, 0], sizes = [2, 1, 32], strides = [1, 1, 1]} : vector<2x64x32xf32> to vector<2x1x32xf32>
    %459 = vector.shape_cast %458 : vector<2x1x32xf32> to vector<2x32xf32>
    %c0_202 = arith.constant 0 : index
    %c1952 = arith.constant 1952 : index
    %460 = vector.load %arg9[%c0_202, %c1952] : memref<2x2048xf32, #tpu.memory_space<vmem>>, vector<2x32xf32>
    tpu.vector_store %arg9[%c0_202, %c1952], %459 {strides = array<i32>} : memref<2x2048xf32, #tpu.memory_space<vmem>>, vector<2x32xf32>,
    %461 = vector.extract_strided_slice %274 {offsets = [0, 62, 0], sizes = [2, 1, 32], strides = [1, 1, 1]} : vector<2x64x32xf32> to vector<2x1x32xf32>
    %462 = vector.shape_cast %461 : vector<2x1x32xf32> to vector<2x32xf32>
    %c0_203 = arith.constant 0 : index
    %c1984 = arith.constant 1984 : index
    %463 = vector.load %arg9[%c0_203, %c1984] : memref<2x2048xf32, #tpu.memory_space<vmem>>, vector<2x32xf32>
    tpu.vector_store %arg9[%c0_203, %c1984], %462 {strides = array<i32>} : memref<2x2048xf32, #tpu.memory_space<vmem>>, vector<2x32xf32>,
    %464 = vector.extract_strided_slice %274 {offsets = [0, 63, 0], sizes = [2, 1, 32], strides = [1, 1, 1]} : vector<2x64x32xf32> to vector<2x1x32xf32>
    %465 = vector.shape_cast %464 : vector<2x1x32xf32> to vector<2x32xf32>
    %c0_204 = arith.constant 0 : index
    %c2016 = arith.constant 2016 : index
    %466 = vector.load %arg9[%c0_204, %c2016] : memref<2x2048xf32, #tpu.memory_space<vmem>>, vector<2x32xf32>
    tpu.vector_store %arg9[%c0_204, %c2016], %465 {strides = array<i32>} : memref<2x2048xf32, #tpu.memory_space<vmem>>, vector<2x32xf32>,
    tpu.wait_dma2 semaphore(%arg11 : memref<!tpu.dma_semaphore, #tpu.memory_space<semaphore_mem>>) src(%arg3 : memref<2048x64xf32, #tpu.memory_space<any>>) dst(%arg10 : memref<2048x64xf32, #tpu.memory_space<vmem>>)
    %c0_205 = arith.constant 0 : index
    %c0_206 = arith.constant 0 : index
    %467 = vector.load %arg9[%c0_205, %c0_206] : memref<2x2048xf32, #tpu.memory_space<vmem>>, vector<2x2048xf32>
    %c0_207 = arith.constant 0 : index
    %c0_208 = arith.constant 0 : index
    %468 = vector.load %arg10[%c0_207, %c0_208] : memref<2048x64xf32, #tpu.memory_space<vmem>>, vector<2048x64xf32>
    %cst_209 = arith.constant dense<0.000000e+00> : vector<2x64xf32>
    %469 = tpu.matmul %467, %468, %cst_209 {dimension_numbers = #tpu.dot_dimension_numbers<[1], [0], [0], [1], [0, 0, 1, 1], [], []>} : vector<2x2048xf32>, vector<2048x64xf32>, vector<2x64xf32> -> vector<2x64xf32>
    %c0_210 = arith.constant 0 : index
    %c0_211 = arith.constant 0 : index
    %470 = vector.load %arg4[%c0_210, %c0_211] : memref<1x64xf32, #tpu.memory_space<vmem>>, vector<1x64xf32>
    %471 = vector.broadcast %470 : vector<1x64xf32> to vector<2x64xf32>
    %472 = arith.addf %469, %471 : vector<2x64xf32>
    %cst_212 = arith.constant 0.000000e+00 : f32
    %473 = vector.broadcast %cst_212 : f32 to vector<2x64xf32>
    %474 = arith.maximumf %472, %473 : vector<2x64xf32>
    %c0_213 = arith.constant 0 : index
    %c0_214 = arith.constant 0 : index
    %475 = vector.load %arg5[%c0_213, %c0_214] : memref<64x65xf32, #tpu.memory_space<vmem>>, vector<64x65xf32>
    %cst_215 = arith.constant dense<0.000000e+00> : vector<2x65xf32>
    %476 = tpu.matmul %474, %475, %cst_215 {dimension_numbers = #tpu.dot_dimension_numbers<[1], [0], [0], [1], [0, 0, 1, 1], [], []>} : vector<2x64xf32>, vector<64x65xf32>, vector<2x65xf32> -> vector<2x65xf32>
    %c0_216 = arith.constant 0 : index
    %c0_217 = arith.constant 0 : index
    %477 = vector.load %arg6[%c0_216, %c0_217] : memref<1x65xf32, #tpu.memory_space<vmem>>, vector<1x65xf32>
    %478 = vector.broadcast %477 : vector<1x65xf32> to vector<2x65xf32>
    %479 = arith.addf %476, %478 : vector<2x65xf32>
    %c0_218 = arith.constant 0 : index
    %c0_219 = arith.constant 0 : index
    %480 = vector.load %arg7[%c0_218, %c0_219] : memref<2x65xf32, #tpu.memory_space<vmem>>, vector<2x65xf32>
    tpu.vector_store %arg7[%c0_218, %c0_219], %479 {strides = array<i32>} : memref<2x65xf32, #tpu.memory_space<vmem>>, vector<2x65xf32>,
    return
  }
}

</mosaic_0001>

<bundles_post_ra>
// kernel: gocnn_forward.1
= control target key start
LH: loop header
LB: loop body
LE: loop exit
PB: predicated region body
PF: predicated region fallthrough
CT: control target
= control target key end

     0   :  { %12 = vsyncpa [#allocation7], 0  ;;  %s17772_s0 = inlined_call_operand.vmem [shape: f32[2,8,8,32], index: 0, kind: input, shape index: {}]   ;;  %s17773_s1 = inlined_call_operand.vmem [shape: f32[4,9,32,32], index: 1, kind: input, shape index: {}]   ;;  %s17774_s2 = inlined_call_operand.vmem [shape: f32[4,1,32], index: 2, kind: input, shape index: {}]   ;;  %s17775_s3 = inlined_call_operand.vmem [shape: f32[2048,64], index: 3, kind: input, shape index: {}]   ;;  %s17776_s4 = inlined_call_operand.vmem [shape: f32[1,64], index: 4, kind: input, shape index: {}]   ;;  %s17777_s5 = inlined_call_operand.vmem [shape: f32[64,65], index: 5, kind: input, shape index: {}]   ;;  %s17778_s6 = inlined_call_operand.vmem [shape: f32[1,65], index: 6, kind: input, shape index: {}]   ;;  %s17779_s7 = inlined_call_operand.hbm [shape: f32[2,65], index: 7, kind: output, shape index: {}]  }
   0x1   :  { %v12610_v0 = vld [vmem:[%s17775_s3] sm:$0xff]  ;;  %v12615_v1 = vld [vmem:[%s17775_s3 + $0x8] sm:$0xff]  ;;  %v12620_v2 = vld [vmem:[%s17775_s3 + $0x10] sm:$0xff] }
   0x2   :  { %17794 = vst [vmem:[#allocation11_spill] sm:$0xff] %v12610_v0  ;;  %17795 = vst [vmem:[#allocation12_spill] sm:$0xff] %v12615_v1  ;;  %v12625_v3 = vld [vmem:[%s17775_s3 + $0x18] sm:$0xff]  ;;  %v12630_v4 = vld [vmem:[%s17775_s3 + $0x20] sm:$0xff] }
   0x3   :  { %17796 = vst [vmem:[#allocation13_spill] sm:$0xff] %v12620_v2  ;;  %17797 = vst [vmem:[#allocation14_spill] sm:$0xff] %v12625_v3  ;;  %v12635_v5 = vld [vmem:[%s17775_s3 + $0x28] sm:$0xff]  ;;  %v12640_v6 = vld [vmem:[%s17775_s3 + $0x30] sm:$0xff] }
   0x4   :  { %17798 = vst [vmem:[#allocation15_spill] sm:$0xff] %v12630_v4  ;;  %17799 = vst [vmem:[#allocation16_spill] sm:$0xff] %v12635_v5  ;;  %v12645_v7 = vld [vmem:[%s17775_s3 + $0x38] sm:$0xff]  ;;  %v12650_v8 = vld [vmem:[%s17775_s3 + $0x40] sm:$0xff] }
   0x5   :  { %17800 = vst [vmem:[#allocation17_spill] sm:$0xff] %v12640_v6  ;;  %17801 = vst [vmem:[#allocation18_spill] sm:$0xff] %v12645_v7  ;;  %v12655_v9 = vld [vmem:[%s17775_s3 + $0x48] sm:$0xff]  ;;  %v12660_v10 = vld [vmem:[%s17775_s3 + $0x50] sm:$0xff] }
   0x6   :  { %17802 = vst [vmem:[#allocation19_spill] sm:$0xff] %v12650_v8  ;;  %17803 = vst [vmem:[#allocation20_spill] sm:$0xff] %v12655_v9  ;;  %v12665_v11 = vld [vmem:[%s17775_s3 + $0x58] sm:$0xff]  ;;  %v12670_v12 = vld [vmem:[%s17775_s3 + $0x60] sm:$0xff] }
   0x7   :  { %17804 = vst [vmem:[#allocation21_spill] sm:$0xff] %v12660_v10  ;;  %17805 = vst [vmem:[#allocation22_spill] sm:$0xff] %v12665_v11  ;;  %v12675_v13 = vld [vmem:[%s17775_s3 + $0x68] sm:$0xff]  ;;  %v12680_v14 = vld [vmem:[%s17775_s3 + $0x70] sm:$0xff] }
   0x8   :  { %17806 = vst [vmem:[#allocation23_spill] sm:$0xff] %v12670_v12  ;;  %17807 = vst [vmem:[#allocation24_spill] sm:$0xff] %v12675_v13  ;;  %v12685_v15 = vld [vmem:[%s17775_s3 + $0x78] sm:$0xff]  ;;  %v12690_v16 = vld [vmem:[%s17775_s3 + $0x80] sm:$0xff] }
   0x9   :  { %17808 = vst [vmem:[#allocation25_spill] sm:$0xff] %v12680_v14  ;;  %17809 = vst [vmem:[#allocation26_spill] sm:$0xff] %v12685_v15  ;;  %v12695_v17 = vld [vmem:[%s17775_s3 + $0x88] sm:$0xff]  ;;  %v12700_v18 = vld [vmem:[%s17775_s3 + $0x90] sm:$0xff] }
   0xa   :  { %17810 = vst [vmem:[#allocation27_spill] sm:$0xff] %v12690_v16  ;;  %17811 = vst [vmem:[#allocation28_spill] sm:$0xff] %v12695_v17  ;;  %v12705_v19 = vld [vmem:[%s17775_s3 + $0x98] sm:$0xff]  ;;  %v12710_v20 = vld [vmem:[%s17775_s3 + $0xa0] sm:$0xff] }
   0xb   :  { %17812 = vst [vmem:[#allocation29_spill] sm:$0xff] %v12700_v18  ;;  %17813 = vst [vmem:[#allocation30_spill] sm:$0xff] %v12705_v19  ;;  %v12715_v21 = vld [vmem:[%s17775_s3 + $0xa8] sm:$0xff]  ;;  %v12720_v22 = vld [vmem:[%s17775_s3 + $0xb0] sm:$0xff] }
   0xc   :  { %17814 = vst [vmem:[#allocation31_spill] sm:$0xff] %v12710_v20  ;;  %17815 = vst [vmem:[#allocation32_spill] sm:$0xff] %v12715_v21  ;;  %v12725_v23 = vld [vmem:[%s17775_s3 + $0xb8] sm:$0xff]  ;;  %v12730_v24 = vld [vmem:[%s17775_s3 + $0xc0] sm:$0xff] }
   0xd   :  { %17816 = vst [vmem:[#allocation33_spill] sm:$0xff] %v12720_v22  ;;  %17817 = vst [vmem:[#allocation34_spill] sm:$0xff] %v12725_v23  ;;  %v12735_v25 = vld [vmem:[%s17775_s3 + $0xc8] sm:$0xff]  ;;  %v12740_v26 = vld [vmem:[%s17775_s3 + $0xd0] sm:$0xff] }
   0xe   :  { %17818 = vst [vmem:[#allocation35_spill] sm:$0xff] %v12730_v24  ;;  %17819 = vst [vmem:[#allocation36_spill] sm:$0xff] %v12735_v25  ;;  %v12745_v27 = vld [vmem:[%s17775_s3 + $0xd8] sm:$0xff]  ;;  %v12750_v28 = vld [vmem:[%s17775_s3 + $0xe0] sm:$0xff] }
   0xf   :  { %17820 = vst [vmem:[#allocation37_spill] sm:$0xff] %v12740_v26  ;;  %17821 = vst [vmem:[#allocation38_spill] sm:$0xff] %v12745_v27  ;;  %v12755_v29 = vld [vmem:[%s17775_s3 + $0xe8] sm:$0xff]  ;;  %v12760_v30 = vld [vmem:[%s17775_s3 + $0xf0] sm:$0xff] }
  0x10   :  { %17822 = vst [vmem:[#allocation39_spill] sm:$0xff] %v12750_v28  ;;  %17823 = vst [vmem:[#allocation40_spill] sm:$0xff] %v12755_v29  ;;  %v12765_v31 = vld [vmem:[%s17775_s3 + $0xf8] sm:$0xff]  ;;  %v12770_v32 = vld [vmem:[%s17775_s3 + $0x100] sm:$0xff] }
  0x11   :  { %17824 = vst [vmem:[#allocation41_spill] sm:$0xff] %v12760_v30  ;;  %17825 = vst [vmem:[#allocation42_spill] sm:$0xff] %v12765_v31  ;;  %v12775_v33 = vld [vmem:[%s17775_s3 + $0x108] sm:$0xff]  ;;  %v12780_v34 = vld [vmem:[%s17775_s3 + $0x110] sm:$0xff] }
  0x12   :  { %17826 = vst [vmem:[#allocation43_spill] sm:$0xff] %v12770_v32  ;;  %17827 = vst [vmem:[#allocation44_spill] sm:$0xff] %v12775_v33  ;;  %v12785_v35 = vld [vmem:[%s17775_s3 + $0x118] sm:$0xff]  ;;  %v12790_v36 = vld [vmem:[%s17775_s3 + $0x120] sm:$0xff] }
  0x13   :  { %17828 = vst [vmem:[#allocation45_spill] sm:$0xff] %v12780_v34  ;;  %17829 = vst [vmem:[#allocation46_spill] sm:$0xff] %v12785_v35  ;;  %v12795_v37 = vld [vmem:[%s17775_s3 + $0x128] sm:$0xff]  ;;  %v12800_v38 = vld [vmem:[%s17775_s3 + $0x130] sm:$0xff] }
  0x14   :  { %17830 = vst [vmem:[#allocation47_spill] sm:$0xff] %v12790_v36  ;;  %17831 = vst [vmem:[#allocation48_spill] sm:$0xff] %v12795_v37  ;;  %v12805_v39 = vld [vmem:[%s17775_s3 + $0x138] sm:$0xff]  ;;  %v12810_v40 = vld [vmem:[%s17775_s3 + $0x140] sm:$0xff] }
  0x15   :  { %17832 = vst [vmem:[#allocation49_spill] sm:$0xff] %v12800_v38  ;;  %17833 = vst [vmem:[#allocation50_spill] sm:$0xff] %v12805_v39  ;;  %v12815_v41 = vld [vmem:[%s17775_s3 + $0x148] sm:$0xff]  ;;  %v12820_v42 = vld [vmem:[%s17775_s3 + $0x150] sm:$0xff] }
  0x16   :  { %17834 = vst [vmem:[#allocation51_spill] sm:$0xff] %v12810_v40  ;;  %17835 = vst [vmem:[#allocation52_spill] sm:$0xff] %v12815_v41  ;;  %v12825_v43 = vld [vmem:[%s17775_s3 + $0x158] sm:$0xff]  ;;  %v12830_v44 = vld [vmem:[%s17775_s3 + $0x160] sm:$0xff] }
  0x17   :  { %17836 = vst [vmem:[#allocation53_spill] sm:$0xff] %v12820_v42  ;;  %17837 = vst [vmem:[#allocation54_spill] sm:$0xff] %v12825_v43  ;;  %v12835_v45 = vld [vmem:[%s17775_s3 + $0x168] sm:$0xff]  ;;  %v12840_v46 = vld [vmem:[%s17775_s3 + $0x170] sm:$0xff] }
  0x18   :  { %17838 = vst [vmem:[#allocation55_spill] sm:$0xff] %v12830_v44  ;;  %17839 = vst [vmem:[#allocation56_spill] sm:$0xff] %v12835_v45  ;;  %v12845_v47 = vld [vmem:[%s17775_s3 + $0x178] sm:$0xff]  ;;  %v12850_v48 = vld [vmem:[%s17775_s3 + $0x180] sm:$0xff] }
  0x19   :  { %17840 = vst [vmem:[#allocation57_spill] sm:$0xff] %v12840_v46  ;;  %17841 = vst [vmem:[#allocation58_spill] sm:$0xff] %v12845_v47  ;;  %v12855_v49 = vld [vmem:[%s17775_s3 + $0x188] sm:$0xff]  ;;  %v12860_v50 = vld [vmem:[%s17775_s3 + $0x190] sm:$0xff] }
  0x1a   :  { %17842 = vst [vmem:[#allocation59_spill] sm:$0xff] %v12850_v48  ;;  %17843 = vst [vmem:[#allocation60_spill] sm:$0xff] %v12855_v49  ;;  %v12865_v51 = vld [vmem:[%s17775_s3 + $0x198] sm:$0xff]  ;;  %v12870_v52 = vld [vmem:[%s17775_s3 + $0x1a0] sm:$0xff] }
  0x1b   :  { %17844 = vst [vmem:[#allocation61_spill] sm:$0xff] %v12860_v50  ;;  %17845 = vst [vmem:[#allocation62_spill] sm:$0xff] %v12865_v51  ;;  %v12875_v53 = vld [vmem:[%s17775_s3 + $0x1a8] sm:$0xff]  ;;  %v12880_v54 = vld [vmem:[%s17775_s3 + $0x1b0] sm:$0xff] }
  0x1c   :  { %17846 = vst [vmem:[#allocation63_spill] sm:$0xff] %v12870_v52  ;;  %17847 = vst [vmem:[#allocation64_spill] sm:$0xff] %v12875_v53  ;;  %v12885_v55 = vld [vmem:[%s17775_s3 + $0x1b8] sm:$0xff]  ;;  %v12890_v56 = vld [vmem:[%s17775_s3 + $0x1c0] sm:$0xff] }
  0x1d   :  { %17848 = vst [vmem:[#allocation65_spill] sm:$0xff] %v12880_v54  ;;  %17849 = vst [vmem:[#allocation66_spill] sm:$0xff] %v12885_v55  ;;  %v12895_v57 = vld [vmem:[%s17775_s3 + $0x1c8] sm:$0xff]  ;;  %v12900_v58 = vld [vmem:[%s17775_s3 + $0x1d0] sm:$0xff] }
  0x1e   :  { %17850 = vst [vmem:[#allocation67_spill] sm:$0xff] %v12890_v56  ;;  %17851 = vst [vmem:[#allocation68_spill] sm:$0xff] %v12895_v57  ;;  %v12905_v59 = vld [vmem:[%s17775_s3 + $0x1d8] sm:$0xff]  ;;  %v12910_v60 = vld [vmem:[%s17775_s3 + $0x1e0] sm:$0xff] }
  0x1f   :  { %17852 = vst [vmem:[#allocation69_spill] sm:$0xff] %v12900_v58  ;;  %17853 = vst [vmem:[#allocation70_spill] sm:$0xff] %v12905_v59  ;;  %v12915_v61 = vld [vmem:[%s17775_s3 + $0x1e8] sm:$0xff]  ;;  %v12920_v62 = vld [vmem:[%s17775_s3 + $0x1f0] sm:$0xff] }
  0x20   :  { %17854 = vst [vmem:[#allocation71_spill] sm:$0xff] %v12910_v60  ;;  %17855 = vst [vmem:[#allocation72_spill] sm:$0xff] %v12915_v61  ;;  %v12925_v63 = vld [vmem:[%s17775_s3 + $0x1f8] sm:$0xff]  ;;  %v12930_v32 = vld [vmem:[%s17775_s3 + $0x200] sm:$0xff] }
  0x21   :  { %17856 = vst [vmem:[#allocation73_spill] sm:$0xff] %v12920_v62  ;;  %17857 = vst [vmem:[#allocation74_spill] sm:$0xff] %v12925_v63  ;;  %v12935_v0 = vld [vmem:[%s17775_s3 + $0x208] sm:$0xff]  ;;  %v12940_v48 = vld [vmem:[%s17775_s3 + $0x210] sm:$0xff] }
  0x22   :  { %17858 = vst [vmem:[#allocation75_spill] sm:$0xff] %v12930_v32  ;;  %17859 = vst [vmem:[#allocation76_spill] sm:$0xff] %v12935_v0  ;;  %v12945_v16 = vld [vmem:[%s17775_s3 + $0x218] sm:$0xff]  ;;  %v12950_v33 = vld [vmem:[%s17775_s3 + $0x220] sm:$0xff] }
  0x23   :  { %17860 = vst [vmem:[#allocation77_spill] sm:$0xff] %v12940_v48  ;;  %17861 = vst [vmem:[#allocation78_spill] sm:$0xff] %v12945_v16  ;;  %v12955_v32 = vld [vmem:[%s17775_s3 + $0x228] sm:$0xff]  ;;  %v12960_v0 = vld [vmem:[%s17775_s3 + $0x230] sm:$0xff] }
  0x24   :  { %17862 = vst [vmem:[#allocation79_spill] sm:$0xff] %v12950_v33  ;;  %17863 = vst [vmem:[#allocation80_spill] sm:$0xff] %v12955_v32  ;;  %v12965_v48 = vld [vmem:[%s17775_s3 + $0x238] sm:$0xff]  ;;  %v12970_v16 = vld [vmem:[%s17775_s3 + $0x240] sm:$0xff] }
  0x25   :  { %17864 = vst [vmem:[#allocation81_spill] sm:$0xff] %v12960_v0  ;;  %17865 = vst [vmem:[#allocation82_spill] sm:$0xff] %v12965_v48  ;;  %v12975_v33 = vld [vmem:[%s17775_s3 + $0x248] sm:$0xff]  ;;  %v12980_v32 = vld [vmem:[%s17775_s3 + $0x250] sm:$0xff] }
  0x26   :  { %17866 = vst [vmem:[#allocation83_spill] sm:$0xff] %v12970_v16  ;;  %17867 = vst [vmem:[#allocation84_spill] sm:$0xff] %v12975_v33  ;;  %v12985_v0 = vld [vmem:[%s17775_s3 + $0x258] sm:$0xff]  ;;  %v12990_v48 = vld [vmem:[%s17775_s3 + $0x260] sm:$0xff] }
  0x27   :  { %17868 = vst [vmem:[#allocation85_spill] sm:$0xff] %v12980_v32  ;;  %17869 = vst [vmem:[#allocation86_spill] sm:$0xff] %v12985_v0  ;;  %v12995_v16 = vld [vmem:[%s17775_s3 + $0x268] sm:$0xff]  ;;  %v13000_v33 = vld [vmem:[%s17775_s3 + $0x270] sm:$0xff] }
  0x28   :  { %17870 = vst [vmem:[#allocation87_spill] sm:$0xff] %v12990_v48  ;;  %17871 = vst [vmem:[#allocation88_spill] sm:$0xff] %v12995_v16  ;;  %v13005_v32 = vld [vmem:[%s17775_s3 + $0x278] sm:$0xff]  ;;  %v13010_v0 = vld [vmem:[%s17775_s3 + $0x280] sm:$0xff] }
  0x29   :  { %17872 = vst [vmem:[#allocation89_spill] sm:$0xff] %v13000_v33  ;;  %17873 = vst [vmem:[#allocation90_spill] sm:$0xff] %v13005_v32  ;;  %v13015_v48 = vld [vmem:[%s17775_s3 + $0x288] sm:$0xff]  ;;  %v13020_v16 = vld [vmem:[%s17775_s3 + $0x290] sm:$0xff] }
  0x2a   :  { %17874 = vst [vmem:[#allocation91_spill] sm:$0xff] %v13010_v0  ;;  %17875 = vst [vmem:[#allocation92_spill] sm:$0xff] %v13015_v48  ;;  %v13025_v33 = vld [vmem:[%s17775_s3 + $0x298] sm:$0xff]  ;;  %v13030_v32 = vld [vmem:[%s17775_s3 + $0x2a0] sm:$0xff] }
  0x2b   :  { %17876 = vst [vmem:[#allocation93_spill] sm:$0xff] %v13020_v16  ;;  %17877 = vst [vmem:[#allocation94_spill] sm:$0xff] %v13025_v33  ;;  %v13035_v0 = vld [vmem:[%s17775_s3 + $0x2a8] sm:$0xff]  ;;  %v13040_v48 = vld [vmem:[%s17775_s3 + $0x2b0] sm:$0xff] }
  0x2c   :  { %17878 = vst [vmem:[#allocation95_spill] sm:$0xff] %v13030_v32  ;;  %17879 = vst [vmem:[#allocation96_spill] sm:$0xff] %v13035_v0  ;;  %v13045_v16 = vld [vmem:[%s17775_s3 + $0x2b8] sm:$0xff]  ;;  %v13050_v33 = vld [vmem:[%s17775_s3 + $0x2c0] sm:$0xff] }
  0x2d   :  { %17880 = vst [vmem:[#allocation97_spill] sm:$0xff] %v13040_v48  ;;  %17881 = vst [vmem:[#allocation98_spill] sm:$0xff] %v13045_v16  ;;  %v13055_v32 = vld [vmem:[%s17775_s3 + $0x2c8] sm:$0xff]  ;;  %v13060_v0 = vld [vmem:[%s17775_s3 + $0x2d0] sm:$0xff] }
  0x2e   :  { %17882 = vst [vmem:[#allocation99_spill] sm:$0xff] %v13050_v33  ;;  %17883 = vst [vmem:[#allocation100_spill] sm:$0xff] %v13055_v32  ;;  %v13065_v48 = vld [vmem:[%s17775_s3 + $0x2d8] sm:$0xff]  ;;  %v13070_v16 = vld [vmem:[%s17775_s3 + $0x2e0] sm:$0xff] }
  0x2f   :  { %17884 = vst [vmem:[#allocation101_spill] sm:$0xff] %v13060_v0  ;;  %17885 = vst [vmem:[#allocation102_spill] sm:$0xff] %v13065_v48  ;;  %v13075_v33 = vld [vmem:[%s17775_s3 + $0x2e8] sm:$0xff]  ;;  %v13080_v32 = vld [vmem:[%s17775_s3 + $0x2f0] sm:$0xff] }
  0x30   :  { %17886 = vst [vmem:[#allocation103_spill] sm:$0xff] %v13070_v16  ;;  %17887 = vst [vmem:[#allocation104_spill] sm:$0xff] %v13075_v33  ;;  %v13085_v0 = vld [vmem:[%s17775_s3 + $0x2f8] sm:$0xff]  ;;  %v13090_v48 = vld [vmem:[%s17775_s3 + $0x300] sm:$0xff] }
  0x31   :  { %17888 = vst [vmem:[#allocation105_spill] sm:$0xff] %v13080_v32  ;;  %17889 = vst [vmem:[#allocation106_spill] sm:$0xff] %v13085_v0  ;;  %v13095_v16 = vld [vmem:[%s17775_s3 + $0x308] sm:$0xff]  ;;  %v13100_v33 = vld [vmem:[%s17775_s3 + $0x310] sm:$0xff] }
  0x32   :  { %17890 = vst [vmem:[#allocation107_spill] sm:$0xff] %v13090_v48  ;;  %17891 = vst [vmem:[#allocation108_spill] sm:$0xff] %v13095_v16  ;;  %v13105_v32 = vld [vmem:[%s17775_s3 + $0x318] sm:$0xff]  ;;  %v13110_v0 = vld [vmem:[%s17775_s3 + $0x320] sm:$0xff] }
  0x33   :  { %17892 = vst [vmem:[#allocation109_spill] sm:$0xff] %v13100_v33  ;;  %17893 = vst [vmem:[#allocation110_spill] sm:$0xff] %v13105_v32  ;;  %v13115_v48 = vld [vmem:[%s17775_s3 + $0x328] sm:$0xff]  ;;  %v13120_v16 = vld [vmem:[%s17775_s3 + $0x330] sm:$0xff] }
  0x34   :  { %17894 = vst [vmem:[#allocation111_spill] sm:$0xff] %v13110_v0  ;;  %17895 = vst [vmem:[#allocation112_spill] sm:$0xff] %v13115_v48  ;;  %v13125_v33 = vld [vmem:[%s17775_s3 + $0x338] sm:$0xff]  ;;  %v13130_v32 = vld [vmem:[%s17775_s3 + $0x340] sm:$0xff] }
  0x35   :  { %17896 = vst [vmem:[#allocation113_spill] sm:$0xff] %v13120_v16  ;;  %17897 = vst [vmem:[#allocation114_spill] sm:$0xff] %v13125_v33  ;;  %v13135_v0 = vld [vmem:[%s17775_s3 + $0x348] sm:$0xff]  ;;  %v13140_v48 = vld [vmem:[%s17775_s3 + $0x350] sm:$0xff] }
  0x36   :  { %17898 = vst [vmem:[#allocation115_spill] sm:$0xff] %v13130_v32  ;;  %17899 = vst [vmem:[#allocation116_spill] sm:$0xff] %v13135_v0  ;;  %v13145_v16 = vld [vmem:[%s17775_s3 + $0x358] sm:$0xff]  ;;  %v13150_v33 = vld [vmem:[%s17775_s3 + $0x360] sm:$0xff] }
  0x37   :  { %17900 = vst [vmem:[#allocation117_spill] sm:$0xff] %v13140_v48  ;;  %17901 = vst [vmem:[#allocation118_spill] sm:$0xff] %v13145_v16  ;;  %v13155_v32 = vld [vmem:[%s17775_s3 + $0x368] sm:$0xff]  ;;  %v13160_v0 = vld [vmem:[%s17775_s3 + $0x370] sm:$0xff] }
  0x38   :  { %17902 = vst [vmem:[#allocation119_spill] sm:$0xff] %v13150_v33  ;;  %17903 = vst [vmem:[#allocation120_spill] sm:$0xff] %v13155_v32  ;;  %v13165_v48 = vld [vmem:[%s17775_s3 + $0x378] sm:$0xff]  ;;  %v13170_v16 = vld [vmem:[%s17775_s3 + $0x380] sm:$0xff] }
  0x39   :  { %17904 = vst [vmem:[#allocation121_spill] sm:$0xff] %v13160_v0  ;;  %17905 = vst [vmem:[#allocation122_spill] sm:$0xff] %v13165_v48  ;;  %v13175_v33 = vld [vmem:[%s17775_s3 + $0x388] sm:$0xff]  ;;  %v13180_v32 = vld [vmem:[%s17775_s3 + $0x390] sm:$0xff] }
  0x3a   :  { %17906 = vst [vmem:[#allocation123_spill] sm:$0xff] %v13170_v16  ;;  %17907 = vst [vmem:[#allocation124_spill] sm:$0xff] %v13175_v33  ;;  %v13185_v0 = vld [vmem:[%s17775_s3 + $0x398] sm:$0xff]  ;;  %v13190_v48 = vld [vmem:[%s17775_s3 + $0x3a0] sm:$0xff] }
  0x3b   :  { %17908 = vst [vmem:[#allocation125_spill] sm:$0xff] %v13180_v32  ;;  %17909 = vst [vmem:[#allocation126_spill] sm:$0xff] %v13185_v0  ;;  %v13195_v16 = vld [vmem:[%s17775_s3 + $0x3a8] sm:$0xff]  ;;  %v13200_v33 = vld [vmem:[%s17775_s3 + $0x3b0] sm:$0xff] }
  0x3c   :  { %17910 = vst [vmem:[#allocation127_spill] sm:$0xff] %v13190_v48  ;;  %17911 = vst [vmem:[#allocation128_spill] sm:$0xff] %v13195_v16  ;;  %v13205_v32 = vld [vmem:[%s17775_s3 + $0x3b8] sm:$0xff]  ;;  %v13210_v0 = vld [vmem:[%s17775_s3 + $0x3c0] sm:$0xff] }
  0x3d   :  { %17912 = vst [vmem:[#allocation129_spill] sm:$0xff] %v13200_v33  ;;  %17913 = vst [vmem:[#allocation130_spill] sm:$0xff] %v13205_v32  ;;  %v13215_v48 = vld [vmem:[%s17775_s3 + $0x3c8] sm:$0xff]  ;;  %v13220_v16 = vld [vmem:[%s17775_s3 + $0x3d0] sm:$0xff] }
  0x3e   :  { %17914 = vst [vmem:[#allocation131_spill] sm:$0xff] %v13210_v0  ;;  %17915 = vst [vmem:[#allocation132_spill] sm:$0xff] %v13215_v48  ;;  %v13225_v33 = vld [vmem:[%s17775_s3 + $0x3d8] sm:$0xff]  ;;  %v13230_v32 = vld [vmem:[%s17775_s3 + $0x3e0] sm:$0xff] }
  0x3f   :  { %17916 = vst [vmem:[#allocation133_spill] sm:$0xff] %v13220_v16  ;;  %17917 = vst [vmem:[#allocation134_spill] sm:$0xff] %v13225_v33  ;;  %v13235_v0 = vld [vmem:[%s17775_s3 + $0x3e8] sm:$0xff]  ;;  %v13240_v48 = vld [vmem:[%s17775_s3 + $0x3f0] sm:$0xff] }
  0x40   :  { %17918 = vst [vmem:[#allocation135_spill] sm:$0xff] %v13230_v32  ;;  %17919 = vst [vmem:[#allocation136_spill] sm:$0xff] %v13235_v0  ;;  %v13245_v16 = vld [vmem:[%s17775_s3 + $0x3f8] sm:$0xff]  ;;  %v13250_v33 = vld [vmem:[%s17775_s3 + $0x400] sm:$0xff] }
  0x41   :  { %17920 = vst [vmem:[#allocation137_spill] sm:$0xff] %v13240_v48  ;;  %17921 = vst [vmem:[#allocation138_spill] sm:$0xff] %v13245_v16  ;;  %v13255_v32 = vld [vmem:[%s17775_s3 + $0x408] sm:$0xff]  ;;  %v13260_v0 = vld [vmem:[%s17775_s3 + $0x410] sm:$0xff] }
  0x42   :  { %17922 = vst [vmem:[#allocation139_spill] sm:$0xff] %v13250_v33  ;;  %17923 = vst [vmem:[#allocation140_spill] sm:$0xff] %v13255_v32  ;;  %v13265_v48 = vld [vmem:[%s17775_s3 + $0x418] sm:$0xff]  ;;  %v13270_v16 = vld [vmem:[%s17775_s3 + $0x420] sm:$0xff] }
  0x43   :  { %17924 = vst [vmem:[#allocation141_spill] sm:$0xff] %v13260_v0  ;;  %17925 = vst [vmem:[#allocation142_spill] sm:$0xff] %v13265_v48  ;;  %v13275_v33 = vld [vmem:[%s17775_s3 + $0x428] sm:$0xff]  ;;  %v13280_v32 = vld [vmem:[%s17775_s3 + $0x430] sm:$0xff] }
  0x44   :  { %17926 = vst [vmem:[#allocation143_spill] sm:$0xff] %v13270_v16  ;;  %17927 = vst [vmem:[#allocation144_spill] sm:$0xff] %v13275_v33  ;;  %v13285_v0 = vld [vmem:[%s17775_s3 + $0x438] sm:$0xff]  ;;  %v13290_v48 = vld [vmem:[%s17775_s3 + $0x440] sm:$0xff] }
  0x45   :  { %17928 = vst [vmem:[#allocation145_spill] sm:$0xff] %v13280_v32  ;;  %17929 = vst [vmem:[#allocation146_spill] sm:$0xff] %v13285_v0  ;;  %v13295_v16 = vld [vmem:[%s17775_s3 + $0x448] sm:$0xff]  ;;  %v13300_v33 = vld [vmem:[%s17775_s3 + $0x450] sm:$0xff] }
  0x46   :  { %17930 = vst [vmem:[#allocation147_spill] sm:$0xff] %v13290_v48  ;;  %17931 = vst [vmem:[#allocation148_spill] sm:$0xff] %v13295_v16  ;;  %v13305_v32 = vld [vmem:[%s17775_s3 + $0x458] sm:$0xff]  ;;  %v13310_v0 = vld [vmem:[%s17775_s3 + $0x460] sm:$0xff] }
  0x47   :  { %17932 = vst [vmem:[#allocation149_spill] sm:$0xff] %v13300_v33  ;;  %17933 = vst [vmem:[#allocation150_spill] sm:$0xff] %v13305_v32  ;;  %v13315_v48 = vld [vmem:[%s17775_s3 + $0x468] sm:$0xff]  ;;  %v13320_v16 = vld [vmem:[%s17775_s3 + $0x470] sm:$0xff] }
  0x48   :  { %17934 = vst [vmem:[#allocation151_spill] sm:$0xff] %v13310_v0  ;;  %17935 = vst [vmem:[#allocation152_spill] sm:$0xff] %v13315_v48  ;;  %v13325_v33 = vld [vmem:[%s17775_s3 + $0x478] sm:$0xff]  ;;  %v13330_v32 = vld [vmem:[%s17775_s3 + $0x480] sm:$0xff] }
  0x49   :  { %17936 = vst [vmem:[#allocation153_spill] sm:$0xff] %v13320_v16  ;;  %17937 = vst [vmem:[#allocation154_spill] sm:$0xff] %v13325_v33  ;;  %v13335_v0 = vld [vmem:[%s17775_s3 + $0x488] sm:$0xff]  ;;  %v13340_v48 = vld [vmem:[%s17775_s3 + $0x490] sm:$0xff] }
  0x4a   :  { %17938 = vst [vmem:[#allocation155_spill] sm:$0xff] %v13330_v32  ;;  %17939 = vst [vmem:[#allocation156_spill] sm:$0xff] %v13335_v0  ;;  %v13345_v16 = vld [vmem:[%s17775_s3 + $0x498] sm:$0xff]  ;;  %v13350_v33 = vld [vmem:[%s17775_s3 + $0x4a0] sm:$0xff] }
  0x4b   :  { %17940 = vst [vmem:[#allocation157_spill] sm:$0xff] %v13340_v48  ;;  %17941 = vst [vmem:[#allocation158_spill] sm:$0xff] %v13345_v16  ;;  %v13355_v32 = vld [vmem:[%s17775_s3 + $0x4a8] sm:$0xff]  ;;  %v13360_v0 = vld [vmem:[%s17775_s3 + $0x4b0] sm:$0xff] }
  0x4c   :  { %17942 = vst [vmem:[#allocation159_spill] sm:$0xff] %v13350_v33  ;;  %17943 = vst [vmem:[#allocation160_spill] sm:$0xff] %v13355_v32  ;;  %v13365_v48 = vld [vmem:[%s17775_s3 + $0x4b8] sm:$0xff]  ;;  %v13370_v16 = vld [vmem:[%s17775_s3 + $0x4c0] sm:$0xff] }
  0x4d   :  { %17944 = vst [vmem:[#allocation161_spill] sm:$0xff] %v13360_v0  ;;  %17945 = vst [vmem:[#allocation162_spill] sm:$0xff] %v13365_v48  ;;  %v13375_v33 = vld [vmem:[%s17775_s3 + $0x4c8] sm:$0xff]  ;;  %v13380_v32 = vld [vmem:[%s17775_s3 + $0x4d0] sm:$0xff] }
  0x4e   :  { %17946 = vst [vmem:[#allocation163_spill] sm:$0xff] %v13370_v16  ;;  %17947 = vst [vmem:[#allocation164_spill] sm:$0xff] %v13375_v33  ;;  %v13385_v0 = vld [vmem:[%s17775_s3 + $0x4d8] sm:$0xff]  ;;  %v13390_v48 = vld [vmem:[%s17775_s3 + $0x4e0] sm:$0xff] }
  0x4f   :  { %17948 = vst [vmem:[#allocation165_spill] sm:$0xff] %v13380_v32  ;;  %17949 = vst [vmem:[#allocation166_spill] sm:$0xff] %v13385_v0  ;;  %v13395_v16 = vld [vmem:[%s17775_s3 + $0x4e8] sm:$0xff]  ;;  %v13400_v33 = vld [vmem:[%s17775_s3 + $0x4f0] sm:$0xff] }
  0x50   :  { %17950 = vst [vmem:[#allocation167_spill] sm:$0xff] %v13390_v48  ;;  %17951 = vst [vmem:[#allocation168_spill] sm:$0xff] %v13395_v16  ;;  %v13405_v32 = vld [vmem:[%s17775_s3 + $0x4f8] sm:$0xff]  ;;  %v13410_v0 = vld [vmem:[%s17775_s3 + $0x500] sm:$0xff] }
  0x51   :  { %17952 = vst [vmem:[#allocation169_spill] sm:$0xff] %v13400_v33  ;;  %17953 = vst [vmem:[#allocation170_spill] sm:$0xff] %v13405_v32  ;;  %v13415_v48 = vld [vmem:[%s17775_s3 + $0x508] sm:$0xff]  ;;  %v13420_v16 = vld [vmem:[%s17775_s3 + $0x510] sm:$0xff] }
  0x52   :  { %17954 = vst [vmem:[#allocation171_spill] sm:$0xff] %v13410_v0  ;;  %17955 = vst [vmem:[#allocation172_spill] sm:$0xff] %v13415_v48  ;;  %v13425_v33 = vld [vmem:[%s17775_s3 + $0x518] sm:$0xff]  ;;  %v13430_v32 = vld [vmem:[%s17775_s3 + $0x520] sm:$0xff] }
  0x53   :  { %17956 = vst [vmem:[#allocation173_spill] sm:$0xff] %v13420_v16  ;;  %17957 = vst [vmem:[#allocation174_spill] sm:$0xff] %v13425_v33  ;;  %v13435_v0 = vld [vmem:[%s17775_s3 + $0x528] sm:$0xff]  ;;  %v13440_v48 = vld [vmem:[%s17775_s3 + $0x530] sm:$0xff] }
  0x54   :  { %17958 = vst [vmem:[#allocation175_spill] sm:$0xff] %v13430_v32  ;;  %17959 = vst [vmem:[#allocation176_spill] sm:$0xff] %v13435_v0  ;;  %v13445_v16 = vld [vmem:[%s17775_s3 + $0x538] sm:$0xff]  ;;  %v13450_v33 = vld [vmem:[%s17775_s3 + $0x540] sm:$0xff] }
  0x55   :  { %17960 = vst [vmem:[#allocation177_spill] sm:$0xff] %v13440_v48  ;;  %17961 = vst [vmem:[#allocation178_spill] sm:$0xff] %v13445_v16  ;;  %v13455_v32 = vld [vmem:[%s17775_s3 + $0x548] sm:$0xff]  ;;  %v13460_v0 = vld [vmem:[%s17775_s3 + $0x550] sm:$0xff] }
  0x56   :  { %17962 = vst [vmem:[#allocation179_spill] sm:$0xff] %v13450_v33  ;;  %17963 = vst [vmem:[#allocation180_spill] sm:$0xff] %v13455_v32  ;;  %v13465_v48 = vld [vmem:[%s17775_s3 + $0x558] sm:$0xff]  ;;  %v13470_v16 = vld [vmem:[%s17775_s3 + $0x560] sm:$0xff] }
  0x57   :  { %17964 = vst [vmem:[#allocation181_spill] sm:$0xff] %v13460_v0  ;;  %17965 = vst [vmem:[#allocation182_spill] sm:$0xff] %v13465_v48  ;;  %v13475_v33 = vld [vmem:[%s17775_s3 + $0x568] sm:$0xff]  ;;  %v13480_v32 = vld [vmem:[%s17775_s3 + $0x570] sm:$0xff] }
  0x58   :  { %17966 = vst [vmem:[#allocation183_spill] sm:$0xff] %v13470_v16  ;;  %17967 = vst [vmem:[#allocation184_spill] sm:$0xff] %v13475_v33  ;;  %v13485_v0 = vld [vmem:[%s17775_s3 + $0x578] sm:$0xff]  ;;  %v13490_v48 = vld [vmem:[%s17775_s3 + $0x580] sm:$0xff] }
  0x59   :  { %17968 = vst [vmem:[#allocation185_spill] sm:$0xff] %v13480_v32  ;;  %17969 = vst [vmem:[#allocation186_spill] sm:$0xff] %v13485_v0  ;;  %v13495_v16 = vld [vmem:[%s17775_s3 + $0x588] sm:$0xff]  ;;  %v13500_v33 = vld [vmem:[%s17775_s3 + $0x590] sm:$0xff] }
  0x5a   :  { %17970 = vst [vmem:[#allocation187_spill] sm:$0xff] %v13490_v48  ;;  %17971 = vst [vmem:[#allocation188_spill] sm:$0xff] %v13495_v16  ;;  %v13505_v32 = vld [vmem:[%s17775_s3 + $0x598] sm:$0xff]  ;;  %v13510_v0 = vld [vmem:[%s17775_s3 + $0x5a0] sm:$0xff] }
  0x5b   :  { %17972 = vst [vmem:[#allocation189_spill] sm:$0xff] %v13500_v33  ;;  %17973 = vst [vmem:[#allocation190_spill] sm:$0xff] %v13505_v32  ;;  %v13515_v48 = vld [vmem:[%s17775_s3 + $0x5a8] sm:$0xff]  ;;  %v13520_v16 = vld [vmem:[%s17775_s3 + $0x5b0] sm:$0xff] }
  0x5c   :  { %17974 = vst [vmem:[#allocation191_spill] sm:$0xff] %v13510_v0  ;;  %17975 = vst [vmem:[#allocation192_spill] sm:$0xff] %v13515_v48  ;;  %v13525_v33 = vld [vmem:[%s17775_s3 + $0x5b8] sm:$0xff]  ;;  %v13530_v32 = vld [vmem:[%s17775_s3 + $0x5c0] sm:$0xff] }
  0x5d   :  { %17976 = vst [vmem:[#allocation193_spill] sm:$0xff] %v13520_v16  ;;  %17977 = vst [vmem:[#allocation194_spill] sm:$0xff] %v13525_v33  ;;  %v13535_v0 = vld [vmem:[%s17775_s3 + $0x5c8] sm:$0xff]  ;;  %v13540_v48 = vld [vmem:[%s17775_s3 + $0x5d0] sm:$0xff] }
  0x5e   :  { %17978 = vst [vmem:[#allocation195_spill] sm:$0xff] %v13530_v32  ;;  %17979 = vst [vmem:[#allocation196_spill] sm:$0xff] %v13535_v0  ;;  %v13545_v16 = vld [vmem:[%s17775_s3 + $0x5d8] sm:$0xff]  ;;  %v13550_v33 = vld [vmem:[%s17775_s3 + $0x5e0] sm:$0xff] }
  0x5f   :  { %17980 = vst [vmem:[#allocation197_spill] sm:$0xff] %v13540_v48  ;;  %17981 = vst [vmem:[#allocation198_spill] sm:$0xff] %v13545_v16  ;;  %v13555_v32 = vld [vmem:[%s17775_s3 + $0x5e8] sm:$0xff]  ;;  %v13560_v0 = vld [vmem:[%s17775_s3 + $0x5f0] sm:$0xff] }
  0x60   :  { %17982 = vst [vmem:[#allocation199_spill] sm:$0xff] %v13550_v33  ;;  %17983 = vst [vmem:[#allocation200_spill] sm:$0xff] %v13555_v32  ;;  %v13565_v48 = vld [vmem:[%s17775_s3 + $0x5f8] sm:$0xff]  ;;  %v13570_v16 = vld [vmem:[%s17775_s3 + $0x600] sm:$0xff] }
  0x61   :  { %17984 = vst [vmem:[#allocation201_spill] sm:$0xff] %v13560_v0  ;;  %17985 = vst [vmem:[#allocation202_spill] sm:$0xff] %v13565_v48  ;;  %v13575_v33 = vld [vmem:[%s17775_s3 + $0x608] sm:$0xff]  ;;  %v13580_v32 = vld [vmem:[%s17775_s3 + $0x610] sm:$0xff] }
  0x62   :  { %17986 = vst [vmem:[#allocation203_spill] sm:$0xff] %v13570_v16  ;;  %17987 = vst [vmem:[#allocation204_spill] sm:$0xff] %v13575_v33  ;;  %v13585_v0 = vld [vmem:[%s17775_s3 + $0x618] sm:$0xff]  ;;  %v13590_v48 = vld [vmem:[%s17775_s3 + $0x620] sm:$0xff] }
  0x63   :  { %17988 = vst [vmem:[#allocation205_spill] sm:$0xff] %v13580_v32  ;;  %17989 = vst [vmem:[#allocation206_spill] sm:$0xff] %v13585_v0  ;;  %v13595_v16 = vld [vmem:[%s17775_s3 + $0x628] sm:$0xff]  ;;  %v13600_v33 = vld [vmem:[%s17775_s3 + $0x630] sm:$0xff] }
  0x64   :  { %17990 = vst [vmem:[#allocation207_spill] sm:$0xff] %v13590_v48  ;;  %17991 = vst [vmem:[#allocation208_spill] sm:$0xff] %v13595_v16  ;;  %v13605_v32 = vld [vmem:[%s17775_s3 + $0x638] sm:$0xff]  ;;  %v13610_v0 = vld [vmem:[%s17775_s3 + $0x640] sm:$0xff] }
  0x65   :  { %17992 = vst [vmem:[#allocation209_spill] sm:$0xff] %v13600_v33  ;;  %17993 = vst [vmem:[#allocation210_spill] sm:$0xff] %v13605_v32  ;;  %v13615_v48 = vld [vmem:[%s17775_s3 + $0x648] sm:$0xff]  ;;  %v13620_v16 = vld [vmem:[%s17775_s3 + $0x650] sm:$0xff] }
  0x66   :  { %17994 = vst [vmem:[#allocation211_spill] sm:$0xff] %v13610_v0  ;;  %17995 = vst [vmem:[#allocation212_spill] sm:$0xff] %v13615_v48  ;;  %v13625_v33 = vld [vmem:[%s17775_s3 + $0x658] sm:$0xff]  ;;  %v13630_v32 = vld [vmem:[%s17775_s3 + $0x660] sm:$0xff] }
  0x67   :  { %17996 = vst [vmem:[#allocation213_spill] sm:$0xff] %v13620_v16  ;;  %17997 = vst [vmem:[#allocation214_spill] sm:$0xff] %v13625_v33  ;;  %v13635_v0 = vld [vmem:[%s17775_s3 + $0x668] sm:$0xff]  ;;  %v13640_v48 = vld [vmem:[%s17775_s3 + $0x670] sm:$0xff] }
  0x68   :  { %17998 = vst [vmem:[#allocation215_spill] sm:$0xff] %v13630_v32  ;;  %17999 = vst [vmem:[#allocation216_spill] sm:$0xff] %v13635_v0  ;;  %v13645_v16 = vld [vmem:[%s17775_s3 + $0x678] sm:$0xff]  ;;  %v13650_v33 = vld [vmem:[%s17775_s3 + $0x680] sm:$0xff] }
  0x69   :  { %18000 = vst [vmem:[#allocation217_spill] sm:$0xff] %v13640_v48  ;;  %18001 = vst [vmem:[#allocation218_spill] sm:$0xff] %v13645_v16  ;;  %v13655_v32 = vld [vmem:[%s17775_s3 + $0x688] sm:$0xff]  ;;  %v13660_v0 = vld [vmem:[%s17775_s3 + $0x690] sm:$0xff] }
  0x6a   :  { %18002 = vst [vmem:[#allocation219_spill] sm:$0xff] %v13650_v33  ;;  %18003 = vst [vmem:[#allocation220_spill] sm:$0xff] %v13655_v32  ;;  %v13665_v48 = vld [vmem:[%s17775_s3 + $0x698] sm:$0xff]  ;;  %v13670_v16 = vld [vmem:[%s17775_s3 + $0x6a0] sm:$0xff] }
  0x6b   :  { %18004 = vst [vmem:[#allocation221_spill] sm:$0xff] %v13660_v0  ;;  %18005 = vst [vmem:[#allocation222_spill] sm:$0xff] %v13665_v48  ;;  %v13675_v33 = vld [vmem:[%s17775_s3 + $0x6a8] sm:$0xff]  ;;  %v13680_v32 = vld [vmem:[%s17775_s3 + $0x6b0] sm:$0xff] }
  0x6c   :  { %18006 = vst [vmem:[#allocation223_spill] sm:$0xff] %v13670_v16  ;;  %18007 = vst [vmem:[#allocation224_spill] sm:$0xff] %v13675_v33  ;;  %v13685_v0 = vld [vmem:[%s17775_s3 + $0x6b8] sm:$0xff]  ;;  %v13690_v48 = vld [vmem:[%s17775_s3 + $0x6c0] sm:$0xff] }
  0x6d   :  { %18008 = vst [vmem:[#allocation225_spill] sm:$0xff] %v13680_v32  ;;  %18009 = vst [vmem:[#allocation226_spill] sm:$0xff] %v13685_v0  ;;  %v13695_v16 = vld [vmem:[%s17775_s3 + $0x6c8] sm:$0xff]  ;;  %v13700_v33 = vld [vmem:[%s17775_s3 + $0x6d0] sm:$0xff] }
  0x6e   :  { %18010 = vst [vmem:[#allocation227_spill] sm:$0xff] %v13690_v48  ;;  %18011 = vst [vmem:[#allocation228_spill] sm:$0xff] %v13695_v16  ;;  %v13705_v32 = vld [vmem:[%s17775_s3 + $0x6d8] sm:$0xff]  ;;  %v13710_v0 = vld [vmem:[%s17775_s3 + $0x6e0] sm:$0xff] }
  0x6f   :  { %18012 = vst [vmem:[#allocation229_spill] sm:$0xff] %v13700_v33  ;;  %18013 = vst [vmem:[#allocation230_spill] sm:$0xff] %v13705_v32  ;;  %v13715_v48 = vld [vmem:[%s17775_s3 + $0x6e8] sm:$0xff]  ;;  %v13720_v16 = vld [vmem:[%s17775_s3 + $0x6f0] sm:$0xff] }
  0x70   :  { %18014 = vst [vmem:[#allocation231_spill] sm:$0xff] %v13710_v0  ;;  %18015 = vst [vmem:[#allocation232_spill] sm:$0xff] %v13715_v48  ;;  %v13725_v33 = vld [vmem:[%s17775_s3 + $0x6f8] sm:$0xff]  ;;  %v13730_v32 = vld [vmem:[%s17775_s3 + $0x700] sm:$0xff] }
  0x71   :  { %18016 = vst [vmem:[#allocation233_spill] sm:$0xff] %v13720_v16  ;;  %18017 = vst [vmem:[#allocation234_spill] sm:$0xff] %v13725_v33  ;;  %v13735_v0 = vld [vmem:[%s17775_s3 + $0x708] sm:$0xff]  ;;  %v13740_v48 = vld [vmem:[%s17775_s3 + $0x710] sm:$0xff] }
  0x72   :  { %18018 = vst [vmem:[#allocation235_spill] sm:$0xff] %v13730_v32  ;;  %18019 = vst [vmem:[#allocation236_spill] sm:$0xff] %v13735_v0  ;;  %v13745_v16 = vld [vmem:[%s17775_s3 + $0x718] sm:$0xff]  ;;  %v13750_v33 = vld [vmem:[%s17775_s3 + $0x720] sm:$0xff] }
  0x73   :  { %18020 = vst [vmem:[#allocation237_spill] sm:$0xff] %v13740_v48  ;;  %18021 = vst [vmem:[#allocation238_spill] sm:$0xff] %v13745_v16  ;;  %v13755_v32 = vld [vmem:[%s17775_s3 + $0x728] sm:$0xff]  ;;  %v13760_v0 = vld [vmem:[%s17775_s3 + $0x730] sm:$0xff] }
  0x74   :  { %18022 = vst [vmem:[#allocation239_spill] sm:$0xff] %v13750_v33  ;;  %18023 = vst [vmem:[#allocation240_spill] sm:$0xff] %v13755_v32  ;;  %v13765_v48 = vld [vmem:[%s17775_s3 + $0x738] sm:$0xff]  ;;  %v13770_v16 = vld [vmem:[%s17775_s3 + $0x740] sm:$0xff] }
  0x75   :  { %18024 = vst [vmem:[#allocation241_spill] sm:$0xff] %v13760_v0  ;;  %18025 = vst [vmem:[#allocation242_spill] sm:$0xff] %v13765_v48  ;;  %v13775_v33 = vld [vmem:[%s17775_s3 + $0x748] sm:$0xff]  ;;  %v13780_v32 = vld [vmem:[%s17775_s3 + $0x750] sm:$0xff] }
  0x76   :  { %18026 = vst [vmem:[#allocation243_spill] sm:$0xff] %v13770_v16  ;;  %18027 = vst [vmem:[#allocation244_spill] sm:$0xff] %v13775_v33  ;;  %v13785_v0 = vld [vmem:[%s17775_s3 + $0x758] sm:$0xff]  ;;  %v13790_v48 = vld [vmem:[%s17775_s3 + $0x760] sm:$0xff] }
  0x77   :  { %18028 = vst [vmem:[#allocation245_spill] sm:$0xff] %v13780_v32  ;;  %18029 = vst [vmem:[#allocation246_spill] sm:$0xff] %v13785_v0  ;;  %v13795_v16 = vld [vmem:[%s17775_s3 + $0x768] sm:$0xff]  ;;  %v13800_v33 = vld [vmem:[%s17775_s3 + $0x770] sm:$0xff] }
  0x78   :  { %18030 = vst [vmem:[#allocation247_spill] sm:$0xff] %v13790_v48  ;;  %18031 = vst [vmem:[#allocation248_spill] sm:$0xff] %v13795_v16  ;;  %v13805_v32 = vld [vmem:[%s17775_s3 + $0x778] sm:$0xff]  ;;  %v13810_v0 = vld [vmem:[%s17775_s3 + $0x780] sm:$0xff] }
  0x79   :  { %18032 = vst [vmem:[#allocation249_spill] sm:$0xff] %v13800_v33  ;;  %18033 = vst [vmem:[#allocation250_spill] sm:$0xff] %v13805_v32  ;;  %v13815_v48 = vld [vmem:[%s17775_s3 + $0x788] sm:$0xff]  ;;  %v13820_v16 = vld [vmem:[%s17775_s3 + $0x790] sm:$0xff] }
  0x7a   :  { %18034 = vst [vmem:[#allocation251_spill] sm:$0xff] %v13810_v0  ;;  %18035 = vst [vmem:[#allocation252_spill] sm:$0xff] %v13815_v48  ;;  %v13825_v33 = vld [vmem:[%s17775_s3 + $0x798] sm:$0xff]  ;;  %v13830_v32 = vld [vmem:[%s17775_s3 + $0x7a0] sm:$0xff] }
  0x7b   :  { %18036 = vst [vmem:[#allocation253_spill] sm:$0xff] %v13820_v16  ;;  %18037 = vst [vmem:[#allocation254_spill] sm:$0xff] %v13825_v33  ;;  %v13835_v0 = vld [vmem:[%s17775_s3 + $0x7a8] sm:$0xff]  ;;  %v13840_v48 = vld [vmem:[%s17775_s3 + $0x7b0] sm:$0xff] }
  0x7c   :  { %18038 = vst [vmem:[#allocation255_spill] sm:$0xff] %v13830_v32  ;;  %18039 = vst [vmem:[#allocation256_spill] sm:$0xff] %v13835_v0  ;;  %v13845_v16 = vld [vmem:[%s17775_s3 + $0x7b8] sm:$0xff]  ;;  %v13850_v33 = vld [vmem:[%s17775_s3 + $0x7c0] sm:$0xff] }
  0x7d   :  { %18040 = vst [vmem:[#allocation257_spill] sm:$0xff] %v13840_v48  ;;  %18041 = vst [vmem:[#allocation258_spill] sm:$0xff] %v13845_v16  ;;  %v13855_v32 = vld [vmem:[%s17775_s3 + $0x7c8] sm:$0xff]  ;;  %v13860_v0 = vld [vmem:[%s17775_s3 + $0x7d0] sm:$0xff] }
  0x7e   :  { %18042 = vst [vmem:[#allocation259_spill] sm:$0xff] %v13850_v33  ;;  %18043 = vst [vmem:[#allocation260_spill] sm:$0xff] %v13855_v32  ;;  %v13865_v48 = vld [vmem:[%s17775_s3 + $0x7d8] sm:$0xff]  ;;  %v13870_v16 = vld [vmem:[%s17775_s3 + $0x7e0] sm:$0xff] }
  0x7f   :  { %18044 = vst [vmem:[#allocation261_spill] sm:$0xff] %v13860_v0  ;;  %18045 = vst [vmem:[#allocation262_spill] sm:$0xff] %v13865_v48  ;;  %v13875_v33 = vld [vmem:[%s17775_s3 + $0x7e8] sm:$0xff]  ;;  %v13880_v32 = vld [vmem:[%s17775_s3 + $0x7f0] sm:$0xff] }
  0x80   :  { %18046 = vst [vmem:[#allocation263_spill] sm:$0xff] %v13870_v16  ;;  %18047 = vst [vmem:[#allocation264_spill] sm:$0xff] %v13875_v33  ;;  %v13885_v0 = vld [vmem:[%s17775_s3 + $0x7f8] sm:$0xff] }
  0x81   :  { %18048 = vst [vmem:[#allocation265_spill] sm:$0xff] %v13880_v32  ;;  %18049 = vst [vmem:[#allocation266_spill] sm:$0xff] %v13885_v0 }
  0x82   :  { %577 = vsyncadd [#allocation5], 32768  ;;  %v668_v48 = vld [vmem:[%s17773_s1 + $0x78] sm:$0xff]  ;;  %v667_v16 = vld [vmem:[%s17773_s1 + $0x70] sm:$0xff]  ;;  %vm578_vm0 = vcmask 261120   ;;  %vm580_vm1 = vcmask 254976  }
  0x83   :  { %11346 = vmatprep.subr.mxu0 %v668_v48  ;;  %12517 = vmatprep.subr.mxu1 %v668_v48  ;;  %v17780_v33 = vmov 0.0   ;;  %v620_v32 = vld [vmem:[%s17772_s0] sm:$0xff]  ;;  %v666_v0 = vld [vmem:[%s17773_s1 + $0x68] sm:$0xff]  ;;  %v622_v17 = vld [vmem:[%s17772_s0 + $0x10] sm:$0xff]  ;;  %vm7656_vm2 = vcmask 1041409   ;;  %vm7658_vm3 = vcmask 1043459  }
  0x84   :  { %582 = vst.msk [vmem:[#allocation2 + $0x10] sm:$0xff] %vm578_vm0, %v17780_v33  ;;  %579 = vst.msk [vmem:[#allocation2] sm:$0xff] %vm578_vm0, %v17780_v33  ;;  %11347 = vmatpush3.msra.mxu0 %v668_v48  ;;  %12521 = vmatpush3.msra.mxu1 %v668_v48  ;;  %v632_v48 = vld [vmem:[%s17772_s0 + $0x60] sm:$0xff]  ;;  %v621_v1 = vld [vmem:[%s17772_s0 + $0x8] sm:$0xff]  ;;  %vm7660_vm4 = vcmask 1045509   ;;  %vm7662_vm5 = vcmask 1047559  }
  0x85   :  { %584 = vst.msk [vmem:[#allocation2 + $0x20] sm:$0xff] %vm578_vm0, %v17780_v33  ;;  %586 = vst.msk [vmem:[#allocation2 + $0x30] sm:$0xff] %vm578_vm0, %v17780_v33  ;;  %11348 = vmatprep.subr.mxu0 %v667_v16  ;;  %12518 = vmatprep.subr.mxu1 %v667_v16  ;;  %v665_v49 = vld [vmem:[%s17773_s1 + $0x60] sm:$0xff]  ;;  %v654_v18 = vld [vmem:[%s17773_s1 + $0x8] sm:$0xff]  ;;  %s12563_s10 = smov 96   ;;  %s12564_s11 = smov 64  }
  0x86   :  { %588 = vst.msk [vmem:[#allocation2 + $0x40] sm:$0xff] %vm578_vm0, %v17780_v33  ;;  %590 = vst.msk [vmem:[#allocation2 + $0x50] sm:$0xff] %vm578_vm0, %v17780_v33  ;;  %11349 = vmatpush3.msra.mxu0 %v667_v16  ;;  %12522 = vmatpush3.msra.mxu1 %v667_v16  ;;  %v680_v16 = vld [vmem:[%s17773_s1 + $0xd8] sm:$0xff]  ;;  %v679_v35 = vld [vmem:[%s17773_s1 + $0xd0] sm:$0xff]  ;;  %vm7676_vm6 = vcmask 517376   ;;  %vm7690_vm7 = vcmask 779776  }
  0x87   :  { %592 = vst.msk [vmem:[#allocation2 + $0x60] sm:$0xff] %vm578_vm0, %v17780_v33  ;;  %594 = vst.msk [vmem:[#allocation2 + $0x70] sm:$0xff] %vm578_vm0, %v17780_v33  ;;  %11350 = vmatprep.subr.mxu0 %v666_v0  ;;  %12519 = vmatprep.subr.mxu1 %v666_v0  ;;  %v678_v19 = vld [vmem:[%s17773_s1 + $0xc8] sm:$0xff]  ;;  %v660_v36 = vld [vmem:[%s17773_s1 + $0x38] sm:$0xff]  ;;  %vm7702_vm8 = vcmask 1042176  }
  0x88   :  { %596 = vst.msk [vmem:[#allocation2 + $0x80] sm:$0xff] %vm578_vm0, %v17780_v33  ;;  %598 = vst.msk [vmem:[#allocation2 + $0x90] sm:$0xff] %vm578_vm0, %v17780_v33  ;;  %11351 = vmatpush3.msra.mxu0 %v666_v0  ;;  %12523 = vmatpush3.msra.mxu1 %v666_v0  ;;  %v626_v0 = vld [vmem:[%s17772_s0 + $0x30] sm:$0xff]  ;;  %v658_v4 = vld [vmem:[%s17773_s1 + $0x28] sm:$0xff] }
  0x89   :  { %600 = vst.msk [vmem:[#allocation2 + $0xa0] sm:$0xff] %vm578_vm0, %v17780_v33  ;;  %602 = vst.msk [vmem:[#allocation2 + $0xb0] sm:$0xff] %vm578_vm0, %v17780_v33  ;;  %11352 = vmatprep.subr.mxu0 %v665_v49  ;;  %12520 = vmatprep.subr.mxu1 %v665_v49  ;;  %v671_v20 = vld [vmem:[%s17773_s1 + $0x90] sm:$0xff]  ;;  %v14403_v5 = vld [vmem:[%s17773_s1 + $0x1f8] sm:$0xff] }
  0x8a   :  { %604 = vst.msk [vmem:[#allocation2 + $0xc0] sm:$0xff] %vm578_vm0, %v17780_v33  ;;  %606 = vst.msk [vmem:[#allocation2 + $0xd0] sm:$0xff] %vm578_vm0, %v17780_v33  ;;  %11353 = vmatpush3.msra.mxu0 %v665_v49  ;;  %12524 = vmatpush3.msra.mxu1 %v665_v49  ;;  %v630_v49 = vld [vmem:[%s17772_s0 + $0x50] sm:$0xff] }
  0x8b   :  { %608 = vst.msk [vmem:[#allocation2 + $0xe0] sm:$0xff] %vm578_vm0, %v17780_v33  ;;  %610 = vst.msk [vmem:[#allocation2 + $0xf0] sm:$0xff] %vm578_vm0, %v17780_v33  ;;  %11410 = vmatprep.subr.mxu0 %v680_v16  ;;  %v689_v3 = vld [vmem:[#allocation2] sm:$0xff] }
  0x8c   :  { %612 = vst.msk [vmem:[#allocation2 + $0x100] sm:$0xff] %vm578_vm0, %v17780_v33  ;;  %614 = vst.msk [vmem:[#allocation2 + $0x110] sm:$0xff] %vm578_vm0, %v17780_v33 }
  0x8d   :  { %616 = vst.msk [vmem:[#allocation2 + $0x120] sm:$0xff] %vm578_vm0, %v17780_v33  ;;  %618 = vst.msk [vmem:[#allocation2 + $0x130] sm:$0xff] %vm578_vm0, %v17780_v33 }
  0x8e   :  { %583 = vst.msk [vmem:[#allocation2 + $0x18] sm:$0x3] %vm580_vm1, %v17780_v33  ;;  %581 = vst.msk [vmem:[#allocation2 + $0x8] sm:$0x3] %vm580_vm1, %v17780_v33 }
  0x8f   :  { %585 = vst.msk [vmem:[#allocation2 + $0x28] sm:$0x3] %vm580_vm1, %v17780_v33  ;;  %587 = vst.msk [vmem:[#allocation2 + $0x38] sm:$0x3] %vm580_vm1, %v17780_v33 }
  0x90   :  { %589 = vst.msk [vmem:[#allocation2 + $0x48] sm:$0x3] %vm580_vm1, %v17780_v33  ;;  %591 = vst.msk [vmem:[#allocation2 + $0x58] sm:$0x3] %vm580_vm1, %v17780_v33 }
  0x91   :  { %593 = vst.msk [vmem:[#allocation2 + $0x68] sm:$0x3] %vm580_vm1, %v17780_v33  ;;  %595 = vst.msk [vmem:[#allocation2 + $0x78] sm:$0x3] %vm580_vm1, %v17780_v33 }
  0x92   :  { %597 = vst.msk [vmem:[#allocation2 + $0x88] sm:$0x3] %vm580_vm1, %v17780_v33  ;;  %599 = vst.msk [vmem:[#allocation2 + $0x98] sm:$0x3] %vm580_vm1, %v17780_v33 }
  0x93   :  { %601 = vst.msk [vmem:[#allocation2 + $0xa8] sm:$0x3] %vm580_vm1, %v17780_v33  ;;  %603 = vst.msk [vmem:[#allocation2 + $0xb8] sm:$0x3] %vm580_vm1, %v17780_v33 }
  0x94   :  { %605 = vst.msk [vmem:[#allocation2 + $0xc8] sm:$0x3] %vm580_vm1, %v17780_v33  ;;  %607 = vst.msk [vmem:[#allocation2 + $0xd8] sm:$0x3] %vm580_vm1, %v17780_v33 }
  0x95   :  { %609 = vst.msk [vmem:[#allocation2 + $0xe8] sm:$0x3] %vm580_vm1, %v17780_v33  ;;  %611 = vst.msk [vmem:[#allocation2 + $0xf8] sm:$0x3] %vm580_vm1, %v17780_v33 }
  0x96   :  { %613 = vst.msk [vmem:[#allocation2 + $0x108] sm:$0x3] %vm580_vm1, %v17780_v33  ;;  %615 = vst.msk [vmem:[#allocation2 + $0x118] sm:$0x3] %vm580_vm1, %v17780_v33 }
  0x97   :  { %617 = vst.msk [vmem:[#allocation2 + $0x128] sm:$0x3] %vm580_vm1, %v17780_v33  ;;  %619 = vst.msk [vmem:[#allocation2 + $0x138] sm:$0x3] %vm580_vm1, %v17780_v33  ;;  %v633_v33 = vld [vmem:[%s17772_s0 + $0x68] sm:$0xff] }
  0x98   :  { %637 = vst.msk [vmem:[#allocation2 + $0x11] sm:$0xff] %vm578_vm0, %v620_v32  ;;  %649 = vst.msk [vmem:[#allocation2 + $0xf1] sm:$0xff] %vm578_vm0, %v632_v48  ;;  %v634_v32 = vld [vmem:[%s17772_s0 + $0x70] sm:$0xff]  ;;  %v656_v48 = vld [vmem:[%s17773_s1 + $0x18] sm:$0xff] }
  0x99   :  { %638 = vst.msk [vmem:[#allocation2 + $0x21] sm:$0xff] %vm578_vm0, %v621_v1  ;;  %650 = vst.msk [vmem:[#allocation2 + $0x101] sm:$0xff] %vm578_vm0, %v633_v33  ;;  %v623_v1 = vld [vmem:[%s17772_s0 + $0x18] sm:$0xff]  ;;  %11378 = vmatprep.subr.mxu1 %v656_v48 }
  0x9a   :  { %639 = vst.msk [vmem:[#allocation2 + $0x31] sm:$0xff] %vm578_vm0, %v622_v17  ;;  %651 = vst.msk [vmem:[#allocation2 + $0x111] sm:$0xff] %vm578_vm0, %v634_v32  ;;  %v635_v33 = vld [vmem:[%s17772_s0 + $0x78] sm:$0xff]  ;;  %v624_v17 = vld [vmem:[%s17772_s0 + $0x20] sm:$0xff] }
  0x9b   :  { %640 = vst.msk [vmem:[#allocation2 + $0x41] sm:$0xff] %vm578_vm0, %v623_v1  ;;  %652 = vst.msk [vmem:[#allocation2 + $0x121] sm:$0xff] %vm578_vm0, %v635_v33  ;;  %v625_v32 = vld [vmem:[%s17772_s0 + $0x28] sm:$0xff]  ;;  %v627_v1 = vld [vmem:[%s17772_s0 + $0x38] sm:$0xff] }
  0x9c   :  { %641 = vst.msk [vmem:[#allocation2 + $0x51] sm:$0xff] %vm578_vm0, %v624_v17  ;;  %642 = vst.msk [vmem:[#allocation2 + $0x61] sm:$0xff] %vm578_vm0, %v625_v32  ;;  %v628_v33 = vld [vmem:[%s17772_s0 + $0x40] sm:$0xff]  ;;  %v629_v17 = vld [vmem:[%s17772_s0 + $0x48] sm:$0xff] }
  0x9d   :  { %643 = vst.msk [vmem:[#allocation2 + $0x71] sm:$0xff] %vm578_vm0, %v626_v0  ;;  %644 = vst.msk [vmem:[#allocation2 + $0x81] sm:$0xff] %vm578_vm0, %v627_v1  ;;  %v631_v32 = vld [vmem:[%s17772_s0 + $0x58] sm:$0xff] }
  0x9e   :  { %645 = vst.msk [vmem:[#allocation2 + $0xb1] sm:$0xff] %vm578_vm0, %v628_v33  ;;  %646 = vst.msk [vmem:[#allocation2 + $0xc1] sm:$0xff] %vm578_vm0, %v629_v17  ;;  %v655_v17 = vld [vmem:[%s17773_s1 + $0x10] sm:$0xff] }
  0x9f   :  { %v690_v0 = vld [vmem:[#allocation2 + $0x10] sm:$0xff]  ;;  %647 = vst.msk [vmem:[#allocation2 + $0xd1] sm:$0xff] %vm578_vm0, %v630_v49  ;;  %648 = vst.msk [vmem:[#allocation2 + $0xe1] sm:$0xff] %vm578_vm0, %v631_v32 }
  0xa0   :  { %v14047_v1 = vld [vmem:[#allocation2 + $0xf0] sm:$0xff]  ;;  %v14049_v34 = vld [vmem:[#allocation2 + $0x20] sm:$0xff]  ;;  %11354 = vmatprep.mubr.msk.f32.mxu0 %vm578_vm0, %v690_v0  ;;  %18050 = vst [vmem:[#allocation267_spill] sm:$0xff] %v14403_v5 }
  0xa1   :  { %11372 = vmatprep.mubr.msk.f32.mxu1 %vm578_vm0, %v14047_v1  ;;  %v14056_v33 = vld [vmem:[#allocation2 + $0x100] sm:$0xff]  ;;  %11355 = vmatmul.mubr.msk.f32.vlgmr.msra.gmra.mxu0 %vm578_vm0, %v14049_v34  ;;  %v14065_v49 = vld [vmem:[#allocation2 + $0x30] sm:$0xff] }
  0xa2   :  { %11373 = vmatmul.mubr.msk.f32.vlgmr.msra.gmra.mxu1 %vm578_vm0, %v14056_v33  ;;  %v14067_v32 = vld [vmem:[#allocation2 + $0x110] sm:$0xff]  ;;  %11411 = vmatpush3.msra.mxu0 %v680_v16  ;;  %v14069_v2 = vld [vmem:[#allocation2 + $0x40] sm:$0xff] }
  0xa3   :  { %11379 = vmatpush3.msra.mxu1 %v656_v48  ;;  %v14071_v50 = vld [vmem:[#allocation2 + $0x120] sm:$0xff]  ;;  %11357 = vmatprep.mubr.msk.f32.mxu0 %vm578_vm0, %v14065_v49  ;;  %v14090_v48 = vld [vmem:[#allocation2 + $0x50] sm:$0xff] }
  0xa4   :  { %11380 = vmatprep.subr.mxu1 %v655_v17  ;;  %11375 = vmatprep.mubr.msk.f32.mxu1 %vm578_vm0, %v14067_v32  ;;  %v653_v16 = vld [vmem:[%s17773_s1] sm:$0xff] }
  0xa5   :  { %11381 = vmatpush3.msra.mxu1 %v655_v17  ;;  %11358 = vmatmul.mubr.msk.f32.gmra.mxu0 %vm578_vm0, %v14069_v2  ;;  %v695_v51 = vld [vmem:[#allocation2 + $0x60] sm:$0xff]  ;;  %v14094_v17 = vld [vmem:[#allocation2 + $0x70] sm:$0xff] }
  0xa6   :  { %11376 = vmatmul.mubr.msk.f32.gmra.mxu1 %vm578_vm0, %v14071_v50  ;;  %11382 = vmatprep.subr.mxu1 %v654_v18  ;;  %v703_v52 = vld [vmem:[#allocation2 + $0xe0] sm:$0xff] }
  0xa7   :  { %11412 = vmatprep.subr.mxu0 %v679_v35  ;;  %11383 = vmatpush3.msra.mxu1 %v654_v18  ;;  %v697_v18 = vld [vmem:[#allocation2 + $0x80] sm:$0xff] }
  0xa8   :  { %11413 = vmatpush3.msra.mxu0 %v679_v35  ;;  %11384 = vmatprep.subr.mxu1 %v653_v16  ;;  %v677_v35 = vld [vmem:[%s17773_s1 + $0xc0] sm:$0xff] }
  0xa9   :  { %11360 = vmatprep.mubr.msk.f32.mxu0 %vm578_vm0, %v14090_v48  ;;  %11385 = vmatpush3.msra.mxu1 %v653_v16  ;;  %v702_v16 = vld [vmem:[#allocation2 + $0xd0] sm:$0xff] }
  0xaa   :  { %11386 = vmatprep.mubr.msk.f32.mxu1 %vm578_vm0, %v689_v3  ;;  %11361 = vmatmul.mubr.msk.f32.gmra.mxu0 %vm578_vm0, %v695_v51  ;;  %v700_v3 = vld [vmem:[#allocation2 + $0xb0] sm:$0xff] }
  0xab   :  { %11387 = vmatmul.mubr.msk.f32.vlgmr.msra.gmra.mxu1 %vm578_vm0, %v690_v0  ;;  %11363 = vmatprep.mubr.msk.f32.mxu0 %vm578_vm0, %v14094_v17  ;;  %v659_v0 = vld [vmem:[%s17773_s1 + $0x30] sm:$0xff] }
  0xac   :  { %11389 = vmatprep.mubr.msk.f32.mxu1 %vm578_vm0, %v14049_v34  ;;  %11414 = vmatprep.subr.mxu0 %v678_v19 }
  0xad   :  { %11442 = vmatprep.subr.mxu1 %v660_v36  ;;  %11415 = vmatpush3.msra.mxu0 %v678_v19  ;;  %v701_v19 = vld [vmem:[#allocation2 + $0xc0] sm:$0xff] }
  0xae   :  { %11443 = vmatpush3.msra.mxu1 %v660_v36  ;;  %11364 = vmatmul.mubr.msk.f32.gmra.mxu0 %vm578_vm0, %v697_v18  ;;  %v672_v36 = vld [vmem:[%s17773_s1 + $0x98] sm:$0xff] }
  0xaf   :  { %11390 = vmatmul.mubr.msk.f32.gmra.mxu1 %vm578_vm0, %v14065_v49  ;;  %11366 = vmatprep.mubr.msk.f32.mxu0 %vm578_vm0, %v700_v3 }
  0xb0   :  { %11392 = vmatprep.mubr.msk.f32.mxu1 %vm578_vm0, %v14069_v2  ;;  %11416 = vmatprep.subr.mxu0 %v677_v35 }
  0xb1   :  { %11444 = vmatprep.subr.mxu1 %v659_v0  ;;  %11417 = vmatpush3.msra.mxu0 %v677_v35  ;;  %v699_v35 = vld [vmem:[#allocation2 + $0xa0] sm:$0xff] }
  0xb2   :  { %11445 = vmatpush3.msra.mxu1 %v659_v0  ;;  %11367 = vmatmul.mubr.msk.f32.gmra.mxu0 %vm578_vm0, %v701_v19  ;;  %v657_v0 = vld [vmem:[%s17773_s1 + $0x20] sm:$0xff] }
  0xb3   :  { %11393 = vmatmul.mubr.msk.f32.gmra.mxu1 %vm578_vm0, %v14090_v48  ;;  %11369 = vmatprep.mubr.msk.f32.mxu0 %vm578_vm0, %v702_v16 }
  0xb4   :  { %11395 = vmatprep.mubr.msk.f32.mxu1 %vm578_vm0, %v695_v51  ;;  %11474 = vmatprep.subr.mxu0 %v672_v36 }
  0xb5   :  { %11446 = vmatprep.subr.mxu1 %v658_v4 }
  0xb6   :  { %11447 = vmatpush3.msra.mxu1 %v658_v4  ;;  %11370 = vmatmul.mubr.msk.f32.gmra.mxu0 %vm578_vm0, %v703_v52  ;;  %v684_v4 = vld [vmem:[%s17773_s1 + $0xf8] sm:$0xff] }
  0xb7   :  { %11396 = vmatmul.mubr.msk.f32.gmra.mxu1 %vm578_vm0, %v14094_v17  ;;  %11418 = vmatprep.mubr.msk.f32.mxu0 %vm578_vm0, %v14049_v34  ;;  %v670_v34 = vld [vmem:[%s17773_s1 + $0x88] sm:$0xff] }
  0xb8   :  { %11398 = vmatprep.mubr.msk.f32.mxu1 %vm578_vm0, %v699_v35  ;;  %11448 = vmatprep.subr.mxu1 %v657_v0  ;;  %v1227_v35 = vld [vmem:[#allocation2 + $0x71] sm:$0xff] }
  0xb9   :  { %11449 = vmatpush3.msra.mxu1 %v657_v0  ;;  %v1230_v0 = vld [vmem:[#allocation2 + $0xa1] sm:$0xff] }
  0xba   :  { %11419 = vmatmul.mubr.msk.f32.vlgmr.msra.gmra.mxu0 %vm578_vm0, %v14065_v49  ;;  %11506 = vmatprep.subr.mxu1 %v684_v4  ;;  %v1220_v49 = vld [vmem:[#allocation2 + $0x1] sm:$0xff] }
  0xbb   :  { %11399 = vmatmul.mubr.msk.f32.gmra.mxu1 %vm578_vm0, %v700_v3  ;;  %11475 = vmatpush3.msra.mxu0 %v672_v36  ;;  %v14189_v3 = vld [vmem:[#allocation2 + $0x31] sm:$0xff]  ;;  %v14206_v36 = vld [vmem:[#allocation2 + $0x61] sm:$0xff] }
  0xbc   :  { %11401 = vmatprep.mubr.msk.f32.mxu1 %vm578_vm0, %v701_v19  ;;  %11421 = vmatprep.mubr.msk.f32.mxu0 %vm578_vm0, %v14069_v2  ;;  %v669_v2 = vld [vmem:[%s17773_s1 + $0x80] sm:$0xff] }
  0xbd   :  { %11476 = vmatprep.subr.mxu0 %v671_v20 }
  0xbe   :  { %11477 = vmatpush3.msra.mxu0 %v671_v20  ;;  %v698_v20 = vld [vmem:[#allocation2 + $0x90] sm:$0xff] }
  0xbf   :  { %11402 = vmatmul.mubr.msk.f32.gmra.mxu1 %vm578_vm0, %v702_v16  ;;  %11422 = vmatmul.mubr.msk.f32.gmra.mxu0 %vm578_vm0, %v14090_v48  ;;  %v1221_v48 = vld [vmem:[#allocation2 + $0x11] sm:$0xff] }
  0xc0   :  { %11404 = vmatprep.mubr.msk.f32.mxu1 %vm578_vm0, %v703_v52  ;;  %11424 = vmatprep.mubr.msk.f32.mxu0 %vm578_vm0, %v695_v51  ;;  %v664_v51 = vld [vmem:[%s17773_s1 + $0x58] sm:$0xff] }
  0xc1   :  { %11478 = vmatprep.subr.mxu0 %v670_v34 }
  0xc2   :  { %11479 = vmatpush3.msra.mxu0 %v670_v34  ;;  %v663_v34 = vld [vmem:[%s17773_s1 + $0x50] sm:$0xff] }
  0xc3   :  { %11405 = vmatmul.mubr.msk.f32.gmra.mxu1 %vm578_vm0, %v14047_v1  ;;  %11425 = vmatmul.mubr.msk.f32.gmra.mxu0 %vm578_vm0, %v14094_v17  ;;  %v14179_v17 = vld [vmem:[#allocation2 + $0x21] sm:$0xff] }
  0xc4   :  { %11407 = vmatprep.mubr.msk.f32.mxu1 %vm578_vm0, %v14056_v33  ;;  %11427 = vmatprep.mubr.msk.f32.mxu0 %vm578_vm0, %v697_v18  ;;  %v683_v18 = vld [vmem:[%s17773_s1 + $0xf0] sm:$0xff] }
  0xc5   :  { %11480 = vmatprep.subr.mxu0 %v669_v2 }
  0xc6   :  { %11481 = vmatpush3.msra.mxu0 %v669_v2  ;;  %v1233_v2 = vld [vmem:[#allocation2 + $0xd1] sm:$0xff] }
  0xc7   :  { %11408 = vmatmul.mubr.msk.f32.gmra.mxu1 %vm578_vm0, %v14067_v32  ;;  %11428 = vmatmul.mubr.msk.f32.gmra.mxu0 %vm578_vm0, %v698_v20  ;;  %v1234_v20 = vld [vmem:[#allocation2 + $0xe1] sm:$0xff] }
  0xc8   :  { %11430 = vmatprep.mubr.msk.f32.mxu0 %vm578_vm0, %v701_v19  ;;  %11450 = vmatprep.mubr.msk.f32.mxu1 %vm578_vm0, %v1220_v49  ;;  %v14191_v19 = vld [vmem:[#allocation2 + $0x41] sm:$0xff] }
  0xc9   :  { %11538 = vmatprep.subr.mxu0 %v664_v51  ;;  %v662_v49 = vld [vmem:[%s17773_s1 + $0x48] sm:$0xff] }
  0xcb   :  { %11431 = vmatmul.mubr.msk.f32.gmra.mxu0 %vm578_vm0, %v702_v16  ;;  %11451 = vmatmul.mubr.msk.f32.vlgmr.msra.gmra.mxu1 %vm578_vm0, %v1221_v48  ;;  %v682_v16 = vld [vmem:[%s17773_s1 + $0xe8] sm:$0xff] }
  0xcc   :  { %11433 = vmatprep.mubr.msk.f32.mxu0 %vm578_vm0, %v703_v52  ;;  %11453 = vmatprep.mubr.msk.f32.mxu1 %vm578_vm0, %v14179_v17  ;;  %v14204_v52 = vld [vmem:[#allocation2 + $0x51] sm:$0xff] }
  0xcd   :  { %11507 = vmatpush3.msra.mxu1 %v684_v4  ;;  %v14226_v4 = vld [vmem:[#allocation2 + $0xc1] sm:$0xff] }
  0xce   :  { %11508 = vmatprep.subr.mxu1 %v683_v18 }
  0xcf   :  { %11434 = vmatmul.mubr.msk.f32.gmra.mxu0 %vm578_vm0, %v14047_v1  ;;  %11454 = vmatmul.mubr.msk.f32.gmra.mxu1 %vm578_vm0, %v14189_v3  ;;  %v681_v1 = vld [vmem:[%s17773_s1 + $0xe0] sm:$0xff] }
  0xd0   :  { %11436 = vmatprep.mubr.msk.f32.mxu0 %vm578_vm0, %v14056_v33  ;;  %11456 = vmatprep.mubr.msk.f32.mxu1 %vm578_vm0, %v14191_v19  ;;  %v708_v33 = vld [vmem:[#allocation2 + $0x130] sm:$0xff] }
  0xd1   :  { %11509 = vmatpush3.msra.mxu1 %v683_v18  ;;  %v661_v18 = vld [vmem:[%s17773_s1 + $0x40] sm:$0xff] }
  0xd2   :  { %11510 = vmatprep.subr.mxu1 %v682_v16 }
  0xd3   :  { %11437 = vmatmul.mubr.msk.f32.gmra.mxu0 %vm578_vm0, %v14067_v32  ;;  %11457 = vmatmul.mubr.msk.f32.gmra.mxu1 %vm578_vm0, %v14204_v52  ;;  %v676_v32 = vld [vmem:[%s17773_s1 + $0xb8] sm:$0xff] }
  0xd4   :  { %11439 = vmatprep.mubr.msk.f32.mxu0 %vm578_vm0, %v14071_v50  ;;  %11459 = vmatprep.mubr.msk.f32.mxu1 %vm578_vm0, %v14206_v36  ;;  %v1231_v50 = vld [vmem:[#allocation2 + $0xb1] sm:$0xff] }
  0xd5   :  { %11511 = vmatpush3.msra.mxu1 %v682_v16  ;;  %v1237_v16 = vld [vmem:[#allocation2 + $0x111] sm:$0xff] }
  0xd6   :  { %11512 = vmatprep.subr.mxu1 %v681_v1 }
  0xd7   :  { %11440 = vmatmul.mubr.msk.f32.gmra.mxu0 %vm578_vm0, %v708_v33  ;;  %11460 = vmatmul.mubr.msk.f32.gmra.mxu1 %vm578_vm0, %v1227_v35  ;;  %v688_v33 = vld [vmem:[%s17773_s1 + $0x118] sm:$0xff] }
  0xd8   :  { %11462 = vmatprep.mubr.msk.f32.mxu1 %vm578_vm0, %v1230_v0  ;;  %11482 = vmatprep.mubr.msk.f32.mxu0 %vm578_vm0, %v1221_v48  ;;  %v1236_v48 = vld [vmem:[#allocation2 + $0x101] sm:$0xff]  ;;  %v675_v0 = vld [vmem:[%s17773_s1 + $0xb0] sm:$0xff] }
  0xd9   :  { %11513 = vmatpush3.msra.mxu1 %v681_v1  ;;  %v1228_v1 = vld [vmem:[#allocation2 + $0x81] sm:$0xff] }
  0xda   :  { %11570 = vmatprep.subr.mxu1 %v676_v32 }
  0xdb   :  { %11463 = vmatmul.mubr.msk.f32.gmra.mxu1 %vm578_vm0, %v1231_v50  ;;  %11483 = vmatmul.mubr.msk.f32.vlgmr.msra.gmra.mxu0 %vm578_vm0, %v14179_v17 }
  0xdc   :  { %11539 = vmatpush3.msra.mxu0 %v664_v51  ;;  %11465 = vmatprep.mubr.msk.f32.mxu1 %vm578_vm0, %v14226_v4  ;;  %v1235_v51 = vld [vmem:[#allocation2 + $0xf1] sm:$0xff] }
  0xdd   :  { %11485 = vmatprep.mubr.msk.f32.mxu0 %vm578_vm0, %v14189_v3  ;;  %11540 = vmatprep.subr.mxu0 %v663_v34 }
  0xde   :  { %11541 = vmatpush3.msra.mxu0 %v663_v34  ;;  %v1786_v34 = vld [vmem:[#allocation2 + $0x32] sm:$0xff] }
  0xdf   :  { %11466 = vmatmul.mubr.msk.f32.gmra.mxu1 %vm578_vm0, %v1233_v2  ;;  %11486 = vmatmul.mubr.msk.f32.gmra.mxu0 %vm578_vm0, %v14191_v19 }
  0xe0   :  { %11468 = vmatprep.mubr.msk.f32.mxu1 %vm578_vm0, %v1234_v20  ;;  %11488 = vmatprep.mubr.msk.f32.mxu0 %vm578_vm0, %v14204_v52 }
  0xe1   :  { %11542 = vmatprep.subr.mxu0 %v662_v49 }
  0xe2   :  { %11543 = vmatpush3.msra.mxu0 %v662_v49  ;;  %v686_v49 = vld [vmem:[%s17773_s1 + $0x108] sm:$0xff] }
  0xe3   :  { %11469 = vmatmul.mubr.msk.f32.gmra.mxu1 %vm578_vm0, %v1235_v51  ;;  %11489 = vmatmul.mubr.msk.f32.gmra.mxu0 %vm578_vm0, %v14206_v36 }
  0xe4   :  { %11471 = vmatprep.mubr.msk.f32.mxu1 %vm578_vm0, %v1236_v48  ;;  %11491 = vmatprep.mubr.msk.f32.mxu0 %vm578_vm0, %v1227_v35 }
  0xe5   :  { %11544 = vmatprep.subr.mxu0 %v661_v18 }
  0xe6   :  { %11545 = vmatpush3.msra.mxu0 %v661_v18  ;;  %v685_v18 = vld [vmem:[%s17773_s1 + $0x100] sm:$0xff] }
  0xe7   :  { %11472 = vmatmul.mubr.msk.f32.gmra.mxu1 %vm578_vm0, %v1237_v16  ;;  %11492 = vmatmul.mubr.msk.f32.gmra.mxu0 %vm578_vm0, %v1228_v1 }
  0xe8   :  { %11494 = vmatprep.mubr.msk.f32.mxu0 %vm578_vm0, %v1231_v50  ;;  %11514 = vmatprep.mubr.msk.f32.mxu1 %vm578_vm0, %v14179_v17  ;;  %v674_v17 = vld [vmem:[%s17773_s1 + $0xa8] sm:$0xff]  ;;  %v687_v50 = vld [vmem:[%s17773_s1 + $0x110] sm:$0xff] }
  0xe9   :  { %11602 = vmatprep.subr.mxu0 %v688_v33 }
  0xeb   :  { %11495 = vmatmul.mubr.msk.f32.gmra.mxu0 %vm578_vm0, %v14226_v4  ;;  %11515 = vmatmul.mubr.msk.f32.vlgmr.msra.gmra.mxu1 %vm578_vm0, %v14189_v3  ;;  %v673_v3 = vld [vmem:[%s17773_s1 + $0xa0] sm:$0xff] }
  0xec   :  { %11497 = vmatprep.mubr.msk.f32.mxu0 %vm578_vm0, %v1233_v2  ;;  %11517 = vmatprep.mubr.msk.f32.mxu1 %vm578_vm0, %v14191_v19  ;;  %v1238_v19 = vld [vmem:[#allocation2 + $0x121] sm:$0xff] }
  0xed   :  { %11571 = vmatpush3.msra.mxu1 %v676_v32  ;;  %v1783_v32 = vld [vmem:[#allocation2 + $0x2] sm:$0xff] }
  0xee   :  { %11572 = vmatprep.subr.mxu1 %v675_v0 }
  0xef   :  { %11498 = vmatmul.mubr.msk.f32.gmra.mxu0 %vm578_vm0, %v1234_v20  ;;  %11518 = vmatmul.mubr.msk.f32.gmra.mxu1 %vm578_vm0, %v14204_v52  ;;  %v1229_v52 = vld [vmem:[#allocation2 + $0x91] sm:$0xff] }
  0xf0   :  { %11500 = vmatprep.mubr.msk.f32.mxu0 %vm578_vm0, %v1235_v51  ;;  %11520 = vmatprep.mubr.msk.f32.mxu1 %vm578_vm0, %v14206_v36  ;;  %v1784_v36 = vld [vmem:[#allocation2 + $0x12] sm:$0xff] }
  0xf1   :  { %11573 = vmatpush3.msra.mxu1 %v675_v0  ;;  %v1796_v0 = vld [vmem:[#allocation2 + $0xd2] sm:$0xff] }
  0xf2   :  { %11574 = vmatprep.subr.mxu1 %v674_v17 }
  0xf3   :  { %11501 = vmatmul.mubr.msk.f32.gmra.mxu0 %vm578_vm0, %v1236_v48  ;;  %11521 = vmatmul.mubr.msk.f32.gmra.mxu1 %vm578_vm0, %v1227_v35  ;;  %v1785_v35 = vld [vmem:[#allocation2 + $0x22] sm:$0xff] }
  0xf4   :  { %11503 = vmatprep.mubr.msk.f32.mxu0 %vm578_vm0, %v1237_v16  ;;  %11523 = vmatprep.mubr.msk.f32.mxu1 %vm578_vm0, %v1228_v1  ;;  %v1793_v1 = vld [vmem:[#allocation2 + $0xa2] sm:$0xff] }
  0xf5   :  { %11575 = vmatpush3.msra.mxu1 %v674_v17  ;;  %v1797_v17 = vld [vmem:[#allocation2 + $0xe2] sm:$0xff] }
  0xf6   :  { %11576 = vmatprep.subr.mxu1 %v673_v3 }
  0xf7   :  { %11504 = vmatmul.mubr.msk.f32.gmra.mxu0 %vm578_vm0, %v1238_v19  ;;  %11524 = vmatmul.mubr.msk.f32.gmra.mxu1 %vm578_vm0, %v1229_v52  ;;  %v1800_v52 = vld [vmem:[#allocation2 + $0x112] sm:$0xff] }
  0xf8   :  { %11526 = vmatprep.mubr.msk.f32.mxu1 %vm578_vm0, %v14226_v4  ;;  %11546 = vmatprep.mubr.msk.f32.mxu0 %vm578_vm0, %v1783_v32  ;;  %v1787_v4 = vld [vmem:[#allocation2 + $0x42] sm:$0xff] }
  0xf9   :  { %11577 = vmatpush3.msra.mxu1 %v673_v3  ;;  %v1798_v3 = vld [vmem:[#allocation2 + $0xf2] sm:$0xff]  ;;  %v1791_v32 = vld [vmem:[#allocation2 + $0x82] sm:$0xff] }
  0xfb   :  { %11527 = vmatmul.mubr.msk.f32.gmra.mxu1 %vm578_vm0, %v1233_v2  ;;  %11547 = vmatmul.mubr.msk.f32.vlgmr.msra.gmra.mxu0 %vm578_vm0, %v1784_v36  ;;  %v1788_v2 = vld [vmem:[#allocation2 + $0x52] sm:$0xff] }
  0xfc   :  { %11603 = vmatpush3.msra.mxu0 %v688_v33  ;;  %11529 = vmatprep.mubr.msk.f32.mxu1 %vm578_vm0, %v1234_v20  ;;  %v1789_v20 = vld [vmem:[#allocation2 + $0x62] sm:$0xff] }
  0xfd   :  { %11549 = vmatprep.mubr.msk.f32.mxu0 %vm578_vm0, %v1785_v35  ;;  %11604 = vmatprep.subr.mxu0 %v687_v50  ;;  %v1795_v33 = vld [vmem:[#allocation2 + $0xc2] sm:$0xff] }
  0xfe   :  { %11605 = vmatpush3.msra.mxu0 %v687_v50  ;;  %v1802_v50 = vld [vmem:[#allocation2 + $0x132] sm:$0xff] }
  0xff   :  { %11530 = vmatmul.mubr.msk.f32.gmra.mxu1 %vm578_vm0, %v1235_v51  ;;  %11550 = vmatmul.mubr.msk.f32.gmra.mxu0 %vm578_vm0, %v1786_v34  ;;  %v1239_v51 = vld [vmem:[#allocation2 + $0x131] sm:$0xff] }
 0x100   :  { %11532 = vmatprep.mubr.msk.f32.mxu1 %vm578_vm0, %v1236_v48  ;;  %11552 = vmatprep.mubr.msk.f32.mxu0 %vm578_vm0, %v1787_v4  ;;  %v1790_v48 = vld [vmem:[#allocation2 + $0x72] sm:$0xff] }
 0x101   :  { %11606 = vmatprep.subr.mxu0 %v686_v49 }
 0x102   :  { %11607 = vmatpush3.msra.mxu0 %v686_v49 }
 0x103   :  { %11533 = vmatmul.mubr.msk.f32.gmra.mxu1 %vm578_vm0, %v1237_v16  ;;  %11553 = vmatmul.mubr.msk.f32.gmra.mxu0 %vm578_vm0, %v1788_v2  ;;  %v1794_v16 = vld [vmem:[#allocation2 + $0xb2] sm:$0xff] }
 0x104   :  { %11535 = vmatprep.mubr.msk.f32.mxu1 %vm578_vm0, %v1238_v19  ;;  %11555 = vmatprep.mubr.msk.f32.mxu0 %vm578_vm0, %v1789_v20  ;;  %v1799_v19 = vld [vmem:[#allocation2 + $0x102] sm:$0xff] }
 0x105   :  { %11608 = vmatprep.subr.mxu0 %v685_v18 }
 0x106   :  { %11609 = vmatpush3.msra.mxu0 %v685_v18  ;;  %v9790_v18 = vld [vmem:[%s17773_s1 + $0x138] sm:$0xff] }
 0x107   :  { %11536 = vmatmul.mubr.msk.f32.gmra.mxu1 %vm578_vm0, %v1239_v51  ;;  %11556 = vmatmul.mubr.msk.f32.gmra.mxu0 %vm578_vm0, %v1790_v48 }
 0x108   :  { %11558 = vmatprep.mubr.msk.f32.mxu0 %vm578_vm0, %v1793_v1  ;;  %11578 = vmatprep.mubr.msk.f32.mxu1 %vm578_vm0, %v1784_v36  ;;  %v1801_v36 = vld [vmem:[#allocation2 + $0x122] sm:$0xff]  ;;  %v9789_v1 = vld [vmem:[%s17773_s1 + $0x130] sm:$0xff] }
 0x109   :  { %11666 = vmatprep.subr.mxu0 %v9790_v18 }
 0x10b   :  { %11559 = vmatmul.mubr.msk.f32.gmra.mxu0 %vm578_vm0, %v1794_v16  ;;  %11579 = vmatmul.mubr.msk.f32.vlgmr.msra.gmra.mxu1 %vm578_vm0, %v1785_v35 }
 0x10c   :  { %11561 = vmatprep.mubr.msk.f32.mxu0 %vm578_vm0, %v1795_v33  ;;  %11581 = vmatprep.mubr.msk.f32.mxu1 %vm578_vm0, %v1786_v34 }
 0x10f   :  { %11562 = vmatmul.mubr.msk.f32.gmra.mxu0 %vm578_vm0, %v1796_v0  ;;  %11582 = vmatmul.mubr.msk.f32.gmra.mxu1 %vm578_vm0, %v1787_v4 }
 0x110   :  { %11564 = vmatprep.mubr.msk.f32.mxu0 %vm578_vm0, %v1797_v17  ;;  %11584 = vmatprep.mubr.msk.f32.mxu1 %vm578_vm0, %v1788_v2 }
 0x113   :  { %11565 = vmatmul.mubr.msk.f32.gmra.mxu0 %vm578_vm0, %v1798_v3  ;;  %11585 = vmatmul.mubr.msk.f32.gmra.mxu1 %vm578_vm0, %v1789_v20 }
 0x114   :  { %11567 = vmatprep.mubr.msk.f32.mxu0 %vm578_vm0, %v1799_v19  ;;  %11587 = vmatprep.mubr.msk.f32.mxu1 %vm578_vm0, %v1790_v48 }
 0x117   :  { %11568 = vmatmul.mubr.msk.f32.gmra.mxu0 %vm578_vm0, %v1800_v52  ;;  %11588 = vmatmul.mubr.msk.f32.gmra.mxu1 %vm578_vm0, %v1791_v32 }
 0x118   :  { %11590 = vmatprep.mubr.msk.f32.mxu1 %vm578_vm0, %v1794_v16  ;;  %11610 = vmatprep.mubr.msk.f32.mxu0 %vm578_vm0, %v1785_v35  ;;  %v1792_v35 = vld [vmem:[#allocation2 + $0x92] sm:$0xff] }
 0x11b   :  { %11591 = vmatmul.mubr.msk.f32.gmra.mxu1 %vm578_vm0, %v1795_v33  ;;  %11611 = vmatmul.mubr.msk.f32.vlgmr.msra.gmra.mxu0 %vm578_vm0, %v1786_v34  ;;  %v9802_v34 = vld [vmem:[%s17773_s1 + $0x198] sm:$0xff] }
 0x11c   :  { %11593 = vmatprep.mubr.msk.f32.mxu1 %vm578_vm0, %v1796_v0  ;;  %11613 = vmatprep.mubr.msk.f32.mxu0 %vm578_vm0, %v1787_v4  ;;  %v9801_v4 = vld [vmem:[%s17773_s1 + $0x190] sm:$0xff] }
 0x11d   :  { %11634 = vmatprep.subr.mxu1 %v9802_v34  ;;  %11667 = vmatpush3.msra.mxu0 %v9790_v18 }
 0x11e   :  { %11635 = vmatpush3.msra.mxu1 %v9802_v34  ;;  %11668 = vmatprep.subr.mxu0 %v9789_v1 }
 0x11f   :  { %11594 = vmatmul.mubr.msk.f32.gmra.mxu1 %vm578_vm0, %v1797_v17  ;;  %11614 = vmatmul.mubr.msk.f32.gmra.mxu0 %vm578_vm0, %v1788_v2 }
 0x120   :  { %11596 = vmatprep.mubr.msk.f32.mxu1 %vm578_vm0, %v1798_v3  ;;  %11616 = vmatprep.mubr.msk.f32.mxu0 %vm578_vm0, %v1789_v20  ;;  %v9800_v20 = vld [vmem:[%s17773_s1 + $0x188] sm:$0xff] }
 0x121   :  { %11636 = vmatprep.subr.mxu1 %v9801_v4  ;;  %11669 = vmatpush3.msra.mxu0 %v9789_v1 }
 0x122   :  { %11637 = vmatpush3.msra.mxu1 %v9801_v4 }
 0x123   :  { %11597 = vmatmul.mubr.msk.f32.gmra.mxu1 %vm578_vm0, %v1799_v19  ;;  %11617 = vmatmul.mubr.msk.f32.gmra.mxu0 %vm578_vm0, %v1790_v48 }
 0x124   :  { %11599 = vmatprep.mubr.msk.f32.mxu1 %vm578_vm0, %v1800_v52  ;;  %11619 = vmatprep.mubr.msk.f32.mxu0 %vm578_vm0, %v1791_v32  ;;  %v2438_v32 = vld [vmem:[#allocation2] sm:$0xff] }
 0x125   :  { %11638 = vmatprep.subr.mxu1 %v9800_v20 }
 0x126   :  { %11639 = vmatpush3.msra.mxu1 %v9800_v20 }
 0x127   :  { %11600 = vmatmul.mubr.msk.f32.gmra.mxu1 %vm578_vm0, %v1801_v36  ;;  %11620 = vmatmul.mubr.msk.f32.gmra.mxu0 %vm578_vm0, %v1792_v35 }
 0x128   :  { %11622 = vmatprep.mubr.msk.f32.mxu0 %vm578_vm0, %v1795_v33 }
 0x12b   :  { %11623 = vmatmul.mubr.msk.f32.gmra.mxu0 %vm578_vm0, %v1796_v0  ;;  %v9788_v0 = vld [vmem:[%s17773_s1 + $0x128] sm:$0xff] }
 0x12c   :  { %11625 = vmatprep.mubr.msk.f32.mxu0 %vm578_vm0, %v1797_v17  ;;  %11670 = vmatprep.subr.mxu0 %v9788_v0 }
 0x12d   :  { %11671 = vmatpush3.msra.mxu0 %v9788_v0 }
 0x12f   :  { %11626 = vmatmul.mubr.msk.f32.gmra.mxu0 %vm578_vm0, %v1798_v3 }
 0x130   :  { %11628 = vmatprep.mubr.msk.f32.mxu0 %vm578_vm0, %v1799_v19  ;;  %v9787_v19 = vld [vmem:[%s17773_s1 + $0x120] sm:$0xff] }
 0x131   :  { %11672 = vmatprep.subr.mxu0 %v9787_v19 }
 0x132   :  { %11673 = vmatpush3.msra.mxu0 %v9787_v19 }
 0x133   :  { %11629 = vmatmul.mubr.msk.f32.gmra.mxu0 %vm578_vm0, %v1800_v52  ;;  %v9799_v52 = vld [vmem:[%s17773_s1 + $0x180] sm:$0xff] }
 0x134   :  { %11631 = vmatprep.mubr.msk.f32.mxu0 %vm578_vm0, %v1801_v36  ;;  %11640 = vmatprep.subr.mxu1 %v9799_v52 }
 0x135   :  { %11641 = vmatpush3.msra.mxu1 %v9799_v52 }
 0x136   :  { %11698 = vmatprep.subr.mxu1 %v14403_v5 }
 0x137   :  { %11632 = vmatmul.mubr.msk.f32.gmra.mxu0 %vm578_vm0, %v1802_v50 }
 0x138   :  { %11674 = vmatprep.mubr.msk.f32.mxu0 %vm578_vm0, %v2438_v32 }
 0x161   :  { %v11356_v49 = vpop.f32.mrf.mxu0 }
 0x162   :  { %v14363_v2 = vpop.f32.mrf.mxu1 }
 0x163   :  { %v14371_v51 = vpop.f32.mrf.mxu0 }
 0x164   :  { %v14373_v48 = vpop.f32.mrf.mxu1 }
 0x165   :  { %v11359_v16 = vpop.f32.mrf.mxu0 }
 0x166   :  { %v11377_v33 = vpop.f32.mrf.mxu1 }
 0x167   :  { %v14381_v17 = vpop.f32.mrf.mxu0 }
 0x168   :  { %v14383_v3 = vpop.f32.mrf.mxu1 }
 0x16a   :  { %v11362_v36 = vpop.f32.mrf.mxu0 }
 0x16b   :  { %v11388_v35 = vpop.f32.mrf.mxu1 }
 0x16c   :  { %v980_v50 = vadd.f32 %v11388_v35, %v11356_v49  ;;  %v14392_v34 = vpop.f32.mrf.mxu0 }
 0x16d   :  { %v14394_v4 = vpop.f32.mrf.mxu1 }
 0x16e   :  { %v11365_v20 = vpop.f32.mrf.mxu0 }
 0x16f   :  { %v11391_v18 = vpop.f32.mrf.mxu1 }
 0x170   :  { %v990_v1 = vadd.f32 %v11391_v18, %v11359_v16  ;;  %v14396_v0 = vpop.f32.mrf.mxu0 }
 0x171   :  { %v14398_v37 = vpop.f32.mrf.mxu1 }
 0x172   :  { %v11368_v49 = vpop.f32.mrf.mxu0 }
 0x173   :  { %v11394_v19 = vpop.f32.mrf.mxu1 }
 0x174   :  { %v1000_v52 = vadd.f32 %v11394_v19, %v11362_v36  ;;  %v14406_v32 = vpop.f32.mrf.mxu0 }
 0x175   :  { %v14408_v35 = vpop.f32.mrf.mxu1 }
 0x176   :  { %v11371_v53 = vpop.f32.mrf.mxu0 }
 0x177   :  { %v11397_v16 = vpop.f32.mrf.mxu1 }
 0x178   :  { %v1010_v18 = vadd.f32 %v11397_v16, %v11365_v20  ;;  %v14410_v21 = vpop.f32.mrf.mxu0 }
 0x179   :  { %v14412_v38 = vpop.f32.mrf.mxu1 }
 0x17a   :  { %v11420_v54 = vpop.f32.mrf.mxu0 }
 0x17b   :  { %v11400_v6 = vpop.f32.mrf.mxu1  ;;  %v14414_v39 = vadd.f32 %v11420_v54, %v980_v50 }
 0x17c   :  { %v1020_v22 = vadd.f32 %v11400_v6, %v11368_v49  ;;  %v14418_v55 = vpop.f32.mrf.mxu0  ;;  %v14429_v6 = vld [vmem:[%s17773_s1 + $0x158] sm:$0xff] }
 0x17d   :  { %v14416_v7 = vpop.f32.mrf.mxu1  ;;  %18051 = vst [vmem:[#allocation268_spill] sm:$0xff] %v14429_v6  ;;  %11730 = vmatprep.subr.mxu0 %v14429_v6 }
 0x17f   :  { %v11403_v36 = vpop.f32.mrf.mxu1  ;;  %v11423_v19 = vpop.f32.mrf.mxu0 }
 0x180   :  { %v1030_v23 = vadd.f32 %v11403_v36, %v11371_v53  ;;  %v14420_v40 = vadd.f32 %v11423_v19, %v990_v1 }
 0x181   :  { %v14422_v8 = vpop.f32.mrf.mxu1  ;;  %v14424_v20 = vpop.f32.mrf.mxu0 }
 0x183   :  { %v11406_v16 = vpop.f32.mrf.mxu1  ;;  %v11426_v56 = vpop.f32.mrf.mxu0 }
 0x184   :  { %v1040_v54 = vadd.f32 %v11406_v16, %v14363_v2  ;;  %v14432_v50 = vadd.f32 %v11426_v56, %v1000_v52 }
 0x185   :  { %v14435_v53 = vpop.f32.mrf.mxu1  ;;  %v14437_v1 = vpop.f32.mrf.mxu0 }
 0x187   :  { %v11409_v49 = vpop.f32.mrf.mxu1  ;;  %v11429_v36 = vpop.f32.mrf.mxu0 }
 0x188   :  { %v1050_v19 = vadd.f32 %v11409_v49, %v11377_v33  ;;  %v14439_v24 = vadd.f32 %v11429_v36, %v1010_v18 }
 0x189   :  { %v14441_v41 = vpop.f32.mrf.mxu1  ;;  %v14443_v9 = vpop.f32.mrf.mxu0 }
 0x18b   :  { %v11432_v57 = vpop.f32.mrf.mxu0  ;;  %v14445_v25 = vpop.f32.mrf.mxu1 }
 0x18c   :  { %v14447_v56 = vadd.f32 %v11432_v57, %v1020_v22 }
 0x18d   :  { %v14449_v2 = vpop.f32.mrf.mxu0  ;;  %v14451_v52 = vpop.f32.mrf.mxu1 }
 0x18f   :  { %v11435_v16 = vpop.f32.mrf.mxu0  ;;  %v14453_v42 = vpop.f32.mrf.mxu1 }
 0x190   :  { %v14455_v10 = vadd.f32 %v11435_v16, %v1030_v23 }
 0x191   :  { %v14457_v33 = vpop.f32.mrf.mxu0  ;;  %v14459_v18 = vpop.f32.mrf.mxu1 }
 0x192   :  { %18052 = vst [vmem:[#allocation269_spill] sm:$0xff] %v14455_v10 }
 0x193   :  { %v11438_v49 = vpop.f32.mrf.mxu0  ;;  %v14461_v36 = vpop.f32.mrf.mxu1 }
 0x194   :  { %v14463_v58 = vadd.f32 %v11438_v49, %v1040_v54 }
 0x195   :  { %v14465_v22 = vpop.f32.mrf.mxu0  ;;  %v14467_v57 = vpop.f32.mrf.mxu1 }
 0x196   :  { %18053 = vst [vmem:[#allocation270_spill] sm:$0xff] %v14463_v58 }
 0x197   :  { %v11441_v26 = vpop.f32.mrf.mxu0  ;;  %v14469_v43 = vpop.f32.mrf.mxu1 }
 0x198   :  { %v14471_v11 = vadd.f32 %v11441_v26, %v1050_v19 }
 0x199   :  { %v14473_v23 = vpop.f32.mrf.mxu0  ;;  %v14475_v16 = vpop.f32.mrf.mxu1 }
 0x19a   :  { %18054 = vst [vmem:[#allocation271_spill] sm:$0xff] %v14471_v11 }
 0x19b   :  { %v14477_v59 = vpop.f32.mrf.mxu1  ;;  %v11484_v27 = vpop.f32.mrf.mxu0 }
 0x19d   :  { %v14479_v44 = vpop.f32.mrf.mxu1  ;;  %v14481_v54 = vpop.f32.mrf.mxu0 }
 0x19e   :  { %18055 = vst [vmem:[#allocation272_spill] sm:$0xff] %v14479_v44 }
 0x19f   :  { %v14483_v49 = vpop.f32.mrf.mxu1  ;;  %v14485_v12 = vpop.f32.mrf.mxu0 }
 0x1a0   :  { %18056 = vst [vmem:[#allocation273_spill] sm:$0xff] %v14483_v49 }
 0x1a1   :  { %v14487_v60 = vpop.f32.mrf.mxu1  ;;  %v14489_v28 = vpop.f32.mrf.mxu0 }
 0x1a2   :  { %18057 = vst [vmem:[#allocation274_spill] sm:$0xff] %v14487_v60 }
 0x1a3   :  { %v14491_v26 = vpop.f32.mrf.mxu1  ;;  %v14493_v19 = vpop.f32.mrf.mxu0 }
 0x1a4   :  { %18058 = vst [vmem:[#allocation275_spill] sm:$0xff] %v14491_v26 }
 0x1a5   :  { %v14495_v45 = vpop.f32.mrf.mxu1  ;;  %v14497_v13 = vpop.f32.mrf.mxu0 }
 0x1a6   :  { %18059 = vst [vmem:[#allocation276_spill] sm:$0xff] %v14495_v45 }
 0x1a7   :  { %v14499_v61 = vpop.f32.mrf.mxu1  ;;  %v14501_v29 = vpop.f32.mrf.mxu0 }
 0x1a8   :  { %18060 = vst [vmem:[#allocation277_spill] sm:$0xff] %v14499_v61  ;;  %18061 = vst [vmem:[#allocation278_spill] sm:$0xff] %v14501_v29 }
 0x1a9   :  { %v14503_v46 = vpop.f32.mrf.mxu1  ;;  %v14505_v14 = vpop.f32.mrf.mxu0 }
 0x1aa   :  { %18062 = vst [vmem:[#allocation279_spill] sm:$0xff] %v14503_v46  ;;  %18063 = vst [vmem:[#allocation280_spill] sm:$0xff] %v14505_v14 }
 0x1ab   :  { %v14507_v62 = vpop.f32.mrf.mxu0  ;;  %v11516_v30 = vpop.f32.mrf.mxu1 }
 0x1ac   :  { %18064 = vst [vmem:[#allocation281_spill] sm:$0xff] %v14507_v62 }
 0x1ad   :  { %v14509_v47 = vpop.f32.mrf.mxu0  ;;  %v14511_v15 = vpop.f32.mrf.mxu1 }
 0x1ae   :  { %18065 = vst [vmem:[#allocation282_spill] sm:$0xff] %v14509_v47 }
 0x1af   :  { %v14513_v63 = vpop.f32.mrf.mxu0  ;;  %v14515_v31 = vpop.f32.mrf.mxu1 }
 0x1b0   :  { %18066 = vst [vmem:[#allocation283_spill] sm:$0xff] %v14513_v63 }
 0x1b1   :  { %v14517_v6 = vpop.f32.mrf.mxu0  ;;  %v14519_v5 = vpop.f32.mrf.mxu1 }
 0x1b2   :  { %18067 = vst [vmem:[#allocation284_spill] sm:$0xff] %v14517_v6 }
 0x1b3   :  { %v14521_v61 = vpop.f32.mrf.mxu0  ;;  %v14523_v46 = vpop.f32.mrf.mxu1 }
 0x1b4   :  { %18068 = vst [vmem:[#allocation285_spill] sm:$0xff] %v14521_v61  ;;  %18069 = vst [vmem:[#allocation286_spill] sm:$0xff] %v14523_v46 }
 0x1b5   :  { %v14525_v11 = vpop.f32.mrf.mxu0  ;;  %v14527_v45 = vpop.f32.mrf.mxu1 }
 0x1b6   :  { %18070 = vst [vmem:[#allocation287_spill] sm:$0xff] %v14525_v11  ;;  %18071 = vst [vmem:[#allocation288_spill] sm:$0xff] %v14527_v45 }
 0x1b7   :  { %v14529_v26 = vpop.f32.mrf.mxu0  ;;  %v14531_v47 = vpop.f32.mrf.mxu1 }
 0x1b8   :  { %18072 = vst [vmem:[#allocation289_spill] sm:$0xff] %v14529_v26  ;;  %18073 = vst [vmem:[#allocation290_spill] sm:$0xff] %v14531_v47 }
 0x1b9   :  { %v14533_v58 = vpop.f32.mrf.mxu0  ;;  %v14535_v63 = vpop.f32.mrf.mxu1 }
 0x1ba   :  { %18074 = vst [vmem:[#allocation291_spill] sm:$0xff] %v14533_v58  ;;  %18075 = vst [vmem:[#allocation292_spill] sm:$0xff] %v14535_v63 }
 0x1bb   :  { %v14537_v62 = vpop.f32.mrf.mxu1  ;;  %v11548_v6 = vpop.f32.mrf.mxu0 }
 0x1bc   :  { %18076 = vst [vmem:[#allocation293_spill] sm:$0xff] %v14537_v62 }
 0x1bd   :  { %v14539_v60 = vpop.f32.mrf.mxu1  ;;  %v1917_v61 = vpop.f32.mrf.mxu0 }
 0x1be   :  { %18077 = vst [vmem:[#allocation294_spill] sm:$0xff] %v14539_v60 }
 0x1bf   :  { %v14541_v14 = vpop.f32.mrf.mxu1  ;;  %v14543_v49 = vpop.f32.mrf.mxu0 }
 0x1c0   :  { %18078 = vst [vmem:[#allocation295_spill] sm:$0xff] %v14541_v14 }
 0x1c1   :  { %v14545_v11 = vpop.f32.mrf.mxu1  ;;  %v14547_v10 = vpop.f32.mrf.mxu0 }
 0x1c2   :  { %18079 = vst [vmem:[#allocation296_spill] sm:$0xff] %v14545_v11  ;;  %18080 = vst [vmem:[#allocation297_spill] sm:$0xff] %v14547_v10 }
 0x1c3   :  { %v14549_v26 = vpop.f32.mrf.mxu1  ;;  %v14551_v47 = vpop.f32.mrf.mxu0 }
 0x1c4   :  { %18081 = vst [vmem:[#allocation298_spill] sm:$0xff] %v14549_v26  ;;  %18082 = vst [vmem:[#allocation299_spill] sm:$0xff] %v14551_v47 }
 0x1c5   :  { %v14553_v58 = vpop.f32.mrf.mxu1  ;;  %v14555_v63 = vpop.f32.mrf.mxu0 }
 0x1c6   :  { %18083 = vst [vmem:[#allocation300_spill] sm:$0xff] %v14553_v58  ;;  %18084 = vst [vmem:[#allocation301_spill] sm:$0xff] %v14555_v63  ;;  %v975_v58 = vadd.f32 %v14394_v4, %v14371_v51  ;;  %v995_v51 = vadd.f32 %v14408_v35, %v14392_v34  ;;  %v1005_v4 = vadd.f32 %v14412_v38, %v14396_v0 }
 0x1c7   :  { %v14557_v62 = vpop.f32.mrf.mxu1  ;;  %v14559_v60 = vpop.f32.mrf.mxu0  ;;  %v1035_v38 = vadd.f32 %v14435_v53, %v14373_v48 }
 0x1c8   :  { %18085 = vst [vmem:[#allocation302_spill] sm:$0xff] %v14557_v62  ;;  %18086 = vst [vmem:[#allocation303_spill] sm:$0xff] %v14559_v60 }
 0x1c9   :  { %v14561_v45 = vpop.f32.mrf.mxu1  ;;  %v14563_v14 = vpop.f32.mrf.mxu0 }
 0x1ca   :  { %18087 = vst [vmem:[#allocation304_spill] sm:$0xff] %v14561_v45  ;;  %18088 = vst [vmem:[#allocation305_spill] sm:$0xff] %v14563_v14  ;;  %v1204_v45 = vadd.f32 %v14418_v55, %v975_v58  ;;  %v1434_v14 = vadd.f32 %v14445_v25, %v14414_v39  ;;  %v1015_v55 = vadd.f32 %v14416_v7, %v14406_v32 }
 0x1cb   :  { %v14565_v29 = vpop.f32.mrf.mxu0  ;;  %v11580_v11 = vpop.f32.mrf.mxu1  ;;  %v1025_v25 = vadd.f32 %v14422_v8, %v14410_v21  ;;  %v1208_v7 = vadd.f32 %v14437_v1, %v995_v51  ;;  %v1045_v8 = vadd.f32 %v14441_v41, %v14383_v3  ;;  %v1210_v21 = vadd.f32 %v14443_v9, %v1005_v4  ;;  %v18095_v51 = vld [vmem:[#allocation278_spill] sm:$0xff]  ;;  %v18096_v4 = vld [vmem:[#allocation288_spill] sm:$0xff] }
 0x1cc   :  { %18089 = vst [vmem:[#allocation306_spill] sm:$0xff] %v14565_v29  ;;  %v1601_v46 = vadd.f32 %v11484_v27, %v1434_v14  ;;  %v1436_v14 = vadd.f32 %v14453_v42, %v14420_v40  ;;  %v1438_v41 = vadd.f32 %v14461_v36, %v14432_v50  ;;  %v14621_v9 = vadd.f32 %v14465_v22, %v1035_v38 }
 0x1cd   :  { %v14567_v44 = vpop.f32.mrf.mxu0  ;;  %v2084_v26 = vpop.f32.mrf.mxu1  ;;  %v1437_v35 = vadd.f32 %v14467_v57, %v1208_v7  ;;  %v18093_v57 = vld [vmem:[#allocation297_spill] sm:$0xff]  ;;  %v18100_v7 = vld [vmem:[#allocation280_spill] sm:$0xff] }
 0x1ce   :  { %18090 = vst [vmem:[#allocation307_spill] sm:$0xff] %v14567_v44  ;;  %v1433_v44 = vadd.f32 %v14451_v52, %v1204_v45  ;;  %v1768_v45 = vadd.f32 %v11516_v30, %v1601_v46  ;;  %v1603_v40 = vadd.f32 %v14485_v12, %v1436_v14  ;;  %v1214_v46 = vadd.f32 %v14457_v33, %v1025_v25  ;;  %v18092_v33 = vld [vmem:[#allocation286_spill] sm:$0xff] }
 0x1cf   :  { %v14569_v10 = vpop.f32.mrf.mxu0  ;;  %v11583_v47 = vpop.f32.mrf.mxu1  ;;  %v1605_v50 = vadd.f32 %v14493_v19, %v1438_v41  ;;  %v1604_v52 = vadd.f32 %v14497_v13, %v1437_v35  ;;  %v18104_v35 = vld [vmem:[#allocation281_spill] sm:$0xff] }
 0x1d0   :  { %18091 = vst [vmem:[#allocation308_spill] sm:$0xff] %v14569_v10  ;;  %v985_v10 = vadd.f32 %v14398_v37, %v14381_v17  ;;  %v1600_v27 = vadd.f32 %v14481_v54, %v1433_v44  ;;  %v1997_v42 = vadd.f32 %v11548_v6, %v1768_v45  ;;  %v1212_v44 = vadd.f32 %v14449_v2, %v1015_v55  ;;  %v18098_v45 = vld [vmem:[#allocation269_spill] sm:$0xff] }
 0x1d1   :  { %v14573_v63 = vpop.f32.mrf.mxu0  ;;  %v14575_v62 = vpop.f32.mrf.mxu1  ;;  %v1770_v12 = vadd.f32 %v14515_v31, %v1603_v40  ;;  %v14633_v6 = vadd.f32 %v14473_v23, %v1045_v8  ;;  %v1771_v55 = vadd.f32 %v18096_v4, %v1604_v52  ;;  %v18102_v40 = vld [vmem:[#allocation301_spill] sm:$0xff] }
 0x1d2   :  { %v1206_v37 = vadd.f32 %v14424_v20, %v985_v10  ;;  %v1767_v30 = vadd.f32 %v14511_v15, %v1600_v27  ;;  %v2164_v32 = vadd.f32 %v11580_v11, %v1997_v42  ;;  %v1440_v20 = vadd.f32 %v14469_v43, %v14439_v24 }
 0x1d3   :  { %v14580_v29 = vpop.f32.mrf.mxu0  ;;  %v14582_v60 = vpop.f32.mrf.mxu1  ;;  %v1999_v31 = vadd.f32 %v14543_v49, %v1770_v12  ;;  %v1439_v24 = vadd.f32 %v14475_v16, %v1210_v21  ;;  %v1442_v43 = vadd.f32 %v14477_v59, %v14447_v56  ;;  %v18097_v59 = vld [vmem:[#allocation299_spill] sm:$0xff]  ;;  %v18101_v21 = vld [vmem:[#allocation290_spill] sm:$0xff] }
 0x1d4   :  { %v1435_v10 = vadd.f32 %v14459_v18, %v1206_v37  ;;  %v1996_v15 = vadd.f32 %v1917_v61, %v1767_v30  ;;  %v1772_v18 = vadd.f32 %v18092_v33, %v1605_v50  ;;  %v1607_v16 = vadd.f32 %v18095_v51, %v1440_v20  ;;  %v18105_v50 = vld [vmem:[#allocation292_spill] sm:$0xff]  ;;  %v18107_v33 = vld [vmem:[#allocation270_spill] sm:$0xff] }
 0x1d5   :  { %v14595_v39 = vpop.f32.mrf.mxu0  ;;  %v14597_v58 = vpop.f32.mrf.mxu1  ;;  %v2166_v54 = vadd.f32 %v11583_v47, %v1999_v31  ;;  %v18099_v47 = vld [vmem:[#allocation273_spill] sm:$0xff]  ;;  %v1606_v8 = vadd.f32 %v18100_v7, %v1439_v24  ;;  %v2000_v30 = vadd.f32 %v18102_v40, %v1771_v55  ;;  %v1609_v20 = vadd.f32 %v18104_v35, %v1442_v43  ;;  %v18112_v55 = vld [vmem:[#allocation276_spill] sm:$0xff] }
 0x1d6   :  { %v1602_v0 = vadd.f32 %v14489_v28, %v1435_v10  ;;  %v14641_v28 = vld [vmem:[%s17774_s2] ss:$0 sm:$0xff]  ;;  %v2163_v61 = vadd.f32 %v2084_v26, %v1996_v15  ;;  %v18094_v26 = vld [vmem:[#allocation272_spill] sm:$0xff]  ;;  %v2001_v56 = vadd.f32 %v18097_v59, %v1772_v18  ;;  %v1444_v38 = vadd.f32 %v18099_v47, %v18098_v45  ;;  %v18108_v18 = vld [vmem:[#allocation275_spill] sm:$0xff] }
 0x1d7   :  { %v14609_v17 = vpop.f32.mrf.mxu0  ;;  %v14611_v34 = vpop.f32.mrf.mxu1  ;;  %v1441_v19 = vadd.f32 %v18094_v26, %v1212_v44  ;;  %v1774_v10 = vadd.f32 %v18101_v21, %v1607_v16  ;;  %v18103_v15 = vld [vmem:[#allocation274_spill] sm:$0xff]  ;;  %v1445_v59 = vadd.f32 %v18112_v55, %v14621_v9  ;;  %v18117_v21 = vld [vmem:[#allocation277_spill] sm:$0xff]  ;;  %v18118_v40 = vld [vmem:[#allocation284_spill] sm:$0xff] }
 0x1d8   :  { %v1769_v11 = vadd.f32 %v14519_v5, %v1602_v0  ;;  %v2168_v41 = vadd.f32 %v14582_v60, %v2001_v56  ;;  %v18113_v56 = vld [vmem:[#allocation283_spill] sm:$0xff] }
 0x1d9   :  { %v14623_v48 = vpop.f32.mrf.mxu0  ;;  %v14625_v3 = vpop.f32.mrf.mxu1  ;;  %v18127_v55 = vld [vmem:[#allocation267_spill] sm:$0xff] }
 0x1da   :  { %v1998_v23 = vadd.f32 %v18093_v57, %v1769_v11  ;;  %v18106_v11 = vld [vmem:[#allocation303_spill] sm:$0xff]  ;;  %v18109_v57 = vld [vmem:[#allocation282_spill] sm:$0xff] }
 0x1db   :  { %v14636_v53 = vpop.f32.mrf.mxu1  ;;  %v11612_v1 = vpop.f32.mrf.mxu0  ;;  %v2003_v31 = vadd.f32 %v18106_v11, %v1774_v10 }
 0x1dc   :  { %v2331_v2 = vadd.f32 %v11612_v1, %v2164_v32  ;;  %v2165_v25 = vadd.f32 %v14575_v62, %v1998_v23  ;;  %v1443_v32 = vadd.f32 %v18103_v15, %v1214_v46  ;;  %v1773_v1 = vadd.f32 %v18105_v50, %v1606_v8  ;;  %v18110_v23 = vld [vmem:[#allocation293_spill] sm:$0xff]  ;;  %v18116_v8 = vld [vmem:[#allocation271_spill] sm:$0xff] }
 0x1dd   :  { %v14650_v36 = vpop.f32.mrf.mxu1  ;;  %v2251_v22 = vpop.f32.mrf.mxu0  ;;  %v1608_v46 = vadd.f32 %v18109_v57, %v1441_v19  ;;  %v1776_v43 = vadd.f32 %v18110_v23, %v1609_v20  ;;  %v1611_v19 = vadd.f32 %v18113_v56, %v1444_v38  ;;  %v1448_v10 = vadd.f32 %v18117_v21, %v18116_v8  ;;  %v18121_v20 = vld [vmem:[#allocation279_spill] sm:$0xff]  ;;  %v18126_v23 = vld [vmem:[#allocation298_spill] sm:$0xff] }
 0x1de   :  { %v2354_v5 = vadd.f32 %v14641_v28, %v2331_v2  ;;  %v2330_v49 = vadd.f32 %v2251_v22, %v2163_v61  ;;  %v2167_v2 = vadd.f32 %v14597_v58, %v2000_v30  ;;  %v1446_v22 = vadd.f32 %v18108_v18, %v18107_v33  ;;  %v18119_v30 = vld [vmem:[#allocation295_spill] sm:$0xff]  ;;  %v18132_v21 = vld [vmem:[#allocation302_spill] sm:$0xff] }
 0x1df   :  { %v11615_v13 = vpop.f32.mrf.mxu0  ;;  %v14665_v42 = vpop.f32.mrf.mxu1  ;;  %v2170_v58 = vadd.f32 %v14611_v34, %v2003_v31  ;;  %v1610_v9 = vadd.f32 %v18118_v40, %v1443_v32  ;;  %v1778_v38 = vadd.f32 %v18119_v30, %v1611_v19  ;;  %v1447_v50 = vadd.f32 %v18121_v20, %v14633_v6  ;;  %v18123_v32 = vld [vmem:[#allocation296_spill] sm:$0xff]  ;;  %v18125_v57 = vld [vmem:[#allocation287_spill] sm:$0xff] }
 0x1e0   :  { %v2370_v37 = vmax.f32 %v2354_v5, 0.0  ;;  %v2353_v14 = vadd.f32 %v14641_v28, %v2330_v49  ;;  %v2333_v27 = vadd.f32 %v11615_v13, %v2166_v54  ;;  %v18111_v54 = vld [vmem:[#allocation305_spill] sm:$0xff]  ;;  %v18114_v13 = vld [vmem:[#allocation294_spill] sm:$0xff]  ;;  %v18130_v19 = vld [vmem:[#allocation300_spill] sm:$0xff] }
 0x1e1   :  { %v2261_v44 = vpop.f32.mrf.mxu0  ;;  %v2002_v5 = vadd.f32 %v18111_v54, %v1773_v1  ;;  %v14682_v49 = vpop.f32.mrf.mxu1  ;;  %v18122_v1 = vld [vmem:[#allocation285_spill] sm:$0xff]  ;;  %v1777_v31 = vadd.f32 %v18123_v32, %v1610_v9  ;;  %v9791_v32 = vld [vmem:[%s17773_s1 + $0x140] sm:$0xff] }
 0x1e2   :  { %2386 = vst.msk [vmem:[#allocation2 + $0x21] sm:$0xff] %vm578_vm0, %v2370_v37  ;;  %v2369_v62 = vmax.f32 %v2353_v14, 0.0  ;;  %v2356_v0 = vadd.f32 %v14641_v28, %v2333_v27  ;;  %v2332_v12 = vadd.f32 %v2261_v44, %v2165_v25  ;;  %v1775_v25 = vadd.f32 %v18114_v13, %v1608_v46  ;;  %v18115_v37 = vld [vmem:[#allocation306_spill] sm:$0xff]  ;;  %v18120_v44 = vld [vmem:[#allocation307_spill] sm:$0xff] }
 0x1e3   :  { %v11618_v61 = vpop.f32.mrf.mxu0  ;;  %v2005_v14 = vadd.f32 %v18115_v37, %v1776_v43  ;;  %v2169_v45 = vadd.f32 %v14625_v3, %v2002_v5  ;;  %v1613_v11 = vadd.f32 %v18122_v1, %v1446_v22  ;;  %v9813_v22 = vld [vmem:[%s17773_s1 + $0x1f0] sm:$0xff]  ;;  %v1612_v46 = vadd.f32 %v18125_v57, %v1445_v59 }
 0x1e4   :  { %2385 = vst.msk [vmem:[#allocation2 + $0x11] sm:$0xff] %vm578_vm0, %v2369_v62  ;;  %v2372_v60 = vmax.f32 %v2356_v0, 0.0  ;;  %v2355_v24 = vadd.f32 %v14641_v28, %v2332_v12  ;;  %v2335_v52 = vadd.f32 %v11618_v61, %v2168_v41  ;;  %v2004_v41 = vadd.f32 %v18120_v44, %v1775_v25  ;;  %v11598_v62 = vpop.f32.mrf.mxu1  ;;  %v18124_v61 = vld [vmem:[#allocation308_spill] sm:$0xff] }
 0x1e5   :  { %v2271_v26 = vpop.f32.mrf.mxu0  ;;  %v2172_v12 = vadd.f32 %v14636_v53, %v2005_v14  ;;  %v1780_v43 = vadd.f32 %v18126_v23, %v1613_v11  ;;  %v2006_v54 = vadd.f32 %v14573_v63, %v1777_v31  ;;  %v18128_v59 = vld [vmem:[#allocation268_spill] sm:$0xff]  ;;  %v18129_v63 = vld [vmem:[#allocation289_spill] sm:$0xff]  ;;  %v1779_v13 = vadd.f32 %v18130_v19, %v1612_v46 }
 0x1e6   :  { %2388 = vst.msk [vmem:[#allocation2 + $0x41] sm:$0xff] %vm578_vm0, %v2372_v60  ;;  %v2371_v51 = vmax.f32 %v2355_v24, 0.0  ;;  %v2358_v16 = vadd.f32 %v14641_v28, %v2335_v52  ;;  %v2334_v4 = vadd.f32 %v2271_v26, %v2167_v2  ;;  %v2007_v2 = vadd.f32 %v18124_v61, %v1778_v38  ;;  %v2144_v5 = vpop.f32.mrf.mxu1 }
 0x1e7   :  { %v11621_v27 = vpop.f32.mrf.mxu0  ;;  %v2171_v52 = vadd.f32 %v14650_v36, %v2004_v41  ;;  %v9793_v36 = vld [vmem:[%s17773_s1 + $0x150] sm:$0xff]  ;;  %v1615_v56 = vadd.f32 %v18129_v63, %v1448_v10  ;;  %v2009_v25 = vadd.f32 %v14580_v29, %v1780_v43  ;;  %v2008_v40 = vadd.f32 %v14595_v39, %v1779_v13  ;;  %v9806_v43 = vld [vmem:[%s17773_s1 + $0x1b8] sm:$0xff] }
 0x1e8   :  { %2387 = vst.msk [vmem:[#allocation2 + $0x31] sm:$0xff] %vm578_vm0, %v2371_v51  ;;  %v2374_v34 = vmax.f32 %v2358_v16, 0.0  ;;  %v2357_v47 = vadd.f32 %v14641_v28, %v2334_v4  ;;  %v2337_v7 = vadd.f32 %v11621_v27, %v2170_v58  ;;  %v2174_v58 = vadd.f32 %v14665_v42, %v2007_v2  ;;  %v11601_v9 = vpop.f32.mrf.mxu1 }
 0x1e9   :  { %v2281_v0 = vpop.f32.mrf.mxu0  ;;  %v14713_v6 = vld [vmem:[#allocation2 + $0x20] sm:$0xff]  ;;  %v2173_v42 = vadd.f32 %v14682_v49, %v2006_v54  ;;  %v9792_v49 = vld [vmem:[%s17773_s1 + $0x148] sm:$0xff]  ;;  %v1782_v10 = vadd.f32 %v18132_v21, %v1615_v56  ;;  %v2176_v38 = vadd.f32 %v11598_v62, %v2009_v25  ;;  %v2175_v20 = vadd.f32 %v2144_v5, %v2008_v40  ;;  %v9818_v54 = vld [vmem:[%s17773_s1 + $0x218] sm:$0xff] }
 0x1ea   :  { %2390 = vst.msk [vmem:[#allocation2 + $0x61] sm:$0xff] %vm578_vm0, %v2374_v34  ;;  %v2373_v3 = vmax.f32 %v2357_v47, 0.0  ;;  %v2360_v15 = vadd.f32 %v14641_v28, %v2337_v7  ;;  %v2336_v35 = vadd.f32 %v2281_v0, %v2169_v45  ;;  %v9812_v47 = vld [vmem:[%s17773_s1 + $0x1e8] sm:$0xff]  ;;  %v2154_v61 = vpop.f32.mrf.mxu1  ;;  %v9798_v21 = vld [vmem:[%s17773_s1 + $0x178] sm:$0xff]  ;;  %v2447_v40 = vld [vmem:[#allocation2 + $0x90] sm:$0xff] }
 0x1eb   :  { %v11624_v60 = vpop.f32.mrf.mxu0  ;;  %v2439_v24 = vld [vmem:[#allocation2 + $0x10] sm:$0xff]  ;;  %v18131_v7 = vld [vmem:[#allocation291_spill] sm:$0xff]  ;;  %v2011_v39 = vadd.f32 %v14609_v17, %v1782_v10 }
 0x1ec   :  { %2389 = vst.msk [vmem:[#allocation2 + $0x51] sm:$0xff] %vm578_vm0, %v2373_v3  ;;  %v2376_v53 = vmax.f32 %v2360_v15, 0.0  ;;  %v2359_v33 = vadd.f32 %v14641_v28, %v2336_v35  ;;  %v2339_v18 = vadd.f32 %v11624_v60, %v2172_v12  ;;  %11642 = vmatprep.mubr.msk.f32.mxu1 %vm578_vm0, %v2439_v24  ;;  %11675 = vmatmul.mubr.msk.f32.vlgmr.msra.gmra.mxu0 %vm578_vm0, %v2439_v24  ;;  %v18133_v12 = vld [vmem:[#allocation304_spill] sm:$0xff]  ;;  %v9811_v17 = vld [vmem:[%s17773_s1 + $0x1e0] sm:$0xff] }
 0x1ed   :  { %v2291_v26 = vpop.f32.mrf.mxu0  ;;  %11643 = vmatmul.mubr.msk.f32.vlgmr.msra.gmra.mxu1 %vm578_vm0, %v14713_v6  ;;  %11677 = vmatprep.mubr.msk.f32.mxu0 %vm578_vm0, %v14713_v6  ;;  %v14745_v29 = vld [vmem:[#allocation2 + $0x40] sm:$0xff]  ;;  %v1614_v8 = vadd.f32 %v18131_v7, %v1447_v50  ;;  %v2178_v60 = vadd.f32 %v11601_v9, %v2011_v39  ;;  %v9816_v10 = vld [vmem:[%s17773_s1 + $0x208] sm:$0xff] }
 0x1ee   :  { %2392 = vst.msk [vmem:[#allocation2 + $0x81] sm:$0xff] %vm578_vm0, %v2376_v53  ;;  %v2375_v51 = vmax.f32 %v2359_v33, 0.0  ;;  %v2362_v16 = vadd.f32 %v14641_v28, %v2339_v18  ;;  %v2338_v4 = vadd.f32 %v2291_v26, %v2171_v52  ;;  %11699 = vmatpush3.msra.mxu1 %v18127_v55  ;;  %11731 = vmatpush3.msra.mxu0 %v18128_v59  ;;  %v2448_v33 = vld [vmem:[#allocation2 + $0xa0] sm:$0xff] }
 0x1ef   :  { %v11627_v37 = vpop.f32.mrf.mxu0  ;;  %v14736_v14 = vld [vmem:[#allocation2 + $0x30] sm:$0xff]  ;;  %11700 = vmatprep.subr.mxu1 %v9813_v22  ;;  %11732 = vmatprep.subr.mxu0 %v9793_v36  ;;  %v1781_v3 = vadd.f32 %v18133_v12, %v1614_v8  ;;  %v2969_v25 = vld [vmem:[#allocation2 + $0x1] sm:$0xff] }
 0x1f0   :  { %2391 = vst.msk [vmem:[#allocation2 + $0x71] sm:$0xff] %vm578_vm0, %v2375_v51  ;;  %v2378_v27 = vmax.f32 %v2362_v16, 0.0  ;;  %v2361_v45 = vadd.f32 %v14641_v28, %v2338_v4  ;;  %v2341_v34 = vadd.f32 %v11627_v37, %v2174_v58  ;;  %11645 = vmatprep.mubr.msk.f32.mxu1 %vm578_vm0, %v14736_v14  ;;  %11678 = vmatmul.mubr.msk.f32.gmra.mxu0 %vm578_vm0, %v14736_v14  ;;  %v2979_v9 = vld [vmem:[#allocation2 + $0xa1] sm:$0xff] }
 0x1f1   :  { %v2301_v30 = vpop.f32.mrf.mxu0  ;;  %11646 = vmatmul.mubr.msk.f32.gmra.mxu1 %vm578_vm0, %v14745_v29  ;;  %11680 = vmatprep.mubr.msk.f32.mxu0 %vm578_vm0, %v14745_v29  ;;  %v14772_v11 = vld [vmem:[#allocation2 + $0x60] sm:$0xff]  ;;  %v2010_v31 = vadd.f32 %v14623_v48, %v1781_v3 }
 0x1f2   :  { %2394 = vst.msk [vmem:[#allocation2 + $0xc1] sm:$0xff] %vm578_vm0, %v2378_v27  ;;  %v2377_v44 = vmax.f32 %v2361_v45, 0.0  ;;  %v2364_v41 = vadd.f32 %v14641_v28, %v2341_v34  ;;  %v2340_v0 = vadd.f32 %v2301_v30, %v2173_v42  ;;  %11701 = vmatpush3.msra.mxu1 %v9813_v22  ;;  %11733 = vmatpush3.msra.mxu0 %v9793_v36  ;;  %v14857_v27 = vld [vmem:[#allocation2 + $0x11] sm:$0xff]  ;;  %v14861_v45 = vld [vmem:[#allocation2 + $0x21] sm:$0xff] }
 0x1f3   :  { %v11630_v15 = vpop.f32.mrf.mxu0  ;;  %v14764_v35 = vld [vmem:[#allocation2 + $0x50] sm:$0xff]  ;;  %11702 = vmatprep.subr.mxu1 %v9812_v47  ;;  %11734 = vmatprep.subr.mxu0 %v9792_v49  ;;  %v2177_v22 = vadd.f32 %v2154_v61, %v2010_v31  ;;  %v14897_v8 = vld [vmem:[#allocation2 + $0x61] sm:$0xff] }
 0x1f4   :  { %2393 = vst.msk [vmem:[#allocation2 + $0xb1] sm:$0xff] %vm578_vm0, %v2377_v44  ;;  %v2380_v62 = vmax.f32 %v2364_v41, 0.0  ;;  %v2363_v50 = vadd.f32 %v14641_v28, %v2340_v0  ;;  %v2343_v1 = vadd.f32 %v11630_v15, %v2176_v38  ;;  %11648 = vmatprep.mubr.msk.f32.mxu1 %vm578_vm0, %v14764_v35  ;;  %11681 = vmatmul.mubr.msk.f32.gmra.mxu0 %vm578_vm0, %v14764_v35  ;;  %v9805_v34 = vld [vmem:[%s17773_s1 + $0x1b0] sm:$0xff]  ;;  %v9815_v38 = vld [vmem:[%s17773_s1 + $0x200] sm:$0xff]  ;;  %v9810_v0 = vld [vmem:[%s17773_s1 + $0x1d8] sm:$0xff] }
 0x1f5   :  { %v2311_v2 = vpop.f32.mrf.mxu0  ;;  %11649 = vmatmul.mubr.msk.f32.gmra.mxu1 %vm578_vm0, %v14772_v11  ;;  %11683 = vmatprep.mubr.msk.f32.mxu0 %vm578_vm0, %v14772_v11  ;;  %v14795_v23 = vld [vmem:[#allocation2 + $0x80] sm:$0xff]  ;;  %v14893_v7 = vld [vmem:[#allocation2 + $0x51] sm:$0xff]  ;;  %v9808_v61 = vld [vmem:[%s17773_s1 + $0x1c8] sm:$0xff] }
 0x1f6   :  { %2396 = vst.msk [vmem:[#allocation2 + $0xe1] sm:$0xff] %vm578_vm0, %v2380_v62  ;;  %v2379_v24 = vmax.f32 %v2363_v50, 0.0  ;;  %v2366_v52 = vadd.f32 %v14641_v28, %v2343_v1  ;;  %v2342_v53 = vadd.f32 %v2311_v2, %v2175_v20  ;;  %11703 = vmatpush3.msra.mxu1 %v9812_v47  ;;  %11735 = vmatpush3.msra.mxu0 %v9792_v49  ;;  %v9804_v47 = vld [vmem:[%s17773_s1 + $0x1a8] sm:$0xff]  ;;  %v9797_v62 = vld [vmem:[%s17773_s1 + $0x170] sm:$0xff]  ;;  %v9807_v2 = vld [vmem:[%s17773_s1 + $0x1c0] sm:$0xff] }
 0x1f7   :  { %v11633_v18 = vpop.f32.mrf.mxu0  ;;  %v14787_v48 = vld [vmem:[#allocation2 + $0x70] sm:$0xff]  ;;  %11704 = vmatprep.subr.mxu1 %v9811_v17  ;;  %11736 = vmatprep.subr.mxu0 %v9791_v32  ;;  %v14879_v49 = vld [vmem:[#allocation2 + $0x41] sm:$0xff] }
 0x1f8   :  { %2395 = vst.msk [vmem:[#allocation2 + $0xd1] sm:$0xff] %vm578_vm0, %v2379_v24  ;;  %v2382_v36 = vmax.f32 %v2366_v52, 0.0  ;;  %v2365_v57 = vadd.f32 %v14641_v28, %v2342_v53  ;;  %v2345_v46 = vadd.f32 %v11633_v18, %v2178_v60  ;;  %11651 = vmatprep.mubr.msk.f32.mxu1 %vm578_vm0, %v14787_v48  ;;  %11684 = vmatmul.mubr.msk.f32.gmra.mxu0 %vm578_vm0, %v14787_v48  ;;  %v14911_v30 = vld [vmem:[#allocation2 + $0x71] sm:$0xff]  ;;  %v9796_v50 = vld [vmem:[%s17773_s1 + $0x168] sm:$0xff] }
 0x1f9   :  { %v2321_v5 = vpop.f32.mrf.mxu0  ;;  %11652 = vmatmul.mubr.msk.f32.gmra.mxu1 %vm578_vm0, %v14795_v23  ;;  %11686 = vmatprep.mubr.msk.f32.mxu0 %vm578_vm0, %v2448_v33  ;;  %v14812_v59 = vld [vmem:[#allocation2 + $0xc0] sm:$0xff]  ;;  %v9809_v1 = vld [vmem:[%s17773_s1 + $0x1d0] sm:$0xff] }
 0x1fa   :  { %2398 = vst.msk [vmem:[#allocation2 + $0x101] sm:$0xff] %vm578_vm0, %v2382_v36  ;;  %v2381_v26 = vmax.f32 %v2365_v57, 0.0  ;;  %v2368_v58 = vadd.f32 %v14641_v28, %v2345_v46  ;;  %v2344_v51 = vadd.f32 %v2321_v5, %v2177_v22  ;;  %11705 = vmatpush3.msra.mxu1 %v9811_v17  ;;  %11737 = vmatpush3.msra.mxu0 %v9791_v32  ;;  %v14926_v41 = vld [vmem:[#allocation2 + $0xc1] sm:$0xff]  ;;  %v9822_v32 = vld [vmem:[%s17773_s1 + $0x238] sm:$0xff] }
 0x1fb   :  { %v2449_v16 = vld [vmem:[#allocation2 + $0xb0] sm:$0xff]  ;;  %11762 = vmatprep.subr.mxu1 %v9806_v43  ;;  %11794 = vmatprep.subr.mxu0 %v9818_v54  ;;  %v2977_v17 = vld [vmem:[#allocation2 + $0x81] sm:$0xff] }
 0x1fc   :  { %2397 = vst.msk [vmem:[#allocation2 + $0xf1] sm:$0xff] %vm578_vm0, %v2381_v26  ;;  %v2384_v4 = vmax.f32 %v2368_v58, 0.0  ;;  %v2367_v55 = vadd.f32 %v14641_v28, %v2344_v51  ;;  %11654 = vmatprep.mubr.msk.f32.mxu1 %vm578_vm0, %v2449_v16  ;;  %11687 = vmatmul.mubr.msk.f32.gmra.mxu0 %vm578_vm0, %v2449_v16  ;;  %v14922_v44 = vld [vmem:[#allocation2 + $0xb1] sm:$0xff]  ;;  %v3532_v52 = vld [vmem:[#allocation2 + $0x2] sm:$0xff] }
 0x1fd   :  { %11655 = vmatmul.mubr.msk.f32.gmra.mxu1 %vm578_vm0, %v14812_v59  ;;  %11689 = vmatprep.mubr.msk.f32.mxu0 %vm578_vm0, %v14812_v59  ;;  %v14826_v28 = vld [vmem:[#allocation2 + $0xe0] sm:$0xff]  ;;  %v2978_v31 = vld [vmem:[#allocation2 + $0x91] sm:$0xff]  ;;  %v9820_v36 = vld [vmem:[%s17773_s1 + $0x228] sm:$0xff] }
 0x1fe   :  { %2400 = vst.msk [vmem:[#allocation2 + $0x121] sm:$0xff] %vm578_vm0, %v2384_v4  ;;  %v2383_v63 = vmax.f32 %v2367_v55, 0.0  ;;  %v2983_v3 = vld [vmem:[#allocation2 + $0xe1] sm:$0xff]  ;;  %v2988_v24 = vld [vmem:[#allocation2 + $0x131] sm:$0xff] }
 0x1ff   :  { %v14819_v56 = vld [vmem:[#allocation2 + $0xd0] sm:$0xff]  ;;  %v3534_v33 = vld [vmem:[#allocation2 + $0x22] sm:$0xff] }
 0x200   :  { %2399 = vst.msk [vmem:[#allocation2 + $0x111] sm:$0xff] %vm578_vm0, %v2383_v63  ;;  %11657 = vmatprep.mubr.msk.f32.mxu1 %vm578_vm0, %v14819_v56  ;;  %11690 = vmatmul.mubr.msk.f32.gmra.mxu0 %vm578_vm0, %v14819_v56  ;;  %v2982_v12 = vld [vmem:[#allocation2 + $0xd1] sm:$0xff]  ;;  %v3536_v22 = vld [vmem:[#allocation2 + $0x42] sm:$0xff] }
 0x201   :  { %11658 = vmatmul.mubr.msk.f32.gmra.mxu1 %vm578_vm0, %v14826_v28  ;;  %11692 = vmatprep.mubr.msk.f32.mxu0 %vm578_vm0, %v14826_v28  ;;  %v14838_v13 = vld [vmem:[#allocation2 + $0x100] sm:$0xff]  ;;  %v3533_v53 = vld [vmem:[#allocation2 + $0x12] sm:$0xff] }
 0x202   :  { %v2985_v15 = vld [vmem:[#allocation2 + $0x101] sm:$0xff]  ;;  %v3535_v18 = vld [vmem:[#allocation2 + $0x32] sm:$0xff] }
 0x203   :  { %v14832_v19 = vld [vmem:[#allocation2 + $0xf0] sm:$0xff]  ;;  %v9819_v46 = vld [vmem:[%s17773_s1 + $0x220] sm:$0xff] }
 0x204   :  { %11660 = vmatprep.mubr.msk.f32.mxu1 %vm578_vm0, %v14832_v19  ;;  %11693 = vmatmul.mubr.msk.f32.gmra.mxu0 %vm578_vm0, %v14832_v19  ;;  %v2984_v39 = vld [vmem:[#allocation2 + $0xf1] sm:$0xff]  ;;  %v3542_v5 = vld [vmem:[#allocation2 + $0xa2] sm:$0xff] }
 0x205   :  { %11661 = vmatmul.mubr.msk.f32.gmra.mxu1 %vm578_vm0, %v14838_v13  ;;  %11695 = vmatprep.mubr.msk.f32.mxu0 %vm578_vm0, %v14838_v13  ;;  %v14850_v42 = vld [vmem:[#allocation2 + $0x120] sm:$0xff]  ;;  %v3537_v57 = vld [vmem:[#allocation2 + $0x52] sm:$0xff] }
 0x206   :  { %v2987_v60 = vld [vmem:[#allocation2 + $0x121] sm:$0xff]  ;;  %v3543_v26 = vld [vmem:[#allocation2 + $0xb2] sm:$0xff] }
 0x207   :  { %v14844_v37 = vld [vmem:[#allocation2 + $0x110] sm:$0xff]  ;;  %v3544_v58 = vld [vmem:[#allocation2 + $0xc2] sm:$0xff] }
 0x208   :  { %11663 = vmatprep.mubr.msk.f32.mxu1 %vm578_vm0, %v14844_v37  ;;  %11696 = vmatmul.mubr.msk.f32.gmra.mxu0 %vm578_vm0, %v14844_v37  ;;  %v2986_v20 = vld [vmem:[#allocation2 + $0x111] sm:$0xff]  ;;  %v3546_v16 = vld [vmem:[#allocation2 + $0xe2] sm:$0xff] }
 0x209   :  { %11664 = vmatmul.mubr.msk.f32.gmra.mxu1 %vm578_vm0, %v14850_v42  ;;  %11738 = vmatprep.mubr.msk.f32.mxu0 %vm578_vm0, %v2969_v25  ;;  %v3545_v51 = vld [vmem:[#allocation2 + $0xd2] sm:$0xff]  ;;  %v3548_v55 = vld [vmem:[#allocation2 + $0x102] sm:$0xff] }
 0x20a   :  { %11706 = vmatprep.mubr.msk.f32.mxu1 %vm578_vm0, %v14713_v6  ;;  %v14872_v6 = vld [vmem:[#allocation2 + $0x31] sm:$0xff]  ;;  %v3550_v63 = vld [vmem:[#allocation2 + $0x122] sm:$0xff] }
 0x20b   :  { %v3547_v4 = vld [vmem:[#allocation2 + $0xf2] sm:$0xff] }
 0x20c   :  { %11739 = vmatmul.mubr.msk.f32.vlgmr.msra.gmra.mxu0 %vm578_vm0, %v14857_v27 }
 0x20d   :  { %11707 = vmatmul.mubr.msk.f32.vlgmr.msra.gmra.mxu1 %vm578_vm0, %v14736_v14  ;;  %11741 = vmatprep.mubr.msk.f32.mxu0 %vm578_vm0, %v14861_v45  ;;  %v9817_v14 = vld [vmem:[%s17773_s1 + $0x210] sm:$0xff] }
 0x20e   :  { %11763 = vmatpush3.msra.mxu1 %v9806_v43  ;;  %11709 = vmatprep.mubr.msk.f32.mxu1 %vm578_vm0, %v14745_v29  ;;  %v9803_v29 = vld [vmem:[%s17773_s1 + $0x1a0] sm:$0xff]  ;;  %v3539_v43 = vld [vmem:[#allocation2 + $0x72] sm:$0xff] }
 0x20f   :  { %11764 = vmatprep.subr.mxu1 %v9805_v34  ;;  %11795 = vmatpush3.msra.mxu0 %v9818_v54  ;;  %v3540_v54 = vld [vmem:[#allocation2 + $0x82] sm:$0xff] }
 0x210   :  { %11742 = vmatmul.mubr.msk.f32.gmra.mxu0 %vm578_vm0, %v14872_v6  ;;  %11765 = vmatpush3.msra.mxu1 %v9805_v34 }
 0x211   :  { %11710 = vmatmul.mubr.msk.f32.gmra.mxu1 %vm578_vm0, %v14764_v35  ;;  %11744 = vmatprep.mubr.msk.f32.mxu0 %vm578_vm0, %v14879_v49  ;;  %v2457_v35 = vld [vmem:[#allocation2 + $0x130] sm:$0xff] }
 0x212   :  { %11712 = vmatprep.mubr.msk.f32.mxu1 %vm578_vm0, %v14772_v11  ;;  %11766 = vmatprep.subr.mxu1 %v9804_v47  ;;  %v9795_v11 = vld [vmem:[%s17773_s1 + $0x160] sm:$0xff] }
 0x213   :  { %11767 = vmatpush3.msra.mxu1 %v9804_v47  ;;  %11796 = vmatprep.subr.mxu0 %v9817_v14 }
 0x214   :  { %11745 = vmatmul.mubr.msk.f32.gmra.mxu0 %vm578_vm0, %v14893_v7  ;;  %11768 = vmatprep.subr.mxu1 %v9803_v29 }
 0x215   :  { %11713 = vmatmul.mubr.msk.f32.gmra.mxu1 %vm578_vm0, %v14787_v48  ;;  %11747 = vmatprep.mubr.msk.f32.mxu0 %vm578_vm0, %v14897_v8  ;;  %v9821_v48 = vld [vmem:[%s17773_s1 + $0x230] sm:$0xff] }
 0x216   :  { %11715 = vmatprep.mubr.msk.f32.mxu1 %vm578_vm0, %v14795_v23  ;;  %11769 = vmatpush3.msra.mxu1 %v9803_v29  ;;  %v3538_v23 = vld [vmem:[#allocation2 + $0x62] sm:$0xff] }
 0x217   :  { %11797 = vmatpush3.msra.mxu0 %v9817_v14  ;;  %11826 = vmatprep.subr.mxu1 %v9798_v21 }
 0x218   :  { %11748 = vmatmul.mubr.msk.f32.gmra.mxu0 %vm578_vm0, %v14911_v30  ;;  %11798 = vmatprep.subr.mxu0 %v9816_v10 }
 0x219   :  { %11716 = vmatmul.mubr.msk.f32.gmra.mxu1 %vm578_vm0, %v2447_v40  ;;  %11750 = vmatprep.mubr.msk.f32.mxu0 %vm578_vm0, %v2979_v9 }
 0x21a   :  { %11718 = vmatprep.mubr.msk.f32.mxu1 %vm578_vm0, %v14812_v59  ;;  %11799 = vmatpush3.msra.mxu0 %v9816_v10  ;;  %v3549_v59 = vld [vmem:[#allocation2 + $0x112] sm:$0xff] }
 0x21b   :  { %11800 = vmatprep.subr.mxu0 %v9815_v38 }
 0x21c   :  { %11751 = vmatmul.mubr.msk.f32.gmra.mxu0 %vm578_vm0, %v14922_v44 }
 0x21d   :  { %11719 = vmatmul.mubr.msk.f32.gmra.mxu1 %vm578_vm0, %v14819_v56  ;;  %11753 = vmatprep.mubr.msk.f32.mxu0 %vm578_vm0, %v14926_v41  ;;  %v3541_v56 = vld [vmem:[#allocation2 + $0x92] sm:$0xff] }
 0x21e   :  { %11721 = vmatprep.mubr.msk.f32.mxu1 %vm578_vm0, %v14826_v28  ;;  %11801 = vmatpush3.msra.mxu0 %v9815_v38  ;;  %v3551_v28 = vld [vmem:[#allocation2 + $0x132] sm:$0xff] }
 0x21f   :  { %11858 = vmatprep.subr.mxu0 %v9810_v0 }
 0x220   :  { %11754 = vmatmul.mubr.msk.f32.gmra.mxu0 %vm578_vm0, %v2982_v12 }
 0x221   :  { %11722 = vmatmul.mubr.msk.f32.gmra.mxu1 %vm578_vm0, %v14832_v19  ;;  %11756 = vmatprep.mubr.msk.f32.mxu0 %vm578_vm0, %v2983_v3  ;;  %v9984_v19 = vld [vmem:[%s17773_s1 + $0x2b8] sm:$0xff] }
 0x222   :  { %11724 = vmatprep.mubr.msk.f32.mxu1 %vm578_vm0, %v14838_v13  ;;  %v9983_v13 = vld [vmem:[%s17773_s1 + $0x2b0] sm:$0xff] }
 0x224   :  { %11757 = vmatmul.mubr.msk.f32.gmra.mxu0 %vm578_vm0, %v2984_v39 }
 0x225   :  { %11725 = vmatmul.mubr.msk.f32.gmra.mxu1 %vm578_vm0, %v14844_v37  ;;  %11759 = vmatprep.mubr.msk.f32.mxu0 %vm578_vm0, %v2985_v15 }
 0x226   :  { %11727 = vmatprep.mubr.msk.f32.mxu1 %vm578_vm0, %v14850_v42 }
 0x228   :  { %11760 = vmatmul.mubr.msk.f32.gmra.mxu0 %vm578_vm0, %v2986_v20 }
 0x229   :  { %11728 = vmatmul.mubr.msk.f32.gmra.mxu1 %vm578_vm0, %v2457_v35  ;;  %11802 = vmatprep.mubr.msk.f32.mxu0 %vm578_vm0, %v14861_v45  ;;  %v9981_v35 = vld [vmem:[%s17773_s1 + $0x2a0] sm:$0xff] }
 0x22a   :  { %11770 = vmatprep.mubr.msk.f32.mxu1 %vm578_vm0, %v14857_v27 }
 0x22c   :  { %11803 = vmatmul.mubr.msk.f32.vlgmr.msra.gmra.mxu0 %vm578_vm0, %v14872_v6 }
 0x22d   :  { %11771 = vmatmul.mubr.msk.f32.vlgmr.msra.gmra.mxu1 %vm578_vm0, %v14861_v45  ;;  %11805 = vmatprep.mubr.msk.f32.mxu0 %vm578_vm0, %v14879_v49 }
 0x22e   :  { %11827 = vmatpush3.msra.mxu1 %v9798_v21  ;;  %11773 = vmatprep.mubr.msk.f32.mxu1 %vm578_vm0, %v14872_v6  ;;  %v9972_v21 = vld [vmem:[%s17773_s1 + $0x258] sm:$0xff] }
 0x22f   :  { %11828 = vmatprep.subr.mxu1 %v9797_v62  ;;  %11859 = vmatpush3.msra.mxu0 %v9810_v0 }
 0x230   :  { %11806 = vmatmul.mubr.msk.f32.gmra.mxu0 %vm578_vm0, %v14893_v7  ;;  %11829 = vmatpush3.msra.mxu1 %v9797_v62 }
 0x231   :  { %11774 = vmatmul.mubr.msk.f32.gmra.mxu1 %vm578_vm0, %v14879_v49  ;;  %11808 = vmatprep.mubr.msk.f32.mxu0 %vm578_vm0, %v14897_v8 }
 0x232   :  { %11776 = vmatprep.mubr.msk.f32.mxu1 %vm578_vm0, %v14893_v7  ;;  %11830 = vmatprep.subr.mxu1 %v9796_v50  ;;  %v9982_v7 = vld [vmem:[%s17773_s1 + $0x2a8] sm:$0xff] }
 0x233   :  { %11831 = vmatpush3.msra.mxu1 %v9796_v50  ;;  %11860 = vmatprep.subr.mxu0 %v9809_v1 }
 0x234   :  { %11809 = vmatmul.mubr.msk.f32.gmra.mxu0 %vm578_vm0, %v14911_v30  ;;  %11832 = vmatprep.subr.mxu1 %v9795_v11 }
 0x235   :  { %11777 = vmatmul.mubr.msk.f32.gmra.mxu1 %vm578_vm0, %v14897_v8  ;;  %11811 = vmatprep.mubr.msk.f32.mxu0 %vm578_vm0, %v2977_v17 }
 0x236   :  { %11779 = vmatprep.mubr.msk.f32.mxu1 %vm578_vm0, %v14911_v30  ;;  %11833 = vmatpush3.msra.mxu1 %v9795_v11  ;;  %v9971_v30 = vld [vmem:[%s17773_s1 + $0x250] sm:$0xff] }
 0x237   :  { %11861 = vmatpush3.msra.mxu0 %v9809_v1  ;;  %11890 = vmatprep.subr.mxu1 %v9822_v32 }
 0x238   :  { %11812 = vmatmul.mubr.msk.f32.gmra.mxu0 %vm578_vm0, %v2978_v31  ;;  %11862 = vmatprep.subr.mxu0 %v9808_v61 }
 0x239   :  { %11780 = vmatmul.mubr.msk.f32.gmra.mxu1 %vm578_vm0, %v2977_v17  ;;  %11814 = vmatprep.mubr.msk.f32.mxu0 %vm578_vm0, %v14926_v41 }
 0x23a   :  { %11782 = vmatprep.mubr.msk.f32.mxu1 %vm578_vm0, %v14922_v44  ;;  %11863 = vmatpush3.msra.mxu0 %v9808_v61 }
 0x23b   :  { %11864 = vmatprep.subr.mxu0 %v9807_v2 }
 0x23c   :  { %11815 = vmatmul.mubr.msk.f32.gmra.mxu0 %vm578_vm0, %v2982_v12 }
 0x23d   :  { %11783 = vmatmul.mubr.msk.f32.gmra.mxu1 %vm578_vm0, %v14926_v41  ;;  %11817 = vmatprep.mubr.msk.f32.mxu0 %vm578_vm0, %v2983_v3  ;;  %v9970_v41 = vld [vmem:[%s17773_s1 + $0x248] sm:$0xff] }
 0x23e   :  { %11785 = vmatprep.mubr.msk.f32.mxu1 %vm578_vm0, %v2982_v12  ;;  %11865 = vmatpush3.msra.mxu0 %v9807_v2 }
 0x23f   :  { %11922 = vmatprep.subr.mxu0 %v9984_v19 }
 0x240   :  { %11818 = vmatmul.mubr.msk.f32.gmra.mxu0 %vm578_vm0, %v2984_v39 }
 0x241   :  { %11786 = vmatmul.mubr.msk.f32.gmra.mxu1 %vm578_vm0, %v2983_v3  ;;  %11820 = vmatprep.mubr.msk.f32.mxu0 %vm578_vm0, %v2985_v15 }
 0x242   :  { %11788 = vmatprep.mubr.msk.f32.mxu1 %vm578_vm0, %v2984_v39  ;;  %v9969_v39 = vld [vmem:[%s17773_s1 + $0x240] sm:$0xff] }
 0x244   :  { %11821 = vmatmul.mubr.msk.f32.gmra.mxu0 %vm578_vm0, %v2986_v20 }
 0x245   :  { %11789 = vmatmul.mubr.msk.f32.gmra.mxu1 %vm578_vm0, %v2985_v15  ;;  %11823 = vmatprep.mubr.msk.f32.mxu0 %vm578_vm0, %v2987_v60 }
 0x246   :  { %11791 = vmatprep.mubr.msk.f32.mxu1 %vm578_vm0, %v2986_v20  ;;  %v4188_v20 = vld [vmem:[#allocation2] sm:$0xff] }
 0x248   :  { %11824 = vmatmul.mubr.msk.f32.gmra.mxu0 %vm578_vm0, %v2988_v24  ;;  %v15129_v24 = vld [vmem:[%s17773_s1 + $0x318] sm:$0xff] }
 0x249   :  { %11792 = vmatmul.mubr.msk.f32.gmra.mxu1 %vm578_vm0, %v2987_v60  ;;  %11866 = vmatprep.mubr.msk.f32.mxu0 %vm578_vm0, %v3533_v53  ;;  %18134 = vst [vmem:[#allocation286_spill] sm:$0xff] %v15129_v24 }
 0x24a   :  { %11834 = vmatprep.mubr.msk.f32.mxu1 %vm578_vm0, %v3532_v52 }
 0x24c   :  { %11867 = vmatmul.mubr.msk.f32.vlgmr.msra.gmra.mxu0 %vm578_vm0, %v3534_v33 }
 0x24d   :  { %11835 = vmatmul.mubr.msk.f32.vlgmr.msra.gmra.mxu1 %vm578_vm0, %v3533_v53  ;;  %11869 = vmatprep.mubr.msk.f32.mxu0 %vm578_vm0, %v3535_v18 }
 0x24e   :  { %11891 = vmatpush3.msra.mxu1 %v9822_v32  ;;  %11837 = vmatprep.mubr.msk.f32.mxu1 %vm578_vm0, %v3534_v33 }
 0x24f   :  { %11892 = vmatprep.subr.mxu1 %v9821_v48  ;;  %11923 = vmatpush3.msra.mxu0 %v9984_v19 }
 0x250   :  { %11870 = vmatmul.mubr.msk.f32.gmra.mxu0 %vm578_vm0, %v3536_v22  ;;  %11893 = vmatpush3.msra.mxu1 %v9821_v48 }
 0x251   :  { %11838 = vmatmul.mubr.msk.f32.gmra.mxu1 %vm578_vm0, %v3535_v18  ;;  %11872 = vmatprep.mubr.msk.f32.mxu0 %vm578_vm0, %v3537_v57 }
 0x252   :  { %11840 = vmatprep.mubr.msk.f32.mxu1 %vm578_vm0, %v3536_v22  ;;  %11894 = vmatprep.subr.mxu1 %v9820_v36 }
 0x253   :  { %11895 = vmatpush3.msra.mxu1 %v9820_v36  ;;  %11924 = vmatprep.subr.mxu0 %v9983_v13 }
 0x254   :  { %11873 = vmatmul.mubr.msk.f32.gmra.mxu0 %vm578_vm0, %v3538_v23  ;;  %11896 = vmatprep.subr.mxu1 %v9819_v46 }
 0x255   :  { %11841 = vmatmul.mubr.msk.f32.gmra.mxu1 %vm578_vm0, %v3537_v57  ;;  %11875 = vmatprep.mubr.msk.f32.mxu0 %vm578_vm0, %v3539_v43 }
 0x256   :  { %11843 = vmatprep.mubr.msk.f32.mxu1 %vm578_vm0, %v3538_v23  ;;  %11897 = vmatpush3.msra.mxu1 %v9819_v46 }
 0x257   :  { %11925 = vmatpush3.msra.mxu0 %v9983_v13  ;;  %11954 = vmatprep.subr.mxu1 %v9972_v21 }
 0x258   :  { %11876 = vmatmul.mubr.msk.f32.gmra.mxu0 %vm578_vm0, %v3540_v54  ;;  %11926 = vmatprep.subr.mxu0 %v9982_v7 }
 0x259   :  { %11844 = vmatmul.mubr.msk.f32.gmra.mxu1 %vm578_vm0, %v3539_v43  ;;  %11878 = vmatprep.mubr.msk.f32.mxu0 %vm578_vm0, %v3543_v26 }
 0x25a   :  { %11846 = vmatprep.mubr.msk.f32.mxu1 %vm578_vm0, %v3542_v5  ;;  %11927 = vmatpush3.msra.mxu0 %v9982_v7 }
 0x25b   :  { %11928 = vmatprep.subr.mxu0 %v9981_v35 }
 0x25c   :  { %11879 = vmatmul.mubr.msk.f32.gmra.mxu0 %vm578_vm0, %v3544_v58 }
 0x25d   :  { %11847 = vmatmul.mubr.msk.f32.gmra.mxu1 %vm578_vm0, %v3543_v26  ;;  %11881 = vmatprep.mubr.msk.f32.mxu0 %vm578_vm0, %v3545_v51 }
 0x25e   :  { %11849 = vmatprep.mubr.msk.f32.mxu1 %vm578_vm0, %v3544_v58  ;;  %11929 = vmatpush3.msra.mxu0 %v9981_v35 }
 0x25f   :  { %11986 = vmatprep.subr.mxu0 %v15129_v24 }
 0x260   :  { %11882 = vmatmul.mubr.msk.f32.gmra.mxu0 %vm578_vm0, %v3546_v16 }
 0x261   :  { %11850 = vmatmul.mubr.msk.f32.gmra.mxu1 %vm578_vm0, %v3545_v51  ;;  %11884 = vmatprep.mubr.msk.f32.mxu0 %vm578_vm0, %v3547_v4 }
 0x262   :  { %11852 = vmatprep.mubr.msk.f32.mxu1 %vm578_vm0, %v3546_v16 }
 0x264   :  { %11885 = vmatmul.mubr.msk.f32.gmra.mxu0 %vm578_vm0, %v3548_v55 }
 0x265   :  { %11853 = vmatmul.mubr.msk.f32.gmra.mxu1 %vm578_vm0, %v3547_v4  ;;  %11887 = vmatprep.mubr.msk.f32.mxu0 %vm578_vm0, %v3549_v59 }
 0x266   :  { %11855 = vmatprep.mubr.msk.f32.mxu1 %vm578_vm0, %v3548_v55 }
 0x268   :  { %11888 = vmatmul.mubr.msk.f32.gmra.mxu0 %vm578_vm0, %v3550_v63 }
 0x269   :  { %11856 = vmatmul.mubr.msk.f32.gmra.mxu1 %vm578_vm0, %v3549_v59 }
 0x26a   :  { %11898 = vmatprep.mubr.msk.f32.mxu1 %vm578_vm0, %v3534_v33 }
 0x26d   :  { %11899 = vmatmul.mubr.msk.f32.vlgmr.msra.gmra.mxu1 %vm578_vm0, %v3535_v18 }
 0x26e   :  { %11901 = vmatprep.mubr.msk.f32.mxu1 %vm578_vm0, %v3536_v22  ;;  %11955 = vmatpush3.msra.mxu1 %v9972_v21 }
 0x26f   :  { %11956 = vmatprep.subr.mxu1 %v9971_v30 }
 0x270   :  { %11957 = vmatpush3.msra.mxu1 %v9971_v30 }
 0x271   :  { %11902 = vmatmul.mubr.msk.f32.gmra.mxu1 %vm578_vm0, %v3537_v57  ;;  %11958 = vmatprep.subr.mxu1 %v9970_v41 }
 0x272   :  { %11904 = vmatprep.mubr.msk.f32.mxu1 %vm578_vm0, %v3538_v23  ;;  %11959 = vmatpush3.msra.mxu1 %v9970_v41 }
 0x273   :  { %11960 = vmatprep.subr.mxu1 %v9969_v39 }
 0x274   :  { %11961 = vmatpush3.msra.mxu1 %v9969_v39 }
 0x275   :  { %11905 = vmatmul.mubr.msk.f32.gmra.mxu1 %vm578_vm0, %v3539_v43 }
 0x276   :  { %11907 = vmatprep.mubr.msk.f32.mxu1 %vm578_vm0, %v3540_v54 }
 0x279   :  { %11908 = vmatmul.mubr.msk.f32.gmra.mxu1 %vm578_vm0, %v3541_v56  ;;  %v15161_v56 = vld [vmem:[%s17773_s1 + $0x278] sm:$0xff] }
 0x27a   :  { %11910 = vmatprep.mubr.msk.f32.mxu1 %vm578_vm0, %v3544_v58  ;;  %18135 = vst [vmem:[#allocation297_spill] sm:$0xff] %v15161_v56  ;;  %12018 = vmatprep.subr.mxu1 %v15161_v56 }
 0x27d   :  { %11911 = vmatmul.mubr.msk.f32.gmra.mxu1 %vm578_vm0, %v3545_v51 }
 0x27e   :  { %11913 = vmatprep.mubr.msk.f32.mxu1 %vm578_vm0, %v3546_v16 }
 0x281   :  { %11914 = vmatmul.mubr.msk.f32.gmra.mxu1 %vm578_vm0, %v3547_v4 }
 0x282   :  { %11916 = vmatprep.mubr.msk.f32.mxu1 %vm578_vm0, %v3548_v55 }
 0x285   :  { %11917 = vmatmul.mubr.msk.f32.gmra.mxu1 %vm578_vm0, %v3549_v59 }
 0x286   :  { %11919 = vmatprep.mubr.msk.f32.mxu1 %vm578_vm0, %v3550_v63 }
 0x289   :  { %11920 = vmatmul.mubr.msk.f32.gmra.mxu1 %vm578_vm0, %v3551_v28 }
 0x28a   :  { %11962 = vmatprep.mubr.msk.f32.mxu1 %vm578_vm0, %v4188_v20 }
 0x2ac   :  { %v11676_v25 = vpop.f32.mrf.mxu0 }
 0x2ad   :  { %v11644_v37 = vpop.f32.mrf.mxu1 }
 0x2ae   :  { %v2729_v42 = vadd.f32 %v11676_v25, %v11644_v37  ;;  %v15083_v27 = vpop.f32.mrf.mxu0 }
 0x2af   :  { %v15085_v45 = vpop.f32.mrf.mxu1 }
 0x2b0   :  { %v11679_v34 = vpop.f32.mrf.mxu0 }
 0x2b1   :  { %v11647_v6 = vpop.f32.mrf.mxu1 }
 0x2b2   :  { %v2739_v47 = vadd.f32 %v11679_v34, %v11647_v6  ;;  %v15087_v49 = vpop.f32.mrf.mxu0 }
 0x2b3   :  { %v15089_v14 = vpop.f32.mrf.mxu1 }
 0x2b4   :  { %v11682_v29 = vpop.f32.mrf.mxu0 }
 0x2b5   :  { %v11650_v8 = vpop.f32.mrf.mxu1 }
 0x2b6   :  { %v2749_v10 = vadd.f32 %v11682_v29, %v11650_v8  ;;  %v15097_v40 = vpop.f32.mrf.mxu0 }
 0x2b7   :  { %v15099_v9 = vpop.f32.mrf.mxu1 }
 0x2b8   :  { %v11685_v38 = vpop.f32.mrf.mxu0 }
 0x2b9   :  { %v11653_v44 = vpop.f32.mrf.mxu1 }
 0x2ba   :  { %v2759_v0 = vadd.f32 %v11685_v38, %v11653_v44  ;;  %v15107_v12 = vpop.f32.mrf.mxu0 }
 0x2bb   :  { %v15109_v3 = vpop.f32.mrf.mxu1 }
 0x2bc   :  { %v11688_v15 = vpop.f32.mrf.mxu0 }
 0x2bd   :  { %v11656_v62 = vpop.f32.mrf.mxu1 }
 0x2be   :  { %v2769_v50 = vadd.f32 %v11688_v15, %v11656_v62  ;;  %v15117_v1 = vpop.f32.mrf.mxu0 }
 0x2bf   :  { %v15120_v11 = vpop.f32.mrf.mxu1 }
 0x2c0   :  { %v11691_v17 = vpop.f32.mrf.mxu0 }
 0x2c1   :  { %v11659_v32 = vpop.f32.mrf.mxu1 }
 0x2c2   :  { %v2779_v31 = vadd.f32 %v11691_v17, %v11659_v32  ;;  %v15122_v61 = vpop.f32.mrf.mxu0 }
 0x2c3   :  { %v15124_v2 = vpop.f32.mrf.mxu1 }
 0x2c4   :  { %v11694_v60 = vpop.f32.mrf.mxu0 }
 0x2c5   :  { %v11662_v52 = vpop.f32.mrf.mxu1 }
 0x2c6   :  { %v2789_v53 = vadd.f32 %v11694_v60, %v11662_v52  ;;  %v15132_v33 = vpop.f32.mrf.mxu0 }
 0x2c7   :  { %v15134_v18 = vpop.f32.mrf.mxu1 }
 0x2c8   :  { %v11697_v48 = vpop.f32.mrf.mxu0 }
 0x2c9   :  { %v11665_v22 = vpop.f32.mrf.mxu1 }
 0x2ca   :  { %v2799_v36 = vadd.f32 %v11697_v48, %v11665_v22  ;;  %v15136_v57 = vpop.f32.mrf.mxu0 }
 0x2cb   :  { %v15138_v46 = vpop.f32.mrf.mxu1 }
 0x2cc   :  { %v15140_v23 = vpop.f32.mrf.mxu0 }
 0x2cd   :  { %v11708_v43 = vpop.f32.mrf.mxu1 }
 0x2ce   :  { %v15142_v54 = vadd.f32 %v11708_v43, %v2729_v42  ;;  %v15144_v5 = vpop.f32.mrf.mxu0 }
 0x2cf   :  { %v15146_v26 = vpop.f32.mrf.mxu1 }
 0x2d0   :  { %v15148_v58 = vpop.f32.mrf.mxu0 }
 0x2d1   :  { %v11711_v51 = vpop.f32.mrf.mxu1 }
 0x2d2   :  { %v15150_v16 = vadd.f32 %v11711_v51, %v2739_v47  ;;  %v15152_v4 = vpop.f32.mrf.mxu0 }
 0x2d3   :  { %v15154_v55 = vpop.f32.mrf.mxu1 }
 0x2d4   :  { %v15156_v59 = vpop.f32.mrf.mxu0 }
 0x2d5   :  { %v11714_v63 = vpop.f32.mrf.mxu1 }
 0x2d6   :  { %v15163_v28 = vadd.f32 %v11714_v63, %v2749_v10  ;;  %v15165_v19 = vpop.f32.mrf.mxu0 }
 0x2d7   :  { %v15168_v13 = vpop.f32.mrf.mxu1 }
 0x2d8   :  { %v15170_v25 = vpop.f32.mrf.mxu0 }
 0x2d9   :  { %v11717_v37 = vpop.f32.mrf.mxu1 }
 0x2da   :  { %v15172_v42 = vadd.f32 %v11717_v37, %v2759_v0  ;;  %v15174_v34 = vpop.f32.mrf.mxu0 }
 0x2db   :  { %v15176_v6 = vpop.f32.mrf.mxu1 }
 0x2dc   :  { %v15178_v47 = vpop.f32.mrf.mxu0 }
 0x2dd   :  { %v11720_v29 = vpop.f32.mrf.mxu1 }
 0x2de   :  { %v15180_v7 = vadd.f32 %v11720_v29, %v2769_v50  ;;  %v15182_v8 = vpop.f32.mrf.mxu0 }
 0x2df   :  { %18136 = vst [vmem:[#allocation272_spill] sm:$0xff] %v15182_v8  ;;  %v15184_v21 = vpop.f32.mrf.mxu1 }
 0x2e0   :  { %v15186_v10 = vpop.f32.mrf.mxu0 }
 0x2e1   :  { %18137 = vst [vmem:[#allocation278_spill] sm:$0xff] %v15186_v10  ;;  %v11723_v30 = vpop.f32.mrf.mxu1 }
 0x2e2   :  { %v15188_v38 = vadd.f32 %v11723_v30, %v2779_v31  ;;  %v15190_v44 = vpop.f32.mrf.mxu0 }
 0x2e3   :  { %18139 = vst [vmem:[#allocation299_spill] sm:$0xff] %v15190_v44  ;;  %v15192_v41 = vpop.f32.mrf.mxu1 }
 0x2e4   :  { %18138 = vst [vmem:[#allocation288_spill] sm:$0xff] %v15188_v38  ;;  %v15194_v0 = vpop.f32.mrf.mxu0 }
 0x2e5   :  { %18140 = vst [vmem:[#allocation269_spill] sm:$0xff] %v15194_v0  ;;  %v11726_v39 = vpop.f32.mrf.mxu1 }
 0x2e6   :  { %v15196_v15 = vadd.f32 %v11726_v39, %v2789_v53  ;;  %v15198_v35 = vpop.f32.mrf.mxu0 }
 0x2e7   :  { %18142 = vst [vmem:[#allocation280_spill] sm:$0xff] %v15198_v35  ;;  %v15200_v20 = vpop.f32.mrf.mxu1 }
 0x2e8   :  { %18141 = vst [vmem:[#allocation273_spill] sm:$0xff] %v15196_v15  ;;  %18143 = vst [vmem:[#allocation290_spill] sm:$0xff] %v15200_v20  ;;  %v15202_v62 = vpop.f32.mrf.mxu0 }
 0x2e9   :  { %18144 = vst [vmem:[#allocation301_spill] sm:$0xff] %v15202_v62  ;;  %v11729_v50 = vpop.f32.mrf.mxu1 }
 0x2ea   :  { %v15204_v17 = vadd.f32 %v11729_v50, %v2799_v36  ;;  %v15206_v32 = vpop.f32.mrf.mxu0 }
 0x2eb   :  { %18146 = vst [vmem:[#allocation281_spill] sm:$0xff] %v15206_v32  ;;  %v15208_v31 = vpop.f32.mrf.mxu1 }
 0x2ec   :  { %18145 = vst [vmem:[#allocation274_spill] sm:$0xff] %v15204_v17  ;;  %18147 = vst [vmem:[#allocation292_spill] sm:$0xff] %v15208_v31  ;;  %v15210_v60 = vpop.f32.mrf.mxu0 }
 0x2ed   :  { %v11772_v52 = vpop.f32.mrf.mxu1 }
 0x2ee   :  { %v15212_v48 = vpop.f32.mrf.mxu0 }
 0x2ef   :  { %v3270_v53 = vpop.f32.mrf.mxu1 }
 0x2f0   :  { %v15214_v22 = vpop.f32.mrf.mxu0 }
 0x2f1   :  { %v11775_v43 = vpop.f32.mrf.mxu1 }
 0x2f2   :  { %v15216_v51 = vpop.f32.mrf.mxu0 }
 0x2f3   :  { %v3280_v63 = vpop.f32.mrf.mxu1 }
 0x2f4   :  { %v15218_v37 = vpop.f32.mrf.mxu0 }
 0x2f5   :  { %v15220_v36 = vpop.f32.mrf.mxu1 }
 0x2f6   :  { %v15222_v29 = vpop.f32.mrf.mxu0 }
 0x2f7   :  { %18148 = vst [vmem:[#allocation303_spill] sm:$0xff] %v15222_v29  ;;  %v15224_v30 = vpop.f32.mrf.mxu1 }
 0x2f8   :  { %v15226_v39 = vpop.f32.mrf.mxu0 }
 0x2f9   :  { %18149 = vst [vmem:[#allocation270_spill] sm:$0xff] %v15226_v39  ;;  %v15228_v50 = vpop.f32.mrf.mxu1 }
 0x2fa   :  { %v15230_v56 = vpop.f32.mrf.mxu0 }
 0x2fb   :  { %18150 = vst [vmem:[#allocation275_spill] sm:$0xff] %v15230_v56  ;;  %v15232_v24 = vpop.f32.mrf.mxu1 }
 0x2fc   :  { %18151 = vst [vmem:[#allocation282_spill] sm:$0xff] %v15232_v24  ;;  %v15234_v32 = vpop.f32.mrf.mxu0 }
 0x2fd   :  { %18152 = vst [vmem:[#allocation293_spill] sm:$0xff] %v15234_v32  ;;  %v15236_v62 = vpop.f32.mrf.mxu1 }
 0x2fe   :  { %18153 = vst [vmem:[#allocation305_spill] sm:$0xff] %v15236_v62  ;;  %v15238_v17 = vpop.f32.mrf.mxu0 }
 0x2ff   :  { %18154 = vst [vmem:[#allocation276_spill] sm:$0xff] %v15238_v17  ;;  %v15240_v31 = vpop.f32.mrf.mxu1 }
 0x300   :  { %18155 = vst [vmem:[#allocation283_spill] sm:$0xff] %v15240_v31  ;;  %v15242_v35 = vpop.f32.mrf.mxu0 }
 0x301   :  { %18156 = vst [vmem:[#allocation294_spill] sm:$0xff] %v15242_v35  ;;  %v15244_v0 = vpop.f32.mrf.mxu1 }
 0x302   :  { %18157 = vst [vmem:[#allocation306_spill] sm:$0xff] %v15244_v0  ;;  %v15246_v15 = vpop.f32.mrf.mxu0 }
 0x303   :  { %18158 = vst [vmem:[#allocation271_spill] sm:$0xff] %v15246_v15  ;;  %v15248_v20 = vpop.f32.mrf.mxu1 }
 0x304   :  { %18159 = vst [vmem:[#allocation277_spill] sm:$0xff] %v15248_v20  ;;  %v15250_v39 = vpop.f32.mrf.mxu0 }
 0x305   :  { %18160 = vst [vmem:[#allocation284_spill] sm:$0xff] %v15250_v39  ;;  %v15252_v56 = vpop.f32.mrf.mxu1 }
 0x306   :  { %18161 = vst [vmem:[#allocation295_spill] sm:$0xff] %v15252_v56  ;;  %v15254_v44 = vpop.f32.mrf.mxu0 }
 0x307   :  { %18162 = vst [vmem:[#allocation307_spill] sm:$0xff] %v15254_v44  ;;  %v15256_v32 = vpop.f32.mrf.mxu1 }
 0x308   :  { %18163 = vst [vmem:[#allocation279_spill] sm:$0xff] %v15256_v32  ;;  %v15258_v62 = vpop.f32.mrf.mxu0 }
 0x309   :  { %18164 = vst [vmem:[#allocation285_spill] sm:$0xff] %v15258_v62  ;;  %v15260_v17 = vpop.f32.mrf.mxu1 }
 0x30a   :  { %18165 = vst [vmem:[#allocation296_spill] sm:$0xff] %v15260_v17  ;;  %v15262_v31 = vpop.f32.mrf.mxu0 }
 0x30b   :  { %18166 = vst [vmem:[#allocation308_spill] sm:$0xff] %v15262_v31  ;;  %v15264_v35 = vpop.f32.mrf.mxu1 }
 0x30c   :  { %18167 = vst [vmem:[#allocation287_spill] sm:$0xff] %v15264_v35  ;;  %v11868_v0 = vpop.f32.mrf.mxu0  ;;  %v2724_v35 = vadd.f32 %v15083_v27, %v15085_v45 }
 0x30d   :  { %v11836_v15 = vpop.f32.mrf.mxu1 }
 0x30e   :  { %v15266_v20 = vpop.f32.mrf.mxu0  ;;  %v2953_v24 = vadd.f32 %v15146_v26, %v2724_v35  ;;  %v2744_v26 = vadd.f32 %v15097_v40, %v15099_v9  ;;  %v2754_v40 = vadd.f32 %v15107_v12, %v15109_v3  ;;  %v3187_v9 = vadd.f32 %v15156_v59, %v15163_v28 }
 0x30f   :  { %v3666_v10 = vpop.f32.mrf.mxu1  ;;  %v2774_v3 = vadd.f32 %v15122_v61, %v15124_v2 }
 0x310   :  { %v15268_v56 = vpop.f32.mrf.mxu0 }
 0x311   :  { %v11839_v39 = vpop.f32.mrf.mxu1  ;;  %18168 = vst [vmem:[#allocation298_spill] sm:$0xff] %v15268_v56 }
 0x312   :  { %v15274_v62 = vpop.f32.mrf.mxu0 }
 0x313   :  { %v3676_v38 = vpop.f32.mrf.mxu1  ;;  %18170 = vst [vmem:[#allocation268_spill] sm:$0xff] %v15274_v62  ;;  %v3183_v62 = vadd.f32 %v15140_v23, %v15142_v54 }
 0x314   :  { %v15282_v29 = vpop.f32.mrf.mxu0 }
 0x315   :  { %v15270_v44 = vpop.f32.mrf.mxu1  ;;  %18173 = vst [vmem:[#allocation291_spill] sm:$0xff] %v15282_v29  ;;  %v3350_v45 = vadd.f32 %v11772_v52, %v3183_v62  ;;  %v3182_v29 = vadd.f32 %v15144_v5, %v2953_v24  ;;  %v2764_v62 = vadd.f32 %v15117_v1, %v15120_v11 }
 0x317   :  { %v15272_v32 = vpop.f32.mrf.mxu1  ;;  %v3517_v24 = vadd.f32 %v15210_v60, %v3350_v45  ;;  %v2961_v1 = vadd.f32 %v15184_v21, %v2764_v62 }
 0x318   :  { %18169 = vst [vmem:[#allocation267_spill] sm:$0xff] %v15272_v32  ;;  %v2734_v32 = vadd.f32 %v15087_v49, %v15089_v14  ;;  %v3185_v49 = vadd.f32 %v15148_v58, %v15150_v16  ;;  %v2957_v14 = vadd.f32 %v15168_v13, %v2744_v26 }
 0x319   :  { %v15276_v17 = vpop.f32.mrf.mxu1  ;;  %v3746_v16 = vadd.f32 %v11836_v15, %v3517_v24  ;;  %v15341_v15 = vadd.f32 %v15136_v57, %v15138_v46  ;;  %v15353_v57 = vld [vmem:[%s17774_s2 + $0x1] ss:$0 sm:$0xff]  ;;  %v3191_v46 = vadd.f32 %v15178_v47, %v15180_v7 }
 0x31a   :  { %18171 = vst [vmem:[#allocation289_spill] sm:$0xff] %v15276_v17  ;;  %v15293_v17 = vpop.f32.mrf.mxu0  ;;  %v2955_v27 = vadd.f32 %v15154_v55, %v2734_v32  ;;  %v2959_v32 = vadd.f32 %v15176_v6, %v2754_v40  ;;  %v3186_v60 = vadd.f32 %v15165_v19, %v2957_v14  ;;  %v3189_v19 = vadd.f32 %v15170_v25, %v15172_v42  ;;  %v18181_v47 = vld [vmem:[#allocation298_spill] sm:$0xff] }
 0x31b   :  { %v15278_v31 = vpop.f32.mrf.mxu1 }
 0x31c   :  { %18172 = vst [vmem:[#allocation300_spill] sm:$0xff] %v15278_v31  ;;  %v15306_v23 = vpop.f32.mrf.mxu0  ;;  %v3184_v55 = vadd.f32 %v15152_v4, %v2955_v27  ;;  %v3354_v4 = vadd.f32 %v15220_v36, %v3187_v9  ;;  %v3353_v11 = vadd.f32 %v15224_v30, %v3186_v60  ;;  %v18180_v30 = vld [vmem:[#allocation278_spill] sm:$0xff]  ;;  %v18188_v60 = vld [vmem:[#allocation283_spill] sm:$0xff] }
 0x31d   :  { %v15284_v8 = vpop.f32.mrf.mxu1 }
 0x31e   :  { %v3351_v58 = vadd.f32 %v3280_v63, %v3184_v55  ;;  %v15324_v52 = vpop.f32.mrf.mxu0  ;;  %v3521_v21 = vadd.f32 %v15218_v37, %v3354_v4  ;;  %v18178_v63 = vld [vmem:[#allocation303_spill] sm:$0xff]  ;;  %v18185_v55 = vld [vmem:[#allocation270_spill] sm:$0xff] }
 0x31f   :  { %v15287_v56 = vpop.f32.mrf.mxu1  ;;  %v3520_v37 = vadd.f32 %v18178_v63, %v3353_v11  ;;  %v18190_v11 = vld [vmem:[#allocation291_spill] sm:$0xff] }
 0x320   :  { %18174 = vst [vmem:[#allocation302_spill] sm:$0xff] %v15287_v56  ;;  %v3349_v56 = vadd.f32 %v3270_v53, %v3182_v29  ;;  %v3518_v2 = vadd.f32 %v15216_v51, %v3351_v58  ;;  %v18176_v53 = vld [vmem:[#allocation282_spill] sm:$0xff]  ;;  %v3750_v51 = vadd.f32 %v15270_v44, %v3521_v21  ;;  %v18179_v29 = vld [vmem:[#allocation288_spill] sm:$0xff] }
 0x321   :  { %v15295_v31 = vpop.f32.mrf.mxu1 }
 0x322   :  { %18175 = vst [vmem:[#allocation304_spill] sm:$0xff] %v15295_v31  ;;  %v3352_v31 = vadd.f32 %v11775_v43, %v3185_v49  ;;  %v3516_v13 = vadd.f32 %v15212_v48, %v3349_v56  ;;  %v2784_v56 = vadd.f32 %v15132_v33, %v15134_v18  ;;  %v3356_v33 = vadd.f32 %v15228_v50, %v3189_v19  ;;  %v15348_v48 = vpop.f32.mrf.mxu0  ;;  %v18184_v49 = vld [vmem:[#allocation267_spill] sm:$0xff] }
 0x323   :  { %v15301_v35 = vpop.f32.mrf.mxu1  ;;  %v3188_v18 = vadd.f32 %v15174_v34, %v2959_v32  ;;  %v3747_v42 = vadd.f32 %v3676_v38, %v3518_v2  ;;  %v18177_v34 = vld [vmem:[#allocation272_spill] sm:$0xff]  ;;  %v18182_v38 = vld [vmem:[#allocation305_spill] sm:$0xff]  ;;  %v3749_v14 = vadd.f32 %v18184_v49, %v3520_v37  ;;  %v18187_v32 = vld [vmem:[#allocation290_spill] sm:$0xff]  ;;  %v3917_v19 = vadd.f32 %v18190_v11, %v3750_v51 }
 0x324   :  { %v3745_v59 = vadd.f32 %v3666_v10, %v3516_v13  ;;  %v3519_v28 = vadd.f32 %v15214_v22, %v3352_v31  ;;  %v3913_v10 = vadd.f32 %v11868_v0, %v3746_v16  ;;  %v2963_v31 = vadd.f32 %v15192_v41, %v2774_v3  ;;  %v15370_v44 = vpop.f32.mrf.mxu0  ;;  %v18186_v13 = vld [vmem:[#allocation268_spill] sm:$0xff] }
 0x325   :  { %v15308_v54 = vpop.f32.mrf.mxu1  ;;  %v3355_v22 = vadd.f32 %v18176_v53, %v3188_v18  ;;  %v3190_v43 = vadd.f32 %v18177_v34, %v2961_v1  ;;  %v3358_v45 = vadd.f32 %v18182_v38, %v3191_v46  ;;  %v3523_v24 = vadd.f32 %v18185_v55, %v3356_v33  ;;  %v18192_v18 = vld [vmem:[#allocation306_spill] sm:$0xff]  ;;  %v18194_v46 = vld [vmem:[#allocation269_spill] sm:$0xff]  ;;  %v18196_v34 = vld [vmem:[#allocation300_spill] sm:$0xff] }
 0x326   :  { %v3748_v61 = vadd.f32 %v11839_v39, %v3519_v28  ;;  %v3912_v41 = vadd.f32 %v15266_v20, %v3745_v59  ;;  %v3193_v39 = vadd.f32 %v18180_v30, %v18179_v29  ;;  %v18183_v20 = vld [vmem:[#allocation299_spill] sm:$0xff]  ;;  %v3914_v62 = vadd.f32 %v18186_v13, %v3747_v42  ;;  %v18195_v42 = vld [vmem:[#allocation293_spill] sm:$0xff]  ;;  %v18198_v30 = vld [vmem:[#allocation280_spill] sm:$0xff] }
 0x327   :  { %v15316_v5 = vpop.f32.mrf.mxu1  ;;  %v3192_v26 = vadd.f32 %v18183_v20, %v2963_v31  ;;  %v2965_v4 = vadd.f32 %v18187_v32, %v2784_v56  ;;  %v3357_v3 = vadd.f32 %v18188_v60, %v3190_v43  ;;  %v18189_v59 = vld [vmem:[#allocation275_spill] sm:$0xff]  ;;  %v18200_v49 = vld [vmem:[#allocation292_spill] sm:$0xff] }
 0x328   :  { %v3915_v7 = vadd.f32 %v18181_v47, %v3748_v61  ;;  %v3522_v28 = vadd.f32 %v18189_v59, %v3355_v22  ;;  %v18191_v61 = vld [vmem:[#allocation289_spill] sm:$0xff]  ;;  %v3360_v21 = vadd.f32 %v18192_v18, %v3193_v39  ;;  %v3916_v22 = vadd.f32 %v15293_v17, %v3749_v14  ;;  %v18201_v55 = vld [vmem:[#allocation295_spill] sm:$0xff]  ;;  %v18209_v18 = vld [vmem:[#allocation296_spill] sm:$0xff] }
 0x329   :  { %v15326_v12 = vpop.f32.mrf.mxu1  ;;  %v3752_v2 = vadd.f32 %v18191_v61, %v3523_v24  ;;  %v3194_v39 = vadd.f32 %v18198_v30, %v2965_v4  ;;  %v2967_v14 = vadd.f32 %v18200_v49, %v15341_v15  ;;  %v18202_v24 = vld [vmem:[#allocation302_spill] sm:$0xff]  ;;  %v18206_v15 = vld [vmem:[#allocation301_spill] sm:$0xff]  ;;  %v18208_v61 = vld [vmem:[#allocation304_spill] sm:$0xff] }
 0x32a   :  { %v3751_v43 = vadd.f32 %v18196_v34, %v3522_v28  ;;  %v18207_v28 = vld [vmem:[#allocation271_spill] sm:$0xff]  ;;  %v18216_v49 = vld [vmem:[#allocation285_spill] sm:$0xff] }
 0x32b   :  { %v15337_v6 = vpop.f32.mrf.mxu1  ;;  %v3919_v20 = vadd.f32 %v15306_v23, %v3752_v2  ;;  %v18204_v23 = vld [vmem:[#allocation279_spill] sm:$0xff] }
 0x32c   :  { %v3918_v4 = vadd.f32 %v15324_v52, %v3751_v43  ;;  %v3361_v60 = vadd.f32 %v18204_v23, %v3194_v39  ;;  %v18213_v30 = vld [vmem:[#allocation307_spill] sm:$0xff] }
 0x32d   :  { %v11900_v25 = vpop.f32.mrf.mxu1 }
 0x32e   :  { %v4080_v0 = vadd.f32 %v11900_v25, %v3913_v10  ;;  %v18193_v25 = vld [vmem:[#allocation273_spill] sm:$0xff]  ;;  %v3528_v39 = vadd.f32 %v18213_v30, %v3361_v60 }
 0x32f   :  { %v4000_v36 = vpop.f32.mrf.mxu1  ;;  %v3195_v56 = vadd.f32 %v18194_v46, %v18193_v25 }
 0x330   :  { %v4104_v50 = vadd.f32 %v15353_v57, %v4080_v0  ;;  %v4079_v27 = vadd.f32 %v4000_v36, %v3912_v41  ;;  %v3525_v0 = vadd.f32 %v18195_v42, %v3358_v45  ;;  %v15385_v41 = vpop.f32.mrf.mxu0  ;;  %v18197_v36 = vld [vmem:[#allocation277_spill] sm:$0xff] }
 0x331   :  { %v11903_v40 = vpop.f32.mrf.mxu1  ;;  %v3359_v29 = vadd.f32 %v18197_v36, %v3192_v26  ;;  %v3362_v26 = vadd.f32 %v18201_v55, %v3195_v56  ;;  %v18211_v56 = vld [vmem:[#allocation284_spill] sm:$0xff] }
 0x332   :  { %v4120_v9 = vmax.f32 %v4104_v50, 0.0  ;;  %v4103_v58 = vadd.f32 %v15353_v57, %v4079_v27  ;;  %v4082_v16 = vadd.f32 %v11903_v40, %v3915_v7  ;;  %v3754_v50 = vadd.f32 %v15284_v8, %v3525_v0  ;;  %v18199_v27 = vld [vmem:[#allocation276_spill] sm:$0xff] }
 0x333   :  { %v4010_v1 = vpop.f32.mrf.mxu1  ;;  %v3524_v47 = vadd.f32 %v18199_v27, %v3357_v3  ;;  %v18205_v3 = vld [vmem:[#allocation274_spill] sm:$0xff]  ;;  %v3529_v42 = vadd.f32 %v18211_v56, %v3362_v26 }
 0x334   :  { %4136 = vst.msk [vmem:[#allocation2 + $0x21] sm:$0xff] %vm578_vm0, %v4120_v9  ;;  %v4119_v10 = vmax.f32 %v4103_v58, 0.0  ;;  %v4106_v31 = vadd.f32 %v15353_v57, %v4082_v16  ;;  %v4081_v33 = vadd.f32 %v4010_v1, %v3914_v62  ;;  %v18203_v9 = vld [vmem:[#allocation294_spill] sm:$0xff]  ;;  %v3883_v58 = vpop.f32.mrf.mxu0  ;;  %v3197_v59 = vadd.f32 %v18206_v15, %v18205_v3 }
 0x335   :  { %v11906_v53 = vpop.f32.mrf.mxu1  ;;  %v3753_v40 = vadd.f32 %v18202_v24, %v3524_v47  ;;  %v3527_v8 = vadd.f32 %v18203_v9, %v3360_v21  ;;  %v3526_v1 = vadd.f32 %v18207_v28, %v3359_v29  ;;  %v18210_v21 = vld [vmem:[#allocation281_spill] sm:$0xff]  ;;  %v3758_v29 = vadd.f32 %v15308_v54, %v3529_v42 }
 0x336   :  { %4135 = vst.msk [vmem:[#allocation2 + $0x11] sm:$0xff] %vm578_vm0, %v4119_v10  ;;  %v4122_v51 = vmax.f32 %v4106_v31, 0.0  ;;  %v4105_v63 = vadd.f32 %v15353_v57, %v4081_v33  ;;  %v4084_v37 = vadd.f32 %v11906_v53, %v3917_v19  ;;  %v3921_v19 = vadd.f32 %v15348_v48, %v3754_v50  ;;  %v11886_v46 = vpop.f32.mrf.mxu0  ;;  %v18215_v54 = vld [vmem:[#allocation297_spill] sm:$0xff] }
 0x337   :  { %v4020_v7 = vpop.f32.mrf.mxu1  ;;  %v3756_v2 = vadd.f32 %v18208_v61, %v3527_v8  ;;  %v3364_v52 = vadd.f32 %v18209_v18, %v3197_v59  ;;  %v3196_v25 = vadd.f32 %v18210_v21, %v2967_v14  ;;  %v3755_v48 = vadd.f32 %v15301_v35, %v3526_v1  ;;  %v9975_v35 = vld [vmem:[%s17773_s1 + $0x270] sm:$0xff]  ;;  %v9994_v8 = vld [vmem:[%s17773_s1 + $0x308] sm:$0xff] }
 0x338   :  { %4138 = vst.msk [vmem:[#allocation2 + $0x41] sm:$0xff] %vm578_vm0, %v4122_v51  ;;  %v4121_v17 = vmax.f32 %v4105_v63, 0.0  ;;  %v4108_v38 = vadd.f32 %v15353_v57, %v4084_v37  ;;  %v4083_v45 = vadd.f32 %v4020_v7, %v3916_v22  ;;  %v3920_v22 = vadd.f32 %v15370_v44, %v3753_v40  ;;  %v9995_v37 = vld [vmem:[%s17773_s1 + $0x310] sm:$0xff]  ;;  %v18212_v44 = vld [vmem:[#allocation287_spill] sm:$0xff] }
 0x339   :  { %v11909_v16 = vpop.f32.mrf.mxu1  ;;  %v3363_v36 = vadd.f32 %v18212_v44, %v3196_v25  ;;  %v3531_v14 = vadd.f32 %v18216_v49, %v3364_v52  ;;  %v4198_v25 = vld [vmem:[#allocation2 + $0xa0] sm:$0xff] }
 0x33a   :  { %4137 = vst.msk [vmem:[#allocation2 + $0x31] sm:$0xff] %vm578_vm0, %v4121_v17  ;;  %v4124_v13 = vmax.f32 %v4108_v38, 0.0  ;;  %v4107_v62 = vadd.f32 %v15353_v57, %v4083_v45  ;;  %v4086_v32 = vadd.f32 %v11909_v16, %v3919_v20  ;;  %v18214_v17 = vld [vmem:[#allocation286_spill] sm:$0xff]  ;;  %v3923_v38 = vadd.f32 %v15385_v41, %v3756_v2  ;;  %v3893_v45 = vpop.f32.mrf.mxu0  ;;  %v9974_v16 = vld [vmem:[%s17773_s1 + $0x268] sm:$0xff] }
 0x33b   :  { %v4030_v11 = vpop.f32.mrf.mxu1  ;;  %v15423_v63 = vld [vmem:[#allocation2 + $0x20] sm:$0xff]  ;;  %v3757_v20 = vadd.f32 %v15316_v5, %v3528_v39  ;;  %v3922_v5 = vadd.f32 %v3883_v58, %v3755_v48  ;;  %v3925_v58 = vadd.f32 %v11886_v46, %v3758_v29 }
 0x33c   :  { %4140 = vst.msk [vmem:[#allocation2 + $0x61] sm:$0xff] %vm578_vm0, %v4124_v13  ;;  %v4123_v10 = vmax.f32 %v4107_v62, 0.0  ;;  %v4110_v31 = vadd.f32 %v15353_v57, %v4086_v32  ;;  %v4085_v33 = vadd.f32 %v4030_v11, %v3918_v4  ;;  %v18217_v13 = vld [vmem:[#allocation308_spill] sm:$0xff]  ;;  %v3760_v4 = vadd.f32 %v15326_v12, %v3531_v14  ;;  %v11889_v15 = vpop.f32.mrf.mxu0  ;;  %v15566_v49 = vld [vmem:[#allocation2 + $0x21] sm:$0xff] }
 0x33d   :  { %v11912_v0 = vpop.f32.mrf.mxu1  ;;  %v4189_v53 = vld [vmem:[#allocation2 + $0x10] sm:$0xff]  ;;  %v3530_v62 = vadd.f32 %v18217_v13, %v3363_v36  ;;  %v3924_v1 = vadd.f32 %v3893_v45, %v3757_v20  ;;  %v4729_v13 = vld [vmem:[#allocation2 + $0xa1] sm:$0xff] }
 0x33e   :  { %4139 = vst.msk [vmem:[#allocation2 + $0x51] sm:$0xff] %vm578_vm0, %v4123_v10  ;;  %v4126_v34 = vmax.f32 %v4110_v31, 0.0  ;;  %v4109_v43 = vadd.f32 %v15353_v57, %v4085_v33  ;;  %v4088_v51 = vadd.f32 %v11912_v0, %v3921_v19  ;;  %11930 = vmatprep.mubr.msk.f32.mxu0 %vm578_vm0, %v4189_v53  ;;  %11963 = vmatmul.mubr.msk.f32.vlgmr.msra.gmra.mxu1 %vm578_vm0, %v4189_v53  ;;  %v9993_v10 = vld [vmem:[%s17773_s1 + $0x300] sm:$0xff]  ;;  %v3903_v46 = vpop.f32.mrf.mxu0  ;;  %v15562_v20 = vld [vmem:[#allocation2 + $0x11] sm:$0xff] }
 0x33f   :  { %v4040_v50 = vpop.f32.mrf.mxu1  ;;  %11931 = vmatmul.mubr.msk.f32.vlgmr.msra.gmra.mxu0 %vm578_vm0, %v15423_v63  ;;  %11965 = vmatprep.mubr.msk.f32.mxu1 %vm578_vm0, %v15423_v63  ;;  %v15453_v41 = vld [vmem:[#allocation2 + $0x40] sm:$0xff]  ;;  %v3759_v11 = vadd.f32 %v15337_v6, %v3530_v62  ;;  %v3927_v21 = vadd.f32 %v11889_v15, %v3760_v4  ;;  %v9987_v14 = vld [vmem:[%s17773_s1 + $0x2d0] sm:$0xff] }
 0x340   :  { %4142 = vst.msk [vmem:[#allocation2 + $0x81] sm:$0xff] %vm578_vm0, %v4126_v34  ;;  %v4125_v27 = vmax.f32 %v4109_v43, 0.0  ;;  %v4112_v47 = vadd.f32 %v15353_v57, %v4088_v51  ;;  %v4087_v7 = vadd.f32 %v4040_v50, %v3920_v22  ;;  %11987 = vmatpush3.msra.mxu0 %v18214_v17  ;;  %12019 = vmatpush3.msra.mxu1 %v18215_v54  ;;  %v9973_v6 = vld [vmem:[%s17773_s1 + $0x260] sm:$0xff]  ;;  %v9988_v43 = vld [vmem:[%s17773_s1 + $0x2d8] sm:$0xff] }
 0x341   :  { %v11915_v55 = vpop.f32.mrf.mxu1  ;;  %v15445_v26 = vld [vmem:[#allocation2 + $0x30] sm:$0xff]  ;;  %11988 = vmatprep.subr.mxu0 %v9995_v37  ;;  %12020 = vmatprep.subr.mxu1 %v9975_v35  ;;  %v3926_v48 = vadd.f32 %v3903_v46, %v3759_v11  ;;  %v10000_v51 = vld [vmem:[%s17773_s1 + $0x338] sm:$0xff]  ;;  %v5284_v46 = vld [vmem:[#allocation2 + $0x22] sm:$0xff] }
 0x342   :  { %4141 = vst.msk [vmem:[#allocation2 + $0x71] sm:$0xff] %vm578_vm0, %v4125_v27  ;;  %v4128_v24 = vmax.f32 %v4112_v47, 0.0  ;;  %v4111_v40 = vadd.f32 %v15353_v57, %v4087_v7  ;;  %v4090_v9 = vadd.f32 %v11915_v55, %v3923_v38  ;;  %11933 = vmatprep.mubr.msk.f32.mxu0 %vm578_vm0, %v15445_v26  ;;  %11966 = vmatmul.mubr.msk.f32.gmra.mxu1 %vm578_vm0, %v15445_v26  ;;  %v4719_v38 = vld [vmem:[#allocation2 + $0x1] sm:$0xff]  ;;  %v9979_v11 = vld [vmem:[%s17773_s1 + $0x290] sm:$0xff] }
 0x343   :  { %v4050_v32 = vpop.f32.mrf.mxu1  ;;  %11934 = vmatmul.mubr.msk.f32.gmra.mxu0 %vm578_vm0, %v15453_v41  ;;  %11968 = vmatprep.mubr.msk.f32.mxu1 %vm578_vm0, %v15453_v41  ;;  %v15478_v2 = vld [vmem:[#allocation2 + $0x60] sm:$0xff]  ;;  %v9986_v55 = vld [vmem:[%s17773_s1 + $0x2c8] sm:$0xff] }
 0x344   :  { %4144 = vst.msk [vmem:[#allocation2 + $0xc1] sm:$0xff] %vm578_vm0, %v4128_v24  ;;  %v4127_v23 = vmax.f32 %v4111_v40, 0.0  ;;  %v4114_v60 = vadd.f32 %v15353_v57, %v4090_v9  ;;  %v4089_v3 = vadd.f32 %v4050_v32, %v3922_v5  ;;  %11989 = vmatpush3.msra.mxu0 %v9995_v37  ;;  %12021 = vmatpush3.msra.mxu1 %v9975_v35  ;;  %v15584_v24 = vld [vmem:[#allocation2 + $0x41] sm:$0xff] }
 0x345   :  { %v11918_v59 = vpop.f32.mrf.mxu1  ;;  %v15469_v28 = vld [vmem:[#allocation2 + $0x50] sm:$0xff]  ;;  %11990 = vmatprep.subr.mxu0 %v9994_v8  ;;  %12022 = vmatprep.subr.mxu1 %v9974_v16  ;;  %v9985_v40 = vld [vmem:[%s17773_s1 + $0x2c0] sm:$0xff] }
 0x346   :  { %4143 = vst.msk [vmem:[#allocation2 + $0xb1] sm:$0xff] %vm578_vm0, %v4127_v23  ;;  %v4130_v12 = vmax.f32 %v4114_v60, 0.0  ;;  %v4113_v19 = vadd.f32 %v15353_v57, %v4089_v3  ;;  %v4092_v61 = vadd.f32 %v11918_v59, %v3925_v58  ;;  %11936 = vmatprep.mubr.msk.f32.mxu0 %vm578_vm0, %v15469_v28  ;;  %11969 = vmatmul.mubr.msk.f32.gmra.mxu1 %vm578_vm0, %v15469_v28  ;;  %v15598_v9 = vld [vmem:[#allocation2 + $0x51] sm:$0xff]  ;;  %v15602_v5 = vld [vmem:[#allocation2 + $0x61] sm:$0xff] }
 0x347   :  { %v4060_v31 = vpop.f32.mrf.mxu1  ;;  %11937 = vmatmul.mubr.msk.f32.gmra.mxu0 %vm578_vm0, %v15478_v2  ;;  %11971 = vmatprep.mubr.msk.f32.mxu1 %vm578_vm0, %v15478_v2  ;;  %v15500_v34 = vld [vmem:[#allocation2 + $0x80] sm:$0xff]  ;;  %v9992_v23 = vld [vmem:[%s17773_s1 + $0x2f8] sm:$0xff] }
 0x348   :  { %4146 = vst.msk [vmem:[#allocation2 + $0xe1] sm:$0xff] %vm578_vm0, %v4130_v12  ;;  %v4129_v33 = vmax.f32 %v4113_v19, 0.0  ;;  %v4116_v18 = vadd.f32 %v15353_v57, %v4092_v61  ;;  %v4091_v52 = vadd.f32 %v4060_v31, %v3924_v1  ;;  %11991 = vmatpush3.msra.mxu0 %v9994_v8  ;;  %12023 = vmatpush3.msra.mxu1 %v9974_v16  ;;  %v9998_v8 = vld [vmem:[%s17773_s1 + $0x328] sm:$0xff]  ;;  %v4197_v16 = vld [vmem:[#allocation2 + $0x90] sm:$0xff]  ;;  %v9997_v32 = vld [vmem:[%s17773_s1 + $0x320] sm:$0xff] }
 0x349   :  { %v11921_v56 = vpop.f32.mrf.mxu1  ;;  %v15492_v42 = vld [vmem:[#allocation2 + $0x70] sm:$0xff]  ;;  %11992 = vmatprep.subr.mxu0 %v9993_v10  ;;  %12024 = vmatprep.subr.mxu1 %v9973_v6  ;;  %v9978_v12 = vld [vmem:[%s17773_s1 + $0x288] sm:$0xff]  ;;  %v9977_v61 = vld [vmem:[%s17773_s1 + $0x280] sm:$0xff] }
 0x34a   :  { %4145 = vst.msk [vmem:[#allocation2 + $0xd1] sm:$0xff] %vm578_vm0, %v4129_v33  ;;  %v4132_v0 = vmax.f32 %v4116_v18, 0.0  ;;  %v4115_v53 = vadd.f32 %v15353_v57, %v4091_v52  ;;  %v4094_v22 = vadd.f32 %v11921_v56, %v3927_v21  ;;  %11939 = vmatprep.mubr.msk.f32.mxu0 %vm578_vm0, %v15492_v42  ;;  %11972 = vmatmul.mubr.msk.f32.gmra.mxu1 %vm578_vm0, %v15492_v42  ;;  %v15616_v62 = vld [vmem:[#allocation2 + $0x71] sm:$0xff]  ;;  %v9990_v31 = vld [vmem:[%s17773_s1 + $0x2e8] sm:$0xff]  ;;  %v9989_v33 = vld [vmem:[%s17773_s1 + $0x2e0] sm:$0xff] }
 0x34b   :  { %v4070_v37 = vpop.f32.mrf.mxu1  ;;  %11940 = vmatmul.mubr.msk.f32.gmra.mxu0 %vm578_vm0, %v15500_v34  ;;  %11974 = vmatprep.mubr.msk.f32.mxu1 %vm578_vm0, %v4198_v25  ;;  %v15517_v50 = vld [vmem:[#allocation2 + $0xc0] sm:$0xff]  ;;  %v9991_v19 = vld [vmem:[%s17773_s1 + $0x2f0] sm:$0xff] }
 0x34c   :  { %4148 = vst.msk [vmem:[#allocation2 + $0x101] sm:$0xff] %vm578_vm0, %v4132_v0  ;;  %v4131_v35 = vmax.f32 %v4115_v53, 0.0  ;;  %v4118_v44 = vadd.f32 %v15353_v57, %v4094_v22  ;;  %v4093_v36 = vadd.f32 %v4070_v37, %v3926_v48  ;;  %11993 = vmatpush3.msra.mxu0 %v9993_v10  ;;  %12025 = vmatpush3.msra.mxu1 %v9973_v6  ;;  %v15631_v4 = vld [vmem:[#allocation2 + $0xc1] sm:$0xff]  ;;  %v10004_v10 = vld [vmem:[%s17773_s1 + $0x358] sm:$0xff] }
 0x34d   :  { %v4199_v29 = vld [vmem:[#allocation2 + $0xb0] sm:$0xff]  ;;  %12050 = vmatprep.subr.mxu0 %v9988_v43  ;;  %12082 = vmatprep.subr.mxu1 %v10000_v51  ;;  %v5282_v21 = vld [vmem:[#allocation2 + $0x2] sm:$0xff] }
 0x34e   :  { %4147 = vst.msk [vmem:[#allocation2 + $0xf1] sm:$0xff] %vm578_vm0, %v4131_v35  ;;  %v4134_v30 = vmax.f32 %v4118_v44, 0.0  ;;  %v4117_v39 = vadd.f32 %v15353_v57, %v4093_v36  ;;  %11942 = vmatprep.mubr.msk.f32.mxu0 %vm578_vm0, %v4199_v29  ;;  %11975 = vmatmul.mubr.msk.f32.gmra.mxu1 %vm578_vm0, %v4199_v29  ;;  %v15627_v58 = vld [vmem:[#allocation2 + $0xb1] sm:$0xff]  ;;  %v5286_v0 = vld [vmem:[#allocation2 + $0x42] sm:$0xff] }
 0x34f   :  { %11943 = vmatmul.mubr.msk.f32.gmra.mxu0 %vm578_vm0, %v15517_v50  ;;  %11977 = vmatprep.mubr.msk.f32.mxu1 %vm578_vm0, %v15517_v50  ;;  %v15531_v57 = vld [vmem:[#allocation2 + $0xe0] sm:$0xff]  ;;  %v4728_v6 = vld [vmem:[#allocation2 + $0x91] sm:$0xff]  ;;  %v10002_v53 = vld [vmem:[%s17773_s1 + $0x348] sm:$0xff] }
 0x350   :  { %4150 = vst.msk [vmem:[#allocation2 + $0x121] sm:$0xff] %vm578_vm0, %v4134_v30  ;;  %v4133_v27 = vmax.f32 %v4117_v39, 0.0  ;;  %v4733_v3 = vld [vmem:[#allocation2 + $0xe1] sm:$0xff]  ;;  %v4738_v52 = vld [vmem:[#allocation2 + $0x131] sm:$0xff] }
 0x351   :  { %v15524_v47 = vld [vmem:[#allocation2 + $0xd0] sm:$0xff]  ;;  %v10001_v48 = vld [vmem:[%s17773_s1 + $0x340] sm:$0xff] }
 0x352   :  { %4149 = vst.msk [vmem:[#allocation2 + $0x111] sm:$0xff] %vm578_vm0, %v4133_v27  ;;  %11945 = vmatprep.mubr.msk.f32.mxu0 %vm578_vm0, %v15524_v47  ;;  %11978 = vmatmul.mubr.msk.f32.gmra.mxu1 %vm578_vm0, %v15524_v47  ;;  %v4732_v60 = vld [vmem:[#allocation2 + $0xd1] sm:$0xff]  ;;  %v5292_v37 = vld [vmem:[#allocation2 + $0xa2] sm:$0xff] }
 0x353   :  { %11946 = vmatmul.mubr.msk.f32.gmra.mxu0 %vm578_vm0, %v15531_v57  ;;  %11980 = vmatprep.mubr.msk.f32.mxu1 %vm578_vm0, %v15531_v57  ;;  %v15543_v17 = vld [vmem:[#allocation2 + $0x100] sm:$0xff]  ;;  %v5283_v25 = vld [vmem:[#allocation2 + $0x12] sm:$0xff] }
 0x354   :  { %v4735_v59 = vld [vmem:[#allocation2 + $0x101] sm:$0xff]  ;;  %v5285_v56 = vld [vmem:[#allocation2 + $0x32] sm:$0xff] }
 0x355   :  { %v15537_v7 = vld [vmem:[#allocation2 + $0xf0] sm:$0xff]  ;;  %v5294_v44 = vld [vmem:[#allocation2 + $0xc2] sm:$0xff] }
 0x356   :  { %11948 = vmatprep.mubr.msk.f32.mxu0 %vm578_vm0, %v15537_v7  ;;  %11981 = vmatmul.mubr.msk.f32.gmra.mxu1 %vm578_vm0, %v15537_v7  ;;  %v4734_v15 = vld [vmem:[#allocation2 + $0xf1] sm:$0xff]  ;;  %v5296_v29 = vld [vmem:[#allocation2 + $0xe2] sm:$0xff] }
 0x357   :  { %11949 = vmatmul.mubr.msk.f32.gmra.mxu0 %vm578_vm0, %v15543_v17  ;;  %11983 = vmatprep.mubr.msk.f32.mxu1 %vm578_vm0, %v15543_v17  ;;  %v15555_v45 = vld [vmem:[#allocation2 + $0x120] sm:$0xff]  ;;  %v5287_v22 = vld [vmem:[#allocation2 + $0x52] sm:$0xff] }
 0x358   :  { %v4737_v18 = vld [vmem:[#allocation2 + $0x121] sm:$0xff]  ;;  %v5293_v35 = vld [vmem:[#allocation2 + $0xb2] sm:$0xff] }
 0x359   :  { %v15549_v54 = vld [vmem:[#allocation2 + $0x110] sm:$0xff]  ;;  %v5298_v39 = vld [vmem:[#allocation2 + $0x102] sm:$0xff] }
 0x35a   :  { %11951 = vmatprep.mubr.msk.f32.mxu0 %vm578_vm0, %v15549_v54  ;;  %11984 = vmatmul.mubr.msk.f32.gmra.mxu1 %vm578_vm0, %v15549_v54  ;;  %v4736_v1 = vld [vmem:[#allocation2 + $0x111] sm:$0xff]  ;;  %v5300_v27 = vld [vmem:[#allocation2 + $0x122] sm:$0xff] }
 0x35b   :  { %11952 = vmatmul.mubr.msk.f32.gmra.mxu0 %vm578_vm0, %v15555_v45  ;;  %12026 = vmatprep.mubr.msk.f32.mxu1 %vm578_vm0, %v4719_v38  ;;  %v5295_v36 = vld [vmem:[#allocation2 + $0xd2] sm:$0xff] }
 0x35c   :  { %11994 = vmatprep.mubr.msk.f32.mxu0 %vm578_vm0, %v15423_v63  ;;  %v15577_v63 = vld [vmem:[#allocation2 + $0x31] sm:$0xff] }
 0x35d   :  { %v5297_v30 = vld [vmem:[#allocation2 + $0xf2] sm:$0xff] }
 0x35e   :  { %12027 = vmatmul.mubr.msk.f32.vlgmr.msra.gmra.mxu1 %vm578_vm0, %v15562_v20 }
 0x35f   :  { %11995 = vmatmul.mubr.msk.f32.vlgmr.msra.gmra.mxu0 %vm578_vm0, %v15445_v26  ;;  %12029 = vmatprep.mubr.msk.f32.mxu1 %vm578_vm0, %v15566_v49  ;;  %v9999_v26 = vld [vmem:[%s17773_s1 + $0x330] sm:$0xff] }
 0x360   :  { %12051 = vmatpush3.msra.mxu0 %v9988_v43  ;;  %11997 = vmatprep.mubr.msk.f32.mxu0 %vm578_vm0, %v15453_v41  ;;  %v9980_v41 = vld [vmem:[%s17773_s1 + $0x298] sm:$0xff] }
 0x361   :  { %12052 = vmatprep.subr.mxu0 %v9987_v14  ;;  %12083 = vmatpush3.msra.mxu1 %v10000_v51  ;;  %v5289_v43 = vld [vmem:[#allocation2 + $0x72] sm:$0xff]  ;;  %v5290_v51 = vld [vmem:[#allocation2 + $0x82] sm:$0xff] }
 0x362   :  { %12030 = vmatmul.mubr.msk.f32.gmra.mxu1 %vm578_vm0, %v15577_v63  ;;  %12053 = vmatpush3.msra.mxu0 %v9987_v14 }
 0x363   :  { %11998 = vmatmul.mubr.msk.f32.gmra.mxu0 %vm578_vm0, %v15469_v28  ;;  %12032 = vmatprep.mubr.msk.f32.mxu1 %vm578_vm0, %v15584_v24  ;;  %v4207_v28 = vld [vmem:[#allocation2 + $0x130] sm:$0xff] }
 0x364   :  { %12000 = vmatprep.mubr.msk.f32.mxu0 %vm578_vm0, %v15478_v2  ;;  %12054 = vmatprep.subr.mxu0 %v9986_v55  ;;  %v4727_v2 = vld [vmem:[#allocation2 + $0x81] sm:$0xff] }
 0x365   :  { %12055 = vmatpush3.msra.mxu0 %v9986_v55  ;;  %12084 = vmatprep.subr.mxu1 %v9999_v26 }
 0x366   :  { %12033 = vmatmul.mubr.msk.f32.gmra.mxu1 %vm578_vm0, %v15598_v9  ;;  %12056 = vmatprep.subr.mxu0 %v9985_v40 }
 0x367   :  { %12001 = vmatmul.mubr.msk.f32.gmra.mxu0 %vm578_vm0, %v15492_v42  ;;  %12035 = vmatprep.mubr.msk.f32.mxu1 %vm578_vm0, %v15602_v5  ;;  %v10003_v42 = vld [vmem:[%s17773_s1 + $0x350] sm:$0xff] }
 0x368   :  { %12003 = vmatprep.mubr.msk.f32.mxu0 %vm578_vm0, %v15500_v34  ;;  %12057 = vmatpush3.msra.mxu0 %v9985_v40  ;;  %v5288_v34 = vld [vmem:[#allocation2 + $0x62] sm:$0xff] }
 0x369   :  { %12085 = vmatpush3.msra.mxu1 %v9999_v26  ;;  %12114 = vmatprep.subr.mxu0 %v9980_v41 }
 0x36a   :  { %12036 = vmatmul.mubr.msk.f32.gmra.mxu1 %vm578_vm0, %v15616_v62  ;;  %12086 = vmatprep.subr.mxu1 %v9998_v8 }
 0x36b   :  { %12004 = vmatmul.mubr.msk.f32.gmra.mxu0 %vm578_vm0, %v4197_v16  ;;  %12038 = vmatprep.mubr.msk.f32.mxu1 %vm578_vm0, %v4729_v13 }
 0x36c   :  { %12006 = vmatprep.mubr.msk.f32.mxu0 %vm578_vm0, %v15517_v50  ;;  %12087 = vmatpush3.msra.mxu1 %v9998_v8  ;;  %v5299_v50 = vld [vmem:[#allocation2 + $0x112] sm:$0xff] }
 0x36d   :  { %12088 = vmatprep.subr.mxu1 %v9997_v32 }
 0x36e   :  { %12039 = vmatmul.mubr.msk.f32.gmra.mxu1 %vm578_vm0, %v15627_v58 }
 0x36f   :  { %12007 = vmatmul.mubr.msk.f32.gmra.mxu0 %vm578_vm0, %v15524_v47  ;;  %12041 = vmatprep.mubr.msk.f32.mxu1 %vm578_vm0, %v15631_v4  ;;  %v5291_v47 = vld [vmem:[#allocation2 + $0x92] sm:$0xff] }
 0x370   :  { %12009 = vmatprep.mubr.msk.f32.mxu0 %vm578_vm0, %v15531_v57  ;;  %12089 = vmatpush3.msra.mxu1 %v9997_v32  ;;  %v5301_v57 = vld [vmem:[#allocation2 + $0x132] sm:$0xff] }
 0x371   :  { %12146 = vmatprep.subr.mxu1 %v9992_v23 }
 0x372   :  { %12042 = vmatmul.mubr.msk.f32.gmra.mxu1 %vm578_vm0, %v4732_v60 }
 0x373   :  { %12010 = vmatmul.mubr.msk.f32.gmra.mxu0 %vm578_vm0, %v15537_v7  ;;  %12044 = vmatprep.mubr.msk.f32.mxu1 %vm578_vm0, %v4733_v3  ;;  %v10166_v7 = vld [vmem:[%s17773_s1 + $0x3d8] sm:$0xff] }
 0x374   :  { %12012 = vmatprep.mubr.msk.f32.mxu0 %vm578_vm0, %v15543_v17  ;;  %v10165_v17 = vld [vmem:[%s17773_s1 + $0x3d0] sm:$0xff] }
 0x376   :  { %12045 = vmatmul.mubr.msk.f32.gmra.mxu1 %vm578_vm0, %v4734_v15 }
 0x377   :  { %12013 = vmatmul.mubr.msk.f32.gmra.mxu0 %vm578_vm0, %v15549_v54  ;;  %12047 = vmatprep.mubr.msk.f32.mxu1 %vm578_vm0, %v4735_v59 }
 0x378   :  { %12015 = vmatprep.mubr.msk.f32.mxu0 %vm578_vm0, %v15555_v45 }
 0x37a   :  { %12048 = vmatmul.mubr.msk.f32.gmra.mxu1 %vm578_vm0, %v4736_v1 }
 0x37b   :  { %12016 = vmatmul.mubr.msk.f32.gmra.mxu0 %vm578_vm0, %v4207_v28  ;;  %12090 = vmatprep.mubr.msk.f32.mxu1 %vm578_vm0, %v15566_v49  ;;  %v10163_v28 = vld [vmem:[%s17773_s1 + $0x3c0] sm:$0xff] }
 0x37c   :  { %12058 = vmatprep.mubr.msk.f32.mxu0 %vm578_vm0, %v15562_v20 }
 0x37e   :  { %12091 = vmatmul.mubr.msk.f32.vlgmr.msra.gmra.mxu1 %vm578_vm0, %v15577_v63 }
 0x37f   :  { %12059 = vmatmul.mubr.msk.f32.vlgmr.msra.gmra.mxu0 %vm578_vm0, %v15566_v49  ;;  %12093 = vmatprep.mubr.msk.f32.mxu1 %vm578_vm0, %v15584_v24 }
 0x380   :  { %12115 = vmatpush3.msra.mxu0 %v9980_v41  ;;  %12061 = vmatprep.mubr.msk.f32.mxu0 %vm578_vm0, %v15577_v63  ;;  %v10154_v41 = vld [vmem:[%s17773_s1 + $0x378] sm:$0xff] }
 0x381   :  { %12116 = vmatprep.subr.mxu0 %v9979_v11  ;;  %12147 = vmatpush3.msra.mxu1 %v9992_v23 }
 0x382   :  { %12094 = vmatmul.mubr.msk.f32.gmra.mxu1 %vm578_vm0, %v15598_v9  ;;  %12117 = vmatpush3.msra.mxu0 %v9979_v11 }
 0x383   :  { %12062 = vmatmul.mubr.msk.f32.gmra.mxu0 %vm578_vm0, %v15584_v24  ;;  %12096 = vmatprep.mubr.msk.f32.mxu1 %vm578_vm0, %v15602_v5 }
 0x384   :  { %12064 = vmatprep.mubr.msk.f32.mxu0 %vm578_vm0, %v15598_v9  ;;  %12118 = vmatprep.subr.mxu0 %v9978_v12  ;;  %v10164_v9 = vld [vmem:[%s17773_s1 + $0x3c8] sm:$0xff] }
 0x385   :  { %12119 = vmatpush3.msra.mxu0 %v9978_v12  ;;  %12148 = vmatprep.subr.mxu1 %v9991_v19 }
 0x386   :  { %12097 = vmatmul.mubr.msk.f32.gmra.mxu1 %vm578_vm0, %v15616_v62  ;;  %12120 = vmatprep.subr.mxu0 %v9977_v61 }
 0x387   :  { %12065 = vmatmul.mubr.msk.f32.gmra.mxu0 %vm578_vm0, %v15602_v5  ;;  %12099 = vmatprep.mubr.msk.f32.mxu1 %vm578_vm0, %v4727_v2 }
 0x388   :  { %12067 = vmatprep.mubr.msk.f32.mxu0 %vm578_vm0, %v15616_v62  ;;  %12121 = vmatpush3.msra.mxu0 %v9977_v61  ;;  %v10153_v62 = vld [vmem:[%s17773_s1 + $0x370] sm:$0xff] }
 0x389   :  { %12149 = vmatpush3.msra.mxu1 %v9991_v19  ;;  %12178 = vmatprep.subr.mxu0 %v10004_v10 }
 0x38a   :  { %12100 = vmatmul.mubr.msk.f32.gmra.mxu1 %vm578_vm0, %v4728_v6  ;;  %12150 = vmatprep.subr.mxu1 %v9990_v31 }
 0x38b   :  { %12068 = vmatmul.mubr.msk.f32.gmra.mxu0 %vm578_vm0, %v4727_v2  ;;  %12102 = vmatprep.mubr.msk.f32.mxu1 %vm578_vm0, %v15631_v4 }
 0x38c   :  { %12070 = vmatprep.mubr.msk.f32.mxu0 %vm578_vm0, %v15627_v58  ;;  %12151 = vmatpush3.msra.mxu1 %v9990_v31 }
 0x38d   :  { %12152 = vmatprep.subr.mxu1 %v9989_v33 }
 0x38e   :  { %12103 = vmatmul.mubr.msk.f32.gmra.mxu1 %vm578_vm0, %v4732_v60 }
 0x38f   :  { %12071 = vmatmul.mubr.msk.f32.gmra.mxu0 %vm578_vm0, %v15631_v4  ;;  %12105 = vmatprep.mubr.msk.f32.mxu1 %vm578_vm0, %v4733_v3  ;;  %v10152_v4 = vld [vmem:[%s17773_s1 + $0x368] sm:$0xff] }
 0x390   :  { %12073 = vmatprep.mubr.msk.f32.mxu0 %vm578_vm0, %v4732_v60  ;;  %12153 = vmatpush3.msra.mxu1 %v9989_v33 }
 0x391   :  { %12210 = vmatprep.subr.mxu1 %v10166_v7 }
 0x392   :  { %12106 = vmatmul.mubr.msk.f32.gmra.mxu1 %vm578_vm0, %v4734_v15 }
 0x393   :  { %12074 = vmatmul.mubr.msk.f32.gmra.mxu0 %vm578_vm0, %v4733_v3  ;;  %12108 = vmatprep.mubr.msk.f32.mxu1 %vm578_vm0, %v4735_v59 }
 0x394   :  { %12076 = vmatprep.mubr.msk.f32.mxu0 %vm578_vm0, %v4734_v15  ;;  %v10151_v15 = vld [vmem:[%s17773_s1 + $0x360] sm:$0xff] }
 0x396   :  { %12109 = vmatmul.mubr.msk.f32.gmra.mxu1 %vm578_vm0, %v4736_v1 }
 0x397   :  { %12077 = vmatmul.mubr.msk.f32.gmra.mxu0 %vm578_vm0, %v4735_v59  ;;  %12111 = vmatprep.mubr.msk.f32.mxu1 %vm578_vm0, %v4737_v18 }
 0x398   :  { %12079 = vmatprep.mubr.msk.f32.mxu0 %vm578_vm0, %v4736_v1  ;;  %v5938_v1 = vld [vmem:[#allocation2] sm:$0xff] }
 0x39a   :  { %12112 = vmatmul.mubr.msk.f32.gmra.mxu1 %vm578_vm0, %v4738_v52  ;;  %v15834_v52 = vld [vmem:[%s17773_s1 + $0x438] sm:$0xff] }
 0x39b   :  { %12080 = vmatmul.mubr.msk.f32.gmra.mxu0 %vm578_vm0, %v4737_v18  ;;  %12154 = vmatprep.mubr.msk.f32.mxu1 %vm578_vm0, %v5283_v25  ;;  %18218 = vst [vmem:[#allocation282_spill] sm:$0xff] %v15834_v52 }
 0x39c   :  { %12122 = vmatprep.mubr.msk.f32.mxu0 %vm578_vm0, %v5282_v21 }
 0x39e   :  { %12155 = vmatmul.mubr.msk.f32.vlgmr.msra.gmra.mxu1 %vm578_vm0, %v5284_v46 }
 0x39f   :  { %12123 = vmatmul.mubr.msk.f32.vlgmr.msra.gmra.mxu0 %vm578_vm0, %v5283_v25  ;;  %12157 = vmatprep.mubr.msk.f32.mxu1 %vm578_vm0, %v5285_v56 }
 0x3a0   :  { %12179 = vmatpush3.msra.mxu0 %v10004_v10  ;;  %12125 = vmatprep.mubr.msk.f32.mxu0 %vm578_vm0, %v5284_v46 }
 0x3a1   :  { %12180 = vmatprep.subr.mxu0 %v10003_v42  ;;  %12211 = vmatpush3.msra.mxu1 %v10166_v7 }
 0x3a2   :  { %12158 = vmatmul.mubr.msk.f32.gmra.mxu1 %vm578_vm0, %v5286_v0  ;;  %12181 = vmatpush3.msra.mxu0 %v10003_v42 }
 0x3a3   :  { %12126 = vmatmul.mubr.msk.f32.gmra.mxu0 %vm578_vm0, %v5285_v56  ;;  %12160 = vmatprep.mubr.msk.f32.mxu1 %vm578_vm0, %v5287_v22 }
 0x3a4   :  { %12128 = vmatprep.mubr.msk.f32.mxu0 %vm578_vm0, %v5286_v0  ;;  %12182 = vmatprep.subr.mxu0 %v10002_v53 }
 0x3a5   :  { %12183 = vmatpush3.msra.mxu0 %v10002_v53  ;;  %12212 = vmatprep.subr.mxu1 %v10165_v17 }
 0x3a6   :  { %12161 = vmatmul.mubr.msk.f32.gmra.mxu1 %vm578_vm0, %v5288_v34  ;;  %12184 = vmatprep.subr.mxu0 %v10001_v48 }
 0x3a7   :  { %12129 = vmatmul.mubr.msk.f32.gmra.mxu0 %vm578_vm0, %v5287_v22  ;;  %12163 = vmatprep.mubr.msk.f32.mxu1 %vm578_vm0, %v5289_v43 }
 0x3a8   :  { %12131 = vmatprep.mubr.msk.f32.mxu0 %vm578_vm0, %v5288_v34  ;;  %12185 = vmatpush3.msra.mxu0 %v10001_v48 }
 0x3a9   :  { %12213 = vmatpush3.msra.mxu1 %v10165_v17  ;;  %12242 = vmatprep.subr.mxu0 %v10154_v41 }
 0x3aa   :  { %12164 = vmatmul.mubr.msk.f32.gmra.mxu1 %vm578_vm0, %v5290_v51  ;;  %12214 = vmatprep.subr.mxu1 %v10164_v9 }
 0x3ab   :  { %12132 = vmatmul.mubr.msk.f32.gmra.mxu0 %vm578_vm0, %v5289_v43  ;;  %12166 = vmatprep.mubr.msk.f32.mxu1 %vm578_vm0, %v5293_v35 }
 0x3ac   :  { %12134 = vmatprep.mubr.msk.f32.mxu0 %vm578_vm0, %v5292_v37  ;;  %12215 = vmatpush3.msra.mxu1 %v10164_v9 }
 0x3ad   :  { %12216 = vmatprep.subr.mxu1 %v10163_v28 }
 0x3ae   :  { %12167 = vmatmul.mubr.msk.f32.gmra.mxu1 %vm578_vm0, %v5294_v44 }
 0x3af   :  { %12135 = vmatmul.mubr.msk.f32.gmra.mxu0 %vm578_vm0, %v5293_v35  ;;  %12169 = vmatprep.mubr.msk.f32.mxu1 %vm578_vm0, %v5295_v36 }
 0x3b0   :  { %12137 = vmatprep.mubr.msk.f32.mxu0 %vm578_vm0, %v5294_v44  ;;  %12217 = vmatpush3.msra.mxu1 %v10163_v28 }
 0x3b1   :  { %12274 = vmatprep.subr.mxu1 %v15834_v52 }
 0x3b2   :  { %12170 = vmatmul.mubr.msk.f32.gmra.mxu1 %vm578_vm0, %v5296_v29 }
 0x3b3   :  { %12138 = vmatmul.mubr.msk.f32.gmra.mxu0 %vm578_vm0, %v5295_v36  ;;  %12172 = vmatprep.mubr.msk.f32.mxu1 %vm578_vm0, %v5297_v30 }
 0x3b4   :  { %12140 = vmatprep.mubr.msk.f32.mxu0 %vm578_vm0, %v5296_v29 }
 0x3b6   :  { %12173 = vmatmul.mubr.msk.f32.gmra.mxu1 %vm578_vm0, %v5298_v39 }
 0x3b7   :  { %12141 = vmatmul.mubr.msk.f32.gmra.mxu0 %vm578_vm0, %v5297_v30  ;;  %12175 = vmatprep.mubr.msk.f32.mxu1 %vm578_vm0, %v5299_v50 }
 0x3b8   :  { %12143 = vmatprep.mubr.msk.f32.mxu0 %vm578_vm0, %v5298_v39 }
 0x3ba   :  { %12176 = vmatmul.mubr.msk.f32.gmra.mxu1 %vm578_vm0, %v5300_v27 }
 0x3bb   :  { %12144 = vmatmul.mubr.msk.f32.gmra.mxu0 %vm578_vm0, %v5299_v50 }
 0x3bc   :  { %12186 = vmatprep.mubr.msk.f32.mxu0 %vm578_vm0, %v5284_v46 }
 0x3bf   :  { %12187 = vmatmul.mubr.msk.f32.vlgmr.msra.gmra.mxu0 %vm578_vm0, %v5285_v56 }
 0x3c0   :  { %12189 = vmatprep.mubr.msk.f32.mxu0 %vm578_vm0, %v5286_v0  ;;  %12243 = vmatpush3.msra.mxu0 %v10154_v41 }
 0x3c1   :  { %12244 = vmatprep.subr.mxu0 %v10153_v62 }
 0x3c2   :  { %12245 = vmatpush3.msra.mxu0 %v10153_v62 }
 0x3c3   :  { %12190 = vmatmul.mubr.msk.f32.gmra.mxu0 %vm578_vm0, %v5287_v22  ;;  %12246 = vmatprep.subr.mxu0 %v10152_v4 }
 0x3c4   :  { %12192 = vmatprep.mubr.msk.f32.mxu0 %vm578_vm0, %v5288_v34  ;;  %12247 = vmatpush3.msra.mxu0 %v10152_v4 }
 0x3c5   :  { %12248 = vmatprep.subr.mxu0 %v10151_v15 }
 0x3c6   :  { %12249 = vmatpush3.msra.mxu0 %v10151_v15 }
 0x3c7   :  { %12193 = vmatmul.mubr.msk.f32.gmra.mxu0 %vm578_vm0, %v5289_v43 }
 0x3c8   :  { %12195 = vmatprep.mubr.msk.f32.mxu0 %vm578_vm0, %v5290_v51 }
 0x3cb   :  { %12196 = vmatmul.mubr.msk.f32.gmra.mxu0 %vm578_vm0, %v5291_v47  ;;  %v15866_v47 = vld [vmem:[%s17773_s1 + $0x398] sm:$0xff] }
 0x3cc   :  { %12198 = vmatprep.mubr.msk.f32.mxu0 %vm578_vm0, %v5294_v44  ;;  %18219 = vst [vmem:[#allocation272_spill] sm:$0xff] %v15866_v47  ;;  %12306 = vmatprep.subr.mxu0 %v15866_v47 }
 0x3cf   :  { %12199 = vmatmul.mubr.msk.f32.gmra.mxu0 %vm578_vm0, %v5295_v36 }
 0x3d0   :  { %12201 = vmatprep.mubr.msk.f32.mxu0 %vm578_vm0, %v5296_v29 }
 0x3d3   :  { %12202 = vmatmul.mubr.msk.f32.gmra.mxu0 %vm578_vm0, %v5297_v30 }
 0x3d4   :  { %12204 = vmatprep.mubr.msk.f32.mxu0 %vm578_vm0, %v5298_v39 }
 0x3d7   :  { %12205 = vmatmul.mubr.msk.f32.gmra.mxu0 %vm578_vm0, %v5299_v50 }
 0x3d8   :  { %12207 = vmatprep.mubr.msk.f32.mxu0 %vm578_vm0, %v5300_v27 }
 0x3db   :  { %12208 = vmatmul.mubr.msk.f32.gmra.mxu0 %vm578_vm0, %v5301_v57 }
 0x3dc   :  { %12250 = vmatprep.mubr.msk.f32.mxu0 %vm578_vm0, %v5938_v1 }
 0x3fe   :  { %v11964_v38 = vpop.f32.mrf.mxu1 }
 0x3ff   :  { %v11932_v54 = vpop.f32.mrf.mxu0 }
 0x400   :  { %v4479_v45 = vadd.f32 %v11964_v38, %v11932_v54  ;;  %v15788_v20 = vpop.f32.mrf.mxu1 }
 0x401   :  { %v15790_v49 = vpop.f32.mrf.mxu0 }
 0x402   :  { %v11967_v14 = vpop.f32.mrf.mxu1 }
 0x403   :  { %v11935_v63 = vpop.f32.mrf.mxu0 }
 0x404   :  { %v4489_v55 = vadd.f32 %v11967_v14, %v11935_v63  ;;  %v15792_v24 = vpop.f32.mrf.mxu1 }
 0x405   :  { %v15794_v26 = vpop.f32.mrf.mxu0 }
 0x406   :  { %v11970_v40 = vpop.f32.mrf.mxu1 }
 0x407   :  { %v11938_v5 = vpop.f32.mrf.mxu0 }
 0x408   :  { %v4499_v8 = vadd.f32 %v11970_v40, %v11938_v5  ;;  %v15802_v16 = vpop.f32.mrf.mxu1 }
 0x409   :  { %v15804_v13 = vpop.f32.mrf.mxu0 }
 0x40a   :  { %v11973_v32 = vpop.f32.mrf.mxu1 }
 0x40b   :  { %v11941_v58 = vpop.f32.mrf.mxu0 }
 0x40c   :  { %v4509_v23 = vadd.f32 %v11973_v32, %v11941_v58  ;;  %v15812_v60 = vpop.f32.mrf.mxu1 }
 0x40d   :  { %v15814_v3 = vpop.f32.mrf.mxu0 }
 0x40e   :  { %v11976_v59 = vpop.f32.mrf.mxu1 }
 0x40f   :  { %v11944_v11 = vpop.f32.mrf.mxu0 }
 0x410   :  { %v4519_v12 = vadd.f32 %v11976_v59, %v11944_v11  ;;  %v15822_v19 = vpop.f32.mrf.mxu1 }
 0x411   :  { %v15825_v61 = vpop.f32.mrf.mxu0 }
 0x412   :  { %v11979_v2 = vpop.f32.mrf.mxu1 }
 0x413   :  { %v11947_v10 = vpop.f32.mrf.mxu0 }
 0x414   :  { %v4529_v6 = vadd.f32 %v11979_v2, %v11947_v10  ;;  %v15827_v31 = vpop.f32.mrf.mxu1 }
 0x415   :  { %v15829_v33 = vpop.f32.mrf.mxu0 }
 0x416   :  { %v11982_v18 = vpop.f32.mrf.mxu1 }
 0x417   :  { %v11950_v21 = vpop.f32.mrf.mxu0 }
 0x418   :  { %v4539_v25 = vadd.f32 %v11982_v18, %v11950_v21  ;;  %v15837_v46 = vpop.f32.mrf.mxu1 }
 0x419   :  { %v15839_v56 = vpop.f32.mrf.mxu0 }
 0x41a   :  { %v11985_v42 = vpop.f32.mrf.mxu1 }
 0x41b   :  { %v11953_v0 = vpop.f32.mrf.mxu0 }
 0x41c   :  { %v4549_v53 = vadd.f32 %v11985_v42, %v11953_v0  ;;  %v15841_v22 = vpop.f32.mrf.mxu1 }
 0x41d   :  { %v15843_v48 = vpop.f32.mrf.mxu0 }
 0x41e   :  { %v15845_v34 = vpop.f32.mrf.mxu1 }
 0x41f   :  { %v11996_v43 = vpop.f32.mrf.mxu0 }
 0x420   :  { %v15847_v51 = vadd.f32 %v11996_v43, %v4479_v45  ;;  %v15849_v37 = vpop.f32.mrf.mxu1 }
 0x421   :  { %v15851_v35 = vpop.f32.mrf.mxu0 }
 0x422   :  { %v15853_v44 = vpop.f32.mrf.mxu1 }
 0x423   :  { %v11999_v36 = vpop.f32.mrf.mxu0 }
 0x424   :  { %v15855_v29 = vadd.f32 %v11999_v36, %v4489_v55  ;;  %v15857_v30 = vpop.f32.mrf.mxu1 }
 0x425   :  { %v15859_v39 = vpop.f32.mrf.mxu0 }
 0x426   :  { %v15861_v50 = vpop.f32.mrf.mxu1 }
 0x427   :  { %v12002_v27 = vpop.f32.mrf.mxu0 }
 0x428   :  { %v15868_v57 = vadd.f32 %v12002_v27, %v4499_v8  ;;  %v15870_v7 = vpop.f32.mrf.mxu1 }
 0x429   :  { %v15873_v17 = vpop.f32.mrf.mxu0 }
 0x42a   :  { %v15875_v38 = vpop.f32.mrf.mxu1 }
 0x42b   :  { %v12005_v54 = vpop.f32.mrf.mxu0 }
 0x42c   :  { %v15877_v45 = vadd.f32 %v12005_v54, %v4509_v23  ;;  %v15879_v14 = vpop.f32.mrf.mxu1 }
 0x42d   :  { %v15881_v63 = vpop.f32.mrf.mxu0 }
 0x42e   :  { %v15883_v55 = vpop.f32.mrf.mxu1 }
 0x42f   :  { %v12008_v40 = vpop.f32.mrf.mxu0 }
 0x430   :  { %v15885_v9 = vadd.f32 %v12008_v40, %v4519_v12  ;;  %v15887_v5 = vpop.f32.mrf.mxu1 }
 0x431   :  { %18220 = vst [vmem:[#allocation303_spill] sm:$0xff] %v15887_v5  ;;  %v15889_v41 = vpop.f32.mrf.mxu0 }
 0x432   :  { %v15891_v8 = vpop.f32.mrf.mxu1 }
 0x433   :  { %18221 = vst [vmem:[#allocation288_spill] sm:$0xff] %v15891_v8  ;;  %v12011_v62 = vpop.f32.mrf.mxu0 }
 0x434   :  { %v15893_v32 = vadd.f32 %v12011_v62, %v4529_v6  ;;  %v15895_v58 = vpop.f32.mrf.mxu1 }
 0x435   :  { %18223 = vst [vmem:[#allocation298_spill] sm:$0xff] %v15895_v58  ;;  %v15897_v4 = vpop.f32.mrf.mxu0 }
 0x436   :  { %18222 = vst [vmem:[#allocation278_spill] sm:$0xff] %v15893_v32  ;;  %v15899_v23 = vpop.f32.mrf.mxu1 }
 0x437   :  { %18224 = vst [vmem:[#allocation305_spill] sm:$0xff] %v15899_v23  ;;  %v12014_v15 = vpop.f32.mrf.mxu0 }
 0x438   :  { %v15901_v59 = vadd.f32 %v12014_v15, %v4539_v25  ;;  %v15903_v28 = vpop.f32.mrf.mxu1 }
 0x439   :  { %18226 = vst [vmem:[#allocation267_spill] sm:$0xff] %v15903_v28  ;;  %v15905_v1 = vpop.f32.mrf.mxu0 }
 0x43a   :  { %18225 = vst [vmem:[#allocation299_spill] sm:$0xff] %v15901_v59  ;;  %18227 = vst [vmem:[#allocation270_spill] sm:$0xff] %v15905_v1  ;;  %v15907_v11 = vpop.f32.mrf.mxu1 }
 0x43b   :  { %18228 = vst [vmem:[#allocation268_spill] sm:$0xff] %v15907_v11  ;;  %v12017_v12 = vpop.f32.mrf.mxu0 }
 0x43c   :  { %v15909_v2 = vadd.f32 %v12017_v12, %v4549_v53  ;;  %v15911_v10 = vpop.f32.mrf.mxu1 }
 0x43d   :  { %18230 = vst [vmem:[#allocation283_spill] sm:$0xff] %v15911_v10  ;;  %v15913_v6 = vpop.f32.mrf.mxu0 }
 0x43e   :  { %18229 = vst [vmem:[#allocation290_spill] sm:$0xff] %v15909_v2  ;;  %18231 = vst [vmem:[#allocation275_spill] sm:$0xff] %v15913_v6  ;;  %v15915_v18 = vpop.f32.mrf.mxu1 }
 0x43f   :  { %v12060_v21 = vpop.f32.mrf.mxu0 }
 0x440   :  { %v15917_v42 = vpop.f32.mrf.mxu1 }
 0x441   :  { %v5020_v25 = vpop.f32.mrf.mxu0 }
 0x442   :  { %v15919_v0 = vpop.f32.mrf.mxu1 }
 0x443   :  { %v12063_v43 = vpop.f32.mrf.mxu0 }
 0x444   :  { %v15921_v36 = vpop.f32.mrf.mxu1 }
 0x445   :  { %v5030_v27 = vpop.f32.mrf.mxu0 }
 0x446   :  { %v15923_v54 = vpop.f32.mrf.mxu1 }
 0x447   :  { %v15925_v53 = vpop.f32.mrf.mxu0 }
 0x448   :  { %v15927_v40 = vpop.f32.mrf.mxu1 }
 0x449   :  { %18232 = vst [vmem:[#allocation291_spill] sm:$0xff] %v15927_v40  ;;  %v15929_v62 = vpop.f32.mrf.mxu0 }
 0x44a   :  { %v15931_v15 = vpop.f32.mrf.mxu1 }
 0x44b   :  { %18233 = vst [vmem:[#allocation289_spill] sm:$0xff] %v15931_v15  ;;  %v15933_v12 = vpop.f32.mrf.mxu0 }
 0x44c   :  { %v15935_v47 = vpop.f32.mrf.mxu1 }
 0x44d   :  { %18234 = vst [vmem:[#allocation306_spill] sm:$0xff] %v15935_v47  ;;  %v15937_v52 = vpop.f32.mrf.mxu0 }
 0x44e   :  { %18235 = vst [vmem:[#allocation273_spill] sm:$0xff] %v15937_v52  ;;  %v15939_v10 = vpop.f32.mrf.mxu1 }
 0x44f   :  { %18236 = vst [vmem:[#allocation269_spill] sm:$0xff] %v15939_v10  ;;  %v15941_v11 = vpop.f32.mrf.mxu0 }
 0x450   :  { %18237 = vst [vmem:[#allocation293_spill] sm:$0xff] %v15941_v11  ;;  %v15943_v2 = vpop.f32.mrf.mxu1 }
 0x451   :  { %18238 = vst [vmem:[#allocation300_spill] sm:$0xff] %v15943_v2  ;;  %v15945_v6 = vpop.f32.mrf.mxu0 }
 0x452   :  { %18239 = vst [vmem:[#allocation277_spill] sm:$0xff] %v15945_v6  ;;  %v15947_v28 = vpop.f32.mrf.mxu1 }
 0x453   :  { %18240 = vst [vmem:[#allocation280_spill] sm:$0xff] %v15947_v28  ;;  %v15949_v23 = vpop.f32.mrf.mxu0 }
 0x454   :  { %18241 = vst [vmem:[#allocation276_spill] sm:$0xff] %v15949_v23  ;;  %v15951_v59 = vpop.f32.mrf.mxu1 }
 0x455   :  { %18242 = vst [vmem:[#allocation292_spill] sm:$0xff] %v15951_v59  ;;  %v15953_v1 = vpop.f32.mrf.mxu0 }
 0x456   :  { %18243 = vst [vmem:[#allocation295_spill] sm:$0xff] %v15953_v1  ;;  %v15955_v15 = vpop.f32.mrf.mxu1 }
 0x457   :  { %18244 = vst [vmem:[#allocation302_spill] sm:$0xff] %v15955_v15  ;;  %v15957_v47 = vpop.f32.mrf.mxu0 }
 0x458   :  { %18245 = vst [vmem:[#allocation294_spill] sm:$0xff] %v15957_v47  ;;  %v15959_v58 = vpop.f32.mrf.mxu1 }
 0x459   :  { %18246 = vst [vmem:[#allocation279_spill] sm:$0xff] %v15959_v58  ;;  %v15961_v10 = vpop.f32.mrf.mxu0 }
 0x45a   :  { %18247 = vst [vmem:[#allocation274_spill] sm:$0xff] %v15961_v10  ;;  %v15963_v11 = vpop.f32.mrf.mxu1 }
 0x45b   :  { %18248 = vst [vmem:[#allocation301_spill] sm:$0xff] %v15963_v11  ;;  %v15965_v2 = vpop.f32.mrf.mxu0 }
 0x45c   :  { %18249 = vst [vmem:[#allocation271_spill] sm:$0xff] %v15965_v2  ;;  %v15967_v6 = vpop.f32.mrf.mxu1 }
 0x45d   :  { %18250 = vst [vmem:[#allocation304_spill] sm:$0xff] %v15967_v6  ;;  %v15969_v28 = vpop.f32.mrf.mxu0 }
 0x45e   :  { %18251 = vst [vmem:[#allocation296_spill] sm:$0xff] %v15969_v28  ;;  %v12156_v23 = vpop.f32.mrf.mxu1  ;;  %v4474_v28 = vadd.f32 %v15788_v20, %v15790_v49 }
 0x45f   :  { %v12124_v59 = vpop.f32.mrf.mxu0 }
 0x460   :  { %v15971_v1 = vpop.f32.mrf.mxu1  ;;  %v4703_v52 = vadd.f32 %v15851_v35, %v4474_v28  ;;  %v4494_v35 = vadd.f32 %v15802_v16, %v15804_v13  ;;  %v4504_v16 = vadd.f32 %v15812_v60, %v15814_v3  ;;  %v4937_v13 = vadd.f32 %v15861_v50, %v15868_v57 }
 0x461   :  { %v5416_v8 = vpop.f32.mrf.mxu0  ;;  %v4524_v3 = vadd.f32 %v15827_v31, %v15829_v33 }
 0x462   :  { %v15973_v47 = vpop.f32.mrf.mxu1 }
 0x463   :  { %v12127_v15 = vpop.f32.mrf.mxu0  ;;  %18252 = vst [vmem:[#allocation281_spill] sm:$0xff] %v15973_v47 }
 0x464   :  { %v15979_v11 = vpop.f32.mrf.mxu1 }
 0x465   :  { %v5426_v32 = vpop.f32.mrf.mxu0  ;;  %18254 = vst [vmem:[#allocation287_spill] sm:$0xff] %v15979_v11  ;;  %v4933_v11 = vadd.f32 %v15845_v34, %v15847_v51 }
 0x466   :  { %v15987_v40 = vpop.f32.mrf.mxu1 }
 0x467   :  { %v15975_v58 = vpop.f32.mrf.mxu0  ;;  %18257 = vst [vmem:[#allocation297_spill] sm:$0xff] %v15987_v40  ;;  %v5100_v49 = vadd.f32 %v12060_v21, %v4933_v11  ;;  %v4932_v40 = vadd.f32 %v15849_v37, %v4703_v52  ;;  %v4514_v11 = vadd.f32 %v15822_v19, %v15825_v61 }
 0x469   :  { %v15977_v10 = vpop.f32.mrf.mxu0  ;;  %v5267_v52 = vadd.f32 %v15915_v18, %v5100_v49  ;;  %v4711_v19 = vadd.f32 %v15889_v41, %v4514_v11 }
 0x46a   :  { %18253 = vst [vmem:[#allocation284_spill] sm:$0xff] %v15977_v10  ;;  %v4484_v10 = vadd.f32 %v15792_v24, %v15794_v26  ;;  %v4935_v24 = vadd.f32 %v15853_v44, %v15855_v29  ;;  %v4707_v26 = vadd.f32 %v15873_v17, %v4494_v35 }
 0x46b   :  { %v15981_v2 = vpop.f32.mrf.mxu0  ;;  %v5496_v29 = vadd.f32 %v12124_v59, %v5267_v52  ;;  %v16046_v59 = vadd.f32 %v15841_v22, %v15843_v48  ;;  %v16058_v22 = vld [vmem:[%s17774_s2 + $0x2] ss:$0 sm:$0xff]  ;;  %v4941_v48 = vadd.f32 %v15883_v55, %v15885_v9  ;;  %v18265_v55 = vld [vmem:[#allocation281_spill] sm:$0xff] }
 0x46c   :  { %18255 = vst [vmem:[#allocation307_spill] sm:$0xff] %v15981_v2  ;;  %v15998_v2 = vpop.f32.mrf.mxu1  ;;  %v4705_v20 = vadd.f32 %v15859_v39, %v4484_v10  ;;  %v4709_v10 = vadd.f32 %v15881_v63, %v4504_v16  ;;  %v4936_v18 = vadd.f32 %v15870_v7, %v4707_v26  ;;  %v4939_v7 = vadd.f32 %v15875_v38, %v15877_v45 }
 0x46d   :  { %v15983_v6 = vpop.f32.mrf.mxu0 }
 0x46e   :  { %18256 = vst [vmem:[#allocation286_spill] sm:$0xff] %v15983_v6  ;;  %v16011_v34 = vpop.f32.mrf.mxu1  ;;  %v4934_v39 = vadd.f32 %v15857_v30, %v4705_v20  ;;  %v5104_v30 = vadd.f32 %v15925_v53, %v4937_v13  ;;  %v5103_v61 = vadd.f32 %v15929_v62, %v4936_v18  ;;  %v18264_v62 = vld [vmem:[#allocation288_spill] sm:$0xff]  ;;  %v18272_v18 = vld [vmem:[#allocation277_spill] sm:$0xff] }
 0x46f   :  { %v15989_v5 = vpop.f32.mrf.mxu0 }
 0x470   :  { %v5101_v44 = vadd.f32 %v5030_v27, %v4934_v39  ;;  %v16029_v21 = vpop.f32.mrf.mxu1  ;;  %v5271_v41 = vadd.f32 %v15923_v54, %v5104_v30  ;;  %v18262_v27 = vld [vmem:[#allocation291_spill] sm:$0xff]  ;;  %v18269_v39 = vld [vmem:[#allocation289_spill] sm:$0xff] }
 0x471   :  { %v15992_v47 = vpop.f32.mrf.mxu0  ;;  %v5270_v54 = vadd.f32 %v18262_v27, %v5103_v61  ;;  %v18274_v61 = vld [vmem:[#allocation297_spill] sm:$0xff] }
 0x472   :  { %18258 = vst [vmem:[#allocation285_spill] sm:$0xff] %v15992_v47  ;;  %v5099_v47 = vadd.f32 %v5020_v25, %v4932_v40  ;;  %v5268_v33 = vadd.f32 %v15921_v36, %v5101_v44  ;;  %v18260_v25 = vld [vmem:[#allocation273_spill] sm:$0xff]  ;;  %v5500_v36 = vadd.f32 %v15975_v58, %v5271_v41  ;;  %v18263_v40 = vld [vmem:[#allocation278_spill] sm:$0xff] }
 0x473   :  { %v16000_v6 = vpop.f32.mrf.mxu0 }
 0x474   :  { %18259 = vst [vmem:[#allocation308_spill] sm:$0xff] %v16000_v6  ;;  %v5102_v6 = vadd.f32 %v12063_v43, %v4935_v24  ;;  %v5266_v17 = vadd.f32 %v15917_v42, %v5099_v47  ;;  %v4534_v47 = vadd.f32 %v15837_v46, %v15839_v56  ;;  %v5106_v46 = vadd.f32 %v15933_v12, %v4939_v7  ;;  %v16053_v42 = vpop.f32.mrf.mxu1  ;;  %v18268_v24 = vld [vmem:[#allocation284_spill] sm:$0xff] }
 0x475   :  { %v16006_v28 = vpop.f32.mrf.mxu0  ;;  %v4938_v56 = vadd.f32 %v15879_v14, %v4709_v10  ;;  %v5497_v45 = vadd.f32 %v5426_v32, %v5268_v33  ;;  %v18261_v14 = vld [vmem:[#allocation303_spill] sm:$0xff]  ;;  %v18266_v32 = vld [vmem:[#allocation293_spill] sm:$0xff]  ;;  %v5499_v26 = vadd.f32 %v18268_v24, %v5270_v54  ;;  %v18271_v10 = vld [vmem:[#allocation270_spill] sm:$0xff]  ;;  %v5667_v7 = vadd.f32 %v18274_v61, %v5500_v36 }
 0x476   :  { %v5495_v50 = vadd.f32 %v5416_v8, %v5266_v17  ;;  %v5269_v57 = vadd.f32 %v15919_v0, %v5102_v6  ;;  %v5663_v8 = vadd.f32 %v12156_v23, %v5496_v29  ;;  %v4713_v6 = vadd.f32 %v15897_v4, %v4524_v3  ;;  %v16075_v58 = vpop.f32.mrf.mxu1  ;;  %v18270_v17 = vld [vmem:[#allocation287_spill] sm:$0xff] }
 0x477   :  { %v16013_v51 = vpop.f32.mrf.mxu0  ;;  %v5105_v0 = vadd.f32 %v18260_v25, %v4938_v56  ;;  %v4940_v43 = vadd.f32 %v18261_v14, %v4711_v19  ;;  %v5108_v49 = vadd.f32 %v18266_v32, %v4941_v48  ;;  %v5273_v52 = vadd.f32 %v18269_v39, %v5106_v46  ;;  %v18276_v56 = vld [vmem:[#allocation276_spill] sm:$0xff]  ;;  %v18278_v48 = vld [vmem:[#allocation305_spill] sm:$0xff]  ;;  %v18280_v14 = vld [vmem:[#allocation286_spill] sm:$0xff] }
 0x478   :  { %v5498_v31 = vadd.f32 %v12127_v15, %v5269_v57  ;;  %v5662_v4 = vadd.f32 %v15971_v1, %v5495_v50  ;;  %v4943_v15 = vadd.f32 %v18264_v62, %v18263_v40  ;;  %v18267_v1 = vld [vmem:[#allocation298_spill] sm:$0xff]  ;;  %v5664_v11 = vadd.f32 %v18270_v17, %v5497_v45  ;;  %v18279_v45 = vld [vmem:[#allocation269_spill] sm:$0xff]  ;;  %v18282_v62 = vld [vmem:[#allocation267_spill] sm:$0xff] }
 0x479   :  { %v16021_v37 = vpop.f32.mrf.mxu0  ;;  %v4942_v35 = vadd.f32 %v18267_v1, %v4713_v6  ;;  %v4715_v30 = vadd.f32 %v18271_v10, %v4534_v47  ;;  %v5107_v3 = vadd.f32 %v18272_v18, %v4940_v43  ;;  %v18273_v50 = vld [vmem:[#allocation306_spill] sm:$0xff]  ;;  %v18284_v24 = vld [vmem:[#allocation275_spill] sm:$0xff] }
 0x47a   :  { %v5665_v9 = vadd.f32 %v18265_v55, %v5498_v31  ;;  %v5272_v57 = vadd.f32 %v18273_v50, %v5105_v0  ;;  %v18275_v31 = vld [vmem:[#allocation307_spill] sm:$0xff]  ;;  %v5110_v41 = vadd.f32 %v18276_v56, %v4943_v15  ;;  %v5666_v0 = vadd.f32 %v15998_v2, %v5499_v26  ;;  %v18285_v39 = vld [vmem:[#allocation294_spill] sm:$0xff] }
 0x47b   :  { %v16031_v60 = vpop.f32.mrf.mxu0  ;;  %v5502_v33 = vadd.f32 %v18275_v31, %v5273_v52  ;;  %v4944_v15 = vadd.f32 %v18282_v62, %v4715_v30  ;;  %v4717_v26 = vadd.f32 %v18284_v24, %v16046_v59  ;;  %v18286_v52 = vld [vmem:[#allocation285_spill] sm:$0xff]  ;;  %v18290_v59 = vld [vmem:[#allocation268_spill] sm:$0xff]  ;;  %v18293_v56 = vld [vmem:[#allocation271_spill] sm:$0xff] }
 0x47c   :  { %v5501_v43 = vadd.f32 %v18280_v14, %v5272_v57  ;;  %v18291_v57 = vld [vmem:[#allocation292_spill] sm:$0xff]  ;;  %v18297_v62 = vld [vmem:[#allocation279_spill] sm:$0xff]  ;;  %v18300_v24 = vld [vmem:[#allocation301_spill] sm:$0xff] }
 0x47d   :  { %v16042_v63 = vpop.f32.mrf.mxu0  ;;  %v5669_v1 = vadd.f32 %v16011_v34, %v5502_v33  ;;  %v18288_v34 = vld [vmem:[#allocation274_spill] sm:$0xff]  ;;  %v18292_v31 = vld [vmem:[#allocation308_spill] sm:$0xff] }
 0x47e   :  { %v5668_v30 = vadd.f32 %v16029_v21, %v5501_v43  ;;  %v5111_v18 = vadd.f32 %v18288_v34, %v4944_v15 }
 0x47f   :  { %v12188_v38 = vpop.f32.mrf.mxu0 }
 0x480   :  { %v5830_v23 = vadd.f32 %v12188_v38, %v5663_v8  ;;  %v18277_v38 = vld [vmem:[#allocation299_spill] sm:$0xff]  ;;  %v5278_v15 = vadd.f32 %v18297_v62, %v5111_v18 }
 0x481   :  { %v5750_v53 = vpop.f32.mrf.mxu0  ;;  %v4945_v47 = vadd.f32 %v18278_v48, %v18277_v38 }
 0x482   :  { %v5854_v12 = vadd.f32 %v16058_v22, %v5830_v23  ;;  %v5829_v20 = vadd.f32 %v5750_v53, %v5662_v4  ;;  %v5275_v23 = vadd.f32 %v18279_v45, %v5108_v49  ;;  %v16090_v4 = vpop.f32.mrf.mxu1  ;;  %v18281_v53 = vld [vmem:[#allocation295_spill] sm:$0xff] }
 0x483   :  { %v12191_v16 = vpop.f32.mrf.mxu0  ;;  %v5109_v40 = vadd.f32 %v18281_v53, %v4942_v35  ;;  %v5112_v35 = vadd.f32 %v18285_v39, %v4945_v47  ;;  %v18295_v47 = vld [vmem:[#allocation302_spill] sm:$0xff] }
 0x484   :  { %v5870_v13 = vmax.f32 %v5854_v12, 0.0  ;;  %v5853_v44 = vadd.f32 %v16058_v22, %v5829_v20  ;;  %v5832_v29 = vadd.f32 %v12191_v16, %v5665_v9  ;;  %v5504_v12 = vadd.f32 %v15989_v5, %v5275_v23  ;;  %v18283_v20 = vld [vmem:[#allocation300_spill] sm:$0xff] }
 0x485   :  { %v5760_v19 = vpop.f32.mrf.mxu0  ;;  %v5274_v55 = vadd.f32 %v18283_v20, %v5107_v3  ;;  %v18289_v3 = vld [vmem:[#allocation290_spill] sm:$0xff]  ;;  %v5279_v45 = vadd.f32 %v18295_v47, %v5112_v35 }
 0x486   :  { %5886 = vst.msk [vmem:[#allocation2 + $0x21] sm:$0xff] %vm578_vm0, %v5870_v13  ;;  %v5869_v8 = vmax.f32 %v5853_v44, 0.0  ;;  %v5856_v6 = vadd.f32 %v16058_v22, %v5832_v29  ;;  %v5831_v46 = vadd.f32 %v5760_v19, %v5664_v11  ;;  %v18287_v13 = vld [vmem:[#allocation280_spill] sm:$0xff]  ;;  %v5633_v44 = vpop.f32.mrf.mxu1  ;;  %v4947_v50 = vadd.f32 %v18290_v59, %v18289_v3 }
 0x487   :  { %v12194_v25 = vpop.f32.mrf.mxu0  ;;  %v5503_v16 = vadd.f32 %v18286_v52, %v5274_v55  ;;  %v5277_v5 = vadd.f32 %v18287_v13, %v5110_v41  ;;  %v5276_v19 = vadd.f32 %v18291_v57, %v5109_v40  ;;  %v18294_v41 = vld [vmem:[#allocation283_spill] sm:$0xff]  ;;  %v5508_v40 = vadd.f32 %v16013_v51, %v5279_v45  ;;  %v18299_v51 = vld [vmem:[#allocation272_spill] sm:$0xff] }
 0x488   :  { %5885 = vst.msk [vmem:[#allocation2 + $0x11] sm:$0xff] %vm578_vm0, %v5869_v8  ;;  %v5872_v36 = vmax.f32 %v5856_v6, 0.0  ;;  %v5855_v27 = vadd.f32 %v16058_v22, %v5831_v46  ;;  %v5834_v54 = vadd.f32 %v12194_v25, %v5667_v7  ;;  %v5671_v7 = vadd.f32 %v16053_v42, %v5504_v12  ;;  %v12174_v48 = vpop.f32.mrf.mxu1 }
 0x489   :  { %v5770_v9 = vpop.f32.mrf.mxu0  ;;  %v5506_v33 = vadd.f32 %v18292_v31, %v5277_v5  ;;  %v5114_v21 = vadd.f32 %v18293_v56, %v4947_v50  ;;  %v4946_v38 = vadd.f32 %v18294_v41, %v4717_v26  ;;  %v5505_v42 = vadd.f32 %v16006_v28, %v5276_v19  ;;  %v10157_v28 = vld [vmem:[%s17773_s1 + $0x390] sm:$0xff]  ;;  %v10176_v5 = vld [vmem:[%s17773_s1 + $0x428] sm:$0xff] }
 0x48a   :  { %5888 = vst.msk [vmem:[#allocation2 + $0x41] sm:$0xff] %vm578_vm0, %v5872_v36  ;;  %v5871_v2 = vmax.f32 %v5855_v27, 0.0  ;;  %v5858_v32 = vadd.f32 %v16058_v22, %v5834_v54  ;;  %v5833_v49 = vadd.f32 %v5770_v9, %v5666_v0  ;;  %v5670_v0 = vadd.f32 %v16075_v58, %v5503_v16  ;;  %v10177_v54 = vld [vmem:[%s17773_s1 + $0x430] sm:$0xff] }
 0x48b   :  { %v12197_v29 = vpop.f32.mrf.mxu0  ;;  %v18296_v58 = vld [vmem:[#allocation296_spill] sm:$0xff]  ;;  %v5281_v26 = vadd.f32 %v18300_v24, %v5114_v21 }
 0x48c   :  { %5887 = vst.msk [vmem:[#allocation2 + $0x31] sm:$0xff] %vm578_vm0, %v5871_v2  ;;  %v5874_v17 = vmax.f32 %v5858_v32, 0.0  ;;  %v5857_v11 = vadd.f32 %v16058_v22, %v5833_v49  ;;  %v5836_v10 = vadd.f32 %v12197_v29, %v5669_v1  ;;  %v5113_v53 = vadd.f32 %v18296_v58, %v4946_v38  ;;  %v18298_v2 = vld [vmem:[#allocation282_spill] sm:$0xff]  ;;  %v5643_v49 = vpop.f32.mrf.mxu1  ;;  %v10156_v29 = vld [vmem:[%s17773_s1 + $0x388] sm:$0xff] }
 0x48d   :  { %v5780_v61 = vpop.f32.mrf.mxu0  ;;  %v16128_v27 = vld [vmem:[#allocation2 + $0x20] sm:$0xff]  ;;  %v5673_v32 = vadd.f32 %v16090_v4, %v5506_v33  ;;  %v5507_v1 = vadd.f32 %v16021_v37, %v5278_v15  ;;  %v5672_v37 = vadd.f32 %v5633_v44, %v5505_v42  ;;  %v5675_v44 = vadd.f32 %v12174_v48, %v5508_v40 }
 0x48e   :  { %5890 = vst.msk [vmem:[#allocation2 + $0x61] sm:$0xff] %vm578_vm0, %v5874_v17  ;;  %v5873_v8 = vmax.f32 %v5857_v11, 0.0  ;;  %v5860_v6 = vadd.f32 %v16058_v22, %v5836_v10  ;;  %v5835_v46 = vadd.f32 %v5780_v61, %v5668_v30  ;;  %v18301_v17 = vld [vmem:[#allocation304_spill] sm:$0xff]  ;;  %v5510_v30 = vadd.f32 %v16031_v60, %v5281_v26  ;;  %v12177_v59 = vpop.f32.mrf.mxu1  ;;  %v5948_v38 = vld [vmem:[#allocation2 + $0xa0] sm:$0xff] }
 0x48f   :  { %v12200_v23 = vpop.f32.mrf.mxu0  ;;  %v5939_v25 = vld [vmem:[#allocation2 + $0x10] sm:$0xff]  ;;  %v5280_v11 = vadd.f32 %v18301_v17, %v5113_v53  ;;  %v5674_v19 = vadd.f32 %v5643_v49, %v5507_v1  ;;  %v16271_v24 = vld [vmem:[#allocation2 + $0x21] sm:$0xff] }
 0x490   :  { %5889 = vst.msk [vmem:[#allocation2 + $0x51] sm:$0xff] %vm578_vm0, %v5873_v8  ;;  %v5876_v14 = vmax.f32 %v5860_v6, 0.0  ;;  %v5859_v43 = vadd.f32 %v16058_v22, %v5835_v46  ;;  %v5838_v36 = vadd.f32 %v12200_v23, %v5671_v7  ;;  %12218 = vmatprep.mubr.msk.f32.mxu1 %vm578_vm0, %v5939_v25  ;;  %12251 = vmatmul.mubr.msk.f32.vlgmr.msra.gmra.mxu0 %vm578_vm0, %v5939_v25  ;;  %v10175_v8 = vld [vmem:[%s17773_s1 + $0x420] sm:$0xff]  ;;  %v5653_v48 = vpop.f32.mrf.mxu1  ;;  %v16267_v1 = vld [vmem:[#allocation2 + $0x11] sm:$0xff] }
 0x491   :  { %v5790_v12 = vpop.f32.mrf.mxu0  ;;  %12219 = vmatmul.mubr.msk.f32.vlgmr.msra.gmra.mxu1 %vm578_vm0, %v16128_v27  ;;  %12253 = vmatprep.mubr.msk.f32.mxu0 %vm578_vm0, %v16128_v27  ;;  %v16158_v4 = vld [vmem:[#allocation2 + $0x40] sm:$0xff]  ;;  %v5509_v61 = vadd.f32 %v16042_v63, %v5280_v11  ;;  %v5677_v41 = vadd.f32 %v12177_v59, %v5510_v30  ;;  %v10169_v26 = vld [vmem:[%s17773_s1 + $0x3f0] sm:$0xff] }
 0x492   :  { %5892 = vst.msk [vmem:[#allocation2 + $0x81] sm:$0xff] %vm578_vm0, %v5876_v14  ;;  %v5875_v20 = vmax.f32 %v5859_v43, 0.0  ;;  %v5862_v55 = vadd.f32 %v16058_v22, %v5838_v36  ;;  %v5837_v9 = vadd.f32 %v5790_v12, %v5670_v0  ;;  %12275 = vmatpush3.msra.mxu1 %v18298_v2  ;;  %12307 = vmatpush3.msra.mxu0 %v18299_v51  ;;  %v10155_v63 = vld [vmem:[%s17773_s1 + $0x380] sm:$0xff]  ;;  %v10170_v43 = vld [vmem:[%s17773_s1 + $0x3f8] sm:$0xff] }
 0x493   :  { %v12203_v39 = vpop.f32.mrf.mxu0  ;;  %v16150_v35 = vld [vmem:[#allocation2 + $0x30] sm:$0xff]  ;;  %12276 = vmatprep.subr.mxu1 %v10177_v54  ;;  %12308 = vmatprep.subr.mxu0 %v10157_v28  ;;  %v5676_v42 = vadd.f32 %v5653_v48, %v5509_v61  ;;  %v10182_v36 = vld [vmem:[%s17773_s1 + $0x458] sm:$0xff]  ;;  %v6479_v17 = vld [vmem:[#allocation2 + $0xa1] sm:$0xff] }
 0x494   :  { %5891 = vst.msk [vmem:[#allocation2 + $0x71] sm:$0xff] %vm578_vm0, %v5875_v20  ;;  %v5878_v52 = vmax.f32 %v5862_v55, 0.0  ;;  %v5861_v16 = vadd.f32 %v16058_v22, %v5837_v9  ;;  %v5840_v13 = vadd.f32 %v12203_v39, %v5673_v32  ;;  %12221 = vmatprep.mubr.msk.f32.mxu1 %vm578_vm0, %v16150_v35  ;;  %12254 = vmatmul.mubr.msk.f32.gmra.mxu0 %vm578_vm0, %v16150_v35  ;;  %v6469_v32 = vld [vmem:[#allocation2 + $0x1] sm:$0xff]  ;;  %v10161_v61 = vld [vmem:[%s17773_s1 + $0x3b0] sm:$0xff] }
 0x495   :  { %v5800_v10 = vpop.f32.mrf.mxu0  ;;  %12222 = vmatmul.mubr.msk.f32.gmra.mxu1 %vm578_vm0, %v16158_v4  ;;  %12256 = vmatprep.mubr.msk.f32.mxu0 %vm578_vm0, %v16158_v4  ;;  %v16183_v33 = vld [vmem:[#allocation2 + $0x60] sm:$0xff]  ;;  %v10168_v39 = vld [vmem:[%s17773_s1 + $0x3e8] sm:$0xff] }
 0x496   :  { %5894 = vst.msk [vmem:[#allocation2 + $0xc1] sm:$0xff] %vm578_vm0, %v5878_v52  ;;  %v5877_v34 = vmax.f32 %v5861_v16, 0.0  ;;  %v5864_v18 = vadd.f32 %v16058_v22, %v5840_v13  ;;  %v5839_v3 = vadd.f32 %v5800_v10, %v5672_v37  ;;  %12277 = vmatpush3.msra.mxu1 %v10177_v54  ;;  %12309 = vmatpush3.msra.mxu0 %v10157_v28  ;;  %v16289_v52 = vld [vmem:[#allocation2 + $0x41] sm:$0xff] }
 0x497   :  { %v12206_v50 = vpop.f32.mrf.mxu0  ;;  %v16174_v57 = vld [vmem:[#allocation2 + $0x50] sm:$0xff]  ;;  %12278 = vmatprep.subr.mxu1 %v10176_v5  ;;  %12310 = vmatprep.subr.mxu0 %v10156_v29  ;;  %v10167_v16 = vld [vmem:[%s17773_s1 + $0x3e0] sm:$0xff] }
 0x498   :  { %5893 = vst.msk [vmem:[#allocation2 + $0xb1] sm:$0xff] %vm578_vm0, %v5877_v34  ;;  %v5880_v60 = vmax.f32 %v5864_v18, 0.0  ;;  %v5863_v7 = vadd.f32 %v16058_v22, %v5839_v3  ;;  %v5842_v31 = vadd.f32 %v12206_v50, %v5675_v44  ;;  %12224 = vmatprep.mubr.msk.f32.mxu1 %vm578_vm0, %v16174_v57  ;;  %12257 = vmatmul.mubr.msk.f32.gmra.mxu0 %vm578_vm0, %v16174_v57  ;;  %v16303_v13 = vld [vmem:[#allocation2 + $0x51] sm:$0xff]  ;;  %v16307_v37 = vld [vmem:[#allocation2 + $0x61] sm:$0xff] }
 0x499   :  { %v5810_v6 = vpop.f32.mrf.mxu0  ;;  %12225 = vmatmul.mubr.msk.f32.gmra.mxu1 %vm578_vm0, %v16183_v33  ;;  %12259 = vmatprep.mubr.msk.f32.mxu0 %vm578_vm0, %v16183_v33  ;;  %v16205_v14 = vld [vmem:[#allocation2 + $0x80] sm:$0xff]  ;;  %v10174_v34 = vld [vmem:[%s17773_s1 + $0x418] sm:$0xff] }
 0x49a   :  { %5896 = vst.msk [vmem:[#allocation2 + $0xe1] sm:$0xff] %vm578_vm0, %v5880_v60  ;;  %v5879_v46 = vmax.f32 %v5863_v7, 0.0  ;;  %v5866_v56 = vadd.f32 %v16058_v22, %v5842_v31  ;;  %v5841_v21 = vadd.f32 %v5810_v6, %v5674_v19  ;;  %12279 = vmatpush3.msra.mxu1 %v10176_v5  ;;  %12311 = vmatpush3.msra.mxu0 %v10156_v29  ;;  %v10180_v5 = vld [vmem:[%s17773_s1 + $0x448] sm:$0xff]  ;;  %v5947_v29 = vld [vmem:[#allocation2 + $0x90] sm:$0xff]  ;;  %v10179_v10 = vld [vmem:[%s17773_s1 + $0x440] sm:$0xff] }
 0x49b   :  { %v12209_v47 = vpop.f32.mrf.mxu0  ;;  %v16197_v45 = vld [vmem:[#allocation2 + $0x70] sm:$0xff]  ;;  %12280 = vmatprep.subr.mxu1 %v10175_v8  ;;  %12312 = vmatprep.subr.mxu0 %v10155_v63  ;;  %v10160_v60 = vld [vmem:[%s17773_s1 + $0x3a8] sm:$0xff]  ;;  %v10159_v31 = vld [vmem:[%s17773_s1 + $0x3a0] sm:$0xff] }
 0x49c   :  { %5895 = vst.msk [vmem:[#allocation2 + $0xd1] sm:$0xff] %vm578_vm0, %v5879_v46  ;;  %v5882_v23 = vmax.f32 %v5866_v56, 0.0  ;;  %v5865_v25 = vadd.f32 %v16058_v22, %v5841_v21  ;;  %v5844_v0 = vadd.f32 %v12209_v47, %v5677_v41  ;;  %12227 = vmatprep.mubr.msk.f32.mxu1 %vm578_vm0, %v16197_v45  ;;  %12260 = vmatmul.mubr.msk.f32.gmra.mxu0 %vm578_vm0, %v16197_v45  ;;  %v16321_v11 = vld [vmem:[#allocation2 + $0x71] sm:$0xff]  ;;  %v10172_v6 = vld [vmem:[%s17773_s1 + $0x408] sm:$0xff]  ;;  %v10171_v46 = vld [vmem:[%s17773_s1 + $0x400] sm:$0xff] }
 0x49d   :  { %v5820_v54 = vpop.f32.mrf.mxu0  ;;  %12228 = vmatmul.mubr.msk.f32.gmra.mxu1 %vm578_vm0, %v16205_v14  ;;  %12262 = vmatprep.mubr.msk.f32.mxu0 %vm578_vm0, %v5948_v38  ;;  %v16222_v12 = vld [vmem:[#allocation2 + $0xc0] sm:$0xff]  ;;  %v10173_v7 = vld [vmem:[%s17773_s1 + $0x410] sm:$0xff] }
 0x49e   :  { %5898 = vst.msk [vmem:[#allocation2 + $0x101] sm:$0xff] %vm578_vm0, %v5882_v23  ;;  %v5881_v28 = vmax.f32 %v5865_v25, 0.0  ;;  %v5868_v58 = vadd.f32 %v16058_v22, %v5844_v0  ;;  %v5843_v53 = vadd.f32 %v5820_v54, %v5676_v42  ;;  %12281 = vmatpush3.msra.mxu1 %v10175_v8  ;;  %12313 = vmatpush3.msra.mxu0 %v10155_v63  ;;  %v16336_v30 = vld [vmem:[#allocation2 + $0xc1] sm:$0xff]  ;;  %v10186_v8 = vld [vmem:[%s17773_s1 + $0x478] sm:$0xff] }
 0x49f   :  { %v5949_v40 = vld [vmem:[#allocation2 + $0xb0] sm:$0xff]  ;;  %12338 = vmatprep.subr.mxu1 %v10170_v43  ;;  %12370 = vmatprep.subr.mxu0 %v10182_v36  ;;  %v7032_v41 = vld [vmem:[#allocation2 + $0x2] sm:$0xff] }
 0x4a0   :  { %5897 = vst.msk [vmem:[#allocation2 + $0xf1] sm:$0xff] %vm578_vm0, %v5881_v28  ;;  %v5884_v62 = vmax.f32 %v5868_v58, 0.0  ;;  %v5867_v15 = vadd.f32 %v16058_v22, %v5843_v53  ;;  %12230 = vmatprep.mubr.msk.f32.mxu1 %vm578_vm0, %v5949_v40  ;;  %12263 = vmatmul.mubr.msk.f32.gmra.mxu0 %vm578_vm0, %v5949_v40  ;;  %v16332_v44 = vld [vmem:[#allocation2 + $0xb1] sm:$0xff]  ;;  %v7034_v48 = vld [vmem:[#allocation2 + $0x22] sm:$0xff] }
 0x4a1   :  { %12231 = vmatmul.mubr.msk.f32.gmra.mxu1 %vm578_vm0, %v16222_v12  ;;  %12265 = vmatprep.mubr.msk.f32.mxu0 %vm578_vm0, %v16222_v12  ;;  %v16236_v22 = vld [vmem:[#allocation2 + $0xe0] sm:$0xff]  ;;  %v6478_v63 = vld [vmem:[#allocation2 + $0x91] sm:$0xff]  ;;  %v10184_v25 = vld [vmem:[%s17773_s1 + $0x468] sm:$0xff] }
 0x4a2   :  { %5900 = vst.msk [vmem:[#allocation2 + $0x121] sm:$0xff] %vm578_vm0, %v5884_v62  ;;  %v5883_v20 = vmax.f32 %v5867_v15, 0.0  ;;  %v6483_v3 = vld [vmem:[#allocation2 + $0xe1] sm:$0xff]  ;;  %v6488_v21 = vld [vmem:[#allocation2 + $0x131] sm:$0xff] }
 0x4a3   :  { %v16229_v55 = vld [vmem:[#allocation2 + $0xd0] sm:$0xff]  ;;  %v7036_v23 = vld [vmem:[#allocation2 + $0x42] sm:$0xff] }
 0x4a4   :  { %5899 = vst.msk [vmem:[#allocation2 + $0x111] sm:$0xff] %vm578_vm0, %v5883_v20  ;;  %12233 = vmatprep.mubr.msk.f32.mxu1 %vm578_vm0, %v16229_v55  ;;  %12266 = vmatmul.mubr.msk.f32.gmra.mxu0 %vm578_vm0, %v16229_v55  ;;  %v6482_v18 = vld [vmem:[#allocation2 + $0xd1] sm:$0xff]  ;;  %v10183_v42 = vld [vmem:[%s17773_s1 + $0x460] sm:$0xff] }
 0x4a5   :  { %12234 = vmatmul.mubr.msk.f32.gmra.mxu1 %vm578_vm0, %v16236_v22  ;;  %12268 = vmatprep.mubr.msk.f32.mxu0 %vm578_vm0, %v16236_v22  ;;  %v16248_v2 = vld [vmem:[#allocation2 + $0x100] sm:$0xff]  ;;  %v7033_v38 = vld [vmem:[#allocation2 + $0x12] sm:$0xff] }
 0x4a6   :  { %v6485_v50 = vld [vmem:[#allocation2 + $0x101] sm:$0xff]  ;;  %v7035_v47 = vld [vmem:[#allocation2 + $0x32] sm:$0xff] }
 0x4a7   :  { %v16242_v9 = vld [vmem:[#allocation2 + $0xf0] sm:$0xff]  ;;  %v7042_v54 = vld [vmem:[#allocation2 + $0xa2] sm:$0xff] }
 0x4a8   :  { %12236 = vmatprep.mubr.msk.f32.mxu1 %vm578_vm0, %v16242_v9  ;;  %12269 = vmatmul.mubr.msk.f32.gmra.mxu0 %vm578_vm0, %v16242_v9  ;;  %v6484_v59 = vld [vmem:[#allocation2 + $0xf1] sm:$0xff]  ;;  %v7044_v58 = vld [vmem:[#allocation2 + $0xc2] sm:$0xff] }
 0x4a9   :  { %12237 = vmatmul.mubr.msk.f32.gmra.mxu1 %vm578_vm0, %v16248_v2  ;;  %12271 = vmatprep.mubr.msk.f32.mxu0 %vm578_vm0, %v16248_v2  ;;  %v16260_v49 = vld [vmem:[#allocation2 + $0x120] sm:$0xff]  ;;  %v7037_v0 = vld [vmem:[#allocation2 + $0x52] sm:$0xff] }
 0x4aa   :  { %v6487_v56 = vld [vmem:[#allocation2 + $0x121] sm:$0xff]  ;;  %v7043_v28 = vld [vmem:[#allocation2 + $0xb2] sm:$0xff] }
 0x4ab   :  { %v16254_v51 = vld [vmem:[#allocation2 + $0x110] sm:$0xff]  ;;  %v7046_v40 = vld [vmem:[#allocation2 + $0xe2] sm:$0xff] }
 0x4ac   :  { %12239 = vmatprep.mubr.msk.f32.mxu1 %vm578_vm0, %v16254_v51  ;;  %12272 = vmatmul.mubr.msk.f32.gmra.mxu0 %vm578_vm0, %v16254_v51  ;;  %v6486_v19 = vld [vmem:[#allocation2 + $0x111] sm:$0xff]  ;;  %v7048_v15 = vld [vmem:[#allocation2 + $0x102] sm:$0xff] }
 0x4ad   :  { %12240 = vmatmul.mubr.msk.f32.gmra.mxu1 %vm578_vm0, %v16260_v49  ;;  %12314 = vmatprep.mubr.msk.f32.mxu0 %vm578_vm0, %v6469_v32  ;;  %v7045_v53 = vld [vmem:[#allocation2 + $0xd2] sm:$0xff]  ;;  %v7050_v20 = vld [vmem:[#allocation2 + $0x122] sm:$0xff] }
 0x4ae   :  { %12282 = vmatprep.mubr.msk.f32.mxu1 %vm578_vm0, %v16128_v27  ;;  %v16282_v27 = vld [vmem:[#allocation2 + $0x31] sm:$0xff] }
 0x4af   :  { %v7047_v62 = vld [vmem:[#allocation2 + $0xf2] sm:$0xff] }
 0x4b0   :  { %12315 = vmatmul.mubr.msk.f32.vlgmr.msra.gmra.mxu0 %vm578_vm0, %v16267_v1 }
 0x4b1   :  { %12283 = vmatmul.mubr.msk.f32.vlgmr.msra.gmra.mxu1 %vm578_vm0, %v16150_v35  ;;  %12317 = vmatprep.mubr.msk.f32.mxu0 %vm578_vm0, %v16271_v24  ;;  %v10181_v35 = vld [vmem:[%s17773_s1 + $0x450] sm:$0xff] }
 0x4b2   :  { %12339 = vmatpush3.msra.mxu1 %v10170_v43  ;;  %12285 = vmatprep.mubr.msk.f32.mxu1 %vm578_vm0, %v16158_v4  ;;  %v10162_v4 = vld [vmem:[%s17773_s1 + $0x3b8] sm:$0xff] }
 0x4b3   :  { %12340 = vmatprep.subr.mxu1 %v10169_v26  ;;  %12371 = vmatpush3.msra.mxu0 %v10182_v36  ;;  %v7039_v43 = vld [vmem:[#allocation2 + $0x72] sm:$0xff]  ;;  %v7040_v36 = vld [vmem:[#allocation2 + $0x82] sm:$0xff] }
 0x4b4   :  { %12318 = vmatmul.mubr.msk.f32.gmra.mxu0 %vm578_vm0, %v16282_v27  ;;  %12341 = vmatpush3.msra.mxu1 %v10169_v26 }
 0x4b5   :  { %12286 = vmatmul.mubr.msk.f32.gmra.mxu1 %vm578_vm0, %v16174_v57  ;;  %12320 = vmatprep.mubr.msk.f32.mxu0 %vm578_vm0, %v16289_v52  ;;  %v5957_v57 = vld [vmem:[#allocation2 + $0x130] sm:$0xff] }
 0x4b6   :  { %12288 = vmatprep.mubr.msk.f32.mxu1 %vm578_vm0, %v16183_v33  ;;  %12342 = vmatprep.subr.mxu1 %v10168_v39  ;;  %v6477_v33 = vld [vmem:[#allocation2 + $0x81] sm:$0xff] }
 0x4b7   :  { %12343 = vmatpush3.msra.mxu1 %v10168_v39  ;;  %12372 = vmatprep.subr.mxu0 %v10181_v35 }
 0x4b8   :  { %12321 = vmatmul.mubr.msk.f32.gmra.mxu0 %vm578_vm0, %v16303_v13  ;;  %12344 = vmatprep.subr.mxu1 %v10167_v16 }
 0x4b9   :  { %12289 = vmatmul.mubr.msk.f32.gmra.mxu1 %vm578_vm0, %v16197_v45  ;;  %12323 = vmatprep.mubr.msk.f32.mxu0 %vm578_vm0, %v16307_v37  ;;  %v10185_v45 = vld [vmem:[%s17773_s1 + $0x470] sm:$0xff] }
 0x4ba   :  { %12291 = vmatprep.mubr.msk.f32.mxu1 %vm578_vm0, %v16205_v14  ;;  %12345 = vmatpush3.msra.mxu1 %v10167_v16  ;;  %v7038_v14 = vld [vmem:[#allocation2 + $0x62] sm:$0xff] }
 0x4bb   :  { %12373 = vmatpush3.msra.mxu0 %v10181_v35  ;;  %12402 = vmatprep.subr.mxu1 %v10162_v4 }
 0x4bc   :  { %12324 = vmatmul.mubr.msk.f32.gmra.mxu0 %vm578_vm0, %v16321_v11  ;;  %12374 = vmatprep.subr.mxu0 %v10180_v5 }
 0x4bd   :  { %12292 = vmatmul.mubr.msk.f32.gmra.mxu1 %vm578_vm0, %v5947_v29  ;;  %12326 = vmatprep.mubr.msk.f32.mxu0 %vm578_vm0, %v6479_v17 }
 0x4be   :  { %12294 = vmatprep.mubr.msk.f32.mxu1 %vm578_vm0, %v16222_v12  ;;  %12375 = vmatpush3.msra.mxu0 %v10180_v5  ;;  %v7049_v12 = vld [vmem:[#allocation2 + $0x112] sm:$0xff] }
 0x4bf   :  { %12376 = vmatprep.subr.mxu0 %v10179_v10 }
 0x4c0   :  { %12327 = vmatmul.mubr.msk.f32.gmra.mxu0 %vm578_vm0, %v16332_v44 }
 0x4c1   :  { %12295 = vmatmul.mubr.msk.f32.gmra.mxu1 %vm578_vm0, %v16229_v55  ;;  %12329 = vmatprep.mubr.msk.f32.mxu0 %vm578_vm0, %v16336_v30  ;;  %v7041_v55 = vld [vmem:[#allocation2 + $0x92] sm:$0xff] }
 0x4c2   :  { %12297 = vmatprep.mubr.msk.f32.mxu1 %vm578_vm0, %v16236_v22  ;;  %12377 = vmatpush3.msra.mxu0 %v10179_v10  ;;  %v7051_v22 = vld [vmem:[#allocation2 + $0x132] sm:$0xff] }
 0x4c3   :  { %12434 = vmatprep.subr.mxu0 %v10174_v34 }
 0x4c4   :  { %12330 = vmatmul.mubr.msk.f32.gmra.mxu0 %vm578_vm0, %v6482_v18 }
 0x4c5   :  { %12298 = vmatmul.mubr.msk.f32.gmra.mxu1 %vm578_vm0, %v16242_v9  ;;  %12332 = vmatprep.mubr.msk.f32.mxu0 %vm578_vm0, %v6483_v3 }
 0x4c6   :  { %12300 = vmatprep.mubr.msk.f32.mxu1 %vm578_vm0, %v16248_v2 }
 0x4c8   :  { %12333 = vmatmul.mubr.msk.f32.gmra.mxu0 %vm578_vm0, %v6484_v59 }
 0x4c9   :  { %12301 = vmatmul.mubr.msk.f32.gmra.mxu1 %vm578_vm0, %v16254_v51  ;;  %12335 = vmatprep.mubr.msk.f32.mxu0 %vm578_vm0, %v6485_v50 }
 0x4ca   :  { %12303 = vmatprep.mubr.msk.f32.mxu1 %vm578_vm0, %v16260_v49 }
 0x4cc   :  { %12336 = vmatmul.mubr.msk.f32.gmra.mxu0 %vm578_vm0, %v6486_v19 }
 0x4cd   :  { %12304 = vmatmul.mubr.msk.f32.gmra.mxu1 %vm578_vm0, %v5957_v57  ;;  %12378 = vmatprep.mubr.msk.f32.mxu0 %vm578_vm0, %v16271_v24 }
 0x4ce   :  { %12346 = vmatprep.mubr.msk.f32.mxu1 %vm578_vm0, %v16267_v1 }
 0x4d0   :  { %12379 = vmatmul.mubr.msk.f32.vlgmr.msra.gmra.mxu0 %vm578_vm0, %v16282_v27 }
 0x4d1   :  { %12347 = vmatmul.mubr.msk.f32.vlgmr.msra.gmra.mxu1 %vm578_vm0, %v16271_v24  ;;  %12381 = vmatprep.mubr.msk.f32.mxu0 %vm578_vm0, %v16289_v52 }
 0x4d2   :  { %12403 = vmatpush3.msra.mxu1 %v10162_v4  ;;  %12349 = vmatprep.mubr.msk.f32.mxu1 %vm578_vm0, %v16282_v27 }
 0x4d3   :  { %12404 = vmatprep.subr.mxu1 %v10161_v61  ;;  %12435 = vmatpush3.msra.mxu0 %v10174_v34 }
 0x4d4   :  { %12382 = vmatmul.mubr.msk.f32.gmra.mxu0 %vm578_vm0, %v16303_v13  ;;  %12405 = vmatpush3.msra.mxu1 %v10161_v61 }
 0x4d5   :  { %12350 = vmatmul.mubr.msk.f32.gmra.mxu1 %vm578_vm0, %v16289_v52  ;;  %12384 = vmatprep.mubr.msk.f32.mxu0 %vm578_vm0, %v16307_v37 }
 0x4d6   :  { %12352 = vmatprep.mubr.msk.f32.mxu1 %vm578_vm0, %v16303_v13  ;;  %12406 = vmatprep.subr.mxu1 %v10160_v60 }
 0x4d7   :  { %12407 = vmatpush3.msra.mxu1 %v10160_v60  ;;  %12436 = vmatprep.subr.mxu0 %v10173_v7 }
 0x4d8   :  { %12385 = vmatmul.mubr.msk.f32.gmra.mxu0 %vm578_vm0, %v16321_v11  ;;  %12408 = vmatprep.subr.mxu1 %v10159_v31 }
 0x4d9   :  { %12353 = vmatmul.mubr.msk.f32.gmra.mxu1 %vm578_vm0, %v16307_v37  ;;  %12387 = vmatprep.mubr.msk.f32.mxu0 %vm578_vm0, %v6477_v33 }
 0x4da   :  { %12355 = vmatprep.mubr.msk.f32.mxu1 %vm578_vm0, %v16321_v11  ;;  %12409 = vmatpush3.msra.mxu1 %v10159_v31 }
 0x4db   :  { %12437 = vmatpush3.msra.mxu0 %v10173_v7  ;;  %12466 = vmatprep.subr.mxu1 %v10186_v8 }
 0x4dc   :  { %12388 = vmatmul.mubr.msk.f32.gmra.mxu0 %vm578_vm0, %v6478_v63  ;;  %12438 = vmatprep.subr.mxu0 %v10172_v6 }
 0x4dd   :  { %12356 = vmatmul.mubr.msk.f32.gmra.mxu1 %vm578_vm0, %v6477_v33  ;;  %12390 = vmatprep.mubr.msk.f32.mxu0 %vm578_vm0, %v16336_v30 }
 0x4de   :  { %12358 = vmatprep.mubr.msk.f32.mxu1 %vm578_vm0, %v16332_v44  ;;  %12439 = vmatpush3.msra.mxu0 %v10172_v6 }
 0x4df   :  { %12440 = vmatprep.subr.mxu0 %v10171_v46 }
 0x4e0   :  { %12391 = vmatmul.mubr.msk.f32.gmra.mxu0 %vm578_vm0, %v6482_v18 }
 0x4e1   :  { %12359 = vmatmul.mubr.msk.f32.gmra.mxu1 %vm578_vm0, %v16336_v30  ;;  %12393 = vmatprep.mubr.msk.f32.mxu0 %vm578_vm0, %v6483_v3 }
 0x4e2   :  { %12361 = vmatprep.mubr.msk.f32.mxu1 %vm578_vm0, %v6482_v18  ;;  %12441 = vmatpush3.msra.mxu0 %v10171_v46 }
 0x4e4   :  { %12394 = vmatmul.mubr.msk.f32.gmra.mxu0 %vm578_vm0, %v6484_v59 }
 0x4e5   :  { %12362 = vmatmul.mubr.msk.f32.gmra.mxu1 %vm578_vm0, %v6483_v3  ;;  %12396 = vmatprep.mubr.msk.f32.mxu0 %vm578_vm0, %v6485_v50 }
 0x4e6   :  { %12364 = vmatprep.mubr.msk.f32.mxu1 %vm578_vm0, %v6484_v59 }
 0x4e8   :  { %12397 = vmatmul.mubr.msk.f32.gmra.mxu0 %vm578_vm0, %v6486_v19 }
 0x4e9   :  { %12365 = vmatmul.mubr.msk.f32.gmra.mxu1 %vm578_vm0, %v6485_v50  ;;  %12399 = vmatprep.mubr.msk.f32.mxu0 %vm578_vm0, %v6487_v56 }
 0x4ea   :  { %12367 = vmatprep.mubr.msk.f32.mxu1 %vm578_vm0, %v6486_v19 }
 0x4ec   :  { %12400 = vmatmul.mubr.msk.f32.gmra.mxu0 %vm578_vm0, %v6488_v21 }
 0x4ed   :  { %12368 = vmatmul.mubr.msk.f32.gmra.mxu1 %vm578_vm0, %v6487_v56  ;;  %12442 = vmatprep.mubr.msk.f32.mxu0 %vm578_vm0, %v7033_v38 }
 0x4ee   :  { %12410 = vmatprep.mubr.msk.f32.mxu1 %vm578_vm0, %v7032_v41 }
 0x4f0   :  { %12443 = vmatmul.mubr.msk.f32.vlgmr.msra.gmra.mxu0 %vm578_vm0, %v7034_v48 }
 0x4f1   :  { %12411 = vmatmul.mubr.msk.f32.vlgmr.msra.gmra.mxu1 %vm578_vm0, %v7033_v38  ;;  %12445 = vmatprep.mubr.msk.f32.mxu0 %vm578_vm0, %v7035_v47 }
 0x4f2   :  { %12467 = vmatpush3.msra.mxu1 %v10186_v8  ;;  %12413 = vmatprep.mubr.msk.f32.mxu1 %vm578_vm0, %v7034_v48 }
 0x4f3   :  { %12468 = vmatprep.subr.mxu1 %v10185_v45 }
 0x4f4   :  { %12446 = vmatmul.mubr.msk.f32.gmra.mxu0 %vm578_vm0, %v7036_v23  ;;  %12469 = vmatpush3.msra.mxu1 %v10185_v45 }
 0x4f5   :  { %12414 = vmatmul.mubr.msk.f32.gmra.mxu1 %vm578_vm0, %v7035_v47  ;;  %12448 = vmatprep.mubr.msk.f32.mxu0 %vm578_vm0, %v7037_v0 }
 0x4f6   :  { %12416 = vmatprep.mubr.msk.f32.mxu1 %vm578_vm0, %v7036_v23  ;;  %12470 = vmatprep.subr.mxu1 %v10184_v25 }
 0x4f7   :  { %12471 = vmatpush3.msra.mxu1 %v10184_v25 }
 0x4f8   :  { %12449 = vmatmul.mubr.msk.f32.gmra.mxu0 %vm578_vm0, %v7038_v14  ;;  %12472 = vmatprep.subr.mxu1 %v10183_v42 }
 0x4f9   :  { %12417 = vmatmul.mubr.msk.f32.gmra.mxu1 %vm578_vm0, %v7037_v0  ;;  %12451 = vmatprep.mubr.msk.f32.mxu0 %vm578_vm0, %v7039_v43 }
 0x4fa   :  { %12419 = vmatprep.mubr.msk.f32.mxu1 %vm578_vm0, %v7038_v14  ;;  %12473 = vmatpush3.msra.mxu1 %v10183_v42 }
 0x4fc   :  { %12452 = vmatmul.mubr.msk.f32.gmra.mxu0 %vm578_vm0, %v7040_v36 }
 0x4fd   :  { %12420 = vmatmul.mubr.msk.f32.gmra.mxu1 %vm578_vm0, %v7039_v43  ;;  %12454 = vmatprep.mubr.msk.f32.mxu0 %vm578_vm0, %v7043_v28 }
 0x4fe   :  { %12422 = vmatprep.mubr.msk.f32.mxu1 %vm578_vm0, %v7042_v54 }
 0x500   :  { %12455 = vmatmul.mubr.msk.f32.gmra.mxu0 %vm578_vm0, %v7044_v58 }
 0x501   :  { %12423 = vmatmul.mubr.msk.f32.gmra.mxu1 %vm578_vm0, %v7043_v28  ;;  %12457 = vmatprep.mubr.msk.f32.mxu0 %vm578_vm0, %v7045_v53 }
 0x502   :  { %12425 = vmatprep.mubr.msk.f32.mxu1 %vm578_vm0, %v7044_v58 }
 0x504   :  { %12458 = vmatmul.mubr.msk.f32.gmra.mxu0 %vm578_vm0, %v7046_v40 }
 0x505   :  { %12426 = vmatmul.mubr.msk.f32.gmra.mxu1 %vm578_vm0, %v7045_v53  ;;  %12460 = vmatprep.mubr.msk.f32.mxu0 %vm578_vm0, %v7047_v62 }
 0x506   :  { %12428 = vmatprep.mubr.msk.f32.mxu1 %vm578_vm0, %v7046_v40 }
 0x508   :  { %12461 = vmatmul.mubr.msk.f32.gmra.mxu0 %vm578_vm0, %v7048_v15 }
 0x509   :  { %12429 = vmatmul.mubr.msk.f32.gmra.mxu1 %vm578_vm0, %v7047_v62  ;;  %12463 = vmatprep.mubr.msk.f32.mxu0 %vm578_vm0, %v7049_v12 }
 0x50a   :  { %12431 = vmatprep.mubr.msk.f32.mxu1 %vm578_vm0, %v7048_v15 }
 0x50c   :  { %12464 = vmatmul.mubr.msk.f32.gmra.mxu0 %vm578_vm0, %v7050_v20 }
 0x50d   :  { %12432 = vmatmul.mubr.msk.f32.gmra.mxu1 %vm578_vm0, %v7049_v12 }
 0x50e   :  { %12474 = vmatprep.mubr.msk.f32.mxu1 %vm578_vm0, %v7034_v48 }
 0x511   :  { %12475 = vmatmul.mubr.msk.f32.vlgmr.msra.gmra.mxu1 %vm578_vm0, %v7035_v47 }
 0x512   :  { %12477 = vmatprep.mubr.msk.f32.mxu1 %vm578_vm0, %v7036_v23 }
 0x515   :  { %12478 = vmatmul.mubr.msk.f32.gmra.mxu1 %vm578_vm0, %v7037_v0 }
 0x516   :  { %12480 = vmatprep.mubr.msk.f32.mxu1 %vm578_vm0, %v7038_v14 }
 0x519   :  { %12481 = vmatmul.mubr.msk.f32.gmra.mxu1 %vm578_vm0, %v7039_v43 }
 0x51a   :  { %12483 = vmatprep.mubr.msk.f32.mxu1 %vm578_vm0, %v7040_v36 }
 0x51d   :  { %12484 = vmatmul.mubr.msk.f32.gmra.mxu1 %vm578_vm0, %v7041_v55 }
 0x51e   :  { %12486 = vmatprep.mubr.msk.f32.mxu1 %vm578_vm0, %v7044_v58 }
 0x521   :  { %12487 = vmatmul.mubr.msk.f32.gmra.mxu1 %vm578_vm0, %v7045_v53 }
 0x522   :  { %12489 = vmatprep.mubr.msk.f32.mxu1 %vm578_vm0, %v7046_v40 }
 0x525   :  { %12490 = vmatmul.mubr.msk.f32.gmra.mxu1 %vm578_vm0, %v7047_v62 }
 0x526   :  { %12492 = vmatprep.mubr.msk.f32.mxu1 %vm578_vm0, %v7048_v15 }
 0x529   :  { %12493 = vmatmul.mubr.msk.f32.gmra.mxu1 %vm578_vm0, %v7049_v12 }
 0x52a   :  { %12495 = vmatprep.mubr.msk.f32.mxu1 %vm578_vm0, %v7050_v20 }
 0x52d   :  { %12496 = vmatmul.mubr.msk.f32.gmra.mxu1 %vm578_vm0, %v7051_v22 }
 0x550   :  { %v12252_v9 = vpop.f32.mrf.mxu0 }
 0x551   :  { %v12220_v2 = vpop.f32.mrf.mxu1 }
 0x552   :  { %v6229_v32 = vadd.f32 %v12252_v9, %v12220_v2  ;;  %v6223_v51 = vpop.f32.mrf.mxu0 }
 0x553   :  { %v6072_v49 = vpop.f32.mrf.mxu1 }
 0x554   :  { %v6224_v1 = vadd.f32 %v6223_v51, %v6072_v49  ;;  %v12255_v24 = vpop.f32.mrf.mxu0 }
 0x555   :  { %v12223_v26 = vpop.f32.mrf.mxu1 }
 0x556   :  { %v6239_v27 = vadd.f32 %v12255_v24, %v12223_v26  ;;  %v6233_v39 = vpop.f32.mrf.mxu0 }
 0x557   :  { %v6082_v52 = vpop.f32.mrf.mxu1 }
 0x558   :  { %v6234_v35 = vadd.f32 %v6233_v39, %v6082_v52  ;;  %v12258_v16 = vpop.f32.mrf.mxu0 }
 0x559   :  { %v12226_v13 = vpop.f32.mrf.mxu1 }
 0x55a   :  { %v6249_v37 = vadd.f32 %v12258_v16, %v12226_v13  ;;  %v6243_v4 = vpop.f32.mrf.mxu0 }
 0x55b   :  { %v6092_v5 = vpop.f32.mrf.mxu1 }
 0x55c   :  { %v6244_v29 = vadd.f32 %v6243_v4, %v6092_v5  ;;  %v12261_v17 = vpop.f32.mrf.mxu0 }
 0x55d   :  { %v12229_v11 = vpop.f32.mrf.mxu1 }
 0x55e   :  { %v6259_v10 = vadd.f32 %v12261_v17, %v12229_v11  ;;  %v6253_v44 = vpop.f32.mrf.mxu0 }
 0x55f   :  { %v6102_v30 = vpop.f32.mrf.mxu1 }
 0x560   :  { %v6254_v34 = vadd.f32 %v6253_v44, %v6102_v30  ;;  %v12264_v18 = vpop.f32.mrf.mxu0 }
 0x561   :  { %v12232_v3 = vpop.f32.mrf.mxu1 }
 0x562   :  { %v6269_v59 = vadd.f32 %v12264_v18, %v12232_v3  ;;  %v6263_v50 = vpop.f32.mrf.mxu0 }
 0x563   :  { %v6112_v57 = vpop.f32.mrf.mxu1 }
 0x564   :  { %v6264_v19 = vadd.f32 %v6263_v50, %v6112_v57  ;;  %v12267_v61 = vpop.f32.mrf.mxu0 }
 0x565   :  { %v12235_v60 = vpop.f32.mrf.mxu1 }
 0x566   :  { %v6279_v7 = vadd.f32 %v12267_v61, %v12235_v60  ;;  %v6273_v31 = vpop.f32.mrf.mxu0 }
 0x567   :  { %v6122_v33 = vpop.f32.mrf.mxu1 }
 0x568   :  { %v6274_v8 = vadd.f32 %v6273_v31, %v6122_v33  ;;  %v12270_v63 = vpop.f32.mrf.mxu0 }
 0x569   :  { %v12238_v6 = vpop.f32.mrf.mxu1 }
 0x56a   :  { %v6289_v46 = vadd.f32 %v12270_v63, %v12238_v6  ;;  %v6283_v56 = vpop.f32.mrf.mxu0 }
 0x56b   :  { %v6132_v21 = vpop.f32.mrf.mxu1 }
 0x56c   :  { %v6284_v41 = vadd.f32 %v6283_v56, %v6132_v21  ;;  %v12273_v38 = vpop.f32.mrf.mxu0 }
 0x56d   :  { %v12241_v48 = vpop.f32.mrf.mxu1 }
 0x56e   :  { %v6299_v47 = vadd.f32 %v12273_v38, %v12241_v48  ;;  %v6293_v45 = vpop.f32.mrf.mxu0 }
 0x56f   :  { %v6142_v23 = vpop.f32.mrf.mxu1 }
 0x570   :  { %v6294_v25 = vadd.f32 %v6293_v45, %v6142_v23  ;;  %v12316_v0 = vpop.f32.mrf.mxu0 }
 0x571   :  { %v12284_v42 = vpop.f32.mrf.mxu1 }
 0x572   :  { %v6454_v14 = vadd.f32 %v12284_v42, %v6229_v32  ;;  %v6603_v43 = vpop.f32.mrf.mxu0 }
 0x573   :  { %v6374_v36 = vpop.f32.mrf.mxu1 }
 0x574   :  { %v6453_v54 = vadd.f32 %v6374_v36, %v6224_v1  ;;  %v12319_v28 = vpop.f32.mrf.mxu0  ;;  %v6683_v58 = vadd.f32 %v12316_v0, %v6454_v14 }
 0x575   :  { %v12287_v53 = vpop.f32.mrf.mxu1 }
 0x576   :  { %v6456_v40 = vadd.f32 %v12287_v53, %v6239_v27  ;;  %v6613_v62 = vpop.f32.mrf.mxu0  ;;  %v6682_v15 = vadd.f32 %v6603_v43, %v6453_v54 }
 0x577   :  { %v6384_v12 = vpop.f32.mrf.mxu1 }
 0x578   :  { %v6455_v20 = vadd.f32 %v6384_v12, %v6234_v35  ;;  %v12322_v55 = vpop.f32.mrf.mxu0  ;;  %v6685_v22 = vadd.f32 %v12319_v28, %v6456_v40 }
 0x579   :  { %v12290_v9 = vpop.f32.mrf.mxu1 }
 0x57a   :  { %v6458_v2 = vadd.f32 %v12290_v9, %v6249_v37  ;;  %v6623_v51 = vpop.f32.mrf.mxu0  ;;  %v6684_v49 = vadd.f32 %v6613_v62, %v6455_v20 }
 0x57b   :  { %v6394_v24 = vpop.f32.mrf.mxu1 }
 0x57c   :  { %v6457_v26 = vadd.f32 %v6394_v24, %v6244_v29  ;;  %v12325_v32 = vpop.f32.mrf.mxu0  ;;  %v6687_v39 = vadd.f32 %v12322_v55, %v6458_v2 }
 0x57d   :  { %v12293_v52 = vpop.f32.mrf.mxu1 }
 0x57e   :  { %v6460_v1 = vadd.f32 %v12293_v52, %v6259_v10  ;;  %v6633_v16 = vpop.f32.mrf.mxu0  ;;  %v6686_v13 = vadd.f32 %v6623_v51, %v6457_v26 }
 0x57f   :  { %v6404_v4 = vpop.f32.mrf.mxu1 }
 0x580   :  { %v6459_v27 = vadd.f32 %v6404_v4, %v6254_v34  ;;  %v16487_v5 = vpop.f32.mrf.mxu0  ;;  %v6689_v17 = vadd.f32 %v12325_v32, %v6460_v1 }
 0x581   :  { %v12296_v35 = vpop.f32.mrf.mxu1 }
 0x582   :  { %v16489_v11 = vadd.f32 %v12296_v35, %v6269_v59  ;;  %v16491_v44 = vpop.f32.mrf.mxu0  ;;  %v6688_v37 = vadd.f32 %v6633_v16, %v6459_v27 }
 0x583   :  { %v6414_v30 = vpop.f32.mrf.mxu1 }
 0x584   :  { %v16493_v18 = vadd.f32 %v6414_v30, %v6264_v19  ;;  %v12331_v29 = vpop.f32.mrf.mxu0 }
 0x585   :  { %v12299_v3 = vpop.f32.mrf.mxu1 }
 0x586   :  { %v6464_v50 = vadd.f32 %v12299_v3, %v6279_v7  ;;  %v6653_v10 = vpop.f32.mrf.mxu0 }
 0x587   :  { %v6424_v57 = vpop.f32.mrf.mxu1 }
 0x588   :  { %v6463_v61 = vadd.f32 %v6424_v57, %v6274_v8  ;;  %v12334_v60 = vpop.f32.mrf.mxu0  ;;  %v6693_v34 = vadd.f32 %v12331_v29, %v6464_v50 }
 0x589   :  { %v12302_v31 = vpop.f32.mrf.mxu1 }
 0x58a   :  { %v6466_v33 = vadd.f32 %v12302_v31, %v6289_v46  ;;  %v6663_v63 = vpop.f32.mrf.mxu0  ;;  %v6692_v6 = vadd.f32 %v6653_v10, %v6463_v61 }
 0x58b   :  { %v6434_v59 = vpop.f32.mrf.mxu1 }
 0x58c   :  { %v6465_v56 = vadd.f32 %v6434_v59, %v6284_v41  ;;  %v12337_v21 = vpop.f32.mrf.mxu0  ;;  %v6695_v38 = vadd.f32 %v12334_v60, %v6466_v33 }
 0x58d   :  { %v12305_v48 = vpop.f32.mrf.mxu1 }
 0x58e   :  { %v6468_v45 = vadd.f32 %v12305_v48, %v6299_v47  ;;  %v6673_v19 = vpop.f32.mrf.mxu0  ;;  %v6694_v23 = vadd.f32 %v6663_v63, %v6465_v56 }
 0x58f   :  { %v6444_v0 = vpop.f32.mrf.mxu1 }
 0x590   :  { %v6467_v42 = vadd.f32 %v6444_v0, %v6294_v25  ;;  %v16495_v7 = vpop.f32.mrf.mxu0  ;;  %v6697_v14 = vadd.f32 %v12337_v21, %v6468_v45 }
 0x591   :  { %v12348_v8 = vpop.f32.mrf.mxu1 }
 0x592   :  { %v16497_v43 = vadd.f32 %v12348_v8, %v6683_v58  ;;  %v16499_v36 = vpop.f32.mrf.mxu0  ;;  %v6696_v46 = vadd.f32 %v6673_v19, %v6467_v42 }
 0x593   :  { %v6770_v54 = vpop.f32.mrf.mxu1 }
 0x594   :  { %v16501_v28 = vadd.f32 %v6770_v54, %v6682_v15  ;;  %v16503_v41 = vpop.f32.mrf.mxu0 }
 0x595   :  { %v12351_v53 = vpop.f32.mrf.mxu1 }
 0x596   :  { %v16505_v47 = vadd.f32 %v12351_v53, %v6685_v22  ;;  %v16507_v40 = vpop.f32.mrf.mxu0 }
 0x597   :  { %v6780_v25 = vpop.f32.mrf.mxu1 }
 0x598   :  { %v16509_v62 = vadd.f32 %v6780_v25, %v6684_v49  ;;  %v12386_v12 = vpop.f32.mrf.mxu0 }
 0x599   :  { %v12354_v20 = vpop.f32.mrf.mxu1 }
 0x59a   :  { %v6854_v58 = vadd.f32 %v12354_v20, %v6687_v39  ;;  %v6957_v55 = vpop.f32.mrf.mxu0 }
 0x59b   :  { %v6790_v9 = vpop.f32.mrf.mxu1 }
 0x59c   :  { %v6853_v2 = vadd.f32 %v6790_v9, %v6686_v13  ;;  %v12389_v51 = vpop.f32.mrf.mxu0  ;;  %v7021_v24 = vadd.f32 %v12386_v12, %v6854_v58 }
 0x59d   :  { %v12357_v15 = vpop.f32.mrf.mxu1 }
 0x59e   :  { %v6856_v26 = vadd.f32 %v12357_v15, %v6689_v17  ;;  %v6967_v32 = vpop.f32.mrf.mxu0  ;;  %v7020_v52 = vadd.f32 %v6957_v55, %v6853_v2 }
 0x59f   :  { %v6800_v1 = vpop.f32.mrf.mxu1 }
 0x5a0   :  { %v6855_v22 = vadd.f32 %v6800_v1, %v6688_v37  ;;  %v16511_v16 = vpop.f32.mrf.mxu0  ;;  %v7023_v4 = vadd.f32 %v12389_v51, %v6856_v26 }
 0x5a1   :  { %v12360_v27 = vpop.f32.mrf.mxu1 }
 0x5a2   :  { %v16513_v49 = vpop.f32.mrf.mxu0  ;;  %v7022_v35 = vadd.f32 %v6967_v32, %v6855_v22 }
 0x5a3   :  { %v6810_v30 = vpop.f32.mrf.mxu1 }
 0x5a4   :  { %v16515_v39 = vpop.f32.mrf.mxu0 }
 0x5a5   :  { %v12363_v29 = vpop.f32.mrf.mxu1 }
 0x5a6   :  { %v16517_v13 = vadd.f32 %v12363_v29, %v6693_v34  ;;  %v16519_v3 = vpop.f32.mrf.mxu0 }
 0x5a7   :  { %v6820_v17 = vpop.f32.mrf.mxu1 }
 0x5a8   :  { %v16521_v50 = vadd.f32 %v6820_v17, %v6692_v6  ;;  %v16523_v10 = vpop.f32.mrf.mxu0 }
 0x5a9   :  { %v12366_v37 = vpop.f32.mrf.mxu1 }
 0x5aa   :  { %v16525_v57 = vadd.f32 %v12366_v37, %v6695_v38  ;;  %v6997_v61 = vpop.f32.mrf.mxu0 }
 0x5ab   :  { %v6830_v60 = vpop.f32.mrf.mxu1 }
 0x5ac   :  { %v6861_v31 = vadd.f32 %v6830_v60, %v6694_v23  ;;  %v12401_v33 = vpop.f32.mrf.mxu0  ;;  %v6691_v60 = vadd.f32 %v16487_v5, %v16489_v11 }
 0x5ad   :  { %v12369_v63 = vpop.f32.mrf.mxu1 }
 0x5ae   :  { %v6864_v59 = vadd.f32 %v12369_v63, %v6697_v14  ;;  %v7007_v56 = vpop.f32.mrf.mxu0  ;;  %v7028_v21 = vadd.f32 %v6997_v61, %v6861_v31  ;;  %v6690_v31 = vadd.f32 %v16491_v44, %v16493_v18  ;;  %v7019_v44 = vadd.f32 %v16503_v41, %v16505_v47 }
 0x5af   :  { %v6840_v34 = vpop.f32.mrf.mxu1  ;;  %v7026_v41 = vadd.f32 %v16519_v3, %v16521_v50  ;;  %v7029_v47 = vadd.f32 %v16523_v10, %v16525_v57 }
 0x5b0   :  { %v6863_v48 = vadd.f32 %v6840_v34, %v6696_v46  ;;  %v12444_v45 = vpop.f32.mrf.mxu0  ;;  %v7031_v19 = vadd.f32 %v12401_v33, %v6864_v59  ;;  %v6858_v33 = vadd.f32 %v12360_v27, %v6691_v60  ;;  %v12561_v59 = vmov 1983009808  }
 0x5b1   :  { %v12412_v0 = vpop.f32.mrf.mxu1  ;;  %v7640_v34 = vlaneseq }
 0x5b2   :  { %v16527_v6 = vpop.f32.mrf.mxu0  ;;  %v7030_v42 = vadd.f32 %v7007_v56, %v6863_v48  ;;  %v7638_v56 = vunpack.c.l.s4 %v12561_v59  ;;  %v6857_v48 = vadd.f32 %v6810_v30, %v6690_v31 }
 0x5b3   :  { %v7166_v8 = vpop.f32.mrf.mxu1  ;;  %v7641_v30 = vshrl.u32 %v7640_v34, 7 }
 0x5b4   :  { %v16529_v54 = vpop.f32.mrf.mxu0 }
 0x5b5   :  { %v12415_v38 = vpop.f32.mrf.mxu1 }
 0x5b6   :  { %v16531_v53 = vpop.f32.mrf.mxu0 }
 0x5b7   :  { %v7176_v23 = vpop.f32.mrf.mxu1 }
 0x5b8   :  { %v16533_v25 = vpop.f32.mrf.mxu0 }
 0x5b9   :  { %v12418_v14 = vpop.f32.mrf.mxu1 }
 0x5ba   :  { %v16535_v12 = vadd.f32 %v12418_v14, %v7021_v24  ;;  %v16537_v20 = vpop.f32.mrf.mxu0 }
 0x5bb   :  { %v7186_v46 = vpop.f32.mrf.mxu1 }
 0x5bc   :  { %v16539_v58 = vadd.f32 %v7186_v46, %v7020_v52  ;;  %v16541_v55 = vpop.f32.mrf.mxu0  ;;  %v7016_v46 = vadd.f32 %v16499_v36, %v16501_v28 }
 0x5bd   :  { %v12421_v9 = vpop.f32.mrf.mxu1 }
 0x5be   :  { %v16543_v2 = vadd.f32 %v12421_v9, %v7023_v4  ;;  %v7363_v51 = vpop.f32.mrf.mxu0  ;;  %v7245_v11 = vadd.f32 %v7166_v8, %v7016_v46  ;;  %v7027_v8 = vadd.f32 %v16515_v39, %v16517_v13 }
 0x5bf   :  { %v7196_v15 = vpop.f32.mrf.mxu1 }
 0x5c0   :  { %v7251_v26 = vadd.f32 %v7196_v15, %v7022_v35  ;;  %v16545_v32 = vpop.f32.mrf.mxu0  ;;  %v7017_v35 = vadd.f32 %v16495_v7, %v16497_v43  ;;  %v7018_v7 = vadd.f32 %v16507_v40, %v16509_v62  ;;  %v7025_v43 = vadd.f32 %v16511_v16, %v6858_v33  ;;  %v16574_v62 = vld [vmem:[%s17774_s2 + $0x3] ss:$0 sm:$0xff]  ;;  %s12562_s2 = smov 32  }
 0x5c1   :  { %v12424_v1 = vpop.f32.mrf.mxu1  ;;  %v7639_v15 = vunpack.c.0.s8 %v7638_v56 }
 0x5c2   :  { %v16547_v22 = vpop.f32.mrf.mxu0  ;;  %v16549_v24 = vadd.f32 %v7363_v51, %v7251_v26  ;;  %v7246_v14 = vadd.f32 %v12412_v0, %v7017_v35  ;;  %v7248_v0 = vadd.f32 %v12415_v38, %v7019_v44  ;;  %v7024_v26 = vadd.f32 %v16513_v49, %v6857_v48 }
 0x5c3   :  { %v7206_v29 = vpop.f32.mrf.mxu1  ;;  %v7247_v60 = vadd.f32 %v7176_v23, %v7018_v7  ;;  %v7254_v16 = vadd.f32 %v12424_v1, %v7025_v43  ;;  %v16578_v50 = vsub.s32 %v7639_v15, %v7641_v30  ;;  %v7417_v1 = vadd.f32 %v16533_v25, %v16535_v12 }
 0x5c4   :  { %v12459_v17 = vpop.f32.mrf.mxu0  ;;  %v7415_v57 = vadd.f32 %v16529_v54, %v7248_v0 }
 0x5c5   :  { %v12427_v37 = vpop.f32.mrf.mxu1  ;;  %18302 = vst [vmem:[#allocation273_spill] sm:$0xff] %v16578_v50  ;;  %v7414_v35 = vadd.f32 %v16531_v53, %v7247_v60  ;;  %v16590_v33 = vadd.f32 %v16545_v32, %v7254_v16 }
 0x5c6   :  { %v7383_v61 = vpop.f32.mrf.mxu0 }
 0x5c7   :  { %v7216_v52 = vpop.f32.mrf.mxu1 }
 0x5c8   :  { %v12462_v9 = vpop.f32.mrf.mxu0  ;;  %v7255_v38 = vadd.f32 %v7216_v52, %v7026_v41 }
 0x5c9   :  { %v12430_v4 = vpop.f32.mrf.mxu1 }
 0x5ca   :  { %v7393_v36 = vpop.f32.mrf.mxu0  ;;  %v7258_v39 = vadd.f32 %v12430_v4, %v7029_v47  ;;  %v16597_v25 = vadd.f32 %v7383_v61, %v7255_v38 }
 0x5cb   :  { %v7226_v63 = vpop.f32.mrf.mxu1 }
 0x5cc   :  { %v7257_v51 = vadd.f32 %v7226_v63, %v7028_v21  ;;  %v7413_v21 = vadd.f32 %v12444_v45, %v7246_v14  ;;  %v7412_v45 = vadd.f32 %v16527_v6, %v7245_v11  ;;  %v12465_v23 = vpop.f32.mrf.mxu0  ;;  %v7416_v6 = vadd.f32 %v16537_v20, %v16539_v58 }
 0x5cd   :  { %v12433_v5 = vpop.f32.mrf.mxu1  ;;  %v16599_v12 = vadd.f32 %v12462_v9, %v7258_v39 }
 0x5ce   :  { %v7260_v18 = vadd.f32 %v12433_v5, %v7031_v19  ;;  %v7253_v19 = vadd.f32 %v7206_v29, %v7024_v26  ;;  %v7419_v29 = vadd.f32 %v16541_v55, %v16543_v2  ;;  %v7403_v20 = vpop.f32.mrf.mxu0  ;;  %v16605_v34 = vadd.f32 %v7393_v36, %v7257_v51 }
 0x5cf   :  { %v7236_v27 = vpop.f32.mrf.mxu1 }
 0x5d0   :  { %v7259_v28 = vadd.f32 %v7236_v27, %v7030_v42  ;;  %v7256_v42 = vadd.f32 %v12427_v37, %v7027_v8  ;;  %v16593_v63 = vadd.f32 %v16547_v22, %v7253_v19  ;;  %v16607_v22 = vadd.f32 %v12465_v23, %v7260_v18 }
 0x5d1   :  { %v12476_v40 = vpop.f32.mrf.mxu1 }
 0x5d2   :  { %v7580_v49 = vadd.f32 %v12476_v40, %v7413_v21  ;;  %v16595_v53 = vadd.f32 %v12459_v17, %v7256_v42  ;;  %v16609_v17 = vadd.f32 %v7403_v20, %v7259_v28 }
 0x5d3   :  { %v7500_v13 = vpop.f32.mrf.mxu1 }
 0x5d4   :  { %v7604_v3 = vadd.f32 %v16574_v62, %v7580_v49  ;;  %v7579_v10 = vadd.f32 %v7500_v13, %v7412_v45 }
 0x5d5   :  { %v12479_v31 = vpop.f32.mrf.mxu1 }
 0x5d6   :  { %v7620_v37 = vmax.f32 %v7604_v3, 0.0  ;;  %v7603_v52 = vadd.f32 %v16574_v62, %v7579_v10  ;;  %v7582_v4 = vadd.f32 %v12479_v31, %v7415_v57 }
 0x5d7   :  { %v7510_v54 = vpop.f32.mrf.mxu1 }
 0x5d8   :  { %v16602_v58 = vrot.slane %v7620_v37, %v16578_v50  ;;  %v7824_v55 = vcombine.high %v7620_v37, %v7620_v37  ;;  %v7619_v2 = vmax.f32 %v7603_v52, 0.0  ;;  %v7606_v59 = vadd.f32 %v16574_v62, %v7582_v4 }
 0x5d9   :  { %v7581_v32 = vadd.f32 %v7510_v54, %v7414_v35  ;;  %v12482_v56 = vpop.f32.mrf.mxu1 }
 0x5da   :  { %v7789_v61 = vrot.slane %v16602_v58, 1  ;;  %v16614_v48 = vcombine.high %v16602_v58, %v16602_v58  ;;  %v16617_v14 = vrot.slane %v7824_v55, %v16578_v50  ;;  %v16620_v46 = vrot.slane %v7619_v2, %v16578_v50 }
 0x5db   :  { %v7704_v9 = vcombine.high %v7619_v2, %v7619_v2  ;;  %v7622_v5 = vmax.f32 %v7606_v59, 0.0  ;;  %v7605_v51 = vadd.f32 %v16574_v62, %v7581_v32  ;;  %v7584_v11 = vadd.f32 %v12482_v56, %v7417_v1  ;;  %v7520_v44 = vpop.f32.mrf.mxu1 }
 0x5dc   :  { %v7813_v18 = vrot.slane %v16614_v48, 1  ;;  %v7849_v7 = vrot.slane %v16617_v14, 1  ;;  %v16627_v43 = vcombine.high %v16617_v14, %v16617_v14  ;;  %v7666_v27 = vrot.slane %v16620_v46, 1 }
 0x5dd   :  { %v16632_v15 = vcombine.high %v16620_v46, %v16620_v46  ;;  %v16635_v30 = vrot.slane %v7704_v9, %v16578_v50  ;;  %v16638_v0 = vrot.slane %v7622_v5, %v16578_v50  ;;  %v8064_v26 = vcombine.high %v7622_v5, %v7622_v5  ;;  %v12485_v36 = vpop.f32.mrf.mxu1 }
 0x5de   :  { %v7621_v28 = vmax.f32 %v7605_v51, 0.0  ;;  %v7608_v21 = vadd.f32 %v16574_v62, %v7584_v11  ;;  %v7583_v60 = vadd.f32 %v7520_v44, %v7416_v6  ;;  %v7586_v8 = vadd.f32 %v12485_v36, %v7419_v29 }
 0x5df   :  { %18303 = vst [vmem:[#allocation303_spill] sm:$0xff] %v16638_v0  ;;  %v7692_v41 = vrot.slane %v16632_v15, 1  ;;  %v7729_v47 = vrot.slane %v16635_v30, 1  ;;  %v16645_v40 = vcombine.high %v16635_v30, %v16635_v30  ;;  %v8029_v16 = vrot.slane %v16638_v0, 1  ;;  %v7530_v49 = vpop.f32.mrf.mxu1 }
 0x5e0   :  { %v16650_v45 = vcombine.high %v16638_v0, %v16638_v0  ;;  %v16653_v19 = vrot.slane %v8064_v26, %v16578_v50  ;;  %v16656_v42 = vrot.slane %v7621_v28, %v16578_v50  ;;  %v7944_v38 = vcombine.high %v7621_v28, %v7621_v28 }
 0x5e1   :  { %v7624_v39 = vmax.f32 %v7608_v21, 0.0  ;;  %v7607_v13 = vadd.f32 %v16574_v62, %v7583_v60  ;;  %v7610_v23 = vadd.f32 %v16574_v62, %v7586_v8  ;;  %v7585_v3 = vadd.f32 %v7530_v49, %v16549_v24  ;;  %v12488_v10 = vpop.f32.mrf.mxu1 }
 0x5e2   :  { %v16665_v35 = vcombine.high %v16653_v19, %v16653_v19  ;;  %v16670_v6 = vcombine.high %v16656_v42, %v16656_v42  ;;  %v16673_v29 = vrot.slane %v7944_v38, %v16578_v50  ;;  %v7588_v55 = vadd.f32 %v12488_v10, %v16590_v33 }
 0x5e3   :  { %v16676_v24 = vrot.slane %v7624_v39, %v16578_v50  ;;  %v8304_v37 = vcombine.high %v7624_v39, %v7624_v39  ;;  %v7540_v52 = vpop.f32.mrf.mxu1  ;;  %v7623_v4 = vmax.f32 %v7607_v13, 0.0  ;;  %v7626_v54 = vmax.f32 %v7610_v23, 0.0 }
 0x5e4   :  { %v7609_v20 = vadd.f32 %v16574_v62, %v7585_v3  ;;  %v16684_v32 = vcombine.high %v16673_v29, %v16673_v29  ;;  %v7612_v28 = vadd.f32 %v16574_v62, %v7588_v55 }
 0x5e5   :  { %18304 = vst [vmem:[#allocation291_spill] sm:$0xff] %v16676_v24  ;;  %v12491_v9 = vpop.f32.mrf.mxu1  ;;  %v16689_v5 = vcombine.high %v16676_v24, %v16676_v24  ;;  %v16692_v51 = vrot.slane %v8304_v37, %v16578_v50  ;;  %v16695_v33 = vrot.slane %v7623_v4, %v16578_v50  ;;  %v8184_v11 = vcombine.high %v7623_v4, %v7623_v4 }
 0x5e6   :  { %v16698_v44 = vrot.slane %v7626_v54, %v16578_v50  ;;  %v8544_v26 = vcombine.high %v7626_v54, %v7626_v54  ;;  %v7625_v36 = vmax.f32 %v7609_v20, 0.0  ;;  %v7628_v20 = vmax.f32 %v7612_v28, 0.0 }
 0x5e7   :  { %v7550_v21 = vpop.f32.mrf.mxu1  ;;  %v16705_v49 = vcombine.high %v16692_v51, %v16692_v51  ;;  %v16710_v39 = vcombine.high %v16695_v33, %v16695_v33  ;;  %v16713_v13 = vrot.slane %v8184_v11, %v16578_v50  ;;  %v7590_v57 = vadd.f32 %v12491_v9, %v16595_v53 }
 0x5e8   :  { %v16718_v3 = vcombine.high %v16698_v44, %v16698_v44  ;;  %v16721_v37 = vrot.slane %v8544_v26, %v16578_v50  ;;  %v16724_v4 = vrot.slane %v7625_v36, %v16578_v50  ;;  %v8424_v54 = vcombine.high %v7625_v36, %v7625_v36 }
 0x5e9   :  { %v12494_v10 = vpop.f32.mrf.mxu1  ;;  %v16730_v23 = vcombine.high %v16713_v13, %v16713_v13  ;;  %v16747_v60 = vrot.slane %v7628_v20, %v16578_v50  ;;  %v7832_v11 = vcombine.high %v7628_v20, %v7628_v20  ;;  %v7587_v26 = vadd.f32 %v7540_v52, %v16593_v63 }
 0x5ea   :  { %18305 = vst [vmem:[#allocation278_spill] sm:$0xff] %v16724_v4  ;;  %v16736_v8 = vcombine.high %v16721_v37, %v16721_v37  ;;  %v16741_v28 = vcombine.high %v16724_v4, %v16724_v4  ;;  %v16744_v55 = vrot.slane %v8424_v54, %v16578_v50  ;;  %v7589_v36 = vadd.f32 %v7550_v21, %v16597_v25 }
 0x5eb   :  { %v7560_v38 = vpop.f32.mrf.mxu1  ;;  %v7592_v59 = vadd.f32 %v12494_v10, %v16599_v12  ;;  %v16760_v1 = vrot.slane %v7832_v11, %v16578_v50  ;;  %v7611_v63 = vadd.f32 %v16574_v62, %v7587_v26  ;;  %v7614_v20 = vadd.f32 %v16574_v62, %v7590_v57 }
 0x5ec   :  { %18306 = vst [vmem:[#allocation288_spill] sm:$0xff] %v16744_v55  ;;  %v16757_v54 = vcombine.high %v16744_v55, %v16744_v55  ;;  %v7613_v53 = vadd.f32 %v16574_v62, %v7589_v36  ;;  %v7591_v12 = vadd.f32 %v7560_v38, %v16605_v34  ;;  %v7792_v10 = vsel %vm7656_vm2, %v16747_v60, %v7789_v61 }
 0x5ed   :  { %v12497_v2 = vpop.f32.mrf.mxu1  ;;  %v7616_v25 = vadd.f32 %v16574_v62, %v7592_v59  ;;  %v7627_v9 = vmax.f32 %v7611_v63, 0.0  ;;  %v7630_v26 = vmax.f32 %v7614_v20, 0.0 }
 0x5ee   :  { %v7594_v21 = vadd.f32 %v12497_v2, %v16607_v22  ;;  %v7629_v56 = vmax.f32 %v7613_v53, 0.0  ;;  %v7615_v57 = vadd.f32 %v16574_v62, %v7591_v12  ;;  %v7793_v22 = vsel %vm7658_vm3, %v16747_v60, %v7792_v10 }
 0x5ef   :  { %v7570_v52 = vpop.f32.mrf.mxu1  ;;  %v7632_v31 = vmax.f32 %v7616_v25, 0.0  ;;  %v16775_v36 = vrot.slane %v7627_v9, %v16578_v50  ;;  %v7712_v59 = vcombine.high %v7627_v9, %v7627_v9  ;;  %v16781_v2 = vrot.slane %v7630_v26, %v16578_v50 }
 0x5f0   :  { %v7593_v11 = vadd.f32 %v7570_v52, %v16609_v17  ;;  %v7618_v34 = vadd.f32 %v16574_v62, %v7594_v21  ;;  %v8072_v61 = vcombine.high %v7630_v26, %v7630_v26  ;;  %v16784_v17 = vrot.slane %v7629_v56, %v16578_v50 }
 0x5f1   :  { %v7952_v38 = vcombine.high %v7629_v56, %v7629_v56  ;;  %v16787_v63 = vrot.slane %v7712_v59, %v16578_v50  ;;  %v16790_v52 = vrot.slane %v7632_v31, %v16578_v50  ;;  %v8312_v20 = vcombine.high %v7632_v31, %v7632_v31 }
 0x5f2   :  { %v7631_v53 = vmax.f32 %v7615_v57, 0.0  ;;  %v16793_v25 = vrot.slane %v8072_v61, %v16578_v50  ;;  %v7634_v9 = vmax.f32 %v7618_v34, 0.0  ;;  %v7794_v21 = vsel %vm7660_vm4, %v16747_v60, %v7793_v22 }
 0x5f3   :  { %v16796_v12 = vrot.slane %v7952_v38, %v16578_v50  ;;  %v16801_v56 = vrot.slane %v8312_v20, %v16578_v50  ;;  %v7795_v31 = vsel %vm7662_vm5, %v16747_v60, %v7794_v21  ;;  %v7617_v34 = vadd.f32 %v16574_v62, %v7593_v11 }
 0x5f4   :  { %v16804_v10 = vrot.slane %v7631_v53, %v16578_v50  ;;  %v8192_v26 = vcombine.high %v7631_v53, %v7631_v53  ;;  %v16809_v57 = vrot.slane %v7634_v9, %v16578_v50  ;;  %v8552_v59 = vcombine.high %v7634_v9, %v7634_v9  ;;  %7796 = vrot.lane.b32.xlu0 %v7795_v31, %s12562_s2 }
 0x5f5   :  { %v7852_v22 = vsel %vm7656_vm2, %v16760_v1, %v7849_v7  ;;  %v7669_v20 = vsel %vm7656_vm2, %v16775_v36, %v7666_v27  ;;  %v7679_v53 = vcombine.high %v16775_v36, %v16775_v36  ;;  %v7633_v11 = vmax.f32 %v7617_v34, 0.0 }
 0x5f6   :  { %v16818_v61 = vrot.slane %v8192_v26, %v16578_v50  ;;  %v7853_v38 = vsel %vm7658_vm3, %v16760_v1, %v7852_v22  ;;  %v16829_v62 = vrot.slane %v8552_v59, %v16578_v50  ;;  %v7670_v9 = vsel %vm7658_vm3, %v16775_v36, %v7669_v20 }
 0x5f7   :  { %v7854_v7 = vsel %vm7660_vm4, %v16760_v1, %v7853_v38  ;;  %v7671_v26 = vsel %vm7660_vm4, %v16775_v36, %v7670_v9  ;;  %v7695_v27 = vsel %vm7656_vm2, %v7679_v53, %v7692_v41  ;;  %v7801_v31 = vcombine.high %v16747_v60, %v16747_v60 }
 0x5f8   :  { %v7855_v21 = vsel %vm7662_vm5, %v16760_v1, %v7854_v7  ;;  %v16845_v59 = vrot.slane %v7633_v11, %v16578_v50  ;;  %v8432_v34 = vcombine.high %v7633_v11, %v7633_v11  ;;  %v7672_v22 = vsel %vm7662_vm5, %v16775_v36, %v7671_v26 }
 0x5f9   :  { %7856 = vrot.lane.b32.xlu1 %v7855_v21, %s12562_s2  ;;  %v7696_v38 = vsel %vm7658_vm3, %v7679_v53, %v7695_v27  ;;  %7673 = vrot.lane.b32.xlu0 %v7672_v22, %s12562_s2  ;;  %v7816_v41 = vsel %vm7656_vm2, %v7801_v31, %v7813_v18  ;;  %v7732_v11 = vsel %vm7656_vm2, %v16787_v63, %v7729_v47 }
 0x5fa   :  { %v7697_v20 = vsel %vm7660_vm4, %v7679_v53, %v7696_v38  ;;  %v8032_v7 = vsel %vm7656_vm2, %v16781_v2, %v8029_v16  ;;  %v16865_v9 = vrot.slane %v8432_v34, %v16578_v50  ;;  %v7817_v26 = vsel %vm7658_vm3, %v7801_v31, %v7816_v41 }
 0x5fb   :  { %v7698_v21 = vsel %vm7662_vm5, %v7679_v53, %v7697_v20  ;;  %v7733_v18 = vsel %vm7658_vm3, %v16787_v63, %v7732_v11  ;;  %v7818_v27 = vsel %vm7660_vm4, %v7801_v31, %v7817_v26  ;;  %v8033_v22 = vsel %vm7658_vm3, %v16781_v2, %v8032_v7 }
 0x5fc   :  { %v7734_v47 = vsel %vm7660_vm4, %v16787_v63, %v7733_v18  ;;  %v7804_v38 = vrot.slane %v7801_v31, 7  ;;  %v7819_v16 = vsel %vm7662_vm5, %v7801_v31, %v7818_v27  ;;  %v8034_v20 = vsel %vm7660_vm4, %v16781_v2, %v8033_v22 }
 0x5fd   :  { %7699 = vrot.lane.b32.xlu1 %v7698_v21, %s12563_s10  ;;  %v7735_v34 = vsel %vm7662_vm5, %v16787_v63, %v7734_v47  ;;  %v7682_v41 = vrot.slane %v7679_v53, 7  ;;  %7820 = vrot.lane.b32.xlu0 %v7819_v16, %s12563_s10  ;;  %v8035_v11 = vsel %vm7662_vm5, %v16781_v2, %v8034_v20  ;;  %v7861_v21 = vcombine.high %v16760_v1, %v16760_v1 }
 0x5fe   :  { %v7805_v7 = vsel %vm7656_vm2, %v7804_v38, %v16614_v48  ;;  %v7873_v31 = vrot.slane %v16627_v43, 1  ;;  %v7741_v53 = vcombine.high %v16787_v63, %v16787_v63  ;;  %v7753_v27 = vrot.slane %v16645_v40, 1 }
 0x5ff   :  { %v7806_v26 = vsel %vm7658_vm3, %v7804_v38, %v7805_v7  ;;  %v7683_v18 = vsel %vm7656_vm2, %v7682_v41, %v16632_v15  ;;  %v7864_v16 = vrot.slane %v7861_v21, 7 }
 0x600   :  { %v7807_v47 = vsel %vm7660_vm4, %v7804_v38, %v7806_v26  ;;  %v7684_v22 = vsel %vm7658_vm3, %v7682_v41, %v7683_v18  ;;  %v7876_v48 = vsel %vm7656_vm2, %v7861_v21, %v7873_v31  ;;  %v7756_v50 = vsel %vm7656_vm2, %v7741_v53, %v7753_v27 }
 0x601   :  { %7736 = vrot.lane.b32.xlu1 %v7735_v34, %s12562_s2  ;;  %v7808_v20 = vsel %vm7662_vm5, %v7804_v38, %v7807_v47  ;;  %v7685_v7 = vsel %vm7660_vm4, %v7682_v41, %v7684_v22  ;;  %v7877_v15 = vsel %vm7658_vm3, %v7861_v21, %v7876_v48  ;;  %8036 = vrot.lane.b32.xlu0 %v8035_v11, %s12562_s2  ;;  %v18307_v22 = vrot.slane %v16656_v42, 1 }
 0x602   :  { %v7686_v0 = vsel %vm7662_vm5, %v7682_v41, %v7685_v7  ;;  %v7878_v26 = vsel %vm7660_vm4, %v7861_v21, %v7877_v15  ;;  %v7865_v31 = vsel %vm7656_vm2, %v7864_v16, %v16627_v43  ;;  %v7757_v18 = vsel %vm7658_vm3, %v7741_v53, %v7756_v50 }
 0x603   :  { %v7879_v34 = vsel %vm7662_vm5, %v7861_v21, %v7878_v26  ;;  %v7866_v38 = vsel %vm7658_vm3, %v7864_v16, %v7865_v31  ;;  %v7758_v47 = vsel %vm7660_vm4, %v7741_v53, %v7757_v18  ;;  %v7912_v11 = vsel %vm7656_vm2, %v16784_v17, %v18307_v22 }
 0x604   :  { %v7867_v41 = vsel %vm7660_vm4, %v7864_v16, %v7866_v38  ;;  %v7759_v27 = vsel %vm7662_vm5, %v7741_v53, %v7758_v47  ;;  %v7913_v43 = vsel %vm7658_vm3, %v16784_v17, %v7912_v11  ;;  %v18308_v50 = vrot.slane %v16653_v19, 1 }
 0x605   :  { %7809 = vrot.lane.b32.xlu1 %v7808_v20, %s12564_s11  ;;  %v7868_v48 = vsel %vm7662_vm5, %v7864_v16, %v7867_v41  ;;  %v7914_v7 = vsel %vm7660_vm4, %v16784_v17, %v7913_v43  ;;  %v8041_v26 = vcombine.high %v16781_v2, %v16781_v2  ;;  %7687 = vrot.lane.b32.xlu0 %v7686_v0, %s12564_s11  ;;  %v18309_v20 = vrot.slane %v16673_v29, 1 }
 0x606   :  { %v8092_v21 = vsel %vm7656_vm2, %v16793_v25, %v18308_v50  ;;  %v7915_v31 = vsel %vm7662_vm5, %v16784_v17, %v7914_v7  ;;  %v7744_v38 = vrot.slane %v7741_v53, 7  ;;  %v18310_v22 = vrot.slane %v16650_v45, 1 }
 0x607   :  { %v8093_v15 = vsel %vm7658_vm3, %v16793_v25, %v8092_v21  ;;  %v7972_v16 = vsel %vm7656_vm2, %v16796_v12, %v18309_v20  ;;  %v8101_v41 = vcombine.high %v16793_v25, %v16793_v25  ;;  %v8113_v21 = vrot.slane %v16665_v35, 1 }
 0x608   :  { %v8094_v18 = vsel %vm7660_vm4, %v16793_v25, %v8093_v15  ;;  %v8056_v11 = vsel %vm7656_vm2, %v8041_v26, %v18310_v22  ;;  %v7973_v0 = vsel %vm7658_vm3, %v16796_v12, %v7972_v16  ;;  %v7745_v53 = vsel %vm7656_vm2, %v7744_v38, %v16645_v40 }
 0x609   :  { %v8095_v47 = vsel %vm7662_vm5, %v16793_v25, %v8094_v18  ;;  %v8057_v43 = vsel %vm7658_vm3, %v8041_v26, %v8056_v11  ;;  %v7974_v50 = vsel %vm7660_vm4, %v16796_v12, %v7973_v0  ;;  %7880 = vrot.lane.b32.xlu1 %v7879_v34, %s12563_s10  ;;  %v7746_v18 = vsel %vm7658_vm3, %v7744_v38, %v7745_v53 }
 0x60a   :  { %v8058_v7 = vsel %vm7660_vm4, %v8041_v26, %v8057_v43  ;;  %v7975_v15 = vsel %vm7662_vm5, %v16796_v12, %v7974_v50  ;;  %v7921_v20 = vcombine.high %v16784_v17, %v16784_v17  ;;  %7869 = vrot.lane.b32.xlu0 %v7868_v48, %s12564_s11  ;;  %v7747_v40 = vsel %vm7660_vm4, %v7744_v38, %v7746_v18 }
 0x60b   :  { %v8059_v16 = vsel %vm7662_vm5, %v8041_v26, %v8058_v7  ;;  %v8116_v22 = vsel %vm7656_vm2, %v8101_v41, %v8113_v21  ;;  %v18311_v34 = vrot.slane %v16676_v24, 1  ;;  %v7748_v0 = vsel %vm7662_vm5, %v7744_v38, %v7747_v40 }
 0x60c   :  { %v8117_v43 = vsel %vm7658_vm3, %v8101_v41, %v8116_v22  ;;  %v18312_v50 = vrot.slane %v16670_v6, 1  ;;  %v7924_v48 = vrot.slane %v7921_v20, 7  ;;  %v7981_v24 = vcombine.high %v16796_v12, %v16796_v12 }
 0x60d   :  { %v8272_v11 = vsel %vm7656_vm2, %v16790_v52, %v18311_v34  ;;  %v8118_v7 = vsel %vm7660_vm4, %v8101_v41, %v8117_v43  ;;  %7760 = vrot.lane.b32.xlu1 %v7759_v27, %s12563_s10  ;;  %v7993_v27 = vrot.slane %v16684_v32, 1 }
 0x60e   :  { %v7936_v53 = vsel %vm7656_vm2, %v7921_v20, %v18312_v50  ;;  %v8273_v21 = vsel %vm7658_vm3, %v16790_v52, %v8272_v11  ;;  %v8119_v38 = vsel %vm7662_vm5, %v8101_v41, %v8118_v7  ;;  %v7925_v22 = vsel %vm7656_vm2, %v7924_v48, %v16670_v6  ;;  %7916 = vrot.lane.b32.xlu0 %v7915_v31, %s12562_s2 }
 0x60f   :  { %v7937_v18 = vsel %vm7658_vm3, %v7921_v20, %v7936_v53  ;;  %v8274_v34 = vsel %vm7660_vm4, %v16790_v52, %v8273_v21  ;;  %v7926_v11 = vsel %vm7658_vm3, %v7924_v48, %v7925_v22  ;;  %v8044_v7 = vrot.slane %v8041_v26, 7 }
 0x610   :  { %v7938_v40 = vsel %vm7660_vm4, %v7921_v20, %v7937_v18  ;;  %v16995_v50 = vsel %vm7662_vm5, %v16790_v52, %v8274_v34  ;;  %v7927_v53 = vsel %vm7660_vm4, %v7924_v48, %v7926_v11  ;;  %v18313_v6 = vrot.slane %v16692_v51, 1 }
 0x611   :  { %v7939_v43 = vsel %vm7662_vm5, %v7921_v20, %v7938_v40  ;;  %v18314_v31 = vrot.slane %v16695_v33, 1  ;;  %v7928_v21 = vsel %vm7662_vm5, %v7924_v48, %v7927_v53  ;;  %v7996_v40 = vsel %vm7656_vm2, %v7981_v24, %v7993_v27  ;;  %8096 = vrot.lane.b32.xlu1 %v8095_v47, %s12562_s2 }
 0x612   :  { %v8332_v18 = vsel %vm7656_vm2, %v16801_v56, %v18313_v6  ;;  %v7997_v34 = vsel %vm7658_vm3, %v7981_v24, %v7996_v40  ;;  %v8045_v11 = vsel %vm7656_vm2, %v8044_v7, %v16650_v45  ;;  %8060 = vrot.lane.b32.xlu0 %v8059_v16, %s12563_s10  ;;  %v8281_v16 = vcombine.high %v16790_v52, %v16790_v52 }
 0x613   :  { %v8152_v20 = vsel %vm7656_vm2, %v16804_v10, %v18314_v31  ;;  %v8333_v22 = vsel %vm7658_vm3, %v16801_v56, %v8332_v18  ;;  %v7998_v27 = vsel %vm7660_vm4, %v7981_v24, %v7997_v34  ;;  %v8046_v53 = vsel %vm7658_vm3, %v8044_v7, %v8045_v11 }
 0x614   :  { %v8153_v26 = vsel %vm7658_vm3, %v16804_v10, %v8152_v20  ;;  %v8334_v6 = vsel %vm7660_vm4, %v16801_v56, %v8333_v22  ;;  %v17033_v45 = vsel %vm7662_vm5, %v7981_v24, %v7998_v27  ;;  %v8047_v31 = vsel %vm7660_vm4, %v8044_v7, %v8046_v53 }
 0x615   :  { %v8154_v48 = vsel %vm7660_vm4, %v16804_v10, %v8153_v26  ;;  %v17026_v47 = vsel %vm7662_vm5, %v16801_v56, %v8334_v6  ;;  %v8104_v20 = vrot.slane %v8101_v41, 7  ;;  %v17039_v40 = vsel %vm7662_vm5, %v8044_v7, %v8047_v31  ;;  %7976 = vrot.lane.b32.xlu1 %v7975_v15, %s12562_s2 }
 0x616   :  { %v17030_v18 = vsel %vm7662_vm5, %v16804_v10, %v8154_v48  ;;  %v18315_v22 = vrot.slane %v16713_v13, 1  ;;  %v7984_v34 = vrot.slane %v7981_v24, 7  ;;  %v8341_v11 = vcombine.high %v16801_v56, %v16801_v56  ;;  %7749 = vrot.lane.b32.xlu0 %v7748_v0, %s12564_s11 }
 0x617   :  { %v8105_v41 = vsel %vm7656_vm2, %v8104_v20, %v16665_v35  ;;  %v18316_v6 = vrot.slane %v16689_v5, 1  ;;  %v8353_v27 = vrot.slane %v16705_v49, 1 }
 0x618   :  { %v8212_v26 = vsel %vm7656_vm2, %v16818_v61, %v18315_v22  ;;  %v8106_v24 = vsel %vm7658_vm3, %v8104_v20, %v8105_v41  ;;  %v7985_v35 = vsel %vm7656_vm2, %v7984_v34, %v16684_v32 }
 0x619   :  { %v8296_v48 = vsel %vm7656_vm2, %v8281_v16, %v18316_v6  ;;  %v8213_v7 = vsel %vm7658_vm3, %v16818_v61, %v8212_v26  ;;  %v8107_v31 = vsel %vm7660_vm4, %v8104_v20, %v8106_v24  ;;  %v7986_v0 = vsel %vm7658_vm3, %v7984_v34, %v7985_v35  ;;  %8120 = vrot.lane.b32.xlu1 %v8119_v38, %s12563_s10 }
 0x61a   :  { %v8297_v53 = vsel %vm7658_vm3, %v8281_v16, %v8296_v48  ;;  %v8214_v15 = vsel %vm7660_vm4, %v16818_v61, %v8213_v7  ;;  %v17071_v41 = vsel %vm7662_vm5, %v8104_v20, %v8107_v31  ;;  %v7987_v48 = vsel %vm7660_vm4, %v7984_v34, %v7986_v0  ;;  %7940 = vrot.lane.b32.xlu0 %v7939_v43, %s12563_s10 }
 0x61b   :  { %v8298_v22 = vsel %vm7660_vm4, %v8281_v16, %v8297_v53  ;;  %v17067_v26 = vsel %vm7662_vm5, %v16818_v61, %v8214_v15  ;;  %v8356_v32 = vsel %vm7656_vm2, %v8341_v11, %v8353_v27  ;;  %v17080_v7 = vsel %vm7662_vm5, %v7984_v34, %v7987_v48 }
 0x61c   :  { %v17074_v6 = vsel %vm7662_vm5, %v8281_v16, %v8298_v22  ;;  %v8357_v24 = vsel %vm7658_vm3, %v8341_v11, %v8356_v32  ;;  %v18317_v53 = vrot.slane %v16698_v44, 1  ;;  %v18318_v15 = vrot.slane %v16721_v37, 1 }
 0x61d   :  { %v8358_v27 = vsel %vm7660_vm4, %v8341_v11, %v8357_v24  ;;  %v8284_v31 = vrot.slane %v8281_v16, 7  ;;  %v8344_v32 = vrot.slane %v8341_v11, 7  ;;  %7929 = vrot.lane.b32.xlu1 %v7928_v21, %s12564_s11 }
 0x61e   :  { %v8512_v20 = vsel %vm7656_vm2, %v16809_v57, %v18317_v53  ;;  %v8572_v35 = vsel %vm7656_vm2, %v16829_v62, %v18318_v15  ;;  %v17098_v22 = vsel %vm7662_vm5, %v8341_v11, %v8358_v27  ;;  %v8161_v53 = vcombine.high %v16804_v10, %v16804_v10  ;;  %8276 = vrot.lane.b32.xlu0 %v16995_v50, %s12562_s2 }
 0x61f   :  { %v8513_v38 = vsel %vm7658_vm3, %v16809_v57, %v8512_v20  ;;  %v8573_v34 = vsel %vm7658_vm3, %v16829_v62, %v8572_v35  ;;  %v8285_v16 = vsel %vm7656_vm2, %v8284_v31, %v16689_v5  ;;  %v8345_v11 = vsel %vm7656_vm2, %v8344_v32, %v16705_v49 }
 0x620   :  { %v8514_v0 = vsel %vm7660_vm4, %v16809_v57, %v8513_v38  ;;  %v8574_v48 = vsel %vm7660_vm4, %v16829_v62, %v8573_v34  ;;  %v8286_v20 = vsel %vm7658_vm3, %v8284_v31, %v8285_v16  ;;  %v8221_v15 = vcombine.high %v16818_v61, %v16818_v61 }
 0x621   :  { %v17106_v43 = vsel %vm7662_vm5, %v16809_v57, %v8514_v0  ;;  %v17110_v24 = vsel %vm7662_vm5, %v16829_v62, %v8574_v48  ;;  %v8233_v35 = vrot.slane %v16730_v23, 1  ;;  %v8287_v5 = vsel %vm7660_vm4, %v8284_v31, %v8286_v20  ;;  %8000 = vrot.lane.b32.xlu1 %v17033_v45, %s12563_s10 }
 0x622   :  { %v8346_v27 = vsel %vm7658_vm3, %v8344_v32, %v8345_v11  ;;  %v18319_v38 = vrot.slane %v16710_v39, 1  ;;  %v18320_v34 = vrot.slane %v16724_v4, 1  ;;  %v17135_v0 = vsel %vm7662_vm5, %v8284_v31, %v8287_v5  ;;  %8049 = vrot.lane.b32.xlu0 %v17039_v40, %s12564_s11 }
 0x623   :  { %v8347_v48 = vsel %vm7660_vm4, %v8344_v32, %v8346_v27  ;;  %v8236_v16 = vsel %vm7656_vm2, %v8221_v15, %v8233_v35  ;;  %v8581_v40 = vcombine.high %v16829_v62, %v16829_v62 }
 0x624   :  { %v8176_v21 = vsel %vm7656_vm2, %v8161_v53, %v18319_v38  ;;  %v8392_v49 = vsel %vm7656_vm2, %v16845_v59, %v18320_v34  ;;  %v17141_v20 = vsel %vm7662_vm5, %v8344_v32, %v8347_v48  ;;  %v8237_v38 = vsel %vm7658_vm3, %v8221_v15, %v8236_v16 }
 0x625   :  { %v8177_v50 = vsel %vm7658_vm3, %v8161_v53, %v8176_v21  ;;  %v8393_v4 = vsel %vm7658_vm3, %v16845_v59, %v8392_v49  ;;  %v8238_v5 = vsel %vm7660_vm4, %v8221_v15, %v8237_v38  ;;  %v18321_v32 = vrot.slane %v16744_v55, 1  ;;  %8336 = vrot.lane.b32.xlu1 %v17026_v47, %s12562_s2 }
 0x626   :  { %v8178_v11 = vsel %vm7660_vm4, %v8161_v53, %v8177_v50  ;;  %v8394_v35 = vsel %vm7660_vm4, %v16845_v59, %v8393_v4  ;;  %v17162_v21 = vsel %vm7662_vm5, %v8221_v15, %v8238_v5  ;;  %v8164_v49 = vrot.slane %v8161_v53, 7  ;;  %8156 = vrot.lane.b32.xlu0 %v17030_v18, %s12562_s2 }
 0x627   :  { %v17150_v31 = vsel %vm7662_vm5, %v8161_v53, %v8178_v11  ;;  %v8452_v27 = vsel %vm7656_vm2, %v16865_v9, %v18321_v32  ;;  %v17166_v45 = vsel %vm7662_vm5, %v16845_v59, %v8394_v35  ;;  %v8224_v48 = vrot.slane %v8221_v15, 7 }
 0x628   :  { %v8453_v34 = vsel %vm7658_vm3, %v16865_v9, %v8452_v27  ;;  %v8521_v50 = vcombine.high %v16809_v57, %v16809_v57  ;;  %v8165_v11 = vsel %vm7656_vm2, %v8164_v49, %v16710_v39  ;;  %v8401_v53 = vcombine.high %v16845_v59, %v16845_v59 }
 0x629   :  { %v8454_v4 = vsel %vm7660_vm4, %v16865_v9, %v8453_v34  ;;  %v8461_v38 = vcombine.high %v16865_v9, %v16865_v9  ;;  %v8166_v15 = vsel %vm7658_vm3, %v8164_v49, %v8165_v11  ;;  %v8225_v5 = vsel %vm7656_vm2, %v8224_v48, %v16730_v23  ;;  %8109 = vrot.lane.b32.xlu1 %v17071_v41, %s12564_s11 }
 0x62a   :  { %v17178_v16 = vsel %vm7662_vm5, %v16865_v9, %v8454_v4  ;;  %v8524_v35 = vrot.slane %v8521_v50, 7  ;;  %v8584_v32 = vrot.slane %v8581_v40, 7  ;;  %v8167_v39 = vsel %vm7660_vm4, %v8164_v49, %v8166_v15  ;;  %8300 = vrot.lane.b32.xlu0 %v17074_v6, %s12563_s10 }
 0x62b   :  { %18322 = vst [vmem:[#allocation281_spill] sm:$0xff] %v17178_v16  ;;  %v8226_v27 = vsel %vm7658_vm3, %v8224_v48, %v8225_v5  ;;  %v18323_v34 = vrot.slane %v16741_v28, 1  ;;  %v8473_v47 = vrot.slane %v16757_v54, 1  ;;  %v17200_v11 = vsel %vm7662_vm5, %v8164_v49, %v8167_v39 }
 0x62c   :  { %18324 = vst [vmem:[#allocation293_spill] sm:$0xff] %v17200_v11  ;;  %v8227_v23 = vsel %vm7660_vm4, %v8224_v48, %v8226_v27  ;;  %v8525_v55 = vsel %vm7656_vm2, %v8524_v35, %v16718_v3  ;;  %v8585_v18 = vsel %vm7656_vm2, %v8584_v32, %v16736_v8 }
 0x62d   :  { %v8416_v4 = vsel %vm7656_vm2, %v8401_v53, %v18323_v34  ;;  %v17208_v15 = vsel %vm7662_vm5, %v8224_v48, %v8227_v23  ;;  %v8526_v5 = vsel %vm7658_vm3, %v8524_v35, %v8525_v55  ;;  %v8586_v34 = vsel %vm7658_vm3, %v8584_v32, %v8585_v18  ;;  %8216 = vrot.lane.b32.xlu1 %v17067_v26, %s12562_s2 }
 0x62e   :  { %v8417_v16 = vsel %vm7658_vm3, %v8401_v53, %v8416_v4  ;;  %v8527_v49 = vsel %vm7660_vm4, %v8524_v35, %v8526_v5  ;;  %v8587_v39 = vsel %vm7660_vm4, %v8584_v32, %v8586_v34  ;;  %v8476_v11 = vsel %vm7656_vm2, %v8461_v38, %v8473_v47  ;;  %7989 = vrot.lane.b32.xlu0 %v17080_v7, %s12564_s11 }
 0x62f   :  { %v8418_v27 = vsel %vm7660_vm4, %v8401_v53, %v8417_v16  ;;  %v17222_v55 = vsel %vm7662_vm5, %v8524_v35, %v8527_v49  ;;  %v17225_v48 = vsel %vm7662_vm5, %v8584_v32, %v8587_v39  ;;  %v8477_v41 = vsel %vm7658_vm3, %v8461_v38, %v8476_v11 }
 0x630   :  { %v17228_v4 = vsel %vm7662_vm5, %v8401_v53, %v8418_v27  ;;  %v8478_v23 = vsel %vm7660_vm4, %v8461_v38, %v8477_v41  ;;  %v8404_v18 = vrot.slane %v8401_v53, 7  ;;  %v8464_v16 = vrot.slane %v8461_v38, 7 }
 0x631   :  { %v18325_v47 = vrot.slane %v16718_v3, 1  ;;  %v17236_v6 = vsel %vm7662_vm5, %v8461_v38, %v8478_v23  ;;  %v8593_v32 = vrot.slane %v16736_v8, 1  ;;  %v7782_v34 = vrot.slane %v16747_v60, 7  ;;  %8360 = vrot.lane.b32.xlu1 %v17098_v22, %s12563_s10 }
 0x632   :  { %v8405_v53 = vsel %vm7656_vm2, %v8404_v18, %v16741_v28  ;;  %v8465_v3 = vsel %vm7656_vm2, %v8464_v16, %v16757_v54  ;;  %v7842_v38 = vrot.slane %v16760_v1, 7  ;;  %8516 = vrot.lane.b32.xlu0 %v17106_v43, %s12562_s2  ;;  %v8022_v22 = vrot.slane %v16781_v2, 7 }
 0x633   :  { %v8536_v5 = vsel %vm7656_vm2, %v8521_v50, %v18325_v47  ;;  %v8406_v8 = vsel %vm7658_vm3, %v8404_v18, %v8405_v53  ;;  %v8466_v60 = vsel %vm7658_vm3, %v8464_v16, %v8465_v3  ;;  %v8596_v26 = vsel %vm7656_vm2, %v8581_v40, %v8593_v32 }
 0x634   :  { %v8537_v35 = vsel %vm7658_vm3, %v8521_v50, %v8536_v5  ;;  %v8407_v28 = vsel %vm7660_vm4, %v8404_v18, %v8406_v8  ;;  %v8467_v54 = vsel %vm7660_vm4, %v8464_v16, %v8466_v60  ;;  %v8597_v39 = vsel %vm7658_vm3, %v8581_v40, %v8596_v26 }
 0x635   :  { %v8538_v11 = vsel %vm7660_vm4, %v8521_v50, %v8537_v35  ;;  %v7783_v1 = vsel %vm7656_vm2, %v7782_v34, %v16602_v58  ;;  %v17263_v7 = vsel %vm7662_vm5, %v8404_v18, %v8407_v28  ;;  %v17266_v27 = vsel %vm7662_vm5, %v8464_v16, %v8467_v54  ;;  %8576 = vrot.lane.b32.xlu1 %v17110_v24, %s12562_s2 }
 0x636   :  { %v17254_v49 = vsel %vm7662_vm5, %v8521_v50, %v8538_v11  ;;  %v8598_v50 = vsel %vm7660_vm4, %v8581_v40, %v8597_v39  ;;  %v7784_v41 = vsel %vm7658_vm3, %v7782_v34, %v7783_v1  ;;  %v7843_v58 = vsel %vm7656_vm2, %v7842_v38, %v16617_v14  ;;  %8289 = vrot.lane.b32.xlu0 %v17135_v0, %s12564_s11 }
 0x637   :  { %v17273_v23 = vsel %vm7662_vm5, %v8581_v40, %v8598_v50  ;;  %v7785_v47 = vsel %vm7660_vm4, %v7782_v34, %v7784_v41  ;;  %v7655_v18 = vrot.slane %v16775_v36, 7  ;;  %v7844_v5 = vsel %vm7658_vm3, %v7842_v38, %v7843_v58  ;;  %v18327_v50 = vld [vmem:[#allocation291_spill] sm:$0xff] }
 0x638   :  { %v7786_v16 = vsel %vm7662_vm5, %v7782_v34, %v7785_v47  ;;  %v7722_v35 = vrot.slane %v16787_v63, 7  ;;  %v7845_v40 = vsel %vm7660_vm4, %v7842_v38, %v7844_v5  ;;  %v18326_v34 = vld [vmem:[#allocation303_spill] sm:$0xff]  ;;  %v7902_v3 = vrot.slane %v16784_v17, 7 }
 0x639   :  { %7788 = vst.msk [vmem:[#allocation3 + $0x4] sm:$0x3] %vm580_vm1, %v7786_v16  ;;  %v7657_v14 = vsel %vm7656_vm2, %v7655_v18, %v16620_v46  ;;  %v7846_v36 = vsel %vm7662_vm5, %v7842_v38, %v7845_v40  ;;  %v8023_v53 = vsel %vm7656_vm2, %v8022_v22, %v18326_v34  ;;  %v8082_v24 = vrot.slane %v16793_v25, 7  ;;  %8349 = vrot.lane.b32.xlu1 %v17141_v20, %s12564_s11  ;;  %v18328_v34 = vld [vmem:[#allocation281_spill] sm:$0xff] }
 0x63a   :  { %v7659_v32 = vsel %vm7658_vm3, %v7655_v18, %v7657_v14  ;;  %v7723_v43 = vsel %vm7656_vm2, %v7722_v35, %v16635_v30  ;;  %7848 = vst.msk [vmem:[#allocation3 + $0x6] sm:$0x3] %vm580_vm1, %v7846_v36  ;;  %v8024_v46 = vsel %vm7658_vm3, %v8022_v22, %v8023_v53  ;;  %v7903_v17 = vsel %vm7656_vm2, %v7902_v3, %v16656_v42 }
 0x63b   :  { %v7661_v2 = vsel %vm7660_vm4, %v7655_v18, %v7659_v32  ;;  %v7724_v63 = vsel %vm7658_vm3, %v7722_v35, %v7723_v43  ;;  %v8025_v38 = vsel %vm7660_vm4, %v8022_v22, %v8024_v46  ;;  %v7962_v26 = vrot.slane %v16796_v12, 7  ;;  %8180 = vrot.lane.b32.xlu0 %v17150_v31, %s12563_s10 }
 0x63c   :  { %v7663_v30 = vsel %vm7662_vm5, %v7655_v18, %v7661_v2  ;;  %v7725_v11 = vsel %vm7660_vm4, %v7722_v35, %v7724_v63  ;;  %v8026_v60 = vsel %vm7662_vm5, %v8022_v22, %v8025_v38  ;;  %v7904_v0 = vsel %vm7658_vm3, %v7902_v3, %v7903_v17  ;;  %v18330_v63 = vld [vmem:[#allocation293_spill] sm:$0xff] }
 0x63d   :  { %7665 = vst.msk [vmem:[#allocation3] sm:$0x3] %vm580_vm1, %v7663_v30  ;;  %v7726_v8 = vsel %vm7662_vm5, %v7722_v35, %v7725_v11  ;;  %8028 = vst.msk [vmem:[#allocation3 + $0xc] sm:$0x3] %vm580_vm1, %v8026_v60  ;;  %v8083_v25 = vsel %vm7656_vm2, %v8082_v24, %v16653_v19  ;;  %v8262_v28 = vrot.slane %v16790_v52, 7  ;;  %v8322_v54 = vrot.slane %v16801_v56, 7  ;;  %8240 = vrot.lane.b32.xlu1 %v17162_v21, %s12563_s10 }
 0x63e   :  { %7728 = vst.msk [vmem:[#allocation3 + $0x2] sm:$0x3] %vm580_vm1, %v7726_v8  ;;  %v7905_v42 = vsel %vm7660_vm4, %v7902_v3, %v7904_v0  ;;  %v8084_v12 = vsel %vm7658_vm3, %v8082_v24, %v8083_v25  ;;  %v7963_v39 = vsel %vm7656_vm2, %v7962_v26, %v16673_v29  ;;  %v8142_v1 = vrot.slane %v16804_v10, 7 }
 0x63f   :  { %v7906_v19 = vsel %vm7662_vm5, %v7902_v3, %v7905_v42  ;;  %v8085_v52 = vsel %vm7660_vm4, %v8082_v24, %v8084_v12  ;;  %v7964_v56 = vsel %vm7658_vm3, %v7962_v26, %v7963_v39  ;;  %v8263_v20 = vsel %vm7656_vm2, %v8262_v28, %v18327_v50  ;;  %8396 = vrot.lane.b32.xlu0 %v17166_v45, %s12562_s2 }
 0x640   :  { %7908 = vst.msk [vmem:[#allocation3 + $0x8] sm:$0x3] %vm580_vm1, %v7906_v19  ;;  %v8086_v41 = vsel %vm7662_vm5, %v8082_v24, %v8085_v52  ;;  %v7965_v29 = vsel %vm7660_vm4, %v7962_v26, %v7964_v56  ;;  %v8264_v10 = vsel %vm7658_vm3, %v8262_v28, %v8263_v20  ;;  %v8323_v31 = vsel %vm7656_vm2, %v8322_v54, %v16692_v51  ;;  %v18331_v24 = vld [vmem:[#allocation288_spill] sm:$0xff] }
 0x641   :  { %8088 = vst.msk [vmem:[#allocation3 + $0xe] sm:$0x3] %vm580_vm1, %v8086_v41  ;;  %v7966_v47 = vsel %vm7662_vm5, %v7962_v26, %v7965_v29  ;;  %v8265_v58 = vsel %vm7660_vm4, %v8262_v28, %v8264_v10  ;;  %v8324_v18 = vsel %vm7658_vm3, %v8322_v54, %v8323_v31  ;;  %v8143_v16 = vsel %vm7656_vm2, %v8142_v1, %v16695_v33 }
 0x642   :  { %7968 = vst.msk [vmem:[#allocation3 + $0xa] sm:$0x3] %vm580_vm1, %v7966_v47  ;;  %v8266_v5 = vsel %vm7662_vm5, %v8262_v28, %v8265_v58  ;;  %v8325_v51 = vsel %vm7660_vm4, %v8322_v54, %v8324_v18  ;;  %v8144_v35 = vsel %vm7658_vm3, %v8142_v1, %v8143_v16  ;;  %v8202_v22 = vrot.slane %v16818_v61, 7  ;;  %8456 = vrot.lane.b32.xlu1 %v18328_v34, %s12562_s2 }
 0x643   :  { %8268 = vst.msk [vmem:[#allocation3 + $0x14] sm:$0x3] %vm580_vm1, %v8266_v5  ;;  %v8326_v33 = vsel %vm7662_vm5, %v8322_v54, %v8325_v51  ;;  %v8145_v40 = vsel %vm7660_vm4, %v8142_v1, %v8144_v35  ;;  %v8502_v21 = vrot.slane %v16809_v57, 7  ;;  %v8562_v14 = vrot.slane %v16829_v62, 7  ;;  %8169 = vrot.lane.b32.xlu0 %v18330_v63, %s12564_s11 }
 0x644   :  { %8328 = vst.msk [vmem:[#allocation3 + $0x16] sm:$0x3] %vm580_vm1, %v8326_v33  ;;  %v8146_v36 = vsel %vm7662_vm5, %v8142_v1, %v8145_v40  ;;  %v8203_v61 = vsel %vm7656_vm2, %v8202_v22, %v16713_v13  ;;  %v8382_v32 = vrot.slane %v16845_v59, 7  ;;  %v8442_v45 = vrot.slane %v16865_v9, 7  ;;  %v18329_v9 = vld [vmem:[#allocation278_spill] sm:$0xff] }
 0x645   :  { %8148 = vst.msk [vmem:[#allocation3 + $0x10] sm:$0x3] %vm580_vm1, %v8146_v36  ;;  %v8204_v43 = vsel %vm7658_vm3, %v8202_v22, %v8203_v61  ;;  %v8503_v57 = vsel %vm7656_vm2, %v8502_v21, %v16698_v44  ;;  %v8563_v62 = vsel %vm7656_vm2, %v8562_v14, %v16721_v37 }
 0x646   :  { %v8205_v53 = vsel %vm7660_vm4, %v8202_v22, %v8204_v43  ;;  %v8504_v13 = vsel %vm7658_vm3, %v8502_v21, %v8503_v57  ;;  %v8564_v59 = vsel %vm7658_vm3, %v8562_v14, %v8563_v62  ;;  %v8383_v2 = vsel %vm7656_vm2, %v8382_v32, %v18329_v9  ;;  %8229 = vrot.lane.b32.xlu1 %v17208_v15, %s12564_s11  ;;  %v18332_v9 = vld [vmem:[#allocation42_spill] sm:$0xff] }
 0x647   :  { %v8206_v44 = vsel %vm7662_vm5, %v8202_v22, %v8205_v53  ;;  %v8505_v46 = vsel %vm7660_vm4, %v8502_v21, %v8504_v13  ;;  %v8565_v37 = vsel %vm7660_vm4, %v8562_v14, %v8564_v59  ;;  %v8384_v3 = vsel %vm7658_vm3, %v8382_v32, %v8383_v2  ;;  %8529 = vrot.lane.b32.xlu0 %v17222_v55, %s12564_s11  ;;  %v18333_v2 = vld [vmem:[#allocation74_spill] sm:$0xff] }
 0x648   :  { %8208 = vst.msk [vmem:[#allocation3 + $0x12] sm:$0x3] %vm580_vm1, %v8206_v44  ;;  %v8506_v30 = vsel %vm7662_vm5, %v8502_v21, %v8505_v46  ;;  %v8566_v11 = vsel %vm7662_vm5, %v8562_v14, %v8565_v37  ;;  %v8385_v38 = vsel %vm7660_vm4, %v8382_v32, %v8384_v3  ;;  %v8443_v8 = vsel %vm7656_vm2, %v8442_v45, %v18331_v24 }
 0x649   :  { %8508 = vst.msk [vmem:[#allocation3 + $0x1c] sm:$0x3] %vm580_vm1, %v8506_v30  ;;  %8568 = vst.msk [vmem:[#allocation3 + $0x1e] sm:$0x3] %vm580_vm1, %v8566_v11  ;;  %v8386_v60 = vsel %vm7662_vm5, %v8382_v32, %v8385_v38  ;;  %v8444_v17 = vsel %vm7658_vm3, %v8442_v45, %v8443_v8  ;;  %11057 = vmatprep.subr.mxu0 %v18332_v9  ;;  %11092 = vmatprep.subr.mxu1 %v18333_v2 }
 0x64a   :  { %8388 = vst.msk [vmem:[#allocation3 + $0x18] sm:$0x3] %vm580_vm1, %v8386_v60  ;;  %v8445_v26 = vsel %vm7660_vm4, %v8442_v45, %v8444_v17  ;;  %8589 = vrot.lane.b32.xlu1 %v17225_v48, %s12564_s11 }
 0x64b   :  { %v8446_v0 = vsel %vm7662_vm5, %v8442_v45, %v8445_v26  ;;  %8420 = vrot.lane.b32.xlu0 %v17228_v4, %s12563_s10 }
 0x64c   :  { %8448 = vst.msk [vmem:[#allocation3 + $0x1a] sm:$0x3] %vm580_vm1, %v8446_v0 }
 0x64e   :  { %8480 = vrot.lane.b32.xlu1 %v17236_v6, %s12563_s10 }
 0x64f   :  { %8409 = vrot.lane.b32.xlu0 %v17263_v7, %s12564_s11 }
 0x652   :  { %8469 = vrot.lane.b32.xlu1 %v17266_v27, %s12564_s11 }
 0x653   :  { %8540 = vrot.lane.b32.xlu0 %v17254_v49, %s12563_s10 }
 0x656   :  { %8600 = vrot.lane.b32.xlu1 %v17273_v23, %s12563_s10 }
 0x666   :  { %v7797_v15 = vpop.permute.xlu0 %7796 }
 0x667   :  { %7799 = vst.msk [vmem:[#allocation3 + $0x4] sm:$0x3] %vm7676_vm6, %v7797_v15 }
 0x66b   :  { %v7857_v55 = vpop.permute.xlu1 %7856  ;;  %v7674_v48 = vpop.permute.xlu0 %7673 }
 0x66c   :  { %7859 = vst.msk [vmem:[#allocation3 + $0x6] sm:$0x3] %vm7676_vm6, %v7857_v55  ;;  %7677 = vst.msk [vmem:[#allocation3] sm:$0x3] %vm7676_vm6, %v7674_v48 }
 0x66f   :  { %v7700_v4 = vpop.permute.xlu1 %7699  ;;  %v7821_v6 = vpop.permute.xlu0 %7820 }
 0x673   :  { %v7737_v7 = vpop.permute.xlu1 %7736  ;;  %v8037_v27 = vpop.permute.xlu0 %8036 }
 0x674   :  { %7739 = vst.msk [vmem:[#allocation3 + $0x2] sm:$0x3] %vm7676_vm6, %v7737_v7  ;;  %8039 = vst.msk [vmem:[#allocation3 + $0xc] sm:$0x3] %vm7676_vm6, %v8037_v27 }
 0x677   :  { %v7810_v49 = vpop.permute.xlu1 %7809  ;;  %v7688_v23 = vpop.permute.xlu0 %7687 }
 0x678   :  { %7812 = vst.msk [vmem:[#allocation3 + $0x4] sm:$0x3] %vm7690_vm7, %v7810_v49  ;;  %7691 = vst.msk [vmem:[#allocation3] sm:$0x3] %vm7690_vm7, %v7688_v23 }
 0x679   :  { %7823 = vst.msk [vmem:[#allocation3 + $0x4] sm:$0x3] %vm7702_vm8, %v7821_v6  ;;  %7703 = vst.msk [vmem:[#allocation3] sm:$0x3] %vm7702_vm8, %v7700_v4 }
 0x67b   :  { %v7881_v25 = vpop.permute.xlu1 %7880 }
 0x67c   :  { %v7870_v28 = vpop.permute.xlu0 %7869 }
 0x67d   :  { %7872 = vst.msk [vmem:[#allocation3 + $0x6] sm:$0x3] %vm7690_vm7, %v7870_v28 }
 0x67e   :  { %7883 = vst.msk [vmem:[#allocation3 + $0x6] sm:$0x3] %vm7702_vm8, %v7881_v25 }
 0x67f   :  { %v7761_v54 = vpop.permute.xlu1 %7760 }
 0x680   :  { %v7917_v42 = vpop.permute.xlu0 %7916 }
 0x681   :  { %7919 = vst.msk [vmem:[#allocation3 + $0x8] sm:$0x3] %vm7676_vm6, %v7917_v42 }
 0x683   :  { %v8097_v12 = vpop.permute.xlu1 %8096 }
 0x684   :  { %8099 = vst.msk [vmem:[#allocation3 + $0xe] sm:$0x3] %vm7676_vm6, %v8097_v12  ;;  %v8061_v39 = vpop.permute.xlu0 %8060 }
 0x687   :  { %v7977_v1 = vpop.permute.xlu1 %7976 }
 0x688   :  { %7979 = vst.msk [vmem:[#allocation3 + $0xa] sm:$0x3] %vm7676_vm6, %v7977_v1  ;;  %v7750_v19 = vpop.permute.xlu0 %7749 }
 0x689   :  { %7752 = vst.msk [vmem:[#allocation3 + $0x2] sm:$0x3] %vm7690_vm7, %v7750_v19 }
 0x68a   :  { %7763 = vst.msk [vmem:[#allocation3 + $0x2] sm:$0x3] %vm7702_vm8, %v7761_v54 }
 0x68b   :  { %v8121_v52 = vpop.permute.xlu1 %8120 }
 0x68c   :  { %v7941_v56 = vpop.permute.xlu0 %7940 }
 0x68f   :  { %v7930_v50 = vpop.permute.xlu1 %7929 }
 0x690   :  { %7932 = vst.msk [vmem:[#allocation3 + $0x8] sm:$0x3] %vm7690_vm7, %v7930_v50  ;;  %v8277_v20 = vpop.permute.xlu0 %8276 }
 0x691   :  { %7943 = vst.msk [vmem:[#allocation3 + $0x8] sm:$0x3] %vm7702_vm8, %v7941_v56 }
 0x692   :  { %8279 = vst.msk [vmem:[#allocation3 + $0x14] sm:$0x3] %vm7676_vm6, %v8277_v20 }
 0x693   :  { %v8001_v41 = vpop.permute.xlu1 %8000 }
 0x694   :  { %v8050_v29 = vpop.permute.xlu0 %8049 }
 0x695   :  { %8052 = vst.msk [vmem:[#allocation3 + $0xc] sm:$0x3] %vm7690_vm7, %v8050_v29 }
 0x696   :  { %8063 = vst.msk [vmem:[#allocation3 + $0xc] sm:$0x3] %vm7702_vm8, %v8061_v39 }
 0x697   :  { %v8337_v10 = vpop.permute.xlu1 %8336 }
 0x698   :  { %8339 = vst.msk [vmem:[#allocation3 + $0x16] sm:$0x3] %vm7676_vm6, %v8337_v10  ;;  %v8157_v31 = vpop.permute.xlu0 %8156 }
 0x699   :  { %8159 = vst.msk [vmem:[#allocation3 + $0x10] sm:$0x3] %vm7676_vm6, %v8157_v31 }
 0x69b   :  { %v8110_v47 = vpop.permute.xlu1 %8109 }
 0x69c   :  { %8112 = vst.msk [vmem:[#allocation3 + $0xe] sm:$0x3] %vm7690_vm7, %v8110_v47  ;;  %v8301_v58 = vpop.permute.xlu0 %8300 }
 0x69d   :  { %8123 = vst.msk [vmem:[#allocation3 + $0xe] sm:$0x3] %vm7702_vm8, %v8121_v52 }
 0x69f   :  { %v8217_v18 = vpop.permute.xlu1 %8216 }
 0x6a0   :  { %8219 = vst.msk [vmem:[#allocation3 + $0x12] sm:$0x3] %vm7676_vm6, %v8217_v18  ;;  %v7990_v16 = vpop.permute.xlu0 %7989 }
 0x6a1   :  { %7992 = vst.msk [vmem:[#allocation3 + $0xa] sm:$0x3] %vm7690_vm7, %v7990_v16 }
 0x6a2   :  { %8003 = vst.msk [vmem:[#allocation3 + $0xa] sm:$0x3] %vm7702_vm8, %v8001_v41 }
 0x6a3   :  { %v8361_v5 = vpop.permute.xlu1 %8360 }
 0x6a4   :  { %v8517_v51 = vpop.permute.xlu0 %8516 }
 0x6a5   :  { %8519 = vst.msk [vmem:[#allocation3 + $0x1c] sm:$0x3] %vm7676_vm6, %v8517_v51 }
 0x6a7   :  { %v8577_v35 = vpop.permute.xlu1 %8576 }
 0x6a8   :  { %8579 = vst.msk [vmem:[#allocation3 + $0x1e] sm:$0x3] %vm7676_vm6, %v8577_v35  ;;  %v8290_v22 = vpop.permute.xlu0 %8289 }
 0x6a9   :  { %8292 = vst.msk [vmem:[#allocation3 + $0x14] sm:$0x3] %vm7690_vm7, %v8290_v22 }
 0x6aa   :  { %8303 = vst.msk [vmem:[#allocation3 + $0x14] sm:$0x3] %vm7702_vm8, %v8301_v58 }
 0x6ab   :  { %v8350_v33 = vpop.permute.xlu1 %8349 }
 0x6ac   :  { %8352 = vst.msk [vmem:[#allocation3 + $0x16] sm:$0x3] %vm7690_vm7, %v8350_v33 }
 0x6ad   :  { %v8181_v40 = vpop.permute.xlu0 %8180  ;;  %8363 = vst.msk [vmem:[#allocation3 + $0x16] sm:$0x3] %vm7702_vm8, %v8361_v5 }
 0x6af   :  { %v8241_v21 = vpop.permute.xlu1 %8240 }
 0x6b1   :  { %v8397_v14 = vpop.permute.xlu0 %8396 }
 0x6b2   :  { %8399 = vst.msk [vmem:[#allocation3 + $0x18] sm:$0x3] %vm7676_vm6, %v8397_v14 }
 0x6b4   :  { %v8457_v36 = vpop.permute.xlu1 %8456 }
 0x6b5   :  { %8459 = vst.msk [vmem:[#allocation3 + $0x1a] sm:$0x3] %vm7676_vm6, %v8457_v36  ;;  %v8170_v61 = vpop.permute.xlu0 %8169 }
 0x6b6   :  { %8172 = vst.msk [vmem:[#allocation3 + $0x10] sm:$0x3] %vm7690_vm7, %v8170_v61 }
 0x6b7   :  { %8183 = vst.msk [vmem:[#allocation3 + $0x10] sm:$0x3] %vm7702_vm8, %v8181_v40 }
 0x6b8   :  { %v8230_v32 = vpop.permute.xlu1 %8229 }
 0x6b9   :  { %8232 = vst.msk [vmem:[#allocation3 + $0x12] sm:$0x3] %vm7690_vm7, %v8230_v32  ;;  %v8530_v45 = vpop.permute.xlu0 %8529 }
 0x6ba   :  { %8243 = vst.msk [vmem:[#allocation3 + $0x12] sm:$0x3] %vm7702_vm8, %v8241_v21 }
 0x6bb   :  { %8532 = vst.msk [vmem:[#allocation3 + $0x1c] sm:$0x3] %vm7690_vm7, %v8530_v45 }
 0x6bc   :  { %v8590_v43 = vpop.permute.xlu1 %8589 }
 0x6bd   :  { %8592 = vst.msk [vmem:[#allocation3 + $0x1e] sm:$0x3] %vm7690_vm7, %v8590_v43  ;;  %v8421_v57 = vpop.permute.xlu0 %8420 }
 0x6c0   :  { %v8481_v62 = vpop.permute.xlu1 %8480 }
 0x6c1   :  { %v8410_v34 = vpop.permute.xlu0 %8409 }
 0x6c2   :  { %8412 = vst.msk [vmem:[#allocation3 + $0x18] sm:$0x3] %vm7690_vm7, %v8410_v34 }
 0x6c3   :  { %8423 = vst.msk [vmem:[#allocation3 + $0x18] sm:$0x3] %vm7702_vm8, %v8421_v57 }
 0x6c4   :  { %v8470_v53 = vpop.permute.xlu1 %8469 }
 0x6c5   :  { %8472 = vst.msk [vmem:[#allocation3 + $0x1a] sm:$0x3] %vm7690_vm7, %v8470_v53  ;;  %v8541_v13 = vpop.permute.xlu0 %8540 }
 0x6c6   :  { %8483 = vst.msk [vmem:[#allocation3 + $0x1a] sm:$0x3] %vm7702_vm8, %v8481_v62  ;;  %8543 = vst.msk [vmem:[#allocation3 + $0x1c] sm:$0x3] %vm7702_vm8, %v8541_v13 }
 0x6c8   :  { %v8601_v59 = vpop.permute.xlu1 %8600 }
 0x6c9   :  { %8603 = vst.msk [vmem:[#allocation3 + $0x1e] sm:$0x3] %vm7702_vm8, %v8601_v59 }
 0x6ca   :  { %12556 = dma.done.wait [#allocation5], 32768 }
 0x6cb   :  { %12557 = vsyncadd [#allocation5], 4294934528  ;;  %v18334_v63 = vld [vmem:[#allocation26_spill] sm:$0xff]  ;;  %v18336_v46 = vld [vmem:[#allocation41_spill] sm:$0xff]  ;;  %vm12565_vm9 = vmmov 0   ;;  %vm9538_vm10 = vcmask 523264  }
 0x6cc   :  { %11058 = vmatpush3.msra.mxu0 %v18334_v63  ;;  %v18335_v44 = vld [vmem:[#allocation58_spill] sm:$0xff]  ;;  %v18337_v37 = vld [vmem:[#allocation73_spill] sm:$0xff]  ;;  %v18340_v11 = vld [vmem:[#allocation40_spill] sm:$0xff]  ;;  %s12566_s28 = smov [#allocation6]   ;;  %vm9612_vm11 = vcmask 525312  }
 0x6cd   :  { %11093 = vmatpush3.msra.mxu1 %v18335_v44  ;;  %11059 = vmatprep.subr.mxu0 %v18336_v46  ;;  %v18338_v3 = vld [vmem:[#allocation25_spill] sm:$0xff]  ;;  %v18341_v38 = vld [vmem:[#allocation72_spill] sm:$0xff]  ;;  %v18344_v60 = vld [vmem:[#allocation39_spill] sm:$0xff]  ;;  %s9620_s29 = sshll.u32 %s12566_s28, 4  ;;  %s9621_s29 = int_to_ptr.vmem [resolvable:$true] %s9620_s29 }
 0x6ce   :  { %11094 = vmatprep.subr.mxu1 %v18337_v37  ;;  %11060 = vmatpush3.msra.mxu0 %v18338_v3  ;;  %v18339_v30 = vld [vmem:[#allocation57_spill] sm:$0xff]  ;;  %v18342_v24 = vld [vmem:[#allocation24_spill] sm:$0xff]  ;;  %v18345_v17 = vld [vmem:[#allocation71_spill] sm:$0xff]  ;;  %s12536_s30 = scalar_lea.vmem %s9621_s29, 32  ;;  %p12541_p1 = scmp.lt.s32.totalorder %s9621_s29, %s9621_s29 }
 0x6cf   :  { %11095 = vmatpush3.msra.mxu1 %v18339_v30  ;;  %11061 = vmatprep.subr.mxu0 %v18340_v11  ;;  %v18343_v8 = vld [vmem:[#allocation56_spill] sm:$0xff]  ;;  %v18346_v26 = vld [vmem:[#allocation23_spill] sm:$0xff]  ;;  %v18348_v15 = vld [vmem:[#allocation38_spill] sm:$0xff]  ;;  %p12537_p0 = scmp.ne.s32.totalorder %s9621_s29, %s12536_s30  ;;  %p12542_p2 = scmp.lt.s32.totalorder %s12536_s30, %s12536_s30 }
 0x6d0   :  { %11096 = vmatprep.subr.mxu1 %v18341_v38  ;;  %11062 = vmatpush3.msra.mxu0 %v18342_v24  ;;  %v18347_v0 = vld [vmem:[#allocation55_spill] sm:$0xff]  ;;  %v18349_v55 = vld [vmem:[#allocation70_spill] sm:$0xff]  ;;  %v18352_v6 = vld [vmem:[#allocation37_spill] sm:$0xff] }
 0x6d1   :  { %11097 = vmatpush3.msra.mxu1 %v18343_v8  ;;  %11063 = vmatprep.subr.mxu0 %v18344_v60  ;;  %v18350_v48 = vld [vmem:[#allocation22_spill] sm:$0xff]  ;;  %v18353_v7 = vld [vmem:[#allocation69_spill] sm:$0xff]  ;;  %v18356_v23 = vld [vmem:[#allocation36_spill] sm:$0xff]  ;;  %p12543_p3 = por %p12542_p2, %p12541_p1 }
 0x6d2   :  { %11098 = vmatprep.subr.mxu1 %v18345_v17  ;;  %11064 = vmatpush3.msra.mxu0 %v18346_v26  ;;  %v18351_v4 = vld [vmem:[#allocation54_spill] sm:$0xff]  ;;  %v18354_v27 = vld [vmem:[#allocation21_spill] sm:$0xff]  ;;  %v18357_v25 = vld [vmem:[#allocation68_spill] sm:$0xff] }
 0x6d3   :  { %11099 = vmatpush3.msra.mxu1 %v18347_v0  ;;  %11065 = vmatprep.subr.mxu0 %v18348_v15  ;;  %v18355_v49 = vld [vmem:[#allocation53_spill] sm:$0xff]  ;;  %v18358_v28 = vld [vmem:[#allocation20_spill] sm:$0xff]  ;;  %v18360_v42 = vld [vmem:[#allocation35_spill] sm:$0xff]  ;;  %p12544_p4 = pnand %p12543_p3, %p12537_p0 }
 0x6d4   :  { %11100 = vmatprep.subr.mxu1 %v18349_v55  ;;  %11066 = vmatpush3.msra.mxu0 %v18350_v48  ;;  %v18359_v54 = vld [vmem:[#allocation52_spill] sm:$0xff]  ;;  %v18361_v12 = vld [vmem:[#allocation67_spill] sm:$0xff]  ;;  %v18364_v19 = vld [vmem:[#allocation34_spill] sm:$0xff] }
 0x6d5   :  { %11101 = vmatpush3.msra.mxu1 %v18351_v4  ;;  %11067 = vmatprep.subr.mxu0 %v18352_v6  ;;  %v18362_v39 = vld [vmem:[#allocation19_spill] sm:$0xff]  ;;  %v18365_v52 = vld [vmem:[#allocation66_spill] sm:$0xff]  ;;  %v18368_v20 = vld [vmem:[#allocation33_spill] sm:$0xff] }
 0x6d6   :  { %11102 = vmatprep.subr.mxu1 %v18353_v7  ;;  %11068 = vmatpush3.msra.mxu0 %v18354_v27  ;;  %v18363_v1 = vld [vmem:[#allocation51_spill] sm:$0xff]  ;;  %v18366_v56 = vld [vmem:[#allocation18_spill] sm:$0xff]  ;;  %v18369_v41 = vld [vmem:[#allocation65_spill] sm:$0xff] }
 0x6d7   :  { %11103 = vmatpush3.msra.mxu1 %v18355_v49  ;;  %11069 = vmatprep.subr.mxu0 %v18356_v23  ;;  %v18367_v50 = vld [vmem:[#allocation50_spill] sm:$0xff]  ;;  %v18370_v10 = vld [vmem:[#allocation17_spill] sm:$0xff]  ;;  %v18372_v47 = vld [vmem:[#allocation32_spill] sm:$0xff] }
 0x6d8   :  { %11104 = vmatprep.subr.mxu1 %v18357_v25  ;;  %11070 = vmatpush3.msra.mxu0 %v18358_v28  ;;  %v8607_v29 = vld [vmem:[#allocation3] sm:$0xff]  ;;  %v18371_v31 = vld [vmem:[#allocation49_spill] sm:$0xff]  ;;  %v18373_v58 = vld [vmem:[#allocation64_spill] sm:$0xff] }
 0x6d9   :  { %11105 = vmatpush3.msra.mxu1 %v18359_v54  ;;  %11071 = vmatprep.subr.mxu0 %v18360_v42  ;;  %v18374_v18 = vld [vmem:[#allocation16_spill] sm:$0xff]  ;;  %v8878_v5 = vcombine.high %v8607_v29, %v8607_v29  ;;  %v18376_v51 = vld [vmem:[#allocation31_spill] sm:$0xff]  ;;  %v18380_v40 = vld [vmem:[#allocation273_spill] sm:$0xff] }
 0x6da   :  { %11106 = vmatprep.subr.mxu1 %v18361_v12  ;;  %11072 = vmatpush3.msra.mxu0 %v18362_v39  ;;  %v18375_v16 = vld [vmem:[#allocation48_spill] sm:$0xff]  ;;  %v18377_v35 = vld [vmem:[#allocation63_spill] sm:$0xff]  ;;  %v8885_v21 = vrot.slane %v8607_v29, %v18380_v40  ;;  %v18381_v14 = vld [vmem:[#allocation30_spill] sm:$0xff] }
 0x6db   :  { %11107 = vmatpush3.msra.mxu1 %v18363_v1  ;;  %11073 = vmatprep.subr.mxu0 %v18364_v19  ;;  %v18378_v22 = vld [vmem:[#allocation15_spill] sm:$0xff]  ;;  %v18382_v36 = vld [vmem:[#allocation62_spill] sm:$0xff]  ;;  %v8892_v45 = vrot.slane %v8878_v5, %v18380_v40  ;;  %v18385_v43 = vld [vmem:[#allocation29_spill] sm:$0xff] }
 0x6dc   :  { %11108 = vmatprep.subr.mxu1 %v18365_v52  ;;  %11074 = vmatpush3.msra.mxu0 %v18366_v56  ;;  %v18379_v33 = vld [vmem:[#allocation47_spill] sm:$0xff]  ;;  %v18383_v61 = vld [vmem:[#allocation14_spill] sm:$0xff]  ;;  %v18386_v57 = vld [vmem:[#allocation61_spill] sm:$0xff]  ;;  %v8893_v53 = vcombine.high %v8885_v21, %v8885_v21 }
 0x6dd   :  { %11109 = vmatpush3.msra.mxu1 %v18367_v50  ;;  %11075 = vmatprep.subr.mxu0 %v18368_v20  ;;  %v18384_v32 = vld [vmem:[#allocation46_spill] sm:$0xff]  ;;  %v18387_v62 = vld [vmem:[#allocation13_spill] sm:$0xff]  ;;  %v18389_v13 = vld [vmem:[#allocation28_spill] sm:$0xff]  ;;  %v8894_v63 = vcombine.high %v8892_v45, %v8892_v45 }
 0x6de   :  { %11110 = vmatprep.subr.mxu1 %v18369_v41  ;;  %11076 = vmatpush3.msra.mxu0 %v18370_v10  ;;  %v18388_v34 = vld [vmem:[#allocation45_spill] sm:$0xff]  ;;  %v18390_v59 = vld [vmem:[#allocation60_spill] sm:$0xff]  ;;  %v18393_v44 = vld [vmem:[#allocation27_spill] sm:$0xff] }
 0x6df   :  { %11111 = vmatpush3.msra.mxu1 %v18371_v31  ;;  %11077 = vmatprep.subr.mxu0 %v18372_v47  ;;  %v18391_v9 = vld [vmem:[#allocation12_spill] sm:$0xff]  ;;  %v18394_v46 = vld [vmem:[#allocation59_spill] sm:$0xff]  ;;  %v18397_v30 = vld [vmem:[#allocation106_spill] sm:$0xff] }
 0x6e0   :  { %11112 = vmatprep.subr.mxu1 %v18373_v58  ;;  %11078 = vmatpush3.msra.mxu0 %v18374_v18  ;;  %v18392_v2 = vld [vmem:[#allocation44_spill] sm:$0xff]  ;;  %v18395_v37 = vld [vmem:[#allocation11_spill] sm:$0xff]  ;;  %v18398_v11 = vld [vmem:[#allocation138_spill] sm:$0xff] }
 0x6e1   :  { %11113 = vmatpush3.msra.mxu1 %v18375_v16  ;;  %11079 = vmatprep.subr.mxu0 %v18376_v51  ;;  %v18396_v3 = vld [vmem:[#allocation43_spill] sm:$0xff]  ;;  %v18399_v38 = vld [vmem:[#allocation90_spill] sm:$0xff]  ;;  %v18401_v8 = vld [vmem:[#allocation105_spill] sm:$0xff] }
 0x6e2   :  { %11114 = vmatprep.subr.mxu1 %v18377_v35  ;;  %11080 = vmatpush3.msra.mxu0 %v18378_v22  ;;  %v18400_v24 = vld [vmem:[#allocation122_spill] sm:$0xff]  ;;  %v18402_v60 = vld [vmem:[#allocation137_spill] sm:$0xff]  ;;  %v18405_v0 = vld [vmem:[#allocation104_spill] sm:$0xff] }
 0x6e3   :  { %11115 = vmatpush3.msra.mxu1 %v18379_v33  ;;  %11081 = vmatprep.subr.mxu0 %v18381_v14  ;;  %v18403_v17 = vld [vmem:[#allocation89_spill] sm:$0xff]  ;;  %v18406_v15 = vld [vmem:[#allocation136_spill] sm:$0xff]  ;;  %v18409_v4 = vld [vmem:[#allocation103_spill] sm:$0xff] }
 0x6e4   :  { %11116 = vmatprep.subr.mxu1 %v18382_v36  ;;  %11082 = vmatpush3.msra.mxu0 %v18383_v61  ;;  %v18404_v26 = vld [vmem:[#allocation121_spill] sm:$0xff]  ;;  %v18407_v55 = vld [vmem:[#allocation88_spill] sm:$0xff]  ;;  %v18410_v6 = vld [vmem:[#allocation135_spill] sm:$0xff] }
 0x6e5   :  { %11117 = vmatpush3.msra.mxu1 %v18384_v32  ;;  %11083 = vmatprep.subr.mxu0 %v18385_v43  ;;  %v18408_v48 = vld [vmem:[#allocation120_spill] sm:$0xff]  ;;  %v18411_v7 = vld [vmem:[#allocation87_spill] sm:$0xff]  ;;  %v18413_v49 = vld [vmem:[#allocation102_spill] sm:$0xff] }
 0x6e6   :  { %11118 = vmatprep.subr.mxu1 %v18386_v57  ;;  %11084 = vmatpush3.msra.mxu0 %v18387_v62  ;;  %v18412_v27 = vld [vmem:[#allocation119_spill] sm:$0xff]  ;;  %v18414_v23 = vld [vmem:[#allocation134_spill] sm:$0xff]  ;;  %v18417_v54 = vld [vmem:[#allocation101_spill] sm:$0xff] }
 0x6e7   :  { %11119 = vmatpush3.msra.mxu1 %v18388_v34  ;;  %11085 = vmatprep.subr.mxu0 %v18389_v13  ;;  %v18415_v25 = vld [vmem:[#allocation86_spill] sm:$0xff]  ;;  %v18418_v42 = vld [vmem:[#allocation133_spill] sm:$0xff]  ;;  %v18421_v1 = vld [vmem:[#allocation100_spill] sm:$0xff] }
 0x6e8   :  { %11120 = vmatprep.subr.mxu1 %v18390_v59  ;;  %11086 = vmatpush3.msra.mxu0 %v18391_v9  ;;  %v18416_v28 = vld [vmem:[#allocation118_spill] sm:$0xff]  ;;  %v18419_v12 = vld [vmem:[#allocation85_spill] sm:$0xff]  ;;  %v18422_v19 = vld [vmem:[#allocation132_spill] sm:$0xff] }
 0x6e9   :  { %11121 = vmatpush3.msra.mxu1 %v18392_v2  ;;  %11087 = vmatprep.subr.mxu0 %v18393_v44  ;;  %v18420_v39 = vld [vmem:[#allocation117_spill] sm:$0xff]  ;;  %v18423_v52 = vld [vmem:[#allocation84_spill] sm:$0xff]  ;;  %v18425_v50 = vld [vmem:[#allocation99_spill] sm:$0xff] }
 0x6ea   :  { %11122 = vmatprep.subr.mxu1 %v18394_v46  ;;  %11088 = vmatpush3.msra.mxu0 %v18395_v37  ;;  %v18424_v56 = vld [vmem:[#allocation116_spill] sm:$0xff]  ;;  %v18426_v20 = vld [vmem:[#allocation131_spill] sm:$0xff]  ;;  %v18429_v10 = vld [vmem:[#allocation98_spill] sm:$0xff] }
 0x6eb   :  { %9026 = vmatprep.mubr.f32.mxu0 %v8893_v53  ;;  %11123 = vmatpush3.msra.mxu1 %v18396_v3  ;;  %v18427_v41 = vld [vmem:[#allocation83_spill] sm:$0xff]  ;;  %v18430_v31 = vld [vmem:[#allocation130_spill] sm:$0xff]  ;;  %v18433_v18 = vld [vmem:[#allocation97_spill] sm:$0xff] }
 0x6ec   :  { %9027 = vmatmul.mubr.f32.vlgmr.msra.gmra.mxu0 %v8885_v21  ;;  %9096 = vmatprep.mubr.f32.mxu1 %v8894_v63  ;;  %v18428_v29 = vld [vmem:[#allocation115_spill] sm:$0xff]  ;;  %v18431_v47 = vld [vmem:[#allocation82_spill] sm:$0xff]  ;;  %v18434_v16 = vld [vmem:[#allocation129_spill] sm:$0xff] }
 0x6ed   :  { %11127 = vmatprep.subr.mxu0 %v18397_v30  ;;  %11162 = vmatprep.subr.mxu1 %v18398_v11  ;;  %v18432_v58 = vld [vmem:[#allocation114_spill] sm:$0xff]  ;;  %v8608_v5 = vld [vmem:[#allocation3 + $0x8] sm:$0xff]  ;;  %v18435_v51 = vld [vmem:[#allocation81_spill] sm:$0xff] }
 0x6ee   :  { %9097 = vmatmul.mubr.f32.vlgmr.msra.gmra.mxu1 %v8892_v45  ;;  %11128 = vmatpush3.msra.mxu0 %v18399_v38  ;;  %v18436_v35 = vld [vmem:[#allocation113_spill] sm:$0xff]  ;;  %v18437_v22 = vld [vmem:[#allocation96_spill] sm:$0xff]  ;;  %v8895_v36 = vcombine.high %v8608_v5, %v8608_v5  ;;  %v18441_v61 = vld [vmem:[#allocation95_spill] sm:$0xff]  ;;  %v8902_v57 = vrot.slane %v8608_v5, %v18380_v40 }
 0x6ef   :  { %11163 = vmatpush3.msra.mxu1 %v18400_v24  ;;  %11129 = vmatprep.subr.mxu0 %v18401_v8  ;;  %v18438_v33 = vld [vmem:[#allocation128_spill] sm:$0xff]  ;;  %v18442_v32 = vld [vmem:[#allocation127_spill] sm:$0xff]  ;;  %v18445_v62 = vld [vmem:[#allocation94_spill] sm:$0xff] }
 0x6f0   :  { %11164 = vmatprep.subr.mxu1 %v18402_v60  ;;  %11130 = vmatpush3.msra.mxu0 %v18403_v17  ;;  %v18439_v21 = vld [vmem:[#allocation80_spill] sm:$0xff]  ;;  %v18443_v45 = vld [vmem:[#allocation79_spill] sm:$0xff]  ;;  %v18446_v34 = vld [vmem:[#allocation126_spill] sm:$0xff]  ;;  %v8909_v59 = vrot.slane %v8895_v36, %v18380_v40  ;;  %v8910_v46 = vcombine.high %v8902_v57, %v8902_v57 }
 0x6f1   :  { %11165 = vmatpush3.msra.mxu1 %v18404_v26  ;;  %11131 = vmatprep.subr.mxu0 %v18405_v0  ;;  %v18440_v14 = vld [vmem:[#allocation112_spill] sm:$0xff]  ;;  %v18444_v43 = vld [vmem:[#allocation111_spill] sm:$0xff]  ;;  %v18447_v53 = vld [vmem:[#allocation78_spill] sm:$0xff] }
 0x6f2   :  { %11166 = vmatprep.subr.mxu1 %v18406_v15  ;;  %11132 = vmatpush3.msra.mxu0 %v18407_v55  ;;  %v18448_v13 = vld [vmem:[#allocation110_spill] sm:$0xff]  ;;  %v18449_v9 = vld [vmem:[#allocation93_spill] sm:$0xff]  ;;  %v18453_v37 = vld [vmem:[#allocation92_spill] sm:$0xff]  ;;  %v8911_v38 = vcombine.high %v8909_v59, %v8909_v59 }
 0x6f3   :  { %11167 = vmatpush3.msra.mxu1 %v18408_v48  ;;  %11133 = vmatprep.subr.mxu0 %v18409_v4  ;;  %v18450_v2 = vld [vmem:[#allocation125_spill] sm:$0xff]  ;;  %v18454_v3 = vld [vmem:[#allocation124_spill] sm:$0xff]  ;;  %v18457_v24 = vld [vmem:[#allocation91_spill] sm:$0xff] }
 0x6f4   :  { %11168 = vmatprep.subr.mxu1 %v18410_v6  ;;  %11134 = vmatpush3.msra.mxu0 %v18411_v7  ;;  %v18451_v63 = vld [vmem:[#allocation77_spill] sm:$0xff]  ;;  %v18455_v30 = vld [vmem:[#allocation76_spill] sm:$0xff]  ;;  %v18458_v8 = vld [vmem:[#allocation123_spill] sm:$0xff] }
 0x6f5   :  { %11169 = vmatpush3.msra.mxu1 %v18412_v27  ;;  %11135 = vmatprep.subr.mxu0 %v18413_v49  ;;  %v18452_v44 = vld [vmem:[#allocation109_spill] sm:$0xff]  ;;  %v18456_v11 = vld [vmem:[#allocation108_spill] sm:$0xff]  ;;  %v18459_v60 = vld [vmem:[#allocation75_spill] sm:$0xff] }
 0x6f6   :  { %11170 = vmatprep.subr.mxu1 %v18414_v23  ;;  %11136 = vmatpush3.msra.mxu0 %v18415_v25  ;;  %v18460_v17 = vld [vmem:[#allocation107_spill] sm:$0xff]  ;;  %v18461_v26 = vld [vmem:[#allocation170_spill] sm:$0xff]  ;;  %v18465_v48 = vld [vmem:[#allocation169_spill] sm:$0xff] }
 0x6f7   :  { %11171 = vmatpush3.msra.mxu1 %v18416_v28  ;;  %11137 = vmatprep.subr.mxu0 %v18417_v54  ;;  %v18462_v0 = vld [vmem:[#allocation202_spill] sm:$0xff]  ;;  %v18466_v4 = vld [vmem:[#allocation201_spill] sm:$0xff]  ;;  %v18469_v27 = vld [vmem:[#allocation168_spill] sm:$0xff] }
 0x6f8   :  { %11172 = vmatprep.subr.mxu1 %v18418_v42  ;;  %11138 = vmatpush3.msra.mxu0 %v18419_v12  ;;  %v18463_v15 = vld [vmem:[#allocation154_spill] sm:$0xff]  ;;  %v18467_v6 = vld [vmem:[#allocation153_spill] sm:$0xff]  ;;  %v18470_v49 = vld [vmem:[#allocation200_spill] sm:$0xff] }
 0x6f9   :  { %11173 = vmatpush3.msra.mxu1 %v18420_v39  ;;  %11139 = vmatprep.subr.mxu0 %v18421_v1  ;;  %v18464_v55 = vld [vmem:[#allocation186_spill] sm:$0xff]  ;;  %v18468_v7 = vld [vmem:[#allocation185_spill] sm:$0xff]  ;;  %v18471_v23 = vld [vmem:[#allocation152_spill] sm:$0xff] }
 0x6fa   :  { %11174 = vmatprep.subr.mxu1 %v18422_v19  ;;  %11140 = vmatpush3.msra.mxu0 %v18423_v52  ;;  %v18472_v25 = vld [vmem:[#allocation184_spill] sm:$0xff]  ;;  %v18473_v28 = vld [vmem:[#allocation167_spill] sm:$0xff]  ;;  %v18477_v39 = vld [vmem:[#allocation166_spill] sm:$0xff] }
 0x6fb   :  { %11175 = vmatpush3.msra.mxu1 %v18424_v56  ;;  %11141 = vmatprep.subr.mxu0 %v18425_v50  ;;  %v18474_v54 = vld [vmem:[#allocation199_spill] sm:$0xff]  ;;  %v18478_v1 = vld [vmem:[#allocation198_spill] sm:$0xff]  ;;  %v18481_v56 = vld [vmem:[#allocation165_spill] sm:$0xff] }
 0x6fc   :  { %11176 = vmatprep.subr.mxu1 %v18426_v20  ;;  %11142 = vmatpush3.msra.mxu0 %v18427_v41  ;;  %v18475_v42 = vld [vmem:[#allocation151_spill] sm:$0xff]  ;;  %v18479_v19 = vld [vmem:[#allocation150_spill] sm:$0xff]  ;;  %v18482_v50 = vld [vmem:[#allocation197_spill] sm:$0xff] }
 0x6fd   :  { %11177 = vmatpush3.msra.mxu1 %v18428_v29  ;;  %11143 = vmatprep.subr.mxu0 %v18429_v10  ;;  %v18476_v12 = vld [vmem:[#allocation183_spill] sm:$0xff]  ;;  %v18480_v52 = vld [vmem:[#allocation182_spill] sm:$0xff]  ;;  %v18483_v20 = vld [vmem:[#allocation149_spill] sm:$0xff] }
 0x6fe   :  { %11178 = vmatprep.subr.mxu1 %v18430_v31  ;;  %11144 = vmatpush3.msra.mxu0 %v18431_v47  ;;  %v18484_v41 = vld [vmem:[#allocation181_spill] sm:$0xff]  ;;  %v18485_v29 = vld [vmem:[#allocation164_spill] sm:$0xff]  ;;  %v18492_v5 = vld [vmem:[#allocation179_spill] sm:$0xff] }
 0x6ff   :  { %11179 = vmatpush3.msra.mxu1 %v18432_v58  ;;  %11145 = vmatprep.subr.mxu0 %v18433_v18  ;;  %v18486_v10 = vld [vmem:[#allocation196_spill] sm:$0xff]  ;;  %v18489_v58 = vld [vmem:[#allocation163_spill] sm:$0xff] }
 0x700   :  { %11180 = vmatprep.subr.mxu1 %v18434_v16  ;;  %11146 = vmatpush3.msra.mxu0 %v18435_v51  ;;  %v18487_v31 = vld [vmem:[#allocation148_spill] sm:$0xff]  ;;  %v18490_v18 = vld [vmem:[#allocation195_spill] sm:$0xff]  ;;  %v18493_v51 = vld [vmem:[#allocation162_spill] sm:$0xff] }
 0x701   :  { %11181 = vmatpush3.msra.mxu1 %v18436_v35  ;;  %11147 = vmatprep.subr.mxu0 %v18437_v22  ;;  %v18488_v47 = vld [vmem:[#allocation180_spill] sm:$0xff]  ;;  %v18491_v16 = vld [vmem:[#allocation147_spill] sm:$0xff]  ;;  %v18494_v35 = vld [vmem:[#allocation194_spill] sm:$0xff] }
 0x702   :  { %11182 = vmatprep.subr.mxu1 %v18438_v33  ;;  %11148 = vmatpush3.msra.mxu0 %v18439_v21  ;;  %v18495_v22 = vld [vmem:[#allocation146_spill] sm:$0xff]  ;;  %v18497_v21 = vld [vmem:[#allocation161_spill] sm:$0xff] }
 0x703   :  { %11183 = vmatpush3.msra.mxu1 %v18440_v14  ;;  %11149 = vmatprep.subr.mxu0 %v18441_v61  ;;  %v18496_v33 = vld [vmem:[#allocation178_spill] sm:$0xff]  ;;  %v18498_v14 = vld [vmem:[#allocation193_spill] sm:$0xff] }
 0x704   :  { %11184 = vmatprep.subr.mxu1 %v18442_v32  ;;  %11150 = vmatpush3.msra.mxu0 %v18443_v45  ;;  %v8609_v36 = vld [vmem:[#allocation3 + $0x10] sm:$0xff] }
 0x705   :  { %11185 = vmatpush3.msra.mxu1 %v18444_v43  ;;  %11151 = vmatprep.subr.mxu0 %v18445_v62  ;;  %v18499_v61 = vld [vmem:[#allocation145_spill] sm:$0xff]  ;;  %v18501_v45 = vld [vmem:[#allocation160_spill] sm:$0xff] }
 0x706   :  { %11186 = vmatprep.subr.mxu1 %v18446_v34  ;;  %11152 = vmatpush3.msra.mxu0 %v18447_v53  ;;  %v18500_v32 = vld [vmem:[#allocation177_spill] sm:$0xff]  ;;  %v18502_v43 = vld [vmem:[#allocation192_spill] sm:$0xff]  ;;  %v8912_v34 = vcombine.high %v8609_v36, %v8609_v36  ;;  %v18505_v53 = vld [vmem:[#allocation159_spill] sm:$0xff] }
 0x707   :  { %11187 = vmatpush3.msra.mxu1 %v18448_v13  ;;  %11153 = vmatprep.subr.mxu0 %v18449_v9  ;;  %v18504_v62 = vld [vmem:[#allocation176_spill] sm:$0xff]  ;;  %v18506_v13 = vld [vmem:[#allocation191_spill] sm:$0xff] }
 0x708   :  { %11188 = vmatprep.subr.mxu1 %v18450_v2  ;;  %11154 = vmatpush3.msra.mxu0 %v18451_v63  ;;  %v18508_v9 = vld [vmem:[#allocation175_spill] sm:$0xff]  ;;  %v8919_v2 = vrot.slane %v8609_v36, %v18380_v40  ;;  %v18509_v63 = vld [vmem:[#allocation158_spill] sm:$0xff] }
 0x709   :  { %11189 = vmatpush3.msra.mxu1 %v18452_v44  ;;  %11155 = vmatprep.subr.mxu0 %v18453_v37  ;;  %v18510_v44 = vld [vmem:[#allocation190_spill] sm:$0xff]  ;;  %v18556_v36 = vld [vmem:[#allocation243_spill] sm:$0xff] }
 0x70a   :  { %11190 = vmatprep.subr.mxu1 %v18454_v3  ;;  %11156 = vmatpush3.msra.mxu0 %v18455_v30  ;;  %v18512_v37 = vld [vmem:[#allocation174_spill] sm:$0xff]  ;;  %v8926_v3 = vrot.slane %v8912_v34, %v18380_v40  ;;  %v18513_v30 = vld [vmem:[#allocation157_spill] sm:$0xff] }
 0x70b   :  { %11191 = vmatpush3.msra.mxu1 %v18456_v11  ;;  %11157 = vmatprep.subr.mxu0 %v18457_v24  ;;  %v18514_v11 = vld [vmem:[#allocation189_spill] sm:$0xff] }
 0x70c   :  { %11192 = vmatprep.subr.mxu1 %v18458_v8  ;;  %11158 = vmatpush3.msra.mxu0 %v18459_v60  ;;  %v18516_v24 = vld [vmem:[#allocation173_spill] sm:$0xff]  ;;  %v8927_v8 = vcombine.high %v8919_v2, %v8919_v2  ;;  %v18517_v60 = vld [vmem:[#allocation156_spill] sm:$0xff] }
 0x70d   :  { %9166 = vmatprep.mubr.f32.mxu0 %v8910_v46  ;;  %11193 = vmatpush3.msra.mxu1 %v18460_v17  ;;  %v18511_v46 = vld [vmem:[#allocation142_spill] sm:$0xff]  ;;  %v18518_v17 = vld [vmem:[#allocation188_spill] sm:$0xff]  ;;  %v18562_v34 = vld [vmem:[#allocation257_spill] sm:$0xff] }
 0x70e   :  { %9167 = vmatmul.mubr.f32.vlgmr.msra.gmra.mxu0 %v8902_v57  ;;  %9236 = vmatprep.mubr.f32.mxu1 %v8911_v38  ;;  %v18503_v57 = vld [vmem:[#allocation144_spill] sm:$0xff]  ;;  %v18515_v38 = vld [vmem:[#allocation141_spill] sm:$0xff] }
 0x70f   :  { %11197 = vmatprep.subr.mxu0 %v18461_v26  ;;  %11232 = vmatprep.subr.mxu1 %v18462_v0  ;;  %v18519_v26 = vld [vmem:[#allocation140_spill] sm:$0xff] }
 0x710   :  { %9237 = vmatmul.mubr.f32.vlgmr.msra.gmra.mxu1 %v8909_v59  ;;  %11198 = vmatpush3.msra.mxu0 %v18463_v15  ;;  %v18507_v59 = vld [vmem:[#allocation143_spill] sm:$0xff]  ;;  %v18520_v0 = vld [vmem:[#allocation172_spill] sm:$0xff]  ;;  %v8928_v15 = vcombine.high %v8926_v3, %v8926_v3 }
 0x711   :  { %11233 = vmatpush3.msra.mxu1 %v18464_v55  ;;  %11199 = vmatprep.subr.mxu0 %v18465_v48  ;;  %v18521_v55 = vld [vmem:[#allocation155_spill] sm:$0xff] }
 0x712   :  { %11234 = vmatprep.subr.mxu1 %v18466_v4  ;;  %11200 = vmatpush3.msra.mxu0 %v18467_v6  ;;  %v18522_v48 = vld [vmem:[#allocation187_spill] sm:$0xff] }
 0x713   :  { %11235 = vmatpush3.msra.mxu1 %v18468_v7  ;;  %11201 = vmatprep.subr.mxu0 %v18469_v27  ;;  %v18523_v4 = vld [vmem:[#allocation139_spill] sm:$0xff]  ;;  %v18525_v7 = vld [vmem:[#allocation234_spill] sm:$0xff] }
 0x714   :  { %11236 = vmatprep.subr.mxu1 %v18470_v49  ;;  %11202 = vmatpush3.msra.mxu0 %v18471_v23  ;;  %v18524_v6 = vld [vmem:[#allocation171_spill] sm:$0xff]  ;;  %v18526_v27 = vld [vmem:[#allocation266_spill] sm:$0xff] }
 0x715   :  { %11237 = vmatpush3.msra.mxu1 %v18472_v25  ;;  %11203 = vmatprep.subr.mxu0 %v18473_v28  ;;  %v18527_v49 = vld [vmem:[#allocation218_spill] sm:$0xff]  ;;  %v18529_v25 = vld [vmem:[#allocation233_spill] sm:$0xff] }
 0x716   :  { %11238 = vmatprep.subr.mxu1 %v18474_v54  ;;  %11204 = vmatpush3.msra.mxu0 %v18475_v42  ;;  %v18528_v23 = vld [vmem:[#allocation250_spill] sm:$0xff]  ;;  %v18530_v28 = vld [vmem:[#allocation265_spill] sm:$0xff] }
 0x717   :  { %11239 = vmatpush3.msra.mxu1 %v18476_v12  ;;  %11205 = vmatprep.subr.mxu0 %v18477_v39  ;;  %v18531_v54 = vld [vmem:[#allocation217_spill] sm:$0xff]  ;;  %v18533_v12 = vld [vmem:[#allocation232_spill] sm:$0xff] }
 0x718   :  { %11240 = vmatprep.subr.mxu1 %v18478_v1  ;;  %11206 = vmatpush3.msra.mxu0 %v18479_v19  ;;  %v18532_v42 = vld [vmem:[#allocation249_spill] sm:$0xff]  ;;  %v18534_v39 = vld [vmem:[#allocation264_spill] sm:$0xff] }
 0x719   :  { %11241 = vmatpush3.msra.mxu1 %v18480_v52  ;;  %11207 = vmatprep.subr.mxu0 %v18481_v56  ;;  %v18535_v1 = vld [vmem:[#allocation216_spill] sm:$0xff]  ;;  %v18537_v52 = vld [vmem:[#allocation231_spill] sm:$0xff] }
 0x71a   :  { %11242 = vmatprep.subr.mxu1 %v18482_v50  ;;  %11208 = vmatpush3.msra.mxu0 %v18483_v20  ;;  %v18536_v19 = vld [vmem:[#allocation248_spill] sm:$0xff]  ;;  %v18538_v56 = vld [vmem:[#allocation263_spill] sm:$0xff] }
 0x71b   :  { %11243 = vmatpush3.msra.mxu1 %v18484_v41  ;;  %11209 = vmatprep.subr.mxu0 %v18485_v29  ;;  %v18539_v50 = vld [vmem:[#allocation215_spill] sm:$0xff]  ;;  %v18541_v41 = vld [vmem:[#allocation230_spill] sm:$0xff] }
 0x71c   :  { %11244 = vmatprep.subr.mxu1 %v18486_v10  ;;  %11210 = vmatpush3.msra.mxu0 %v18487_v31  ;;  %v18540_v20 = vld [vmem:[#allocation247_spill] sm:$0xff]  ;;  %v18542_v29 = vld [vmem:[#allocation262_spill] sm:$0xff] }
 0x71d   :  { %11245 = vmatpush3.msra.mxu1 %v18488_v47  ;;  %11211 = vmatprep.subr.mxu0 %v18489_v58  ;;  %v18543_v10 = vld [vmem:[#allocation214_spill] sm:$0xff]  ;;  %v18545_v47 = vld [vmem:[#allocation229_spill] sm:$0xff] }
 0x71e   :  { %11246 = vmatprep.subr.mxu1 %v18490_v18  ;;  %11212 = vmatpush3.msra.mxu0 %v18491_v16  ;;  %v18544_v31 = vld [vmem:[#allocation246_spill] sm:$0xff]  ;;  %v18546_v58 = vld [vmem:[#allocation261_spill] sm:$0xff] }
 0x71f   :  { %11247 = vmatpush3.msra.mxu1 %v18492_v5  ;;  %11213 = vmatprep.subr.mxu0 %v18493_v51  ;;  %v18547_v18 = vld [vmem:[#allocation213_spill] sm:$0xff]  ;;  %v18549_v5 = vld [vmem:[#allocation228_spill] sm:$0xff] }
 0x720   :  { %11248 = vmatprep.subr.mxu1 %v18494_v35  ;;  %11214 = vmatpush3.msra.mxu0 %v18495_v22  ;;  %v18548_v16 = vld [vmem:[#allocation245_spill] sm:$0xff]  ;;  %v18550_v51 = vld [vmem:[#allocation260_spill] sm:$0xff] }
 0x721   :  { %11249 = vmatpush3.msra.mxu1 %v18496_v33  ;;  %11215 = vmatprep.subr.mxu0 %v18497_v21  ;;  %v18551_v35 = vld [vmem:[#allocation212_spill] sm:$0xff]  ;;  %v18553_v33 = vld [vmem:[#allocation227_spill] sm:$0xff] }
 0x722   :  { %11250 = vmatprep.subr.mxu1 %v18498_v14  ;;  %11216 = vmatpush3.msra.mxu0 %v18499_v61  ;;  %v18552_v22 = vld [vmem:[#allocation244_spill] sm:$0xff]  ;;  %v18554_v21 = vld [vmem:[#allocation259_spill] sm:$0xff]  ;;  %v18557_v61 = vld [vmem:[#allocation226_spill] sm:$0xff] }
 0x723   :  { %11251 = vmatpush3.msra.mxu1 %v18500_v32  ;;  %11217 = vmatprep.subr.mxu0 %v18501_v45  ;;  %v18555_v14 = vld [vmem:[#allocation211_spill] sm:$0xff]  ;;  %v18558_v32 = vld [vmem:[#allocation258_spill] sm:$0xff] }
 0x724   :  { %11252 = vmatprep.subr.mxu1 %v18502_v43  ;;  %11218 = vmatpush3.msra.mxu0 %v18503_v57  ;;  %v18559_v45 = vld [vmem:[#allocation210_spill] sm:$0xff] }
 0x725   :  { %11253 = vmatpush3.msra.mxu1 %v18504_v62  ;;  %11219 = vmatprep.subr.mxu0 %v18505_v53  ;;  %v18560_v43 = vld [vmem:[#allocation242_spill] sm:$0xff]  ;;  %v18561_v62 = vld [vmem:[#allocation225_spill] sm:$0xff] }
 0x726   :  { %11254 = vmatprep.subr.mxu1 %v18506_v13  ;;  %11220 = vmatpush3.msra.mxu0 %v18507_v59  ;;  %v8610_v57 = vld [vmem:[#allocation3 + $0x18] sm:$0xff]  ;;  %v18565_v59 = vld [vmem:[#allocation224_spill] sm:$0xff] }
 0x727   :  { %11255 = vmatpush3.msra.mxu1 %v18508_v9  ;;  %11221 = vmatprep.subr.mxu0 %v18509_v63  ;;  %v18563_v53 = vld [vmem:[#allocation209_spill] sm:$0xff]  ;;  %v18566_v9 = vld [vmem:[#allocation256_spill] sm:$0xff] }
 0x728   :  { %11256 = vmatprep.subr.mxu1 %v18510_v44  ;;  %11222 = vmatpush3.msra.mxu0 %v18511_v46  ;;  %v18564_v13 = vld [vmem:[#allocation241_spill] sm:$0xff]  ;;  %v18567_v63 = vld [vmem:[#allocation208_spill] sm:$0xff]  ;;  %v18569_v46 = vld [vmem:[#allocation223_spill] sm:$0xff] }
 0x729   :  { %11257 = vmatpush3.msra.mxu1 %v18512_v37  ;;  %11223 = vmatprep.subr.mxu0 %v18513_v30  ;;  %v18568_v44 = vld [vmem:[#allocation240_spill] sm:$0xff]  ;;  %v18570_v37 = vld [vmem:[#allocation255_spill] sm:$0xff] }
 0x72a   :  { %11258 = vmatprep.subr.mxu1 %v18514_v11  ;;  %11224 = vmatpush3.msra.mxu0 %v18515_v38  ;;  %v18572_v30 = vld [vmem:[#allocation239_spill] sm:$0xff]  ;;  %v8936_v11 = vrot.slane %v8610_v57, %v18380_v40  ;;  %v18573_v38 = vld [vmem:[#allocation222_spill] sm:$0xff] }
 0x72b   :  { %11259 = vmatpush3.msra.mxu1 %v18516_v24  ;;  %11225 = vmatprep.subr.mxu0 %v18517_v60  ;;  %v18574_v24 = vld [vmem:[#allocation254_spill] sm:$0xff] }
 0x72c   :  { %11260 = vmatprep.subr.mxu1 %v18518_v17  ;;  %11226 = vmatpush3.msra.mxu0 %v18519_v26  ;;  %v18575_v60 = vld [vmem:[#allocation206_spill] sm:$0xff]  ;;  %v18577_v26 = vld [vmem:[#allocation221_spill] sm:$0xff] }
 0x72d   :  { %11261 = vmatpush3.msra.mxu1 %v18520_v0  ;;  %11227 = vmatprep.subr.mxu0 %v18521_v55  ;;  %v18576_v17 = vld [vmem:[#allocation238_spill] sm:$0xff]  ;;  %v18578_v0 = vld [vmem:[#allocation253_spill] sm:$0xff] }
 0x72e   :  { %11262 = vmatprep.subr.mxu1 %v18522_v48  ;;  %11228 = vmatpush3.msra.mxu0 %v18523_v4  ;;  %v18580_v55 = vld [vmem:[#allocation237_spill] sm:$0xff]  ;;  %v8944_v48 = vcombine.high %v8936_v11, %v8936_v11  ;;  %v18581_v4 = vld [vmem:[#allocation220_spill] sm:$0xff] }
 0x72f   :  { %9306 = vmatprep.mubr.f32.mxu0 %v8927_v8  ;;  %11263 = vmatpush3.msra.mxu1 %v18524_v6  ;;  %v18582_v6 = vld [vmem:[#allocation252_spill] sm:$0xff] }
 0x730   :  { %9307 = vmatmul.mubr.f32.vlgmr.msra.gmra.mxu0 %v8919_v2  ;;  %9376 = vmatprep.mubr.f32.mxu1 %v8928_v15  ;;  %v8929_v2 = vcombine.high %v8610_v57, %v8610_v57  ;;  %v18579_v15 = vld [vmem:[#allocation205_spill] sm:$0xff] }
 0x731   :  { %11267 = vmatprep.subr.mxu0 %v18525_v7  ;;  %11302 = vmatprep.subr.mxu1 %v18526_v27  ;;  %v18583_v27 = vld [vmem:[#allocation204_spill] sm:$0xff] }
 0x732   :  { %9377 = vmatmul.mubr.f32.vlgmr.msra.gmra.mxu1 %v8926_v3  ;;  %11268 = vmatpush3.msra.mxu0 %v18527_v49  ;;  %v18571_v3 = vld [vmem:[#allocation207_spill] sm:$0xff]  ;;  %v8943_v8 = vrot.slane %v8929_v2, %v18380_v40  ;;  %v18584_v40 = vld [vmem:[#allocation236_spill] sm:$0xff] }
 0x733   :  { %11303 = vmatpush3.msra.mxu1 %v18528_v23  ;;  %11269 = vmatprep.subr.mxu0 %v18529_v25  ;;  %v18585_v49 = vld [vmem:[#allocation219_spill] sm:$0xff] }
 0x734   :  { %11304 = vmatprep.subr.mxu1 %v18530_v28  ;;  %11270 = vmatpush3.msra.mxu0 %v18531_v54  ;;  %v8945_v7 = vcombine.high %v8943_v8, %v8943_v8  ;;  %v18586_v23 = vld [vmem:[#allocation251_spill] sm:$0xff]  ;;  %v18589_v54 = vmov 0.0  }
 0x735   :  { %11305 = vmatpush3.msra.mxu1 %v18532_v42  ;;  %11271 = vmatprep.subr.mxu0 %v18533_v12  ;;  %v18587_v25 = vld [vmem:[#allocation203_spill] sm:$0xff]  ;;  %v9530_v42 = vld [vmem:[%s17777_s5 + $0x38] sm:$0xff]  ;;  %v9529_v12 = vld [vmem:[%s17777_s5 + $0x30] sm:$0xff] }
 0x736   :  { %11306 = vmatprep.subr.mxu1 %v18534_v39  ;;  %11272 = vmatpush3.msra.mxu0 %v18535_v1  ;;  %v18588_v28 = vld [vmem:[#allocation235_spill] sm:$0xff] }
 0x737   :  { %11307 = vmatpush3.msra.mxu1 %v18536_v19  ;;  %11273 = vmatprep.subr.mxu0 %v18537_v52  ;;  %v9528_v39 = vld [vmem:[%s17777_s5 + $0x28] sm:$0xff]  ;;  %v9527_v1 = vld [vmem:[%s17777_s5 + $0x20] sm:$0xff]  ;;  %v9526_v19 = vld [vmem:[%s17777_s5 + $0x18] sm:$0xff] }
 0x738   :  { %11308 = vmatprep.subr.mxu1 %v18538_v56  ;;  %11274 = vmatpush3.msra.mxu0 %v18539_v50  ;;  %v9525_v52 = vld [vmem:[%s17777_s5 + $0x10] sm:$0xff]  ;;  %v9524_v56 = vld [vmem:[%s17777_s5 + $0x8] sm:$0xff]  ;;  %v9523_v50 = vld [vmem:[%s17777_s5] sm:$0xff] }
 0x739   :  { %11309 = vmatpush3.msra.mxu1 %v18540_v20  ;;  %11275 = vmatprep.subr.mxu0 %v18541_v41 }
 0x73a   :  { %11310 = vmatprep.subr.mxu1 %v18542_v29  ;;  %11276 = vmatpush3.msra.mxu0 %v18543_v10 }
 0x73b   :  { %11311 = vmatpush3.msra.mxu1 %v18544_v31  ;;  %11277 = vmatprep.subr.mxu0 %v18545_v47  ;;  %v10333_v47 = vld [vmem:[%s17776_s4] ss:$0 sm:$0xff] }
 0x73c   :  { %11312 = vmatprep.subr.mxu1 %v18546_v58  ;;  %11278 = vmatpush3.msra.mxu0 %v18547_v18 }
 0x73d   :  { %11313 = vmatpush3.msra.mxu1 %v18548_v16  ;;  %11279 = vmatprep.subr.mxu0 %v18549_v5 }
 0x73e   :  { %11314 = vmatprep.subr.mxu1 %v18550_v51  ;;  %11280 = vmatpush3.msra.mxu0 %v18551_v35 }
 0x73f   :  { %11315 = vmatpush3.msra.mxu1 %v18552_v22  ;;  %11281 = vmatprep.subr.mxu0 %v18553_v33 }
 0x740   :  { %11316 = vmatprep.subr.mxu1 %v18554_v21  ;;  %11282 = vmatpush3.msra.mxu0 %v18555_v14 }
 0x741   :  { %11317 = vmatpush3.msra.mxu1 %v18556_v36  ;;  %11283 = vmatprep.subr.mxu0 %v18557_v61 }
 0x742   :  { %11318 = vmatprep.subr.mxu1 %v18558_v32  ;;  %11284 = vmatpush3.msra.mxu0 %v18559_v45 }
 0x743   :  { %11319 = vmatpush3.msra.mxu1 %v18560_v43  ;;  %11285 = vmatprep.subr.mxu0 %v18561_v62 }
 0x744   :  { %11320 = vmatprep.subr.mxu1 %v18562_v34  ;;  %11286 = vmatpush3.msra.mxu0 %v18563_v53 }
 0x745   :  { %11321 = vmatpush3.msra.mxu1 %v18564_v13  ;;  %11287 = vmatprep.subr.mxu0 %v18565_v59 }
 0x746   :  { %11322 = vmatprep.subr.mxu1 %v18566_v9  ;;  %11288 = vmatpush3.msra.mxu0 %v18567_v63 }
 0x747   :  { %11323 = vmatpush3.msra.mxu1 %v18568_v44  ;;  %11289 = vmatprep.subr.mxu0 %v18569_v46 }
 0x748   :  { %11324 = vmatprep.subr.mxu1 %v18570_v37  ;;  %11290 = vmatpush3.msra.mxu0 %v18571_v3 }
 0x749   :  { %11325 = vmatpush3.msra.mxu1 %v18572_v30  ;;  %11291 = vmatprep.subr.mxu0 %v18573_v38  ;;  %v10334_v30 = vld [vmem:[%s17778_s6] ss:$0 sm:$0xff] }
 0x74a   :  { %11326 = vmatprep.subr.mxu1 %v18574_v24  ;;  %11292 = vmatpush3.msra.mxu0 %v18575_v60 }
 0x74b   :  { %11327 = vmatpush3.msra.mxu1 %v18576_v17  ;;  %11293 = vmatprep.subr.mxu0 %v18577_v26 }
 0x74c   :  { %11328 = vmatprep.subr.mxu1 %v18578_v0  ;;  %11294 = vmatpush3.msra.mxu0 %v18579_v15 }
 0x74d   :  { %11329 = vmatpush3.msra.mxu1 %v18580_v55  ;;  %11295 = vmatprep.subr.mxu0 %v18581_v4 }
 0x74e   :  { %11330 = vmatprep.subr.mxu1 %v18582_v6  ;;  %11296 = vmatpush3.msra.mxu0 %v18583_v27 }
 0x74f   :  { %11331 = vmatpush3.msra.mxu1 %v18584_v40  ;;  %11297 = vmatprep.subr.mxu0 %v18585_v49 }
 0x750   :  { %11332 = vmatprep.subr.mxu1 %v18586_v23  ;;  %11298 = vmatpush3.msra.mxu0 %v18587_v25 }
 0x751   :  { %9446 = vmatprep.mubr.f32.mxu0 %v8944_v48  ;;  %11333 = vmatpush3.msra.mxu1 %v18588_v28 }
 0x752   :  { %9516 = vmatprep.mubr.f32.mxu1 %v8945_v7  ;;  %9447 = vmatmul.mubr.f32.vlgmr.msra.gmra.mxu0 %v8936_v11 }
 0x753   :  { %9517 = vmatmul.mubr.f32.vlgmr.msra.gmra.mxu1 %v8943_v8  ;;  %12498 = vmatprep.subr.mxu0 %v18589_v54 }
 0x754   :  { %12499 = vmatpush3.msra.mxu0 %v9530_v42  ;;  %12514 = vmatprep.mubr.msk.f32.mxu0 %vm12565_vm9, %v18589_v54 }
 0x755   :  { %12500 = vmatprep.subr.mxu0 %v18589_v54 }
 0x756   :  { %12501 = vmatpush3.msra.mxu0 %v9529_v12 }
 0x757   :  { %12502 = vmatprep.subr.mxu0 %v18589_v54 }
 0x758   :  { %12503 = vmatpush3.msra.mxu0 %v9528_v39 }
 0x759   :  { %12504 = vmatprep.subr.mxu0 %v18589_v54 }
 0x75a   :  { %12505 = vmatpush3.msra.mxu0 %v9527_v1 }
 0x75b   :  { %12506 = vmatprep.subr.mxu0 %v18589_v54 }
 0x75c   :  { %12507 = vmatpush3.msra.mxu0 %v9526_v19 }
 0x75d   :  { %12508 = vmatprep.subr.mxu0 %v18589_v54 }
 0x75e   :  { %12509 = vmatpush3.msra.mxu0 %v9525_v52 }
 0x75f   :  { %12510 = vmatprep.subr.mxu0 %v18589_v54 }
 0x760   :  { %12511 = vmatpush3.msra.mxu0 %v9524_v56 }
 0x761   :  { %12512 = vmatprep.subr.mxu0 %v18589_v54 }
 0x762   :  { %12513 = vmatpush3.msra.mxu0 %v9523_v50 }
 0x7ac   :  { %v11089_v20 = vpop.f32.mrf.mxu0 }
 0x7ae   :  { %v11124_v41 = vpop.f32.mrf.mxu1  ;;  %v11090_v29 = vpop.f32.mrf.mxu0 }
 0x7af   :  { %v11091_v31 = vadd.f32 %v11090_v29, %v11089_v20 }
 0x7b0   :  { %v11125_v58 = vpop.f32.mrf.mxu1 }
 0x7b1   :  { %v9029_v5 = vadd.f32 %v11091_v31, %v10333_v47  ;;  %v11126_v51 = vadd.f32 %v11125_v58, %v11124_v41 }
 0x7b3   :  { %v9099_v21 = vadd.f32 %v11126_v51, %v9029_v5 }
 0x7ce   :  { %v11159_v10 = vpop.f32.mrf.mxu0 }
 0x7d0   :  { %v11194_v18 = vpop.f32.mrf.mxu1  ;;  %v11160_v16 = vpop.f32.mrf.mxu0 }
 0x7d1   :  { %v11161_v22 = vadd.f32 %v11160_v16, %v11159_v10 }
 0x7d2   :  { %v11195_v33 = vpop.f32.mrf.mxu1 }
 0x7d3   :  { %v9169_v61 = vadd.f32 %v11161_v22, %v9099_v21  ;;  %v11196_v32 = vadd.f32 %v11195_v33, %v11194_v18 }
 0x7d5   :  { %v9239_v57 = vadd.f32 %v11196_v32, %v9169_v61 }
 0x7f0   :  { %v11229_v35 = vpop.f32.mrf.mxu0 }
 0x7f2   :  { %v11264_v14 = vpop.f32.mrf.mxu1  ;;  %v11230_v36 = vpop.f32.mrf.mxu0 }
 0x7f3   :  { %v11231_v45 = vadd.f32 %v11230_v36, %v11229_v35 }
 0x7f4   :  { %v11265_v43 = vpop.f32.mrf.mxu1 }
 0x7f5   :  { %v9309_v62 = vadd.f32 %v11231_v45, %v9239_v57  ;;  %v11266_v34 = vadd.f32 %v11265_v43, %v11264_v14 }
 0x7f7   :  { %v9379_v2 = vadd.f32 %v11266_v34, %v9309_v62 }
 0x812   :  { %v11299_v53 = vpop.f32.mrf.mxu0 }
 0x813   :  { %v11334_v13 = vpop.f32.mrf.mxu1 }
 0x814   :  { %v11300_v59 = vpop.f32.mrf.mxu0 }
 0x815   :  { %v11335_v9 = vpop.f32.mrf.mxu1  ;;  %v11301_v63 = vadd.f32 %v11300_v59, %v11299_v53 }
 0x816   :  { %v11336_v46 = vadd.f32 %v11335_v9, %v11334_v13 }
 0x817   :  { %v9449_v44 = vadd.f32 %v11301_v63, %v9379_v2 }
 0x819   :  { %v9519_v37 = vadd.f32 %v11336_v46, %v9449_v44 }
 0x81b   :  { %v9522_v3 = vmax.f32 %v9519_v37, 0.0 }
 0x81d   :  { %12515 = vmatmul.mubr.msk.f32.vlgmr.msra.gmra.mxu0 %vm9538_vm10, %v9522_v3 }
 0x8dd   :  { %v9608_v11 = vpop.f32.mrf.mxu0 }
 0x8de   :  { %v9609_v38 = vadd.f32 %v10334_v30, %v9608_v11 }
 0x8df   :  { %v12516_v24 = vpop.f32.mrf.mxu0 }
 0x8e0   :  { %9613 = vst.msk [vmem:[#allocation6] sm:$0x3] %vm9612_vm11, %v9609_v38 }
 0x8e1   :  { %12547 = shalt.err (!%p12544_p4)
}
 0x8e2   :  { %9623 = dma.vmem_to_hbm [thread:$0]  %s9621_s29, 32, %s17779_s7, [#allocation7]  }
 0x8e3   :  { %12558 = dma.done.wait [#allocation7], 32  }
 0x8e4   :  { %12559 = vsyncadd [#allocation7], 4294967264 }
 0x8e5   :  { %9627 = vsyncpa [#allocation7], 1 }
 0x8e6   :  { %9628 = vsyncmov [#allocation5] }
 0x8e9   :  { %s9629_s6 = vpop.sfrf %9628 }
 0x8ea   :  { %p10336_p5 = scmp.ne.s32.totalorder %s9629_s6, 0 }
 0x8ec   :  { %9633 = shalt.err (%p10336_p5)  }

</bundles_post_ra>
